<compile_context>
chip_gen: v7x
topology: tpu7x:2x2x1
jax: 0.10.0
libtpu: 0.0.40
codegen_flags: <defaults>
</compile_context>

<pallas_src>
import functools
import math

import numpy as np
import jax
import jax.numpy as jnp
from jax.experimental import pallas as pl
from jax.experimental.pallas import tpu as pltpu


# ----------------------------------------------------------------------------
# Geometry helpers for the lane-dense padded-flat layout
# ----------------------------------------------------------------------------
def _geom(H, W):
    """wp = padded width; mi = number of interior flat positions; lead = 128-aligned
    leading zero band; buf = total buffer length (lead + mi + wp + 1)."""
    wp = W + 2
    mi = H * wp - 2
    lead = ((wp + 1 + 127) // 128) * 128
    buf = lead + mi + wp + 1
    return wp, mi, lead, buf


@functools.lru_cache(maxsize=None)
def _col_mask_np(H, W):
    """(1, mi) f32 mask that zeroes the wrap-around padding-column positions."""
    wp = W + 2
    mi = H * wp - 2
    cols = (np.arange(mi) + (wp + 1)) % wp
    return ((cols >= 1) & (cols <= W)).astype(np.float32).reshape(1, mi)


@functools.lru_cache(maxsize=1)
def _compiler_params():
    vmem = 32 * 1024 * 1024                      # safe fallback (ran clean everywhere)
    try:
        cap = pltpu.get_tpu_info().vmem_capacity_bytes
        vmem = min(int(cap) * 3 // 4, 100 * 1024 * 1024)
    except Exception:
        pass
    return pltpu.CompilerParams(
        dimension_semantics=("parallel",),       # batch axis -> both v7x TensorCores
        vmem_limit_bytes=vmem,
    )


# ----------------------------------------------------------------------------
# Pallas kernels
# ----------------------------------------------------------------------------
def _conv3x3_kernel(*refs, cins, wp, mi, lead, negative_slope):
    """refs = x_0..x_{n-1} (Cin_i, buf) bf16, w (Cout, 9*sum(Cin)) bf16, b (Cout,1) f32,
             mask (1, mi) f32, out (Cout, buf), slab scratch (9*sum(Cin), mi) bf16.

    Output is written already zero-padded (lead/trail bands + masked padding columns)
    so it can feed the next same-resolution conv or serve as a U-Net skip with no glue.
    """
    n_in = len(cins)
    x_refs = refs[:n_in]
    w_ref, b_ref, m_ref, o_ref, slab_ref = refs[n_in:n_in + 5]
    cout = o_ref.shape[0]
    base = lead - (wp + 1)

    # Fused im2col: one lane-shifted copy per (input, tap) into the (K, mi) slab.
    row = 0
    for x_ref, cin in zip(x_refs, cins):
        for dy in range(3):
            for dx in range(3):
                slab_ref[pl.ds(row, cin), :] = x_ref[:, pl.ds(base + dy * wp + dx, mi)]
                row += cin

    # One MXU matmul with K = 9*sum(Cin), f32 accumulation.
    y = jnp.dot(w_ref[...], slab_ref[...], preferred_element_type=jnp.float32)
    y = y + b_ref[...]
    if negative_slope is not None:
        y = jnp.where(y >= 0.0, y, negative_slope * y)
    y = y * m_ref[...]                               # zero the wrap-around border cols

    # Direct stores: lane-aligned lane-dense interior store + tiny zero border bands.
    o_ref[:, pl.ds(0, lead)] = jnp.zeros((cout, lead), o_ref.dtype)
    o_ref[:, pl.ds(lead, mi)] = y.astype(o_ref.dtype)
    o_ref[:, pl.ds(lead + mi, wp + 1)] = jnp.zeros((cout, wp + 1), o_ref.dtype)


def _head_kernel(x_ref, w1_ref, b1_ref, w2_ref, b2_ref, m_ref, o_ref, h_ref, slab_ref,
                 *, cin, wp, mi, lead, negative_slope):
    """rem2 (3x3 conv + LeakyReLU) fused with the 2-channel flow conv (no activation).
    rem2's full-resolution activation never leaves VMEM (h_ref scratch)."""
    c1 = w1_ref.shape[0]
    c2 = w2_ref.shape[0]
    base = lead - (wp + 1)

    def conv_from(src_ref, c_src, w_ref, b_ref):
        row = 0
        for dy in range(3):
            for dx in range(3):
                slab_ref[pl.ds(row, c_src), :] = src_ref[:, pl.ds(base + dy * wp + dx, mi)]
                row += c_src
        return jnp.dot(w_ref[...], slab_ref[pl.ds(0, 9 * c_src), :],
                       preferred_element_type=jnp.float32) + b_ref[...]

    # stage 1: rem2 conv + LeakyReLU, written zero-bordered into VMEM scratch
    y1 = conv_from(x_ref, cin, w1_ref, b1_ref)
    y1 = jnp.where(y1 >= 0.0, y1, negative_slope * y1) * m_ref[...]
    h_ref[:, pl.ds(0, lead)] = jnp.zeros((c1, lead), h_ref.dtype)
    h_ref[:, pl.ds(lead, mi)] = y1.astype(h_ref.dtype)
    h_ref[:, pl.ds(lead + mi, wp + 1)] = jnp.zeros((c1, wp + 1), h_ref.dtype)

    # stage 2: flow conv on the VMEM-resident rem2 output
    y2 = conv_from(h_ref, c1, w2_ref, b2_ref) * m_ref[...]
    o_ref[:, pl.ds(0, lead)] = jnp.zeros((c2, lead), o_ref.dtype)
    o_ref[:, pl.ds(lead, mi)] = y2.astype(o_ref.dtype)
    o_ref[:, pl.ds(lead + mi, wp + 1)] = jnp.zeros((c2, wp + 1), o_ref.dtype)


# ----------------------------------------------------------------------------
# pallas_call wrappers
# ----------------------------------------------------------------------------
def conv3x3_pf(inputs_pf, w, b, H, W, *, negative_slope=0.2, out_dtype=jnp.bfloat16):
    """inputs_pf[i]: (B, Cin_i, buf) lane-dense padded-flat bf16; w: (Cout, 9*sum(Cin))
    bf16; b: (Cout, 1) f32.  Returns (B, Cout, buf) zero-bordered padded-flat."""
    B = inputs_pf[0].shape[0]
    wp, mi, lead, buf = _geom(H, W)
    cout, K = w.shape
    cins = tuple(int(x.shape[1]) for x in inputs_pf)
    assert K == 9 * sum(cins)

    kern = functools.partial(_conv3x3_kernel, cins=cins, wp=wp, mi=mi, lead=lead,
                             negative_slope=negative_slope)
    in_specs = (
        [pl.BlockSpec((None, c, buf), lambda bb: (bb, 0, 0)) for c in cins]
        + [pl.BlockSpec((cout, K), lambda bb: (0, 0)),
           pl.BlockSpec((cout, 1), lambda bb: (0, 0)),
           pl.BlockSpec((1, mi), lambda bb: (0, 0))]
    )
    # TODO(synk): add a row-tiled ("parallel") grid axis with halo'd manual DMA for
    # realistic image sizes (whole-image blocks are fine at these test resolutions).
    return pl.pallas_call(
        kern,
        out_shape=jax.ShapeDtypeStruct((B, cout, buf), out_dtype),
        grid=(B,),
        in_specs=in_specs,
        out_specs=pl.BlockSpec((None, cout, buf), lambda bb: (bb, 0, 0)),
        scratch_shapes=[pltpu.VMEM((K, mi), jnp.bfloat16)],
        compiler_params=_compiler_params(),
    )(*inputs_pf, w, b, jnp.asarray(_col_mask_np(H, W)))


def conv_head_pf(x_pf, w1, b1, w2, b2, H, W, *, negative_slope=0.2):
    """Fused rem2 conv + LeakyReLU + 2-channel flow conv.  Returns (B, 2, buf) f32."""
    B, cin, _ = x_pf.shape
    wp, mi, lead, buf = _geom(H, W)
    c1, k1 = w1.shape
    c2, k2 = w2.shape
    kmax = max(k1, k2)

    kern = functools.partial(_head_kernel, cin=int(cin), wp=wp, mi=mi, lead=lead,
                             negative_slope=negative_slope)
    return pl.pallas_call(
        kern,
        out_shape=jax.ShapeDtypeStruct((B, c2, buf), jnp.float32),
        grid=(B,),
        in_specs=[
            pl.BlockSpec((None, int(cin), buf), lambda bb: (bb, 0, 0)),
            pl.BlockSpec((c1, k1), lambda bb: (0, 0)),
            pl.BlockSpec((c1, 1), lambda bb: (0, 0)),
            pl.BlockSpec((c2, k2), lambda bb: (0, 0)),
            pl.BlockSpec((c2, 1), lambda bb: (0, 0)),
            pl.BlockSpec((1, mi), lambda bb: (0, 0)),
        ],
        out_specs=pl.BlockSpec((None, c2, buf), lambda bb: (bb, 0, 0)),
        scratch_shapes=[pltpu.VMEM((c1, buf), jnp.bfloat16),
                        pltpu.VMEM((kmax, mi), jnp.bfloat16)],
        compiler_params=_compiler_params(),
    )(x_pf, w1, b1, w2, b2, jnp.asarray(_col_mask_np(H, W)))


# ----------------------------------------------------------------------------
# Cheap XLA glue (channel-first throughout): layout conversions, pool, up, warp
# ----------------------------------------------------------------------------
def pad_flat_cf(x):
    """(B,C,H,W) -> lane-dense padded-flat (B, C, buf)."""
    B, C, H, W = x.shape
    wp, _, lead, _ = _geom(H, W)
    xp = jnp.pad(x, ((0, 0), (0, 0), (1, 1), (1, 1)))
    flat = xp.reshape(B, C, (H + 2) * wp)
    return jnp.pad(flat, ((0, 0), (0, 0), (lead - (wp + 1), 0)))


def unflatten_cf(x_pf, H, W):
    """(B,C,buf) padded-flat -> compact (B,C,H,W)."""
    B, C, _ = x_pf.shape
    wp, _, lead, _ = _geom(H, W)
    off = lead - (wp + 1)
    return x_pf[:, :, off:off + (H + 2) * wp].reshape(B, C, H + 2, wp)[:, :, 1:H + 1, 1:W + 1]


def maxpool2_cf(x):   # nn.MaxPool2d(2)   (even H, W as in voxelmorph)
    B, C, H, W = x.shape
    return x.reshape(B, C, H // 2, 2, W // 2, 2).max(axis=(3, 5))


def upsample2_cf(x):  # nn.Upsample(scale_factor=2, mode='nearest')
    return jnp.repeat(jnp.repeat(x, 2, axis=2), 2, axis=3)


def warp_bilinear_cf(src, flow):
    """voxelmorph SpatialTransformer: bilinear grid_sample(align_corners=True, zeros pad).
    src (B,C,H,W); flow (B,2,H,W) with ch0 = displacement along H, ch1 = along W."""
    # TODO(synk): the data-dependent gather of grid_sample stays in plain JAX.
    B, C, H, W = src.shape
    gy = jnp.arange(H, dtype=jnp.float32)[None, :, None]
    gx = jnp.arange(W, dtype=jnp.float32)[None, None, :]
    y = gy + flow[:, 0]
    x = gx + flow[:, 1]
    y0 = jnp.floor(y)
    x0 = jnp.floor(x)
    y1 = y0 + 1.0
    x1 = x0 + 1.0
    wy1 = y - y0
    wy0 = 1.0 - wy1
    wx1 = x - x0
    wx0 = 1.0 - wx1
    srcf = src.reshape(B, C, H * W)

    def tap(yy, xx, wgt):
        valid = ((yy >= 0) & (yy <= H - 1) & (xx >= 0) & (xx <= W - 1)).astype(jnp.float32)
        yi = jnp.clip(yy, 0, H - 1).astype(jnp.int32)
        xi = jnp.clip(xx, 0, W - 1).astype(jnp.int32)
        idx = (yi * W + xi).reshape(B, 1, H * W)
        idx_b = jnp.broadcast_to(idx, (B, C, H * W))
        vals = jnp.take_along_axis(srcf, idx_b, axis=2).reshape(B, C, H, W)
        return vals * (wgt * valid)[:, None, :, :]

    return (tap(y0, x0, wy0 * wx0) + tap(y0, x1, wy0 * wx1)
            + tap(y1, x0, wy1 * wx0) + tap(y1, x1, wy1 * wx1))


# ----------------------------------------------------------------------------
# Parameters (deterministic synthetic init; shapes from VxmDense default U-Net)
# ----------------------------------------------------------------------------
UNET_LAYERS = [
    # name, cin, cout    (3x3 conv + LeakyReLU(0.2))
    ("enc0", 2, 16), ("enc1", 16, 32), ("enc2", 32, 32), ("enc3", 32, 32),
    ("dec0", 32, 32), ("dec1", 64, 32), ("dec2", 64, 32), ("dec3", 64, 32),
    ("rem0", 48, 32), ("rem1", 32, 16), ("rem2", 16, 16),
]


def init_params(key):
    params = {}
    keys = jax.random.split(key, len(UNET_LAYERS) + 1)
    for (name, cin, cout), k in zip(UNET_LAYERS, keys[:-1]):
        kw, kb = jax.random.split(k)
        bound = 1.0 / math.sqrt(cin * 9)
        params[name + "_w"] = jax.random.uniform(kw, (cout, cin, 3, 3), jnp.float32,
                                                 -bound, bound)
        params[name + "_b"] = jax.random.uniform(kb, (cout,), jnp.float32, -bound, bound)
    # flow conv: Normal(0, 1e-5) weights, zero bias (exact voxelmorph init spec)
    params["flow_w"] = 1e-5 * jax.random.normal(keys[-1], (2, 16, 3, 3), jnp.float32)
    params["flow_b"] = jnp.zeros((2,), jnp.float32)
    return params


def pack_params(params):
    """One-time packing (outside jit): PyTorch (Cout,Cin,3,3) -> (Cout, 9*Cin) bf16 with
    K index = tap*Cin + cin; decoder skip-concat weights split & re-concatenated along K;
    enc0's 2 input channels zero-padded to 8 so all slab row offsets are sublane-aligned."""
    def pw(wt):
        cout = wt.shape[0]
        return jnp.transpose(wt, (0, 2, 3, 1)).reshape(cout, -1).astype(jnp.bfloat16)

    def pb(b):
        return b.reshape(-1, 1).astype(jnp.float32)

    packed = {}
    w0 = jnp.pad(params["enc0_w"], ((0, 0), (0, 6), (0, 0), (0, 0)))
    packed["enc0"] = (pw(w0), pb(params["enc0_b"]))
    for name in ("enc1", "enc2", "enc3", "dec0", "rem1", "rem2"):
        packed[name] = (pw(params[name + "_w"]), pb(params[name + "_b"]))
    # torch.cat([main, skip], dim=1) ordering -> main block first along K
    for name, c_main in (("dec1", 32), ("dec2", 32), ("dec3", 32), ("rem0", 32)):
        wt = params[name + "_w"]
        packed[name] = (jnp.concatenate([pw(wt[:, :c_main]), pw(wt[:, c_main:])], axis=1),
                        pb(params[name + "_b"]))
    packed["flow"] = (pw(params["flow_w"]), pb(params["flow_b"]))
    return packed


# ----------------------------------------------------------------------------
# Registration_SubNet.forward
# ----------------------------------------------------------------------------
def registration_subnet_forward(packed, fixed, moving):
    """fixed, moving: (B,H,W,1).  Returns (moved (B,1,H,W), flow (B,2,H,W)) like VxmDense."""
    moving32 = moving.astype(jnp.float32)
    fixed32 = fixed.astype(jnp.float32)
    B, H, W, _ = moving.shape

    mov_cf = jnp.transpose(moving32, (0, 3, 1, 2))       # (B,1,H,W)
    fix_cf = jnp.transpose(fixed32, (0, 3, 1, 2))

    # torch.cat([source=moving, target=fixed], dim=1); channels padded 2 -> 8 with zeros
    # (matching zero columns in the packed enc0 weight) for sublane-aligned slab rows.
    x = jnp.concatenate([mov_cf, fix_cf,
                         jnp.zeros((B, 6, H, W), jnp.float32)], axis=1).astype(jnp.bfloat16)
    x_pf = pad_flat_cf(x)
    h, w = H, W

    # encoder: fused conv kernels; padded output doubles as the U-Net skip tensor
    skips = []
    for name in ("enc0", "enc1", "enc2", "enc3"):
        wt, bt = packed[name]
        x_pf = conv3x3_pf([x_pf], wt, bt, h, w)
        skips.append(x_pf)
        # TODO(synk): fuse the 2x2 maxpool into the conv epilogue to kill this round trip.
        pooled = maxpool2_cf(unflatten_cf(x_pf, h, w))
        h, w = h // 2, w // 2
        x_pf = pad_flat_cf(pooled)

    # decoder: conv, nearest 2x upsample; the skip concat is folded into the consuming
    # conv as a second input whose weights were concatenated along K at pack time.
    for name in ("dec0", "dec1", "dec2", "dec3"):
        wt, bt = packed[name]
        ins = [x_pf] if name == "dec0" else [x_pf, skips.pop()]
        x_pf = conv3x3_pf(ins, wt, bt, h, w)
        # TODO(synk): fuse the nearest-2x upsample into the consuming conv's tap loads.
        up = upsample2_cf(unflatten_cf(x_pf, h, w))
        h, w = 2 * h, 2 * w
        x_pf = pad_flat_cf(up)

    # remaining full-resolution convs (rem0 consumes the enc0 skip, split weights)
    wt, bt = packed["rem0"]
    x_pf = conv3x3_pf([x_pf, skips.pop()], wt, bt, h, w)
    wt, bt = packed["rem1"]
    x_pf = conv3x3_pf([x_pf], wt, bt, h, w)

    # rem2 + flow head fused in one kernel (flow: no activation, f32 output);
    # int_steps=0 / int_downsize=1 => flow used directly
    w2, b2 = packed["rem2"]
    wf, bf = packed["flow"]
    flow_pf = conv_head_pf(x_pf, w2, b2, wf, bf, h, w)
    flow = unflatten_cf(flow_pf, h, w)                   # (B,2,H,W) float32

    # SpatialTransformer: warp the moving (source) image by the flow
    moved = warp_bilinear_cf(mov_cf, flow)               # (B,1,H,W)

    return moved, flow


if __name__ == "__main__":
    key = jax.random.PRNGKey(0)
    kf, km, kp = jax.random.split(key, 3)
    B, H, W = 2, 16, 16                      # 16x16 supports the 4 pooling levels (->1x1)
    fixed = jax.random.uniform(kf, (B, H, W, 1), dtype=jnp.float32)
    moving = jax.random.uniform(km, (B, H, W, 1), dtype=jnp.float32)
    packed = pack_params(init_params(kp))    # one-time weight packing, outside jit

    fwd = jax.jit(registration_subnet_forward)
    moved, flow = fwd(packed, fixed, moving)
    jax.block_until_ready((moved, flow))

    assert moved.shape == (B, 1, H, W) and moved.dtype == jnp.float32
    assert flow.shape == (B, 2, H, W) and flow.dtype == jnp.float32
    assert bool(jnp.all(jnp.isfinite(moved))) and bool(jnp.all(jnp.isfinite(flow)))
    print("KERNEL_OK")
</pallas_src>

<mosaic_0001>
module attributes {stable_mosaic.version = 11 : i64} {
  func.func @_conv3x3_kernel(%arg0: i32, %arg1: memref<1x8x433xbf16, #tpu.memory_space<vmem>>, %arg2: memref<16x72xbf16, #tpu.memory_space<vmem>>, %arg3: memref<16x1xf32, #tpu.memory_space<vmem>>, %arg4: memref<1x286xf32, #tpu.memory_space<vmem>>, %arg5: memref<1x16x433xbf16, #tpu.memory_space<vmem>>, %arg6: memref<72x286xbf16, #tpu.memory_space<vmem>>) attributes {dimension_semantics = [#tpu.dimension_semantics<parallel>], iteration_bounds = array<i64: 2>, scalar_prefetch = 0 : i64, scratch_operands = 1 : i64, tpu.core_type = #tpu.core_type<tc>, window_params = [{transform_indices = @transform_0, window_bounds = array<i64: 1, 8, 433>}, {pipeline_mode = #tpu.pipeline_mode<synchronous>, transform_indices = @transform_1, window_bounds = array<i64: 16, 72>}, {pipeline_mode = #tpu.pipeline_mode<synchronous>, transform_indices = @transform_2, window_bounds = array<i64: 16, 1>}, {pipeline_mode = #tpu.pipeline_mode<synchronous>, transform_indices = @transform_3, window_bounds = array<i64: 1, 286>}, {transform_indices = @transform_4, window_bounds = array<i64: 1, 16, 433>}]} {
    %c0 = arith.constant 0 : index
    %c0_0 = arith.constant 0 : index
    %c109 = arith.constant 109 : index
    %0 = vector.load %arg1[%c0, %c0_0, %c109] : memref<1x8x433xbf16, #tpu.memory_space<vmem>>, vector<1x8x286xbf16>
    %1 = vector.shape_cast %0 : vector<1x8x286xbf16> to vector<8x286xbf16>
    %c0_1 = arith.constant 0 : index
    %c0_2 = arith.constant 0 : index
    %2 = vector.load %arg6[%c0_1, %c0_2] : memref<72x286xbf16, #tpu.memory_space<vmem>>, vector<8x286xbf16>
    tpu.vector_store %arg6[%c0_1, %c0_2], %1 {strides = array<i32>} : memref<72x286xbf16, #tpu.memory_space<vmem>>, vector<8x286xbf16>,
    %c0_3 = arith.constant 0 : index
    %c0_4 = arith.constant 0 : index
    %c110 = arith.constant 110 : index
    %3 = vector.load %arg1[%c0_3, %c0_4, %c110] : memref<1x8x433xbf16, #tpu.memory_space<vmem>>, vector<1x8x286xbf16>
    %4 = vector.shape_cast %3 : vector<1x8x286xbf16> to vector<8x286xbf16>
    %c8 = arith.constant 8 : index
    %c0_5 = arith.constant 0 : index
    %5 = vector.load %arg6[%c8, %c0_5] : memref<72x286xbf16, #tpu.memory_space<vmem>>, vector<8x286xbf16>
    tpu.vector_store %arg6[%c8, %c0_5], %4 {strides = array<i32>} : memref<72x286xbf16, #tpu.memory_space<vmem>>, vector<8x286xbf16>,
    %c0_6 = arith.constant 0 : index
    %c0_7 = arith.constant 0 : index
    %c111 = arith.constant 111 : index
    %6 = vector.load %arg1[%c0_6, %c0_7, %c111] : memref<1x8x433xbf16, #tpu.memory_space<vmem>>, vector<1x8x286xbf16>
    %7 = vector.shape_cast %6 : vector<1x8x286xbf16> to vector<8x286xbf16>
    %c16 = arith.constant 16 : index
    %c0_8 = arith.constant 0 : index
    %8 = vector.load %arg6[%c16, %c0_8] : memref<72x286xbf16, #tpu.memory_space<vmem>>, vector<8x286xbf16>
    tpu.vector_store %arg6[%c16, %c0_8], %7 {strides = array<i32>} : memref<72x286xbf16, #tpu.memory_space<vmem>>, vector<8x286xbf16>,
    %c0_9 = arith.constant 0 : index
    %c0_10 = arith.constant 0 : index
    %c127 = arith.constant 127 : index
    %9 = vector.load %arg1[%c0_9, %c0_10, %c127] : memref<1x8x433xbf16, #tpu.memory_space<vmem>>, vector<1x8x286xbf16>
    %10 = vector.shape_cast %9 : vector<1x8x286xbf16> to vector<8x286xbf16>
    %c24 = arith.constant 24 : index
    %c0_11 = arith.constant 0 : index
    %11 = vector.load %arg6[%c24, %c0_11] : memref<72x286xbf16, #tpu.memory_space<vmem>>, vector<8x286xbf16>
    tpu.vector_store %arg6[%c24, %c0_11], %10 {strides = array<i32>} : memref<72x286xbf16, #tpu.memory_space<vmem>>, vector<8x286xbf16>,
    %c0_12 = arith.constant 0 : index
    %c0_13 = arith.constant 0 : index
    %c128 = arith.constant 128 : index
    %12 = vector.load %arg1[%c0_12, %c0_13, %c128] : memref<1x8x433xbf16, #tpu.memory_space<vmem>>, vector<1x8x286xbf16>
    %13 = vector.shape_cast %12 : vector<1x8x286xbf16> to vector<8x286xbf16>
    %c32 = arith.constant 32 : index
    %c0_14 = arith.constant 0 : index
    %14 = vector.load %arg6[%c32, %c0_14] : memref<72x286xbf16, #tpu.memory_space<vmem>>, vector<8x286xbf16>
    tpu.vector_store %arg6[%c32, %c0_14], %13 {strides = array<i32>} : memref<72x286xbf16, #tpu.memory_space<vmem>>, vector<8x286xbf16>,
    %c0_15 = arith.constant 0 : index
    %c0_16 = arith.constant 0 : index
    %c129 = arith.constant 129 : index
    %15 = vector.load %arg1[%c0_15, %c0_16, %c129] : memref<1x8x433xbf16, #tpu.memory_space<vmem>>, vector<1x8x286xbf16>
    %16 = vector.shape_cast %15 : vector<1x8x286xbf16> to vector<8x286xbf16>
    %c40 = arith.constant 40 : index
    %c0_17 = arith.constant 0 : index
    %17 = vector.load %arg6[%c40, %c0_17] : memref<72x286xbf16, #tpu.memory_space<vmem>>, vector<8x286xbf16>
    tpu.vector_store %arg6[%c40, %c0_17], %16 {strides = array<i32>} : memref<72x286xbf16, #tpu.memory_space<vmem>>, vector<8x286xbf16>,
    %c0_18 = arith.constant 0 : index
    %c0_19 = arith.constant 0 : index
    %c145 = arith.constant 145 : index
    %18 = vector.load %arg1[%c0_18, %c0_19, %c145] : memref<1x8x433xbf16, #tpu.memory_space<vmem>>, vector<1x8x286xbf16>
    %19 = vector.shape_cast %18 : vector<1x8x286xbf16> to vector<8x286xbf16>
    %c48 = arith.constant 48 : index
    %c0_20 = arith.constant 0 : index
    %20 = vector.load %arg6[%c48, %c0_20] : memref<72x286xbf16, #tpu.memory_space<vmem>>, vector<8x286xbf16>
    tpu.vector_store %arg6[%c48, %c0_20], %19 {strides = array<i32>} : memref<72x286xbf16, #tpu.memory_space<vmem>>, vector<8x286xbf16>,
    %c0_21 = arith.constant 0 : index
    %c0_22 = arith.constant 0 : index
    %c146 = arith.constant 146 : index
    %21 = vector.load %arg1[%c0_21, %c0_22, %c146] : memref<1x8x433xbf16, #tpu.memory_space<vmem>>, vector<1x8x286xbf16>
    %22 = vector.shape_cast %21 : vector<1x8x286xbf16> to vector<8x286xbf16>
    %c56 = arith.constant 56 : index
    %c0_23 = arith.constant 0 : index
    %23 = vector.load %arg6[%c56, %c0_23] : memref<72x286xbf16, #tpu.memory_space<vmem>>, vector<8x286xbf16>
    tpu.vector_store %arg6[%c56, %c0_23], %22 {strides = array<i32>} : memref<72x286xbf16, #tpu.memory_space<vmem>>, vector<8x286xbf16>,
    %c0_24 = arith.constant 0 : index
    %c0_25 = arith.constant 0 : index
    %c147 = arith.constant 147 : index
    %24 = vector.load %arg1[%c0_24, %c0_25, %c147] : memref<1x8x433xbf16, #tpu.memory_space<vmem>>, vector<1x8x286xbf16>
    %25 = vector.shape_cast %24 : vector<1x8x286xbf16> to vector<8x286xbf16>
    %c64 = arith.constant 64 : index
    %c0_26 = arith.constant 0 : index
    %26 = vector.load %arg6[%c64, %c0_26] : memref<72x286xbf16, #tpu.memory_space<vmem>>, vector<8x286xbf16>
    tpu.vector_store %arg6[%c64, %c0_26], %25 {strides = array<i32>} : memref<72x286xbf16, #tpu.memory_space<vmem>>, vector<8x286xbf16>,
    %c0_27 = arith.constant 0 : index
    %c0_28 = arith.constant 0 : index
    %27 = vector.load %arg2[%c0_27, %c0_28] : memref<16x72xbf16, #tpu.memory_space<vmem>>, vector<16x72xbf16>
    %c0_29 = arith.constant 0 : index
    %c0_30 = arith.constant 0 : index
    %28 = vector.load %arg6[%c0_29, %c0_30] : memref<72x286xbf16, #tpu.memory_space<vmem>>, vector<72x286xbf16>
    %cst = arith.constant dense<0.000000e+00> : vector<16x286xf32>
    %29 = tpu.matmul %27, %28, %cst {dimension_numbers = #tpu.dot_dimension_numbers<[1], [0], [0], [1], [0, 0, 1, 1], [], []>} : vector<16x72xbf16>, vector<72x286xbf16>, vector<16x286xf32> -> vector<16x286xf32>
    %c0_31 = arith.constant 0 : index
    %c0_32 = arith.constant 0 : index
    %30 = vector.load %arg3[%c0_31, %c0_32] : memref<16x1xf32, #tpu.memory_space<vmem>>, vector<16x1xf32>
    %31 = vector.broadcast %30 : vector<16x1xf32> to vector<16x286xf32>
    %32 = arith.addf %29, %31 : vector<16x286xf32>
    %cst_33 = arith.constant 0.000000e+00 : f32
    %33 = vector.broadcast %cst_33 : f32 to vector<16x286xf32>
    %34 = arith.cmpf oge, %32, %33 : vector<16x286xf32>
    %cst_34 = arith.constant 2.000000e-01 : f32
    %35 = vector.broadcast %cst_34 : f32 to vector<16x286xf32>
    %36 = arith.mulf %35, %32 : vector<16x286xf32>
    %37 = arith.select %34, %32, %36 : vector<16x286xi1>, vector<16x286xf32>
    %c0_35 = arith.constant 0 : index
    %c0_36 = arith.constant 0 : index
    %38 = vector.load %arg4[%c0_35, %c0_36] : memref<1x286xf32, #tpu.memory_space<vmem>>, vector<1x286xf32>
    %39 = vector.broadcast %38 : vector<1x286xf32> to vector<16x286xf32>
    %40 = arith.mulf %37, %39 : vector<16x286xf32>
    %cst_37 = arith.constant 0.000000e+00 : bf16
    %41 = vector.broadcast %cst_37 : bf16 to vector<16x128xbf16>
    %c0_38 = arith.constant 0 : index
    %c0_39 = arith.constant 0 : index
    %c0_40 = arith.constant 0 : index
    %42 = vector.load %arg5[%c0_38, %c0_39, %c0_40] : memref<1x16x433xbf16, #tpu.memory_space<vmem>>, vector<1x16x128xbf16>
    %43 = vector.shape_cast %42 : vector<1x16x128xbf16> to vector<16x128xbf16>
    %44 = vector.shape_cast %41 : vector<16x128xbf16> to vector<1x16x128xbf16>
    tpu.vector_store %arg5[%c0_38, %c0_39, %c0_40], %44 {strides = array<i32>} : memref<1x16x433xbf16, #tpu.memory_space<vmem>>, vector<1x16x128xbf16>,
    %45 = arith.truncf %40 : vector<16x286xf32> to vector<16x286xbf16>
    %c0_41 = arith.constant 0 : index
    %c0_42 = arith.constant 0 : index
    %c128_43 = arith.constant 128 : index
    %46 = vector.load %arg5[%c0_41, %c0_42, %c128_43] : memref<1x16x433xbf16, #tpu.memory_space<vmem>>, vector<1x16x286xbf16>
    %47 = vector.shape_cast %46 : vector<1x16x286xbf16> to vector<16x286xbf16>
    %48 = vector.shape_cast %45 : vector<16x286xbf16> to vector<1x16x286xbf16>
    tpu.vector_store %arg5[%c0_41, %c0_42, %c128_43], %48 {strides = array<i32>} : memref<1x16x433xbf16, #tpu.memory_space<vmem>>, vector<1x16x286xbf16>,
    %cst_44 = arith.constant 0.000000e+00 : bf16
    %49 = vector.broadcast %cst_44 : bf16 to vector<16x19xbf16>
    %c0_45 = arith.constant 0 : index
    %c0_46 = arith.constant 0 : index
    %c414 = arith.constant 414 : index
    %50 = vector.load %arg5[%c0_45, %c0_46, %c414] : memref<1x16x433xbf16, #tpu.memory_space<vmem>>, vector<1x16x19xbf16>
    %51 = vector.shape_cast %50 : vector<1x16x19xbf16> to vector<16x19xbf16>
    %52 = vector.shape_cast %49 : vector<16x19xbf16> to vector<1x16x19xbf16>
    tpu.vector_store %arg5[%c0_45, %c0_46, %c414], %52 {strides = array<i32>} : memref<1x16x433xbf16, #tpu.memory_space<vmem>>, vector<1x16x19xbf16>,
    return
  }
  func.func @transform_0(%arg0: i32) -> (i32, i32, i32) {
    %c0_i32 = arith.constant 0 : i32
    %c0_i32_0 = arith.constant 0 : i32
    %c0_i32_1 = arith.constant 0 : i32
    return %arg0, %c0_i32, %c0_i32_0 : i32, i32, i32
  }
  func.func @transform_1(%arg0: i32) -> (i32, i32) {
    %c0_i32 = arith.constant 0 : i32
    %c0_i32_0 = arith.constant 0 : i32
    %c0_i32_1 = arith.constant 0 : i32
    return %c0_i32, %c0_i32_0 : i32, i32
  }
  func.func @transform_2(%arg0: i32) -> (i32, i32) {
    %c0_i32 = arith.constant 0 : i32
    %c0_i32_0 = arith.constant 0 : i32
    %c0_i32_1 = arith.constant 0 : i32
    return %c0_i32, %c0_i32_0 : i32, i32
  }
  func.func @transform_3(%arg0: i32) -> (i32, i32) {
    %c0_i32 = arith.constant 0 : i32
    %c0_i32_0 = arith.constant 0 : i32
    %c0_i32_1 = arith.constant 0 : i32
    return %c0_i32, %c0_i32_0 : i32, i32
  }
  func.func @transform_4(%arg0: i32) -> (i32, i32, i32) {
    %c0_i32 = arith.constant 0 : i32
    %c0_i32_0 = arith.constant 0 : i32
    %c0_i32_1 = arith.constant 0 : i32
    return %arg0, %c0_i32, %c0_i32_0 : i32, i32, i32
  }
}

module attributes {stable_mosaic.version = 11 : i64} {
  func.func @_conv3x3_kernel(%arg0: i32, %arg1: memref<1x16x217xbf16, #tpu.memory_space<vmem>>, %arg2: memref<32x144xbf16, #tpu.memory_space<vmem>>, %arg3: memref<32x1xf32, #tpu.memory_space<vmem>>, %arg4: memref<1x78xf32, #tpu.memory_space<vmem>>, %arg5: memref<1x32x217xbf16, #tpu.memory_space<vmem>>, %arg6: memref<144x78xbf16, #tpu.memory_space<vmem>>) attributes {dimension_semantics = [#tpu.dimension_semantics<parallel>], iteration_bounds = array<i64: 2>, scalar_prefetch = 0 : i64, scratch_operands = 1 : i64, tpu.core_type = #tpu.core_type<tc>, window_params = [{transform_indices = @transform_0, window_bounds = array<i64: 1, 16, 217>}, {pipeline_mode = #tpu.pipeline_mode<synchronous>, transform_indices = @transform_1, window_bounds = array<i64: 32, 144>}, {pipeline_mode = #tpu.pipeline_mode<synchronous>, transform_indices = @transform_2, window_bounds = array<i64: 32, 1>}, {pipeline_mode = #tpu.pipeline_mode<synchronous>, transform_indices = @transform_3, window_bounds = array<i64: 1, 78>}, {transform_indices = @transform_4, window_bounds = array<i64: 1, 32, 217>}]} {
    %c0 = arith.constant 0 : index
    %c0_0 = arith.constant 0 : index
    %c117 = arith.constant 117 : index
    %0 = vector.load %arg1[%c0, %c0_0, %c117] : memref<1x16x217xbf16, #tpu.memory_space<vmem>>, vector<1x16x78xbf16>
    %1 = vector.shape_cast %0 : vector<1x16x78xbf16> to vector<16x78xbf16>
    %c0_1 = arith.constant 0 : index
    %c0_2 = arith.constant 0 : index
    %2 = vector.load %arg6[%c0_1, %c0_2] : memref<144x78xbf16, #tpu.memory_space<vmem>>, vector<16x78xbf16>
    tpu.vector_store %arg6[%c0_1, %c0_2], %1 {strides = array<i32>} : memref<144x78xbf16, #tpu.memory_space<vmem>>, vector<16x78xbf16>,
    %c0_3 = arith.constant 0 : index
    %c0_4 = arith.constant 0 : index
    %c118 = arith.constant 118 : index
    %3 = vector.load %arg1[%c0_3, %c0_4, %c118] : memref<1x16x217xbf16, #tpu.memory_space<vmem>>, vector<1x16x78xbf16>
    %4 = vector.shape_cast %3 : vector<1x16x78xbf16> to vector<16x78xbf16>
    %c16 = arith.constant 16 : index
    %c0_5 = arith.constant 0 : index
    %5 = vector.load %arg6[%c16, %c0_5] : memref<144x78xbf16, #tpu.memory_space<vmem>>, vector<16x78xbf16>
    tpu.vector_store %arg6[%c16, %c0_5], %4 {strides = array<i32>} : memref<144x78xbf16, #tpu.memory_space<vmem>>, vector<16x78xbf16>,
    %c0_6 = arith.constant 0 : index
    %c0_7 = arith.constant 0 : index
    %c119 = arith.constant 119 : index
    %6 = vector.load %arg1[%c0_6, %c0_7, %c119] : memref<1x16x217xbf16, #tpu.memory_space<vmem>>, vector<1x16x78xbf16>
    %7 = vector.shape_cast %6 : vector<1x16x78xbf16> to vector<16x78xbf16>
    %c32 = arith.constant 32 : index
    %c0_8 = arith.constant 0 : index
    %8 = vector.load %arg6[%c32, %c0_8] : memref<144x78xbf16, #tpu.memory_space<vmem>>, vector<16x78xbf16>
    tpu.vector_store %arg6[%c32, %c0_8], %7 {strides = array<i32>} : memref<144x78xbf16, #tpu.memory_space<vmem>>, vector<16x78xbf16>,
    %c0_9 = arith.constant 0 : index
    %c0_10 = arith.constant 0 : index
    %c127 = arith.constant 127 : index
    %9 = vector.load %arg1[%c0_9, %c0_10, %c127] : memref<1x16x217xbf16, #tpu.memory_space<vmem>>, vector<1x16x78xbf16>
    %10 = vector.shape_cast %9 : vector<1x16x78xbf16> to vector<16x78xbf16>
    %c48 = arith.constant 48 : index
    %c0_11 = arith.constant 0 : index
    %11 = vector.load %arg6[%c48, %c0_11] : memref<144x78xbf16, #tpu.memory_space<vmem>>, vector<16x78xbf16>
    tpu.vector_store %arg6[%c48, %c0_11], %10 {strides = array<i32>} : memref<144x78xbf16, #tpu.memory_space<vmem>>, vector<16x78xbf16>,
    %c0_12 = arith.constant 0 : index
    %c0_13 = arith.constant 0 : index
    %c128 = arith.constant 128 : index
    %12 = vector.load %arg1[%c0_12, %c0_13, %c128] : memref<1x16x217xbf16, #tpu.memory_space<vmem>>, vector<1x16x78xbf16>
    %13 = vector.shape_cast %12 : vector<1x16x78xbf16> to vector<16x78xbf16>
    %c64 = arith.constant 64 : index
    %c0_14 = arith.constant 0 : index
    %14 = vector.load %arg6[%c64, %c0_14] : memref<144x78xbf16, #tpu.memory_space<vmem>>, vector<16x78xbf16>
    tpu.vector_store %arg6[%c64, %c0_14], %13 {strides = array<i32>} : memref<144x78xbf16, #tpu.memory_space<vmem>>, vector<16x78xbf16>,
    %c0_15 = arith.constant 0 : index
    %c0_16 = arith.constant 0 : index
    %c129 = arith.constant 129 : index
    %15 = vector.load %arg1[%c0_15, %c0_16, %c129] : memref<1x16x217xbf16, #tpu.memory_space<vmem>>, vector<1x16x78xbf16>
    %16 = vector.shape_cast %15 : vector<1x16x78xbf16> to vector<16x78xbf16>
    %c80 = arith.constant 80 : index
    %c0_17 = arith.constant 0 : index
    %17 = vector.load %arg6[%c80, %c0_17] : memref<144x78xbf16, #tpu.memory_space<vmem>>, vector<16x78xbf16>
    tpu.vector_store %arg6[%c80, %c0_17], %16 {strides = array<i32>} : memref<144x78xbf16, #tpu.memory_space<vmem>>, vector<16x78xbf16>,
    %c0_18 = arith.constant 0 : index
    %c0_19 = arith.constant 0 : index
    %c137 = arith.constant 137 : index
    %18 = vector.load %arg1[%c0_18, %c0_19, %c137] : memref<1x16x217xbf16, #tpu.memory_space<vmem>>, vector<1x16x78xbf16>
    %19 = vector.shape_cast %18 : vector<1x16x78xbf16> to vector<16x78xbf16>
    %c96 = arith.constant 96 : index
    %c0_20 = arith.constant 0 : index
    %20 = vector.load %arg6[%c96, %c0_20] : memref<144x78xbf16, #tpu.memory_space<vmem>>, vector<16x78xbf16>
    tpu.vector_store %arg6[%c96, %c0_20], %19 {strides = array<i32>} : memref<144x78xbf16, #tpu.memory_space<vmem>>, vector<16x78xbf16>,
    %c0_21 = arith.constant 0 : index
    %c0_22 = arith.constant 0 : index
    %c138 = arith.constant 138 : index
    %21 = vector.load %arg1[%c0_21, %c0_22, %c138] : memref<1x16x217xbf16, #tpu.memory_space<vmem>>, vector<1x16x78xbf16>
    %22 = vector.shape_cast %21 : vector<1x16x78xbf16> to vector<16x78xbf16>
    %c112 = arith.constant 112 : index
    %c0_23 = arith.constant 0 : index
    %23 = vector.load %arg6[%c112, %c0_23] : memref<144x78xbf16, #tpu.memory_space<vmem>>, vector<16x78xbf16>
    tpu.vector_store %arg6[%c112, %c0_23], %22 {strides = array<i32>} : memref<144x78xbf16, #tpu.memory_space<vmem>>, vector<16x78xbf16>,
    %c0_24 = arith.constant 0 : index
    %c0_25 = arith.constant 0 : index
    %c139 = arith.constant 139 : index
    %24 = vector.load %arg1[%c0_24, %c0_25, %c139] : memref<1x16x217xbf16, #tpu.memory_space<vmem>>, vector<1x16x78xbf16>
    %25 = vector.shape_cast %24 : vector<1x16x78xbf16> to vector<16x78xbf16>
    %c128_26 = arith.constant 128 : index
    %c0_27 = arith.constant 0 : index
    %26 = vector.load %arg6[%c128_26, %c0_27] : memref<144x78xbf16, #tpu.memory_space<vmem>>, vector<16x78xbf16>
    tpu.vector_store %arg6[%c128_26, %c0_27], %25 {strides = array<i32>} : memref<144x78xbf16, #tpu.memory_space<vmem>>, vector<16x78xbf16>,
    %c0_28 = arith.constant 0 : index
    %c0_29 = arith.constant 0 : index
    %27 = vector.load %arg2[%c0_28, %c0_29] : memref<32x144xbf16, #tpu.memory_space<vmem>>, vector<32x144xbf16>
    %c0_30 = arith.constant 0 : index
    %c0_31 = arith.constant 0 : index
    %28 = vector.load %arg6[%c0_30, %c0_31] : memref<144x78xbf16, #tpu.memory_space<vmem>>, vector<144x78xbf16>
    %cst = arith.constant dense<0.000000e+00> : vector<32x78xf32>
    %29 = tpu.matmul %27, %28, %cst {dimension_numbers = #tpu.dot_dimension_numbers<[1], [0], [0], [1], [0, 0, 1, 1], [], []>} : vector<32x144xbf16>, vector<144x78xbf16>, vector<32x78xf32> -> vector<32x78xf32>
    %c0_32 = arith.constant 0 : index
    %c0_33 = arith.constant 0 : index
    %30 = vector.load %arg3[%c0_32, %c0_33] : memref<32x1xf32, #tpu.memory_space<vmem>>, vector<32x1xf32>
    %31 = vector.broadcast %30 : vector<32x1xf32> to vector<32x78xf32>
    %32 = arith.addf %29, %31 : vector<32x78xf32>
    %cst_34 = arith.constant 0.000000e+00 : f32
    %33 = vector.broadcast %cst_34 : f32 to vector<32x78xf32>
    %34 = arith.cmpf oge, %32, %33 : vector<32x78xf32>
    %cst_35 = arith.constant 2.000000e-01 : f32
    %35 = vector.broadcast %cst_35 : f32 to vector<32x78xf32>
    %36 = arith.mulf %35, %32 : vector<32x78xf32>
    %37 = arith.select %34, %32, %36 : vector<32x78xi1>, vector<32x78xf32>
    %c0_36 = arith.constant 0 : index
    %c0_37 = arith.constant 0 : index
    %38 = vector.load %arg4[%c0_36, %c0_37] : memref<1x78xf32, #tpu.memory_space<vmem>>, vector<1x78xf32>
    %39 = vector.broadcast %38 : vector<1x78xf32> to vector<32x78xf32>
    %40 = arith.mulf %37, %39 : vector<32x78xf32>
    %cst_38 = arith.constant 0.000000e+00 : bf16
    %41 = vector.broadcast %cst_38 : bf16 to vector<32x128xbf16>
    %c0_39 = arith.constant 0 : index
    %c0_40 = arith.constant 0 : index
    %c0_41 = arith.constant 0 : index
    %42 = vector.load %arg5[%c0_39, %c0_40, %c0_41] : memref<1x32x217xbf16, #tpu.memory_space<vmem>>, vector<1x32x128xbf16>
    %43 = vector.shape_cast %42 : vector<1x32x128xbf16> to vector<32x128xbf16>
    %44 = vector.shape_cast %41 : vector<32x128xbf16> to vector<1x32x128xbf16>
    tpu.vector_store %arg5[%c0_39, %c0_40, %c0_41], %44 {strides = array<i32>} : memref<1x32x217xbf16, #tpu.memory_space<vmem>>, vector<1x32x128xbf16>,
    %45 = arith.truncf %40 : vector<32x78xf32> to vector<32x78xbf16>
    %c0_42 = arith.constant 0 : index
    %c0_43 = arith.constant 0 : index
    %c128_44 = arith.constant 128 : index
    %46 = vector.load %arg5[%c0_42, %c0_43, %c128_44] : memref<1x32x217xbf16, #tpu.memory_space<vmem>>, vector<1x32x78xbf16>
    %47 = vector.shape_cast %46 : vector<1x32x78xbf16> to vector<32x78xbf16>
    %48 = vector.shape_cast %45 : vector<32x78xbf16> to vector<1x32x78xbf16>
    tpu.vector_store %arg5[%c0_42, %c0_43, %c128_44], %48 {strides = array<i32>} : memref<1x32x217xbf16, #tpu.memory_space<vmem>>, vector<1x32x78xbf16>,
    %cst_45 = arith.constant 0.000000e+00 : bf16
    %49 = vector.broadcast %cst_45 : bf16 to vector<32x11xbf16>
    %c0_46 = arith.constant 0 : index
    %c0_47 = arith.constant 0 : index
    %c206 = arith.constant 206 : index
    %50 = vector.load %arg5[%c0_46, %c0_47, %c206] : memref<1x32x217xbf16, #tpu.memory_space<vmem>>, vector<1x32x11xbf16>
    %51 = vector.shape_cast %50 : vector<1x32x11xbf16> to vector<32x11xbf16>
    %52 = vector.shape_cast %49 : vector<32x11xbf16> to vector<1x32x11xbf16>
    tpu.vector_store %arg5[%c0_46, %c0_47, %c206], %52 {strides = array<i32>} : memref<1x32x217xbf16, #tpu.memory_space<vmem>>, vector<1x32x11xbf16>,
    return
  }
  func.func @transform_0(%arg0: i32) -> (i32, i32, i32) {
    %c0_i32 = arith.constant 0 : i32
    %c0_i32_0 = arith.constant 0 : i32
    %c0_i32_1 = arith.constant 0 : i32
    return %arg0, %c0_i32, %c0_i32_0 : i32, i32, i32
  }
  func.func @transform_1(%arg0: i32) -> (i32, i32) {
    %c0_i32 = arith.constant 0 : i32
    %c0_i32_0 = arith.constant 0 : i32
    %c0_i32_1 = arith.constant 0 : i32
    return %c0_i32, %c0_i32_0 : i32, i32
  }
  func.func @transform_2(%arg0: i32) -> (i32, i32) {
    %c0_i32 = arith.constant 0 : i32
    %c0_i32_0 = arith.constant 0 : i32
    %c0_i32_1 = arith.constant 0 : i32
    return %c0_i32, %c0_i32_0 : i32, i32
  }
  func.func @transform_3(%arg0: i32) -> (i32, i32) {
    %c0_i32 = arith.constant 0 : i32
    %c0_i32_0 = arith.constant 0 : i32
    %c0_i32_1 = arith.constant 0 : i32
    return %c0_i32, %c0_i32_0 : i32, i32
  }
  func.func @transform_4(%arg0: i32) -> (i32, i32, i32) {
    %c0_i32 = arith.constant 0 : i32
    %c0_i32_0 = arith.constant 0 : i32
    %c0_i32_1 = arith.constant 0 : i32
    return %arg0, %c0_i32, %c0_i32_0 : i32, i32, i32
  }
}

module attributes {stable_mosaic.version = 11 : i64} {
  func.func @_conv3x3_kernel(%arg0: i32, %arg1: memref<1x32x157xbf16, #tpu.memory_space<vmem>>, %arg2: memref<32x288xbf16, #tpu.memory_space<vmem>>, %arg3: memref<32x1xf32, #tpu.memory_space<vmem>>, %arg4: memref<1x22xf32, #tpu.memory_space<vmem>>, %arg5: memref<1x32x157xbf16, #tpu.memory_space<vmem>>, %arg6: memref<288x22xbf16, #tpu.memory_space<vmem>>) attributes {dimension_semantics = [#tpu.dimension_semantics<parallel>], iteration_bounds = array<i64: 2>, scalar_prefetch = 0 : i64, scratch_operands = 1 : i64, tpu.core_type = #tpu.core_type<tc>, window_params = [{transform_indices = @transform_0, window_bounds = array<i64: 1, 32, 157>}, {pipeline_mode = #tpu.pipeline_mode<synchronous>, transform_indices = @transform_1, window_bounds = array<i64: 32, 288>}, {pipeline_mode = #tpu.pipeline_mode<synchronous>, transform_indices = @transform_2, window_bounds = array<i64: 32, 1>}, {pipeline_mode = #tpu.pipeline_mode<synchronous>, transform_indices = @transform_3, window_bounds = array<i64: 1, 22>}, {transform_indices = @transform_4, window_bounds = array<i64: 1, 32, 157>}]} {
    %c0 = arith.constant 0 : index
    %c0_0 = arith.constant 0 : index
    %c121 = arith.constant 121 : index
    %0 = vector.load %arg1[%c0, %c0_0, %c121] : memref<1x32x157xbf16, #tpu.memory_space<vmem>>, vector<1x32x22xbf16>
    %1 = vector.shape_cast %0 : vector<1x32x22xbf16> to vector<32x22xbf16>
    %c0_1 = arith.constant 0 : index
    %c0_2 = arith.constant 0 : index
    %2 = vector.load %arg6[%c0_1, %c0_2] : memref<288x22xbf16, #tpu.memory_space<vmem>>, vector<32x22xbf16>
    tpu.vector_store %arg6[%c0_1, %c0_2], %1 {strides = array<i32>} : memref<288x22xbf16, #tpu.memory_space<vmem>>, vector<32x22xbf16>,
    %c0_3 = arith.constant 0 : index
    %c0_4 = arith.constant 0 : index
    %c122 = arith.constant 122 : index
    %3 = vector.load %arg1[%c0_3, %c0_4, %c122] : memref<1x32x157xbf16, #tpu.memory_space<vmem>>, vector<1x32x22xbf16>
    %4 = vector.shape_cast %3 : vector<1x32x22xbf16> to vector<32x22xbf16>
    %c32 = arith.constant 32 : index
    %c0_5 = arith.constant 0 : index
    %5 = vector.load %arg6[%c32, %c0_5] : memref<288x22xbf16, #tpu.memory_space<vmem>>, vector<32x22xbf16>
    tpu.vector_store %arg6[%c32, %c0_5], %4 {strides = array<i32>} : memref<288x22xbf16, #tpu.memory_space<vmem>>, vector<32x22xbf16>,
    %c0_6 = arith.constant 0 : index
    %c0_7 = arith.constant 0 : index
    %c123 = arith.constant 123 : index
    %6 = vector.load %arg1[%c0_6, %c0_7, %c123] : memref<1x32x157xbf16, #tpu.memory_space<vmem>>, vector<1x32x22xbf16>
    %7 = vector.shape_cast %6 : vector<1x32x22xbf16> to vector<32x22xbf16>
    %c64 = arith.constant 64 : index
    %c0_8 = arith.constant 0 : index
    %8 = vector.load %arg6[%c64, %c0_8] : memref<288x22xbf16, #tpu.memory_space<vmem>>, vector<32x22xbf16>
    tpu.vector_store %arg6[%c64, %c0_8], %7 {strides = array<i32>} : memref<288x22xbf16, #tpu.memory_space<vmem>>, vector<32x22xbf16>,
    %c0_9 = arith.constant 0 : index
    %c0_10 = arith.constant 0 : index
    %c127 = arith.constant 127 : index
    %9 = vector.load %arg1[%c0_9, %c0_10, %c127] : memref<1x32x157xbf16, #tpu.memory_space<vmem>>, vector<1x32x22xbf16>
    %10 = vector.shape_cast %9 : vector<1x32x22xbf16> to vector<32x22xbf16>
    %c96 = arith.constant 96 : index
    %c0_11 = arith.constant 0 : index
    %11 = vector.load %arg6[%c96, %c0_11] : memref<288x22xbf16, #tpu.memory_space<vmem>>, vector<32x22xbf16>
    tpu.vector_store %arg6[%c96, %c0_11], %10 {strides = array<i32>} : memref<288x22xbf16, #tpu.memory_space<vmem>>, vector<32x22xbf16>,
    %c0_12 = arith.constant 0 : index
    %c0_13 = arith.constant 0 : index
    %c128 = arith.constant 128 : index
    %12 = vector.load %arg1[%c0_12, %c0_13, %c128] : memref<1x32x157xbf16, #tpu.memory_space<vmem>>, vector<1x32x22xbf16>
    %13 = vector.shape_cast %12 : vector<1x32x22xbf16> to vector<32x22xbf16>
    %c128_14 = arith.constant 128 : index
    %c0_15 = arith.constant 0 : index
    %14 = vector.load %arg6[%c128_14, %c0_15] : memref<288x22xbf16, #tpu.memory_space<vmem>>, vector<32x22xbf16>
    tpu.vector_store %arg6[%c128_14, %c0_15], %13 {strides = array<i32>} : memref<288x22xbf16, #tpu.memory_space<vmem>>, vector<32x22xbf16>,
    %c0_16 = arith.constant 0 : index
    %c0_17 = arith.constant 0 : index
    %c129 = arith.constant 129 : index
    %15 = vector.load %arg1[%c0_16, %c0_17, %c129] : memref<1x32x157xbf16, #tpu.memory_space<vmem>>, vector<1x32x22xbf16>
    %16 = vector.shape_cast %15 : vector<1x32x22xbf16> to vector<32x22xbf16>
    %c160 = arith.constant 160 : index
    %c0_18 = arith.constant 0 : index
    %17 = vector.load %arg6[%c160, %c0_18] : memref<288x22xbf16, #tpu.memory_space<vmem>>, vector<32x22xbf16>
    tpu.vector_store %arg6[%c160, %c0_18], %16 {strides = array<i32>} : memref<288x22xbf16, #tpu.memory_space<vmem>>, vector<32x22xbf16>,
    %c0_19 = arith.constant 0 : index
    %c0_20 = arith.constant 0 : index
    %c133 = arith.constant 133 : index
    %18 = vector.load %arg1[%c0_19, %c0_20, %c133] : memref<1x32x157xbf16, #tpu.memory_space<vmem>>, vector<1x32x22xbf16>
    %19 = vector.shape_cast %18 : vector<1x32x22xbf16> to vector<32x22xbf16>
    %c192 = arith.constant 192 : index
    %c0_21 = arith.constant 0 : index
    %20 = vector.load %arg6[%c192, %c0_21] : memref<288x22xbf16, #tpu.memory_space<vmem>>, vector<32x22xbf16>
    tpu.vector_store %arg6[%c192, %c0_21], %19 {strides = array<i32>} : memref<288x22xbf16, #tpu.memory_space<vmem>>, vector<32x22xbf16>,
    %c0_22 = arith.constant 0 : index
    %c0_23 = arith.constant 0 : index
    %c134 = arith.constant 134 : index
    %21 = vector.load %arg1[%c0_22, %c0_23, %c134] : memref<1x32x157xbf16, #tpu.memory_space<vmem>>, vector<1x32x22xbf16>
    %22 = vector.shape_cast %21 : vector<1x32x22xbf16> to vector<32x22xbf16>
    %c224 = arith.constant 224 : index
    %c0_24 = arith.constant 0 : index
    %23 = vector.load %arg6[%c224, %c0_24] : memref<288x22xbf16, #tpu.memory_space<vmem>>, vector<32x22xbf16>
    tpu.vector_store %arg6[%c224, %c0_24], %22 {strides = array<i32>} : memref<288x22xbf16, #tpu.memory_space<vmem>>, vector<32x22xbf16>,
    %c0_25 = arith.constant 0 : index
    %c0_26 = arith.constant 0 : index
    %c135 = arith.constant 135 : index
    %24 = vector.load %arg1[%c0_25, %c0_26, %c135] : memref<1x32x157xbf16, #tpu.memory_space<vmem>>, vector<1x32x22xbf16>
    %25 = vector.shape_cast %24 : vector<1x32x22xbf16> to vector<32x22xbf16>
    %c256 = arith.constant 256 : index
    %c0_27 = arith.constant 0 : index
    %26 = vector.load %arg6[%c256, %c0_27] : memref<288x22xbf16, #tpu.memory_space<vmem>>, vector<32x22xbf16>
    tpu.vector_store %arg6[%c256, %c0_27], %25 {strides = array<i32>} : memref<288x22xbf16, #tpu.memory_space<vmem>>, vector<32x22xbf16>,
    %c0_28 = arith.constant 0 : index
    %c0_29 = arith.constant 0 : index
    %27 = vector.load %arg2[%c0_28, %c0_29] : memref<32x288xbf16, #tpu.memory_space<vmem>>, vector<32x288xbf16>
    %c0_30 = arith.constant 0 : index
    %c0_31 = arith.constant 0 : index
    %28 = vector.load %arg6[%c0_30, %c0_31] : memref<288x22xbf16, #tpu.memory_space<vmem>>, vector<288x22xbf16>
    %cst = arith.constant dense<0.000000e+00> : vector<32x22xf32>
    %29 = tpu.matmul %27, %28, %cst {dimension_numbers = #tpu.dot_dimension_numbers<[1], [0], [0], [1], [0, 0, 1, 1], [], []>} : vector<32x288xbf16>, vector<288x22xbf16>, vector<32x22xf32> -> vector<32x22xf32>
    %c0_32 = arith.constant 0 : index
    %c0_33 = arith.constant 0 : index
    %30 = vector.load %arg3[%c0_32, %c0_33] : memref<32x1xf32, #tpu.memory_space<vmem>>, vector<32x1xf32>
    %31 = vector.broadcast %30 : vector<32x1xf32> to vector<32x22xf32>
    %32 = arith.addf %29, %31 : vector<32x22xf32>
    %cst_34 = arith.constant 0.000000e+00 : f32
    %33 = vector.broadcast %cst_34 : f32 to vector<32x22xf32>
    %34 = arith.cmpf oge, %32, %33 : vector<32x22xf32>
    %cst_35 = arith.constant 2.000000e-01 : f32
    %35 = vector.broadcast %cst_35 : f32 to vector<32x22xf32>
    %36 = arith.mulf %35, %32 : vector<32x22xf32>
    %37 = arith.select %34, %32, %36 : vector<32x22xi1>, vector<32x22xf32>
    %c0_36 = arith.constant 0 : index
    %c0_37 = arith.constant 0 : index
    %38 = vector.load %arg4[%c0_36, %c0_37] : memref<1x22xf32, #tpu.memory_space<vmem>>, vector<1x22xf32>
    %39 = vector.broadcast %38 : vector<1x22xf32> to vector<32x22xf32>
    %40 = arith.mulf %37, %39 : vector<32x22xf32>
    %cst_38 = arith.constant 0.000000e+00 : bf16
    %41 = vector.broadcast %cst_38 : bf16 to vector<32x128xbf16>
    %c0_39 = arith.constant 0 : index
    %c0_40 = arith.constant 0 : index
    %c0_41 = arith.constant 0 : index
    %42 = vector.load %arg5[%c0_39, %c0_40, %c0_41] : memref<1x32x157xbf16, #tpu.memory_space<vmem>>, vector<1x32x128xbf16>
    %43 = vector.shape_cast %42 : vector<1x32x128xbf16> to vector<32x128xbf16>
    %44 = vector.shape_cast %41 : vector<32x128xbf16> to vector<1x32x128xbf16>
    tpu.vector_store %arg5[%c0_39, %c0_40, %c0_41], %44 {strides = array<i32>} : memref<1x32x157xbf16, #tpu.memory_space<vmem>>, vector<1x32x128xbf16>,
    %45 = arith.truncf %40 : vector<32x22xf32> to vector<32x22xbf16>
    %c0_42 = arith.constant 0 : index
    %c0_43 = arith.constant 0 : index
    %c128_44 = arith.constant 128 : index
    %46 = vector.load %arg5[%c0_42, %c0_43, %c128_44] : memref<1x32x157xbf16, #tpu.memory_space<vmem>>, vector<1x32x22xbf16>
    %47 = vector.shape_cast %46 : vector<1x32x22xbf16> to vector<32x22xbf16>
    %48 = vector.shape_cast %45 : vector<32x22xbf16> to vector<1x32x22xbf16>
    tpu.vector_store %arg5[%c0_42, %c0_43, %c128_44], %48 {strides = array<i32>} : memref<1x32x157xbf16, #tpu.memory_space<vmem>>, vector<1x32x22xbf16>,
    %cst_45 = arith.constant 0.000000e+00 : bf16
    %49 = vector.broadcast %cst_45 : bf16 to vector<32x7xbf16>
    %c0_46 = arith.constant 0 : index
    %c0_47 = arith.constant 0 : index
    %c150 = arith.constant 150 : index
    %50 = vector.load %arg5[%c0_46, %c0_47, %c150] : memref<1x32x157xbf16, #tpu.memory_space<vmem>>, vector<1x32x7xbf16>
    %51 = vector.shape_cast %50 : vector<1x32x7xbf16> to vector<32x7xbf16>
    %52 = vector.shape_cast %49 : vector<32x7xbf16> to vector<1x32x7xbf16>
    tpu.vector_store %arg5[%c0_46, %c0_47, %c150], %52 {strides = array<i32>} : memref<1x32x157xbf16, #tpu.memory_space<vmem>>, vector<1x32x7xbf16>,
    return
  }
  func.func @transform_0(%arg0: i32) -> (i32, i32, i32) {
    %c0_i32 = arith.constant 0 : i32
    %c0_i32_0 = arith.constant 0 : i32
    %c0_i32_1 = arith.constant 0 : i32
    return %arg0, %c0_i32, %c0_i32_0 : i32, i32, i32
  }
  func.func @transform_1(%arg0: i32) -> (i32, i32) {
    %c0_i32 = arith.constant 0 : i32
    %c0_i32_0 = arith.constant 0 : i32
    %c0_i32_1 = arith.constant 0 : i32
    return %c0_i32, %c0_i32_0 : i32, i32
  }
  func.func @transform_2(%arg0: i32) -> (i32, i32) {
    %c0_i32 = arith.constant 0 : i32
    %c0_i32_0 = arith.constant 0 : i32
    %c0_i32_1 = arith.constant 0 : i32
    return %c0_i32, %c0_i32_0 : i32, i32
  }
  func.func @transform_3(%arg0: i32) -> (i32, i32) {
    %c0_i32 = arith.constant 0 : i32
    %c0_i32_0 = arith.constant 0 : i32
    %c0_i32_1 = arith.constant 0 : i32
    return %c0_i32, %c0_i32_0 : i32, i32
  }
  func.func @transform_4(%arg0: i32) -> (i32, i32, i32) {
    %c0_i32 = arith.constant 0 : i32
    %c0_i32_0 = arith.constant 0 : i32
    %c0_i32_1 = arith.constant 0 : i32
    return %arg0, %c0_i32, %c0_i32_0 : i32, i32, i32
  }
}

module attributes {stable_mosaic.version = 11 : i64} {
  func.func @_conv3x3_kernel(%arg0: i32, %arg1: memref<1x32x139xbf16, #tpu.memory_space<vmem>>, %arg2: memref<32x288xbf16, #tpu.memory_space<vmem>>, %arg3: memref<32x1xf32, #tpu.memory_space<vmem>>, %arg4: memref<1x6xf32, #tpu.memory_space<vmem>>, %arg5: memref<1x32x139xbf16, #tpu.memory_space<vmem>>, %arg6: memref<288x6xbf16, #tpu.memory_space<vmem>>) attributes {dimension_semantics = [#tpu.dimension_semantics<parallel>], iteration_bounds = array<i64: 2>, scalar_prefetch = 0 : i64, scratch_operands = 1 : i64, tpu.core_type = #tpu.core_type<tc>, window_params = [{transform_indices = @transform_0, window_bounds = array<i64: 1, 32, 139>}, {pipeline_mode = #tpu.pipeline_mode<synchronous>, transform_indices = @transform_1, window_bounds = array<i64: 32, 288>}, {pipeline_mode = #tpu.pipeline_mode<synchronous>, transform_indices = @transform_2, window_bounds = array<i64: 32, 1>}, {pipeline_mode = #tpu.pipeline_mode<synchronous>, transform_indices = @transform_3, window_bounds = array<i64: 1, 6>}, {transform_indices = @transform_4, window_bounds = array<i64: 1, 32, 139>}]} {
    %c0 = arith.constant 0 : index
    %c0_0 = arith.constant 0 : index
    %c123 = arith.constant 123 : index
    %0 = vector.load %arg1[%c0, %c0_0, %c123] : memref<1x32x139xbf16, #tpu.memory_space<vmem>>, vector<1x32x6xbf16>
    %1 = vector.shape_cast %0 : vector<1x32x6xbf16> to vector<32x6xbf16>
    %c0_1 = arith.constant 0 : index
    %c0_2 = arith.constant 0 : index
    %2 = vector.load %arg6[%c0_1, %c0_2] : memref<288x6xbf16, #tpu.memory_space<vmem>>, vector<32x6xbf16>
    tpu.vector_store %arg6[%c0_1, %c0_2], %1 {strides = array<i32>} : memref<288x6xbf16, #tpu.memory_space<vmem>>, vector<32x6xbf16>,
    %c0_3 = arith.constant 0 : index
    %c0_4 = arith.constant 0 : index
    %c124 = arith.constant 124 : index
    %3 = vector.load %arg1[%c0_3, %c0_4, %c124] : memref<1x32x139xbf16, #tpu.memory_space<vmem>>, vector<1x32x6xbf16>
    %4 = vector.shape_cast %3 : vector<1x32x6xbf16> to vector<32x6xbf16>
    %c32 = arith.constant 32 : index
    %c0_5 = arith.constant 0 : index
    %5 = vector.load %arg6[%c32, %c0_5] : memref<288x6xbf16, #tpu.memory_space<vmem>>, vector<32x6xbf16>
    tpu.vector_store %arg6[%c32, %c0_5], %4 {strides = array<i32>} : memref<288x6xbf16, #tpu.memory_space<vmem>>, vector<32x6xbf16>,
    %c0_6 = arith.constant 0 : index
    %c0_7 = arith.constant 0 : index
    %c125 = arith.constant 125 : index
    %6 = vector.load %arg1[%c0_6, %c0_7, %c125] : memref<1x32x139xbf16, #tpu.memory_space<vmem>>, vector<1x32x6xbf16>
    %7 = vector.shape_cast %6 : vector<1x32x6xbf16> to vector<32x6xbf16>
    %c64 = arith.constant 64 : index
    %c0_8 = arith.constant 0 : index
    %8 = vector.load %arg6[%c64, %c0_8] : memref<288x6xbf16, #tpu.memory_space<vmem>>, vector<32x6xbf16>
    tpu.vector_store %arg6[%c64, %c0_8], %7 {strides = array<i32>} : memref<288x6xbf16, #tpu.memory_space<vmem>>, vector<32x6xbf16>,
    %c0_9 = arith.constant 0 : index
    %c0_10 = arith.constant 0 : index
    %c127 = arith.constant 127 : index
    %9 = vector.load %arg1[%c0_9, %c0_10, %c127] : memref<1x32x139xbf16, #tpu.memory_space<vmem>>, vector<1x32x6xbf16>
    %10 = vector.shape_cast %9 : vector<1x32x6xbf16> to vector<32x6xbf16>
    %c96 = arith.constant 96 : index
    %c0_11 = arith.constant 0 : index
    %11 = vector.load %arg6[%c96, %c0_11] : memref<288x6xbf16, #tpu.memory_space<vmem>>, vector<32x6xbf16>
    tpu.vector_store %arg6[%c96, %c0_11], %10 {strides = array<i32>} : memref<288x6xbf16, #tpu.memory_space<vmem>>, vector<32x6xbf16>,
    %c0_12 = arith.constant 0 : index
    %c0_13 = arith.constant 0 : index
    %c128 = arith.constant 128 : index
    %12 = vector.load %arg1[%c0_12, %c0_13, %c128] : memref<1x32x139xbf16, #tpu.memory_space<vmem>>, vector<1x32x6xbf16>
    %13 = vector.shape_cast %12 : vector<1x32x6xbf16> to vector<32x6xbf16>
    %c128_14 = arith.constant 128 : index
    %c0_15 = arith.constant 0 : index
    %14 = vector.load %arg6[%c128_14, %c0_15] : memref<288x6xbf16, #tpu.memory_space<vmem>>, vector<32x6xbf16>
    tpu.vector_store %arg6[%c128_14, %c0_15], %13 {strides = array<i32>} : memref<288x6xbf16, #tpu.memory_space<vmem>>, vector<32x6xbf16>,
    %c0_16 = arith.constant 0 : index
    %c0_17 = arith.constant 0 : index
    %c129 = arith.constant 129 : index
    %15 = vector.load %arg1[%c0_16, %c0_17, %c129] : memref<1x32x139xbf16, #tpu.memory_space<vmem>>, vector<1x32x6xbf16>
    %16 = vector.shape_cast %15 : vector<1x32x6xbf16> to vector<32x6xbf16>
    %c160 = arith.constant 160 : index
    %c0_18 = arith.constant 0 : index
    %17 = vector.load %arg6[%c160, %c0_18] : memref<288x6xbf16, #tpu.memory_space<vmem>>, vector<32x6xbf16>
    tpu.vector_store %arg6[%c160, %c0_18], %16 {strides = array<i32>} : memref<288x6xbf16, #tpu.memory_space<vmem>>, vector<32x6xbf16>,
    %c0_19 = arith.constant 0 : index
    %c0_20 = arith.constant 0 : index
    %c131 = arith.constant 131 : index
    %18 = vector.load %arg1[%c0_19, %c0_20, %c131] : memref<1x32x139xbf16, #tpu.memory_space<vmem>>, vector<1x32x6xbf16>
    %19 = vector.shape_cast %18 : vector<1x32x6xbf16> to vector<32x6xbf16>
    %c192 = arith.constant 192 : index
    %c0_21 = arith.constant 0 : index
    %20 = vector.load %arg6[%c192, %c0_21] : memref<288x6xbf16, #tpu.memory_space<vmem>>, vector<32x6xbf16>
    tpu.vector_store %arg6[%c192, %c0_21], %19 {strides = array<i32>} : memref<288x6xbf16, #tpu.memory_space<vmem>>, vector<32x6xbf16>,
    %c0_22 = arith.constant 0 : index
    %c0_23 = arith.constant 0 : index
    %c132 = arith.constant 132 : index
    %21 = vector.load %arg1[%c0_22, %c0_23, %c132] : memref<1x32x139xbf16, #tpu.memory_space<vmem>>, vector<1x32x6xbf16>
    %22 = vector.shape_cast %21 : vector<1x32x6xbf16> to vector<32x6xbf16>
    %c224 = arith.constant 224 : index
    %c0_24 = arith.constant 0 : index
    %23 = vector.load %arg6[%c224, %c0_24] : memref<288x6xbf16, #tpu.memory_space<vmem>>, vector<32x6xbf16>
    tpu.vector_store %arg6[%c224, %c0_24], %22 {strides = array<i32>} : memref<288x6xbf16, #tpu.memory_space<vmem>>, vector<32x6xbf16>,
    %c0_25 = arith.constant 0 : index
    %c0_26 = arith.constant 0 : index
    %c133 = arith.constant 133 : index
    %24 = vector.load %arg1[%c0_25, %c0_26, %c133] : memref<1x32x139xbf16, #tpu.memory_space<vmem>>, vector<1x32x6xbf16>
    %25 = vector.shape_cast %24 : vector<1x32x6xbf16> to vector<32x6xbf16>
    %c256 = arith.constant 256 : index
    %c0_27 = arith.constant 0 : index
    %26 = vector.load %arg6[%c256, %c0_27] : memref<288x6xbf16, #tpu.memory_space<vmem>>, vector<32x6xbf16>
    tpu.vector_store %arg6[%c256, %c0_27], %25 {strides = array<i32>} : memref<288x6xbf16, #tpu.memory_space<vmem>>, vector<32x6xbf16>,
    %c0_28 = arith.constant 0 : index
    %c0_29 = arith.constant 0 : index
    %27 = vector.load %arg2[%c0_28, %c0_29] : memref<32x288xbf16, #tpu.memory_space<vmem>>, vector<32x288xbf16>
    %c0_30 = arith.constant 0 : index
    %c0_31 = arith.constant 0 : index
    %28 = vector.load %arg6[%c0_30, %c0_31] : memref<288x6xbf16, #tpu.memory_space<vmem>>, vector<288x6xbf16>
    %cst = arith.constant dense<0.000000e+00> : vector<32x6xf32>
    %29 = tpu.matmul %27, %28, %cst {dimension_numbers = #tpu.dot_dimension_numbers<[1], [0], [0], [1], [0, 0, 1, 1], [], []>} : vector<32x288xbf16>, vector<288x6xbf16>, vector<32x6xf32> -> vector<32x6xf32>
    %c0_32 = arith.constant 0 : index
    %c0_33 = arith.constant 0 : index
    %30 = vector.load %arg3[%c0_32, %c0_33] : memref<32x1xf32, #tpu.memory_space<vmem>>, vector<32x1xf32>
    %31 = vector.broadcast %30 : vector<32x1xf32> to vector<32x6xf32>
    %32 = arith.addf %29, %31 : vector<32x6xf32>
    %cst_34 = arith.constant 0.000000e+00 : f32
    %33 = vector.broadcast %cst_34 : f32 to vector<32x6xf32>
    %34 = arith.cmpf oge, %32, %33 : vector<32x6xf32>
    %cst_35 = arith.constant 2.000000e-01 : f32
    %35 = vector.broadcast %cst_35 : f32 to vector<32x6xf32>
    %36 = arith.mulf %35, %32 : vector<32x6xf32>
    %37 = arith.select %34, %32, %36 : vector<32x6xi1>, vector<32x6xf32>
    %c0_36 = arith.constant 0 : index
    %c0_37 = arith.constant 0 : index
    %38 = vector.load %arg4[%c0_36, %c0_37] : memref<1x6xf32, #tpu.memory_space<vmem>>, vector<1x6xf32>
    %39 = vector.broadcast %38 : vector<1x6xf32> to vector<32x6xf32>
    %40 = arith.mulf %37, %39 : vector<32x6xf32>
    %cst_38 = arith.constant 0.000000e+00 : bf16
    %41 = vector.broadcast %cst_38 : bf16 to vector<32x128xbf16>
    %c0_39 = arith.constant 0 : index
    %c0_40 = arith.constant 0 : index
    %c0_41 = arith.constant 0 : index
    %42 = vector.load %arg5[%c0_39, %c0_40, %c0_41] : memref<1x32x139xbf16, #tpu.memory_space<vmem>>, vector<1x32x128xbf16>
    %43 = vector.shape_cast %42 : vector<1x32x128xbf16> to vector<32x128xbf16>
    %44 = vector.shape_cast %41 : vector<32x128xbf16> to vector<1x32x128xbf16>
    tpu.vector_store %arg5[%c0_39, %c0_40, %c0_41], %44 {strides = array<i32>} : memref<1x32x139xbf16, #tpu.memory_space<vmem>>, vector<1x32x128xbf16>,
    %45 = arith.truncf %40 : vector<32x6xf32> to vector<32x6xbf16>
    %c0_42 = arith.constant 0 : index
    %c0_43 = arith.constant 0 : index
    %c128_44 = arith.constant 128 : index
    %46 = vector.load %arg5[%c0_42, %c0_43, %c128_44] : memref<1x32x139xbf16, #tpu.memory_space<vmem>>, vector<1x32x6xbf16>
    %47 = vector.shape_cast %46 : vector<1x32x6xbf16> to vector<32x6xbf16>
    %48 = vector.shape_cast %45 : vector<32x6xbf16> to vector<1x32x6xbf16>
    tpu.vector_store %arg5[%c0_42, %c0_43, %c128_44], %48 {strides = array<i32>} : memref<1x32x139xbf16, #tpu.memory_space<vmem>>, vector<1x32x6xbf16>,
    %cst_45 = arith.constant 0.000000e+00 : bf16
    %49 = vector.broadcast %cst_45 : bf16 to vector<32x5xbf16>
    %c0_46 = arith.constant 0 : index
    %c0_47 = arith.constant 0 : index
    %c134 = arith.constant 134 : index
    %50 = vector.load %arg5[%c0_46, %c0_47, %c134] : memref<1x32x139xbf16, #tpu.memory_space<vmem>>, vector<1x32x5xbf16>
    %51 = vector.shape_cast %50 : vector<1x32x5xbf16> to vector<32x5xbf16>
    %52 = vector.shape_cast %49 : vector<32x5xbf16> to vector<1x32x5xbf16>
    tpu.vector_store %arg5[%c0_46, %c0_47, %c134], %52 {strides = array<i32>} : memref<1x32x139xbf16, #tpu.memory_space<vmem>>, vector<1x32x5xbf16>,
    return
  }
  func.func @transform_0(%arg0: i32) -> (i32, i32, i32) {
    %c0_i32 = arith.constant 0 : i32
    %c0_i32_0 = arith.constant 0 : i32
    %c0_i32_1 = arith.constant 0 : i32
    return %arg0, %c0_i32, %c0_i32_0 : i32, i32, i32
  }
  func.func @transform_1(%arg0: i32) -> (i32, i32) {
    %c0_i32 = arith.constant 0 : i32
    %c0_i32_0 = arith.constant 0 : i32
    %c0_i32_1 = arith.constant 0 : i32
    return %c0_i32, %c0_i32_0 : i32, i32
  }
  func.func @transform_2(%arg0: i32) -> (i32, i32) {
    %c0_i32 = arith.constant 0 : i32
    %c0_i32_0 = arith.constant 0 : i32
    %c0_i32_1 = arith.constant 0 : i32
    return %c0_i32, %c0_i32_0 : i32, i32
  }
  func.func @transform_3(%arg0: i32) -> (i32, i32) {
    %c0_i32 = arith.constant 0 : i32
    %c0_i32_0 = arith.constant 0 : i32
    %c0_i32_1 = arith.constant 0 : i32
    return %c0_i32, %c0_i32_0 : i32, i32
  }
  func.func @transform_4(%arg0: i32) -> (i32, i32, i32) {
    %c0_i32 = arith.constant 0 : i32
    %c0_i32_0 = arith.constant 0 : i32
    %c0_i32_1 = arith.constant 0 : i32
    return %arg0, %c0_i32, %c0_i32_0 : i32, i32, i32
  }
}

module attributes {stable_mosaic.version = 11 : i64} {
  func.func @_conv3x3_kernel(%arg0: i32, %arg1: memref<1x32x133xbf16, #tpu.memory_space<vmem>>, %arg2: memref<32x288xbf16, #tpu.memory_space<vmem>>, %arg3: memref<32x1xf32, #tpu.memory_space<vmem>>, %arg4: memref<1x1xf32, #tpu.memory_space<vmem>>, %arg5: memref<1x32x133xbf16, #tpu.memory_space<vmem>>, %arg6: memref<288x1xbf16, #tpu.memory_space<vmem>>) attributes {dimension_semantics = [#tpu.dimension_semantics<parallel>], iteration_bounds = array<i64: 2>, scalar_prefetch = 0 : i64, scratch_operands = 1 : i64, tpu.core_type = #tpu.core_type<tc>, window_params = [{transform_indices = @transform_0, window_bounds = array<i64: 1, 32, 133>}, {pipeline_mode = #tpu.pipeline_mode<synchronous>, transform_indices = @transform_1, window_bounds = array<i64: 32, 288>}, {pipeline_mode = #tpu.pipeline_mode<synchronous>, transform_indices = @transform_2, window_bounds = array<i64: 32, 1>}, {pipeline_mode = #tpu.pipeline_mode<synchronous>, transform_indices = @transform_3, window_bounds = array<i64: 1, 1>}, {transform_indices = @transform_4, window_bounds = array<i64: 1, 32, 133>}]} {
    %c0 = arith.constant 0 : index
    %c0_0 = arith.constant 0 : index
    %c124 = arith.constant 124 : index
    %0 = vector.load %arg1[%c0, %c0_0, %c124] : memref<1x32x133xbf16, #tpu.memory_space<vmem>>, vector<1x32x1xbf16>
    %1 = vector.shape_cast %0 : vector<1x32x1xbf16> to vector<32x1xbf16>
    %c0_1 = arith.constant 0 : index
    %c0_2 = arith.constant 0 : index
    %2 = vector.load %arg6[%c0_1, %c0_2] : memref<288x1xbf16, #tpu.memory_space<vmem>>, vector<32x1xbf16>
    tpu.vector_store %arg6[%c0_1, %c0_2], %1 {strides = array<i32>} : memref<288x1xbf16, #tpu.memory_space<vmem>>, vector<32x1xbf16>,
    %c0_3 = arith.constant 0 : index
    %c0_4 = arith.constant 0 : index
    %c125 = arith.constant 125 : index
    %3 = vector.load %arg1[%c0_3, %c0_4, %c125] : memref<1x32x133xbf16, #tpu.memory_space<vmem>>, vector<1x32x1xbf16>
    %4 = vector.shape_cast %3 : vector<1x32x1xbf16> to vector<32x1xbf16>
    %c32 = arith.constant 32 : index
    %c0_5 = arith.constant 0 : index
    %5 = vector.load %arg6[%c32, %c0_5] : memref<288x1xbf16, #tpu.memory_space<vmem>>, vector<32x1xbf16>
    tpu.vector_store %arg6[%c32, %c0_5], %4 {strides = array<i32>} : memref<288x1xbf16, #tpu.memory_space<vmem>>, vector<32x1xbf16>,
    %c0_6 = arith.constant 0 : index
    %c0_7 = arith.constant 0 : index
    %c126 = arith.constant 126 : index
    %6 = vector.load %arg1[%c0_6, %c0_7, %c126] : memref<1x32x133xbf16, #tpu.memory_space<vmem>>, vector<1x32x1xbf16>
    %7 = vector.shape_cast %6 : vector<1x32x1xbf16> to vector<32x1xbf16>
    %c64 = arith.constant 64 : index
    %c0_8 = arith.constant 0 : index
    %8 = vector.load %arg6[%c64, %c0_8] : memref<288x1xbf16, #tpu.memory_space<vmem>>, vector<32x1xbf16>
    tpu.vector_store %arg6[%c64, %c0_8], %7 {strides = array<i32>} : memref<288x1xbf16, #tpu.memory_space<vmem>>, vector<32x1xbf16>,
    %c0_9 = arith.constant 0 : index
    %c0_10 = arith.constant 0 : index
    %c127 = arith.constant 127 : index
    %9 = vector.load %arg1[%c0_9, %c0_10, %c127] : memref<1x32x133xbf16, #tpu.memory_space<vmem>>, vector<1x32x1xbf16>
    %10 = vector.shape_cast %9 : vector<1x32x1xbf16> to vector<32x1xbf16>
    %c96 = arith.constant 96 : index
    %c0_11 = arith.constant 0 : index
    %11 = vector.load %arg6[%c96, %c0_11] : memref<288x1xbf16, #tpu.memory_space<vmem>>, vector<32x1xbf16>
    tpu.vector_store %arg6[%c96, %c0_11], %10 {strides = array<i32>} : memref<288x1xbf16, #tpu.memory_space<vmem>>, vector<32x1xbf16>,
    %c0_12 = arith.constant 0 : index
    %c0_13 = arith.constant 0 : index
    %c128 = arith.constant 128 : index
    %12 = vector.load %arg1[%c0_12, %c0_13, %c128] : memref<1x32x133xbf16, #tpu.memory_space<vmem>>, vector<1x32x1xbf16>
    %13 = vector.shape_cast %12 : vector<1x32x1xbf16> to vector<32x1xbf16>
    %c128_14 = arith.constant 128 : index
    %c0_15 = arith.constant 0 : index
    %14 = vector.load %arg6[%c128_14, %c0_15] : memref<288x1xbf16, #tpu.memory_space<vmem>>, vector<32x1xbf16>
    tpu.vector_store %arg6[%c128_14, %c0_15], %13 {strides = array<i32>} : memref<288x1xbf16, #tpu.memory_space<vmem>>, vector<32x1xbf16>,
    %c0_16 = arith.constant 0 : index
    %c0_17 = arith.constant 0 : index
    %c129 = arith.constant 129 : index
    %15 = vector.load %arg1[%c0_16, %c0_17, %c129] : memref<1x32x133xbf16, #tpu.memory_space<vmem>>, vector<1x32x1xbf16>
    %16 = vector.shape_cast %15 : vector<1x32x1xbf16> to vector<32x1xbf16>
    %c160 = arith.constant 160 : index
    %c0_18 = arith.constant 0 : index
    %17 = vector.load %arg6[%c160, %c0_18] : memref<288x1xbf16, #tpu.memory_space<vmem>>, vector<32x1xbf16>
    tpu.vector_store %arg6[%c160, %c0_18], %16 {strides = array<i32>} : memref<288x1xbf16, #tpu.memory_space<vmem>>, vector<32x1xbf16>,
    %c0_19 = arith.constant 0 : index
    %c0_20 = arith.constant 0 : index
    %c130 = arith.constant 130 : index
    %18 = vector.load %arg1[%c0_19, %c0_20, %c130] : memref<1x32x133xbf16, #tpu.memory_space<vmem>>, vector<1x32x1xbf16>
    %19 = vector.shape_cast %18 : vector<1x32x1xbf16> to vector<32x1xbf16>
    %c192 = arith.constant 192 : index
    %c0_21 = arith.constant 0 : index
    %20 = vector.load %arg6[%c192, %c0_21] : memref<288x1xbf16, #tpu.memory_space<vmem>>, vector<32x1xbf16>
    tpu.vector_store %arg6[%c192, %c0_21], %19 {strides = array<i32>} : memref<288x1xbf16, #tpu.memory_space<vmem>>, vector<32x1xbf16>,
    %c0_22 = arith.constant 0 : index
    %c0_23 = arith.constant 0 : index
    %c131 = arith.constant 131 : index
    %21 = vector.load %arg1[%c0_22, %c0_23, %c131] : memref<1x32x133xbf16, #tpu.memory_space<vmem>>, vector<1x32x1xbf16>
    %22 = vector.shape_cast %21 : vector<1x32x1xbf16> to vector<32x1xbf16>
    %c224 = arith.constant 224 : index
    %c0_24 = arith.constant 0 : index
    %23 = vector.load %arg6[%c224, %c0_24] : memref<288x1xbf16, #tpu.memory_space<vmem>>, vector<32x1xbf16>
    tpu.vector_store %arg6[%c224, %c0_24], %22 {strides = array<i32>} : memref<288x1xbf16, #tpu.memory_space<vmem>>, vector<32x1xbf16>,
    %c0_25 = arith.constant 0 : index
    %c0_26 = arith.constant 0 : index
    %c132 = arith.constant 132 : index
    %24 = vector.load %arg1[%c0_25, %c0_26, %c132] : memref<1x32x133xbf16, #tpu.memory_space<vmem>>, vector<1x32x1xbf16>
    %25 = vector.shape_cast %24 : vector<1x32x1xbf16> to vector<32x1xbf16>
    %c256 = arith.constant 256 : index
    %c0_27 = arith.constant 0 : index
    %26 = vector.load %arg6[%c256, %c0_27] : memref<288x1xbf16, #tpu.memory_space<vmem>>, vector<32x1xbf16>
    tpu.vector_store %arg6[%c256, %c0_27], %25 {strides = array<i32>} : memref<288x1xbf16, #tpu.memory_space<vmem>>, vector<32x1xbf16>,
    %c0_28 = arith.constant 0 : index
    %c0_29 = arith.constant 0 : index
    %27 = vector.load %arg2[%c0_28, %c0_29] : memref<32x288xbf16, #tpu.memory_space<vmem>>, vector<32x288xbf16>
    %c0_30 = arith.constant 0 : index
    %c0_31 = arith.constant 0 : index
    %28 = vector.load %arg6[%c0_30, %c0_31] : memref<288x1xbf16, #tpu.memory_space<vmem>>, vector<288x1xbf16>
    %cst = arith.constant dense<0.000000e+00> : vector<32x1xf32>
    %29 = tpu.matmul %27, %28, %cst {dimension_numbers = #tpu.dot_dimension_numbers<[1], [0], [0], [1], [0, 0, 1, 1], [], []>} : vector<32x288xbf16>, vector<288x1xbf16>, vector<32x1xf32> -> vector<32x1xf32>
    %c0_32 = arith.constant 0 : index
    %c0_33 = arith.constant 0 : index
    %30 = vector.load %arg3[%c0_32, %c0_33] : memref<32x1xf32, #tpu.memory_space<vmem>>, vector<32x1xf32>
    %31 = arith.addf %29, %30 : vector<32x1xf32>
    %cst_34 = arith.constant 0.000000e+00 : f32
    %32 = vector.broadcast %cst_34 : f32 to vector<32x1xf32>
    %33 = arith.cmpf oge, %31, %32 : vector<32x1xf32>
    %cst_35 = arith.constant 2.000000e-01 : f32
    %34 = vector.broadcast %cst_35 : f32 to vector<32x1xf32>
    %35 = arith.mulf %34, %31 : vector<32x1xf32>
    %36 = arith.select %33, %31, %35 : vector<32x1xi1>, vector<32x1xf32>
    %c0_36 = arith.constant 0 : index
    %c0_37 = arith.constant 0 : index
    %37 = vector.load %arg4[%c0_36, %c0_37] : memref<1x1xf32, #tpu.memory_space<vmem>>, vector<1x1xf32>
    %38 = vector.broadcast %37 : vector<1x1xf32> to vector<32x1xf32>
    %39 = arith.mulf %36, %38 : vector<32x1xf32>
    %cst_38 = arith.constant 0.000000e+00 : bf16
    %40 = vector.broadcast %cst_38 : bf16 to vector<32x128xbf16>
    %c0_39 = arith.constant 0 : index
    %c0_40 = arith.constant 0 : index
    %c0_41 = arith.constant 0 : index
    %41 = vector.load %arg5[%c0_39, %c0_40, %c0_41] : memref<1x32x133xbf16, #tpu.memory_space<vmem>>, vector<1x32x128xbf16>
    %42 = vector.shape_cast %41 : vector<1x32x128xbf16> to vector<32x128xbf16>
    %43 = vector.shape_cast %40 : vector<32x128xbf16> to vector<1x32x128xbf16>
    tpu.vector_store %arg5[%c0_39, %c0_40, %c0_41], %43 {strides = array<i32>} : memref<1x32x133xbf16, #tpu.memory_space<vmem>>, vector<1x32x128xbf16>,
    %44 = arith.truncf %39 : vector<32x1xf32> to vector<32x1xbf16>
    %c0_42 = arith.constant 0 : index
    %c0_43 = arith.constant 0 : index
    %c128_44 = arith.constant 128 : index
    %45 = vector.load %arg5[%c0_42, %c0_43, %c128_44] : memref<1x32x133xbf16, #tpu.memory_space<vmem>>, vector<1x32x1xbf16>
    %46 = vector.shape_cast %45 : vector<1x32x1xbf16> to vector<32x1xbf16>
    %47 = vector.shape_cast %44 : vector<32x1xbf16> to vector<1x32x1xbf16>
    tpu.vector_store %arg5[%c0_42, %c0_43, %c128_44], %47 {strides = array<i32>} : memref<1x32x133xbf16, #tpu.memory_space<vmem>>, vector<1x32x1xbf16>,
    %cst_45 = arith.constant 0.000000e+00 : bf16
    %48 = vector.broadcast %cst_45 : bf16 to vector<32x4xbf16>
    %c0_46 = arith.constant 0 : index
    %c0_47 = arith.constant 0 : index
    %c129_48 = arith.constant 129 : index
    %49 = vector.load %arg5[%c0_46, %c0_47, %c129_48] : memref<1x32x133xbf16, #tpu.memory_space<vmem>>, vector<1x32x4xbf16>
    %50 = vector.shape_cast %49 : vector<1x32x4xbf16> to vector<32x4xbf16>
    %51 = vector.shape_cast %48 : vector<32x4xbf16> to vector<1x32x4xbf16>
    tpu.vector_store %arg5[%c0_46, %c0_47, %c129_48], %51 {strides = array<i32>} : memref<1x32x133xbf16, #tpu.memory_space<vmem>>, vector<1x32x4xbf16>,
    return
  }
  func.func @transform_0(%arg0: i32) -> (i32, i32, i32) {
    %c0_i32 = arith.constant 0 : i32
    %c0_i32_0 = arith.constant 0 : i32
    %c0_i32_1 = arith.constant 0 : i32
    return %arg0, %c0_i32, %c0_i32_0 : i32, i32, i32
  }
  func.func @transform_1(%arg0: i32) -> (i32, i32) {
    %c0_i32 = arith.constant 0 : i32
    %c0_i32_0 = arith.constant 0 : i32
    %c0_i32_1 = arith.constant 0 : i32
    return %c0_i32, %c0_i32_0 : i32, i32
  }
  func.func @transform_2(%arg0: i32) -> (i32, i32) {
    %c0_i32 = arith.constant 0 : i32
    %c0_i32_0 = arith.constant 0 : i32
    %c0_i32_1 = arith.constant 0 : i32
    return %c0_i32, %c0_i32_0 : i32, i32
  }
  func.func @transform_3(%arg0: i32) -> (i32, i32) {
    %c0_i32 = arith.constant 0 : i32
    %c0_i32_0 = arith.constant 0 : i32
    %c0_i32_1 = arith.constant 0 : i32
    return %c0_i32, %c0_i32_0 : i32, i32
  }
  func.func @transform_4(%arg0: i32) -> (i32, i32, i32) {
    %c0_i32 = arith.constant 0 : i32
    %c0_i32_0 = arith.constant 0 : i32
    %c0_i32_1 = arith.constant 0 : i32
    return %arg0, %c0_i32, %c0_i32_0 : i32, i32, i32
  }
}

module attributes {stable_mosaic.version = 11 : i64} {
  func.func @_conv3x3_kernel(%arg0: i32, %arg1: memref<1x32x139xbf16, #tpu.memory_space<vmem>>, %arg2: memref<1x32x139xbf16, #tpu.memory_space<vmem>>, %arg3: memref<32x576xbf16, #tpu.memory_space<vmem>>, %arg4: memref<32x1xf32, #tpu.memory_space<vmem>>, %arg5: memref<1x6xf32, #tpu.memory_space<vmem>>, %arg6: memref<1x32x139xbf16, #tpu.memory_space<vmem>>, %arg7: memref<576x6xbf16, #tpu.memory_space<vmem>>) attributes {dimension_semantics = [#tpu.dimension_semantics<parallel>], iteration_bounds = array<i64: 2>, scalar_prefetch = 0 : i64, scratch_operands = 1 : i64, tpu.core_type = #tpu.core_type<tc>, window_params = [{transform_indices = @transform_0, window_bounds = array<i64: 1, 32, 139>}, {transform_indices = @transform_1, window_bounds = array<i64: 1, 32, 139>}, {pipeline_mode = #tpu.pipeline_mode<synchronous>, transform_indices = @transform_2, window_bounds = array<i64: 32, 576>}, {pipeline_mode = #tpu.pipeline_mode<synchronous>, transform_indices = @transform_3, window_bounds = array<i64: 32, 1>}, {pipeline_mode = #tpu.pipeline_mode<synchronous>, transform_indices = @transform_4, window_bounds = array<i64: 1, 6>}, {transform_indices = @transform_5, window_bounds = array<i64: 1, 32, 139>}]} {
    %c0 = arith.constant 0 : index
    %c0_0 = arith.constant 0 : index
    %c123 = arith.constant 123 : index
    %0 = vector.load %arg1[%c0, %c0_0, %c123] : memref<1x32x139xbf16, #tpu.memory_space<vmem>>, vector<1x32x6xbf16>
    %1 = vector.shape_cast %0 : vector<1x32x6xbf16> to vector<32x6xbf16>
    %c0_1 = arith.constant 0 : index
    %c0_2 = arith.constant 0 : index
    %2 = vector.load %arg7[%c0_1, %c0_2] : memref<576x6xbf16, #tpu.memory_space<vmem>>, vector<32x6xbf16>
    tpu.vector_store %arg7[%c0_1, %c0_2], %1 {strides = array<i32>} : memref<576x6xbf16, #tpu.memory_space<vmem>>, vector<32x6xbf16>,
    %c0_3 = arith.constant 0 : index
    %c0_4 = arith.constant 0 : index
    %c124 = arith.constant 124 : index
    %3 = vector.load %arg1[%c0_3, %c0_4, %c124] : memref<1x32x139xbf16, #tpu.memory_space<vmem>>, vector<1x32x6xbf16>
    %4 = vector.shape_cast %3 : vector<1x32x6xbf16> to vector<32x6xbf16>
    %c32 = arith.constant 32 : index
    %c0_5 = arith.constant 0 : index
    %5 = vector.load %arg7[%c32, %c0_5] : memref<576x6xbf16, #tpu.memory_space<vmem>>, vector<32x6xbf16>
    tpu.vector_store %arg7[%c32, %c0_5], %4 {strides = array<i32>} : memref<576x6xbf16, #tpu.memory_space<vmem>>, vector<32x6xbf16>,
    %c0_6 = arith.constant 0 : index
    %c0_7 = arith.constant 0 : index
    %c125 = arith.constant 125 : index
    %6 = vector.load %arg1[%c0_6, %c0_7, %c125] : memref<1x32x139xbf16, #tpu.memory_space<vmem>>, vector<1x32x6xbf16>
    %7 = vector.shape_cast %6 : vector<1x32x6xbf16> to vector<32x6xbf16>
    %c64 = arith.constant 64 : index
    %c0_8 = arith.constant 0 : index
    %8 = vector.load %arg7[%c64, %c0_8] : memref<576x6xbf16, #tpu.memory_space<vmem>>, vector<32x6xbf16>
    tpu.vector_store %arg7[%c64, %c0_8], %7 {strides = array<i32>} : memref<576x6xbf16, #tpu.memory_space<vmem>>, vector<32x6xbf16>,
    %c0_9 = arith.constant 0 : index
    %c0_10 = arith.constant 0 : index
    %c127 = arith.constant 127 : index
    %9 = vector.load %arg1[%c0_9, %c0_10, %c127] : memref<1x32x139xbf16, #tpu.memory_space<vmem>>, vector<1x32x6xbf16>
    %10 = vector.shape_cast %9 : vector<1x32x6xbf16> to vector<32x6xbf16>
    %c96 = arith.constant 96 : index
    %c0_11 = arith.constant 0 : index
    %11 = vector.load %arg7[%c96, %c0_11] : memref<576x6xbf16, #tpu.memory_space<vmem>>, vector<32x6xbf16>
    tpu.vector_store %arg7[%c96, %c0_11], %10 {strides = array<i32>} : memref<576x6xbf16, #tpu.memory_space<vmem>>, vector<32x6xbf16>,
    %c0_12 = arith.constant 0 : index
    %c0_13 = arith.constant 0 : index
    %c128 = arith.constant 128 : index
    %12 = vector.load %arg1[%c0_12, %c0_13, %c128] : memref<1x32x139xbf16, #tpu.memory_space<vmem>>, vector<1x32x6xbf16>
    %13 = vector.shape_cast %12 : vector<1x32x6xbf16> to vector<32x6xbf16>
    %c128_14 = arith.constant 128 : index
    %c0_15 = arith.constant 0 : index
    %14 = vector.load %arg7[%c128_14, %c0_15] : memref<576x6xbf16, #tpu.memory_space<vmem>>, vector<32x6xbf16>
    tpu.vector_store %arg7[%c128_14, %c0_15], %13 {strides = array<i32>} : memref<576x6xbf16, #tpu.memory_space<vmem>>, vector<32x6xbf16>,
    %c0_16 = arith.constant 0 : index
    %c0_17 = arith.constant 0 : index
    %c129 = arith.constant 129 : index
    %15 = vector.load %arg1[%c0_16, %c0_17, %c129] : memref<1x32x139xbf16, #tpu.memory_space<vmem>>, vector<1x32x6xbf16>
    %16 = vector.shape_cast %15 : vector<1x32x6xbf16> to vector<32x6xbf16>
    %c160 = arith.constant 160 : index
    %c0_18 = arith.constant 0 : index
    %17 = vector.load %arg7[%c160, %c0_18] : memref<576x6xbf16, #tpu.memory_space<vmem>>, vector<32x6xbf16>
    tpu.vector_store %arg7[%c160, %c0_18], %16 {strides = array<i32>} : memref<576x6xbf16, #tpu.memory_space<vmem>>, vector<32x6xbf16>,
    %c0_19 = arith.constant 0 : index
    %c0_20 = arith.constant 0 : index
    %c131 = arith.constant 131 : index
    %18 = vector.load %arg1[%c0_19, %c0_20, %c131] : memref<1x32x139xbf16, #tpu.memory_space<vmem>>, vector<1x32x6xbf16>
    %19 = vector.shape_cast %18 : vector<1x32x6xbf16> to vector<32x6xbf16>
    %c192 = arith.constant 192 : index
    %c0_21 = arith.constant 0 : index
    %20 = vector.load %arg7[%c192, %c0_21] : memref<576x6xbf16, #tpu.memory_space<vmem>>, vector<32x6xbf16>
    tpu.vector_store %arg7[%c192, %c0_21], %19 {strides = array<i32>} : memref<576x6xbf16, #tpu.memory_space<vmem>>, vector<32x6xbf16>,
    %c0_22 = arith.constant 0 : index
    %c0_23 = arith.constant 0 : index
    %c132 = arith.constant 132 : index
    %21 = vector.load %arg1[%c0_22, %c0_23, %c132] : memref<1x32x139xbf16, #tpu.memory_space<vmem>>, vector<1x32x6xbf16>
    %22 = vector.shape_cast %21 : vector<1x32x6xbf16> to vector<32x6xbf16>
    %c224 = arith.constant 224 : index
    %c0_24 = arith.constant 0 : index
    %23 = vector.load %arg7[%c224, %c0_24] : memref<576x6xbf16, #tpu.memory_space<vmem>>, vector<32x6xbf16>
    tpu.vector_store %arg7[%c224, %c0_24], %22 {strides = array<i32>} : memref<576x6xbf16, #tpu.memory_space<vmem>>, vector<32x6xbf16>,
    %c0_25 = arith.constant 0 : index
    %c0_26 = arith.constant 0 : index
    %c133 = arith.constant 133 : index
    %24 = vector.load %arg1[%c0_25, %c0_26, %c133] : memref<1x32x139xbf16, #tpu.memory_space<vmem>>, vector<1x32x6xbf16>
    %25 = vector.shape_cast %24 : vector<1x32x6xbf16> to vector<32x6xbf16>
    %c256 = arith.constant 256 : index
    %c0_27 = arith.constant 0 : index
    %26 = vector.load %arg7[%c256, %c0_27] : memref<576x6xbf16, #tpu.memory_space<vmem>>, vector<32x6xbf16>
    tpu.vector_store %arg7[%c256, %c0_27], %25 {strides = array<i32>} : memref<576x6xbf16, #tpu.memory_space<vmem>>, vector<32x6xbf16>,
    %c0_28 = arith.constant 0 : index
    %c0_29 = arith.constant 0 : index
    %c123_30 = arith.constant 123 : index
    %27 = vector.load %arg2[%c0_28, %c0_29, %c123_30] : memref<1x32x139xbf16, #tpu.memory_space<vmem>>, vector<1x32x6xbf16>
    %28 = vector.shape_cast %27 : vector<1x32x6xbf16> to vector<32x6xbf16>
    %c288 = arith.constant 288 : index
    %c0_31 = arith.constant 0 : index
    %29 = vector.load %arg7[%c288, %c0_31] : memref<576x6xbf16, #tpu.memory_space<vmem>>, vector<32x6xbf16>
    tpu.vector_store %arg7[%c288, %c0_31], %28 {strides = array<i32>} : memref<576x6xbf16, #tpu.memory_space<vmem>>, vector<32x6xbf16>,
    %c0_32 = arith.constant 0 : index
    %c0_33 = arith.constant 0 : index
    %c124_34 = arith.constant 124 : index
    %30 = vector.load %arg2[%c0_32, %c0_33, %c124_34] : memref<1x32x139xbf16, #tpu.memory_space<vmem>>, vector<1x32x6xbf16>
    %31 = vector.shape_cast %30 : vector<1x32x6xbf16> to vector<32x6xbf16>
    %c320 = arith.constant 320 : index
    %c0_35 = arith.constant 0 : index
    %32 = vector.load %arg7[%c320, %c0_35] : memref<576x6xbf16, #tpu.memory_space<vmem>>, vector<32x6xbf16>
    tpu.vector_store %arg7[%c320, %c0_35], %31 {strides = array<i32>} : memref<576x6xbf16, #tpu.memory_space<vmem>>, vector<32x6xbf16>,
    %c0_36 = arith.constant 0 : index
    %c0_37 = arith.constant 0 : index
    %c125_38 = arith.constant 125 : index
    %33 = vector.load %arg2[%c0_36, %c0_37, %c125_38] : memref<1x32x139xbf16, #tpu.memory_space<vmem>>, vector<1x32x6xbf16>
    %34 = vector.shape_cast %33 : vector<1x32x6xbf16> to vector<32x6xbf16>
    %c352 = arith.constant 352 : index
    %c0_39 = arith.constant 0 : index
    %35 = vector.load %arg7[%c352, %c0_39] : memref<576x6xbf16, #tpu.memory_space<vmem>>, vector<32x6xbf16>
    tpu.vector_store %arg7[%c352, %c0_39], %34 {strides = array<i32>} : memref<576x6xbf16, #tpu.memory_space<vmem>>, vector<32x6xbf16>,
    %c0_40 = arith.constant 0 : index
    %c0_41 = arith.constant 0 : index
    %c127_42 = arith.constant 127 : index
    %36 = vector.load %arg2[%c0_40, %c0_41, %c127_42] : memref<1x32x139xbf16, #tpu.memory_space<vmem>>, vector<1x32x6xbf16>
    %37 = vector.shape_cast %36 : vector<1x32x6xbf16> to vector<32x6xbf16>
    %c384 = arith.constant 384 : index
    %c0_43 = arith.constant 0 : index
    %38 = vector.load %arg7[%c384, %c0_43] : memref<576x6xbf16, #tpu.memory_space<vmem>>, vector<32x6xbf16>
    tpu.vector_store %arg7[%c384, %c0_43], %37 {strides = array<i32>} : memref<576x6xbf16, #tpu.memory_space<vmem>>, vector<32x6xbf16>,
    %c0_44 = arith.constant 0 : index
    %c0_45 = arith.constant 0 : index
    %c128_46 = arith.constant 128 : index
    %39 = vector.load %arg2[%c0_44, %c0_45, %c128_46] : memref<1x32x139xbf16, #tpu.memory_space<vmem>>, vector<1x32x6xbf16>
    %40 = vector.shape_cast %39 : vector<1x32x6xbf16> to vector<32x6xbf16>
    %c416 = arith.constant 416 : index
    %c0_47 = arith.constant 0 : index
    %41 = vector.load %arg7[%c416, %c0_47] : memref<576x6xbf16, #tpu.memory_space<vmem>>, vector<32x6xbf16>
    tpu.vector_store %arg7[%c416, %c0_47], %40 {strides = array<i32>} : memref<576x6xbf16, #tpu.memory_space<vmem>>, vector<32x6xbf16>,
    %c0_48 = arith.constant 0 : index
    %c0_49 = arith.constant 0 : index
    %c129_50 = arith.constant 129 : index
    %42 = vector.load %arg2[%c0_48, %c0_49, %c129_50] : memref<1x32x139xbf16, #tpu.memory_space<vmem>>, vector<1x32x6xbf16>
    %43 = vector.shape_cast %42 : vector<1x32x6xbf16> to vector<32x6xbf16>
    %c448 = arith.constant 448 : index
    %c0_51 = arith.constant 0 : index
    %44 = vector.load %arg7[%c448, %c0_51] : memref<576x6xbf16, #tpu.memory_space<vmem>>, vector<32x6xbf16>
    tpu.vector_store %arg7[%c448, %c0_51], %43 {strides = array<i32>} : memref<576x6xbf16, #tpu.memory_space<vmem>>, vector<32x6xbf16>,
    %c0_52 = arith.constant 0 : index
    %c0_53 = arith.constant 0 : index
    %c131_54 = arith.constant 131 : index
    %45 = vector.load %arg2[%c0_52, %c0_53, %c131_54] : memref<1x32x139xbf16, #tpu.memory_space<vmem>>, vector<1x32x6xbf16>
    %46 = vector.shape_cast %45 : vector<1x32x6xbf16> to vector<32x6xbf16>
    %c480 = arith.constant 480 : index
    %c0_55 = arith.constant 0 : index
    %47 = vector.load %arg7[%c480, %c0_55] : memref<576x6xbf16, #tpu.memory_space<vmem>>, vector<32x6xbf16>
    tpu.vector_store %arg7[%c480, %c0_55], %46 {strides = array<i32>} : memref<576x6xbf16, #tpu.memory_space<vmem>>, vector<32x6xbf16>,
    %c0_56 = arith.constant 0 : index
    %c0_57 = arith.constant 0 : index
    %c132_58 = arith.constant 132 : index
    %48 = vector.load %arg2[%c0_56, %c0_57, %c132_58] : memref<1x32x139xbf16, #tpu.memory_space<vmem>>, vector<1x32x6xbf16>
    %49 = vector.shape_cast %48 : vector<1x32x6xbf16> to vector<32x6xbf16>
    %c512 = arith.constant 512 : index
    %c0_59 = arith.constant 0 : index
    %50 = vector.load %arg7[%c512, %c0_59] : memref<576x6xbf16, #tpu.memory_space<vmem>>, vector<32x6xbf16>
    tpu.vector_store %arg7[%c512, %c0_59], %49 {strides = array<i32>} : memref<576x6xbf16, #tpu.memory_space<vmem>>, vector<32x6xbf16>,
    %c0_60 = arith.constant 0 : index
    %c0_61 = arith.constant 0 : index
    %c133_62 = arith.constant 133 : index
    %51 = vector.load %arg2[%c0_60, %c0_61, %c133_62] : memref<1x32x139xbf16, #tpu.memory_space<vmem>>, vector<1x32x6xbf16>
    %52 = vector.shape_cast %51 : vector<1x32x6xbf16> to vector<32x6xbf16>
    %c544 = arith.constant 544 : index
    %c0_63 = arith.constant 0 : index
    %53 = vector.load %arg7[%c544, %c0_63] : memref<576x6xbf16, #tpu.memory_space<vmem>>, vector<32x6xbf16>
    tpu.vector_store %arg7[%c544, %c0_63], %52 {strides = array<i32>} : memref<576x6xbf16, #tpu.memory_space<vmem>>, vector<32x6xbf16>,
    %c0_64 = arith.constant 0 : index
    %c0_65 = arith.constant 0 : index
    %54 = vector.load %arg3[%c0_64, %c0_65] : memref<32x576xbf16, #tpu.memory_space<vmem>>, vector<32x576xbf16>
    %c0_66 = arith.constant 0 : index
    %c0_67 = arith.constant 0 : index
    %55 = vector.load %arg7[%c0_66, %c0_67] : memref<576x6xbf16, #tpu.memory_space<vmem>>, vector<576x6xbf16>
    %cst = arith.constant dense<0.000000e+00> : vector<32x6xf32>
    %56 = tpu.matmul %54, %55, %cst {dimension_numbers = #tpu.dot_dimension_numbers<[1], [0], [0], [1], [0, 0, 1, 1], [], []>} : vector<32x576xbf16>, vector<576x6xbf16>, vector<32x6xf32> -> vector<32x6xf32>
    %c0_68 = arith.constant 0 : index
    %c0_69 = arith.constant 0 : index
    %57 = vector.load %arg4[%c0_68, %c0_69] : memref<32x1xf32, #tpu.memory_space<vmem>>, vector<32x1xf32>
    %58 = vector.broadcast %57 : vector<32x1xf32> to vector<32x6xf32>
    %59 = arith.addf %56, %58 : vector<32x6xf32>
    %cst_70 = arith.constant 0.000000e+00 : f32
    %60 = vector.broadcast %cst_70 : f32 to vector<32x6xf32>
    %61 = arith.cmpf oge, %59, %60 : vector<32x6xf32>
    %cst_71 = arith.constant 2.000000e-01 : f32
    %62 = vector.broadcast %cst_71 : f32 to vector<32x6xf32>
    %63 = arith.mulf %62, %59 : vector<32x6xf32>
    %64 = arith.select %61, %59, %63 : vector<32x6xi1>, vector<32x6xf32>
    %c0_72 = arith.constant 0 : index
    %c0_73 = arith.constant 0 : index
    %65 = vector.load %arg5[%c0_72, %c0_73] : memref<1x6xf32, #tpu.memory_space<vmem>>, vector<1x6xf32>
    %66 = vector.broadcast %65 : vector<1x6xf32> to vector<32x6xf32>
    %67 = arith.mulf %64, %66 : vector<32x6xf32>
    %cst_74 = arith.constant 0.000000e+00 : bf16
    %68 = vector.broadcast %cst_74 : bf16 to vector<32x128xbf16>
    %c0_75 = arith.constant 0 : index
    %c0_76 = arith.constant 0 : index
    %c0_77 = arith.constant 0 : index
    %69 = vector.load %arg6[%c0_75, %c0_76, %c0_77] : memref<1x32x139xbf16, #tpu.memory_space<vmem>>, vector<1x32x128xbf16>
    %70 = vector.shape_cast %69 : vector<1x32x128xbf16> to vector<32x128xbf16>
    %71 = vector.shape_cast %68 : vector<32x128xbf16> to vector<1x32x128xbf16>
    tpu.vector_store %arg6[%c0_75, %c0_76, %c0_77], %71 {strides = array<i32>} : memref<1x32x139xbf16, #tpu.memory_space<vmem>>, vector<1x32x128xbf16>,
    %72 = arith.truncf %67 : vector<32x6xf32> to vector<32x6xbf16>
    %c0_78 = arith.constant 0 : index
    %c0_79 = arith.constant 0 : index
    %c128_80 = arith.constant 128 : index
    %73 = vector.load %arg6[%c0_78, %c0_79, %c128_80] : memref<1x32x139xbf16, #tpu.memory_space<vmem>>, vector<1x32x6xbf16>
    %74 = vector.shape_cast %73 : vector<1x32x6xbf16> to vector<32x6xbf16>
    %75 = vector.shape_cast %72 : vector<32x6xbf16> to vector<1x32x6xbf16>
    tpu.vector_store %arg6[%c0_78, %c0_79, %c128_80], %75 {strides = array<i32>} : memref<1x32x139xbf16, #tpu.memory_space<vmem>>, vector<1x32x6xbf16>,
    %cst_81 = arith.constant 0.000000e+00 : bf16
    %76 = vector.broadcast %cst_81 : bf16 to vector<32x5xbf16>
    %c0_82 = arith.constant 0 : index
    %c0_83 = arith.constant 0 : index
    %c134 = arith.constant 134 : index
    %77 = vector.load %arg6[%c0_82, %c0_83, %c134] : memref<1x32x139xbf16, #tpu.memory_space<vmem>>, vector<1x32x5xbf16>
    %78 = vector.shape_cast %77 : vector<1x32x5xbf16> to vector<32x5xbf16>
    %79 = vector.shape_cast %76 : vector<32x5xbf16> to vector<1x32x5xbf16>
    tpu.vector_store %arg6[%c0_82, %c0_83, %c134], %79 {strides = array<i32>} : memref<1x32x139xbf16, #tpu.memory_space<vmem>>, vector<1x32x5xbf16>,
    return
  }
  func.func @transform_0(%arg0: i32) -> (i32, i32, i32) {
    %c0_i32 = arith.constant 0 : i32
    %c0_i32_0 = arith.constant 0 : i32
    %c0_i32_1 = arith.constant 0 : i32
    return %arg0, %c0_i32, %c0_i32_0 : i32, i32, i32
  }
  func.func @transform_1(%arg0: i32) -> (i32, i32, i32) {
    %c0_i32 = arith.constant 0 : i32
    %c0_i32_0 = arith.constant 0 : i32
    %c0_i32_1 = arith.constant 0 : i32
    return %arg0, %c0_i32, %c0_i32_0 : i32, i32, i32
  }
  func.func @transform_2(%arg0: i32) -> (i32, i32) {
    %c0_i32 = arith.constant 0 : i32
    %c0_i32_0 = arith.constant 0 : i32
    %c0_i32_1 = arith.constant 0 : i32
    return %c0_i32, %c0_i32_0 : i32, i32
  }
  func.func @transform_3(%arg0: i32) -> (i32, i32) {
    %c0_i32 = arith.constant 0 : i32
    %c0_i32_0 = arith.constant 0 : i32
    %c0_i32_1 = arith.constant 0 : i32
    return %c0_i32, %c0_i32_0 : i32, i32
  }
  func.func @transform_4(%arg0: i32) -> (i32, i32) {
    %c0_i32 = arith.constant 0 : i32
    %c0_i32_0 = arith.constant 0 : i32
    %c0_i32_1 = arith.constant 0 : i32
    return %c0_i32, %c0_i32_0 : i32, i32
  }
  func.func @transform_5(%arg0: i32) -> (i32, i32, i32) {
    %c0_i32 = arith.constant 0 : i32
    %c0_i32_0 = arith.constant 0 : i32
    %c0_i32_1 = arith.constant 0 : i32
    return %arg0, %c0_i32, %c0_i32_0 : i32, i32, i32
  }
}

module attributes {stable_mosaic.version = 11 : i64} {
  func.func @_conv3x3_kernel(%arg0: i32, %arg1: memref<1x32x157xbf16, #tpu.memory_space<vmem>>, %arg2: memref<1x32x157xbf16, #tpu.memory_space<vmem>>, %arg3: memref<32x576xbf16, #tpu.memory_space<vmem>>, %arg4: memref<32x1xf32, #tpu.memory_space<vmem>>, %arg5: memref<1x22xf32, #tpu.memory_space<vmem>>, %arg6: memref<1x32x157xbf16, #tpu.memory_space<vmem>>, %arg7: memref<576x22xbf16, #tpu.memory_space<vmem>>) attributes {dimension_semantics = [#tpu.dimension_semantics<parallel>], iteration_bounds = array<i64: 2>, scalar_prefetch = 0 : i64, scratch_operands = 1 : i64, tpu.core_type = #tpu.core_type<tc>, window_params = [{transform_indices = @transform_0, window_bounds = array<i64: 1, 32, 157>}, {transform_indices = @transform_1, window_bounds = array<i64: 1, 32, 157>}, {pipeline_mode = #tpu.pipeline_mode<synchronous>, transform_indices = @transform_2, window_bounds = array<i64: 32, 576>}, {pipeline_mode = #tpu.pipeline_mode<synchronous>, transform_indices = @transform_3, window_bounds = array<i64: 32, 1>}, {pipeline_mode = #tpu.pipeline_mode<synchronous>, transform_indices = @transform_4, window_bounds = array<i64: 1, 22>}, {transform_indices = @transform_5, window_bounds = array<i64: 1, 32, 157>}]} {
    %c0 = arith.constant 0 : index
    %c0_0 = arith.constant 0 : index
    %c121 = arith.constant 121 : index
    %0 = vector.load %arg1[%c0, %c0_0, %c121] : memref<1x32x157xbf16, #tpu.memory_space<vmem>>, vector<1x32x22xbf16>
    %1 = vector.shape_cast %0 : vector<1x32x22xbf16> to vector<32x22xbf16>
    %c0_1 = arith.constant 0 : index
    %c0_2 = arith.constant 0 : index
    %2 = vector.load %arg7[%c0_1, %c0_2] : memref<576x22xbf16, #tpu.memory_space<vmem>>, vector<32x22xbf16>
    tpu.vector_store %arg7[%c0_1, %c0_2], %1 {strides = array<i32>} : memref<576x22xbf16, #tpu.memory_space<vmem>>, vector<32x22xbf16>,
    %c0_3 = arith.constant 0 : index
    %c0_4 = arith.constant 0 : index
    %c122 = arith.constant 122 : index
    %3 = vector.load %arg1[%c0_3, %c0_4, %c122] : memref<1x32x157xbf16, #tpu.memory_space<vmem>>, vector<1x32x22xbf16>
    %4 = vector.shape_cast %3 : vector<1x32x22xbf16> to vector<32x22xbf16>
    %c32 = arith.constant 32 : index
    %c0_5 = arith.constant 0 : index
    %5 = vector.load %arg7[%c32, %c0_5] : memref<576x22xbf16, #tpu.memory_space<vmem>>, vector<32x22xbf16>
    tpu.vector_store %arg7[%c32, %c0_5], %4 {strides = array<i32>} : memref<576x22xbf16, #tpu.memory_space<vmem>>, vector<32x22xbf16>,
    %c0_6 = arith.constant 0 : index
    %c0_7 = arith.constant 0 : index
    %c123 = arith.constant 123 : index
    %6 = vector.load %arg1[%c0_6, %c0_7, %c123] : memref<1x32x157xbf16, #tpu.memory_space<vmem>>, vector<1x32x22xbf16>
    %7 = vector.shape_cast %6 : vector<1x32x22xbf16> to vector<32x22xbf16>
    %c64 = arith.constant 64 : index
    %c0_8 = arith.constant 0 : index
    %8 = vector.load %arg7[%c64, %c0_8] : memref<576x22xbf16, #tpu.memory_space<vmem>>, vector<32x22xbf16>
    tpu.vector_store %arg7[%c64, %c0_8], %7 {strides = array<i32>} : memref<576x22xbf16, #tpu.memory_space<vmem>>, vector<32x22xbf16>,
    %c0_9 = arith.constant 0 : index
    %c0_10 = arith.constant 0 : index
    %c127 = arith.constant 127 : index
    %9 = vector.load %arg1[%c0_9, %c0_10, %c127] : memref<1x32x157xbf16, #tpu.memory_space<vmem>>, vector<1x32x22xbf16>
    %10 = vector.shape_cast %9 : vector<1x32x22xbf16> to vector<32x22xbf16>
    %c96 = arith.constant 96 : index
    %c0_11 = arith.constant 0 : index
    %11 = vector.load %arg7[%c96, %c0_11] : memref<576x22xbf16, #tpu.memory_space<vmem>>, vector<32x22xbf16>
    tpu.vector_store %arg7[%c96, %c0_11], %10 {strides = array<i32>} : memref<576x22xbf16, #tpu.memory_space<vmem>>, vector<32x22xbf16>,
    %c0_12 = arith.constant 0 : index
    %c0_13 = arith.constant 0 : index
    %c128 = arith.constant 128 : index
    %12 = vector.load %arg1[%c0_12, %c0_13, %c128] : memref<1x32x157xbf16, #tpu.memory_space<vmem>>, vector<1x32x22xbf16>
    %13 = vector.shape_cast %12 : vector<1x32x22xbf16> to vector<32x22xbf16>
    %c128_14 = arith.constant 128 : index
    %c0_15 = arith.constant 0 : index
    %14 = vector.load %arg7[%c128_14, %c0_15] : memref<576x22xbf16, #tpu.memory_space<vmem>>, vector<32x22xbf16>
    tpu.vector_store %arg7[%c128_14, %c0_15], %13 {strides = array<i32>} : memref<576x22xbf16, #tpu.memory_space<vmem>>, vector<32x22xbf16>,
    %c0_16 = arith.constant 0 : index
    %c0_17 = arith.constant 0 : index
    %c129 = arith.constant 129 : index
    %15 = vector.load %arg1[%c0_16, %c0_17, %c129] : memref<1x32x157xbf16, #tpu.memory_space<vmem>>, vector<1x32x22xbf16>
    %16 = vector.shape_cast %15 : vector<1x32x22xbf16> to vector<32x22xbf16>
    %c160 = arith.constant 160 : index
    %c0_18 = arith.constant 0 : index
    %17 = vector.load %arg7[%c160, %c0_18] : memref<576x22xbf16, #tpu.memory_space<vmem>>, vector<32x22xbf16>
    tpu.vector_store %arg7[%c160, %c0_18], %16 {strides = array<i32>} : memref<576x22xbf16, #tpu.memory_space<vmem>>, vector<32x22xbf16>,
    %c0_19 = arith.constant 0 : index
    %c0_20 = arith.constant 0 : index
    %c133 = arith.constant 133 : index
    %18 = vector.load %arg1[%c0_19, %c0_20, %c133] : memref<1x32x157xbf16, #tpu.memory_space<vmem>>, vector<1x32x22xbf16>
    %19 = vector.shape_cast %18 : vector<1x32x22xbf16> to vector<32x22xbf16>
    %c192 = arith.constant 192 : index
    %c0_21 = arith.constant 0 : index
    %20 = vector.load %arg7[%c192, %c0_21] : memref<576x22xbf16, #tpu.memory_space<vmem>>, vector<32x22xbf16>
    tpu.vector_store %arg7[%c192, %c0_21], %19 {strides = array<i32>} : memref<576x22xbf16, #tpu.memory_space<vmem>>, vector<32x22xbf16>,
    %c0_22 = arith.constant 0 : index
    %c0_23 = arith.constant 0 : index
    %c134 = arith.constant 134 : index
    %21 = vector.load %arg1[%c0_22, %c0_23, %c134] : memref<1x32x157xbf16, #tpu.memory_space<vmem>>, vector<1x32x22xbf16>
    %22 = vector.shape_cast %21 : vector<1x32x22xbf16> to vector<32x22xbf16>
    %c224 = arith.constant 224 : index
    %c0_24 = arith.constant 0 : index
    %23 = vector.load %arg7[%c224, %c0_24] : memref<576x22xbf16, #tpu.memory_space<vmem>>, vector<32x22xbf16>
    tpu.vector_store %arg7[%c224, %c0_24], %22 {strides = array<i32>} : memref<576x22xbf16, #tpu.memory_space<vmem>>, vector<32x22xbf16>,
    %c0_25 = arith.constant 0 : index
    %c0_26 = arith.constant 0 : index
    %c135 = arith.constant 135 : index
    %24 = vector.load %arg1[%c0_25, %c0_26, %c135] : memref<1x32x157xbf16, #tpu.memory_space<vmem>>, vector<1x32x22xbf16>
    %25 = vector.shape_cast %24 : vector<1x32x22xbf16> to vector<32x22xbf16>
    %c256 = arith.constant 256 : index
    %c0_27 = arith.constant 0 : index
    %26 = vector.load %arg7[%c256, %c0_27] : memref<576x22xbf16, #tpu.memory_space<vmem>>, vector<32x22xbf16>
    tpu.vector_store %arg7[%c256, %c0_27], %25 {strides = array<i32>} : memref<576x22xbf16, #tpu.memory_space<vmem>>, vector<32x22xbf16>,
    %c0_28 = arith.constant 0 : index
    %c0_29 = arith.constant 0 : index
    %c121_30 = arith.constant 121 : index
    %27 = vector.load %arg2[%c0_28, %c0_29, %c121_30] : memref<1x32x157xbf16, #tpu.memory_space<vmem>>, vector<1x32x22xbf16>
    %28 = vector.shape_cast %27 : vector<1x32x22xbf16> to vector<32x22xbf16>
    %c288 = arith.constant 288 : index
    %c0_31 = arith.constant 0 : index
    %29 = vector.load %arg7[%c288, %c0_31] : memref<576x22xbf16, #tpu.memory_space<vmem>>, vector<32x22xbf16>
    tpu.vector_store %arg7[%c288, %c0_31], %28 {strides = array<i32>} : memref<576x22xbf16, #tpu.memory_space<vmem>>, vector<32x22xbf16>,
    %c0_32 = arith.constant 0 : index
    %c0_33 = arith.constant 0 : index
    %c122_34 = arith.constant 122 : index
    %30 = vector.load %arg2[%c0_32, %c0_33, %c122_34] : memref<1x32x157xbf16, #tpu.memory_space<vmem>>, vector<1x32x22xbf16>
    %31 = vector.shape_cast %30 : vector<1x32x22xbf16> to vector<32x22xbf16>
    %c320 = arith.constant 320 : index
    %c0_35 = arith.constant 0 : index
    %32 = vector.load %arg7[%c320, %c0_35] : memref<576x22xbf16, #tpu.memory_space<vmem>>, vector<32x22xbf16>
    tpu.vector_store %arg7[%c320, %c0_35], %31 {strides = array<i32>} : memref<576x22xbf16, #tpu.memory_space<vmem>>, vector<32x22xbf16>,
    %c0_36 = arith.constant 0 : index
    %c0_37 = arith.constant 0 : index
    %c123_38 = arith.constant 123 : index
    %33 = vector.load %arg2[%c0_36, %c0_37, %c123_38] : memref<1x32x157xbf16, #tpu.memory_space<vmem>>, vector<1x32x22xbf16>
    %34 = vector.shape_cast %33 : vector<1x32x22xbf16> to vector<32x22xbf16>
    %c352 = arith.constant 352 : index
    %c0_39 = arith.constant 0 : index
    %35 = vector.load %arg7[%c352, %c0_39] : memref<576x22xbf16, #tpu.memory_space<vmem>>, vector<32x22xbf16>
    tpu.vector_store %arg7[%c352, %c0_39], %34 {strides = array<i32>} : memref<576x22xbf16, #tpu.memory_space<vmem>>, vector<32x22xbf16>,
    %c0_40 = arith.constant 0 : index
    %c0_41 = arith.constant 0 : index
    %c127_42 = arith.constant 127 : index
    %36 = vector.load %arg2[%c0_40, %c0_41, %c127_42] : memref<1x32x157xbf16, #tpu.memory_space<vmem>>, vector<1x32x22xbf16>
    %37 = vector.shape_cast %36 : vector<1x32x22xbf16> to vector<32x22xbf16>
    %c384 = arith.constant 384 : index
    %c0_43 = arith.constant 0 : index
    %38 = vector.load %arg7[%c384, %c0_43] : memref<576x22xbf16, #tpu.memory_space<vmem>>, vector<32x22xbf16>
    tpu.vector_store %arg7[%c384, %c0_43], %37 {strides = array<i32>} : memref<576x22xbf16, #tpu.memory_space<vmem>>, vector<32x22xbf16>,
    %c0_44 = arith.constant 0 : index
    %c0_45 = arith.constant 0 : index
    %c128_46 = arith.constant 128 : index
    %39 = vector.load %arg2[%c0_44, %c0_45, %c128_46] : memref<1x32x157xbf16, #tpu.memory_space<vmem>>, vector<1x32x22xbf16>
    %40 = vector.shape_cast %39 : vector<1x32x22xbf16> to vector<32x22xbf16>
    %c416 = arith.constant 416 : index
    %c0_47 = arith.constant 0 : index
    %41 = vector.load %arg7[%c416, %c0_47] : memref<576x22xbf16, #tpu.memory_space<vmem>>, vector<32x22xbf16>
    tpu.vector_store %arg7[%c416, %c0_47], %40 {strides = array<i32>} : memref<576x22xbf16, #tpu.memory_space<vmem>>, vector<32x22xbf16>,
    %c0_48 = arith.constant 0 : index
    %c0_49 = arith.constant 0 : index
    %c129_50 = arith.constant 129 : index
    %42 = vector.load %arg2[%c0_48, %c0_49, %c129_50] : memref<1x32x157xbf16, #tpu.memory_space<vmem>>, vector<1x32x22xbf16>
    %43 = vector.shape_cast %42 : vector<1x32x22xbf16> to vector<32x22xbf16>
    %c448 = arith.constant 448 : index
    %c0_51 = arith.constant 0 : index
    %44 = vector.load %arg7[%c448, %c0_51] : memref<576x22xbf16, #tpu.memory_space<vmem>>, vector<32x22xbf16>
    tpu.vector_store %arg7[%c448, %c0_51], %43 {strides = array<i32>} : memref<576x22xbf16, #tpu.memory_space<vmem>>, vector<32x22xbf16>,
    %c0_52 = arith.constant 0 : index
    %c0_53 = arith.constant 0 : index
    %c133_54 = arith.constant 133 : index
    %45 = vector.load %arg2[%c0_52, %c0_53, %c133_54] : memref<1x32x157xbf16, #tpu.memory_space<vmem>>, vector<1x32x22xbf16>
    %46 = vector.shape_cast %45 : vector<1x32x22xbf16> to vector<32x22xbf16>
    %c480 = arith.constant 480 : index
    %c0_55 = arith.constant 0 : index
    %47 = vector.load %arg7[%c480, %c0_55] : memref<576x22xbf16, #tpu.memory_space<vmem>>, vector<32x22xbf16>
    tpu.vector_store %arg7[%c480, %c0_55], %46 {strides = array<i32>} : memref<576x22xbf16, #tpu.memory_space<vmem>>, vector<32x22xbf16>,
    %c0_56 = arith.constant 0 : index
    %c0_57 = arith.constant 0 : index
    %c134_58 = arith.constant 134 : index
    %48 = vector.load %arg2[%c0_56, %c0_57, %c134_58] : memref<1x32x157xbf16, #tpu.memory_space<vmem>>, vector<1x32x22xbf16>
    %49 = vector.shape_cast %48 : vector<1x32x22xbf16> to vector<32x22xbf16>
    %c512 = arith.constant 512 : index
    %c0_59 = arith.constant 0 : index
    %50 = vector.load %arg7[%c512, %c0_59] : memref<576x22xbf16, #tpu.memory_space<vmem>>, vector<32x22xbf16>
    tpu.vector_store %arg7[%c512, %c0_59], %49 {strides = array<i32>} : memref<576x22xbf16, #tpu.memory_space<vmem>>, vector<32x22xbf16>,
    %c0_60 = arith.constant 0 : index
    %c0_61 = arith.constant 0 : index
    %c135_62 = arith.constant 135 : index
    %51 = vector.load %arg2[%c0_60, %c0_61, %c135_62] : memref<1x32x157xbf16, #tpu.memory_space<vmem>>, vector<1x32x22xbf16>
    %52 = vector.shape_cast %51 : vector<1x32x22xbf16> to vector<32x22xbf16>
    %c544 = arith.constant 544 : index
    %c0_63 = arith.constant 0 : index
    %53 = vector.load %arg7[%c544, %c0_63] : memref<576x22xbf16, #tpu.memory_space<vmem>>, vector<32x22xbf16>
    tpu.vector_store %arg7[%c544, %c0_63], %52 {strides = array<i32>} : memref<576x22xbf16, #tpu.memory_space<vmem>>, vector<32x22xbf16>,
    %c0_64 = arith.constant 0 : index
    %c0_65 = arith.constant 0 : index
    %54 = vector.load %arg3[%c0_64, %c0_65] : memref<32x576xbf16, #tpu.memory_space<vmem>>, vector<32x576xbf16>
    %c0_66 = arith.constant 0 : index
    %c0_67 = arith.constant 0 : index
    %55 = vector.load %arg7[%c0_66, %c0_67] : memref<576x22xbf16, #tpu.memory_space<vmem>>, vector<576x22xbf16>
    %cst = arith.constant dense<0.000000e+00> : vector<32x22xf32>
    %56 = tpu.matmul %54, %55, %cst {dimension_numbers = #tpu.dot_dimension_numbers<[1], [0], [0], [1], [0, 0, 1, 1], [], []>} : vector<32x576xbf16>, vector<576x22xbf16>, vector<32x22xf32> -> vector<32x22xf32>
    %c0_68 = arith.constant 0 : index
    %c0_69 = arith.constant 0 : index
    %57 = vector.load %arg4[%c0_68, %c0_69] : memref<32x1xf32, #tpu.memory_space<vmem>>, vector<32x1xf32>
    %58 = vector.broadcast %57 : vector<32x1xf32> to vector<32x22xf32>
    %59 = arith.addf %56, %58 : vector<32x22xf32>
    %cst_70 = arith.constant 0.000000e+00 : f32
    %60 = vector.broadcast %cst_70 : f32 to vector<32x22xf32>
    %61 = arith.cmpf oge, %59, %60 : vector<32x22xf32>
    %cst_71 = arith.constant 2.000000e-01 : f32
    %62 = vector.broadcast %cst_71 : f32 to vector<32x22xf32>
    %63 = arith.mulf %62, %59 : vector<32x22xf32>
    %64 = arith.select %61, %59, %63 : vector<32x22xi1>, vector<32x22xf32>
    %c0_72 = arith.constant 0 : index
    %c0_73 = arith.constant 0 : index
    %65 = vector.load %arg5[%c0_72, %c0_73] : memref<1x22xf32, #tpu.memory_space<vmem>>, vector<1x22xf32>
    %66 = vector.broadcast %65 : vector<1x22xf32> to vector<32x22xf32>
    %67 = arith.mulf %64, %66 : vector<32x22xf32>
    %cst_74 = arith.constant 0.000000e+00 : bf16
    %68 = vector.broadcast %cst_74 : bf16 to vector<32x128xbf16>
    %c0_75 = arith.constant 0 : index
    %c0_76 = arith.constant 0 : index
    %c0_77 = arith.constant 0 : index
    %69 = vector.load %arg6[%c0_75, %c0_76, %c0_77] : memref<1x32x157xbf16, #tpu.memory_space<vmem>>, vector<1x32x128xbf16>
    %70 = vector.shape_cast %69 : vector<1x32x128xbf16> to vector<32x128xbf16>
    %71 = vector.shape_cast %68 : vector<32x128xbf16> to vector<1x32x128xbf16>
    tpu.vector_store %arg6[%c0_75, %c0_76, %c0_77], %71 {strides = array<i32>} : memref<1x32x157xbf16, #tpu.memory_space<vmem>>, vector<1x32x128xbf16>,
    %72 = arith.truncf %67 : vector<32x22xf32> to vector<32x22xbf16>
    %c0_78 = arith.constant 0 : index
    %c0_79 = arith.constant 0 : index
    %c128_80 = arith.constant 128 : index
    %73 = vector.load %arg6[%c0_78, %c0_79, %c128_80] : memref<1x32x157xbf16, #tpu.memory_space<vmem>>, vector<1x32x22xbf16>
    %74 = vector.shape_cast %73 : vector<1x32x22xbf16> to vector<32x22xbf16>
    %75 = vector.shape_cast %72 : vector<32x22xbf16> to vector<1x32x22xbf16>
    tpu.vector_store %arg6[%c0_78, %c0_79, %c128_80], %75 {strides = array<i32>} : memref<1x32x157xbf16, #tpu.memory_space<vmem>>, vector<1x32x22xbf16>,
    %cst_81 = arith.constant 0.000000e+00 : bf16
    %76 = vector.broadcast %cst_81 : bf16 to vector<32x7xbf16>
    %c0_82 = arith.constant 0 : index
    %c0_83 = arith.constant 0 : index
    %c150 = arith.constant 150 : index
    %77 = vector.load %arg6[%c0_82, %c0_83, %c150] : memref<1x32x157xbf16, #tpu.memory_space<vmem>>, vector<1x32x7xbf16>
    %78 = vector.shape_cast %77 : vector<1x32x7xbf16> to vector<32x7xbf16>
    %79 = vector.shape_cast %76 : vector<32x7xbf16> to vector<1x32x7xbf16>
    tpu.vector_store %arg6[%c0_82, %c0_83, %c150], %79 {strides = array<i32>} : memref<1x32x157xbf16, #tpu.memory_space<vmem>>, vector<1x32x7xbf16>,
    return
  }
  func.func @transform_0(%arg0: i32) -> (i32, i32, i32) {
    %c0_i32 = arith.constant 0 : i32
    %c0_i32_0 = arith.constant 0 : i32
    %c0_i32_1 = arith.constant 0 : i32
    return %arg0, %c0_i32, %c0_i32_0 : i32, i32, i32
  }
  func.func @transform_1(%arg0: i32) -> (i32, i32, i32) {
    %c0_i32 = arith.constant 0 : i32
    %c0_i32_0 = arith.constant 0 : i32
    %c0_i32_1 = arith.constant 0 : i32
    return %arg0, %c0_i32, %c0_i32_0 : i32, i32, i32
  }
  func.func @transform_2(%arg0: i32) -> (i32, i32) {
    %c0_i32 = arith.constant 0 : i32
    %c0_i32_0 = arith.constant 0 : i32
    %c0_i32_1 = arith.constant 0 : i32
    return %c0_i32, %c0_i32_0 : i32, i32
  }
  func.func @transform_3(%arg0: i32) -> (i32, i32) {
    %c0_i32 = arith.constant 0 : i32
    %c0_i32_0 = arith.constant 0 : i32
    %c0_i32_1 = arith.constant 0 : i32
    return %c0_i32, %c0_i32_0 : i32, i32
  }
  func.func @transform_4(%arg0: i32) -> (i32, i32) {
    %c0_i32 = arith.constant 0 : i32
    %c0_i32_0 = arith.constant 0 : i32
    %c0_i32_1 = arith.constant 0 : i32
    return %c0_i32, %c0_i32_0 : i32, i32
  }
  func.func @transform_5(%arg0: i32) -> (i32, i32, i32) {
    %c0_i32 = arith.constant 0 : i32
    %c0_i32_0 = arith.constant 0 : i32
    %c0_i32_1 = arith.constant 0 : i32
    return %arg0, %c0_i32, %c0_i32_0 : i32, i32, i32
  }
}

module attributes {stable_mosaic.version = 11 : i64} {
  func.func @_conv3x3_kernel(%arg0: i32, %arg1: memref<1x32x217xbf16, #tpu.memory_space<vmem>>, %arg2: memref<1x32x217xbf16, #tpu.memory_space<vmem>>, %arg3: memref<32x576xbf16, #tpu.memory_space<vmem>>, %arg4: memref<32x1xf32, #tpu.memory_space<vmem>>, %arg5: memref<1x78xf32, #tpu.memory_space<vmem>>, %arg6: memref<1x32x217xbf16, #tpu.memory_space<vmem>>, %arg7: memref<576x78xbf16, #tpu.memory_space<vmem>>) attributes {dimension_semantics = [#tpu.dimension_semantics<parallel>], iteration_bounds = array<i64: 2>, scalar_prefetch = 0 : i64, scratch_operands = 1 : i64, tpu.core_type = #tpu.core_type<tc>, window_params = [{transform_indices = @transform_0, window_bounds = array<i64: 1, 32, 217>}, {transform_indices = @transform_1, window_bounds = array<i64: 1, 32, 217>}, {pipeline_mode = #tpu.pipeline_mode<synchronous>, transform_indices = @transform_2, window_bounds = array<i64: 32, 576>}, {pipeline_mode = #tpu.pipeline_mode<synchronous>, transform_indices = @transform_3, window_bounds = array<i64: 32, 1>}, {pipeline_mode = #tpu.pipeline_mode<synchronous>, transform_indices = @transform_4, window_bounds = array<i64: 1, 78>}, {transform_indices = @transform_5, window_bounds = array<i64: 1, 32, 217>}]} {
    %c0 = arith.constant 0 : index
    %c0_0 = arith.constant 0 : index
    %c117 = arith.constant 117 : index
    %0 = vector.load %arg1[%c0, %c0_0, %c117] : memref<1x32x217xbf16, #tpu.memory_space<vmem>>, vector<1x32x78xbf16>
    %1 = vector.shape_cast %0 : vector<1x32x78xbf16> to vector<32x78xbf16>
    %c0_1 = arith.constant 0 : index
    %c0_2 = arith.constant 0 : index
    %2 = vector.load %arg7[%c0_1, %c0_2] : memref<576x78xbf16, #tpu.memory_space<vmem>>, vector<32x78xbf16>
    tpu.vector_store %arg7[%c0_1, %c0_2], %1 {strides = array<i32>} : memref<576x78xbf16, #tpu.memory_space<vmem>>, vector<32x78xbf16>,
    %c0_3 = arith.constant 0 : index
    %c0_4 = arith.constant 0 : index
    %c118 = arith.constant 118 : index
    %3 = vector.load %arg1[%c0_3, %c0_4, %c118] : memref<1x32x217xbf16, #tpu.memory_space<vmem>>, vector<1x32x78xbf16>
    %4 = vector.shape_cast %3 : vector<1x32x78xbf16> to vector<32x78xbf16>
    %c32 = arith.constant 32 : index
    %c0_5 = arith.constant 0 : index
    %5 = vector.load %arg7[%c32, %c0_5] : memref<576x78xbf16, #tpu.memory_space<vmem>>, vector<32x78xbf16>
    tpu.vector_store %arg7[%c32, %c0_5], %4 {strides = array<i32>} : memref<576x78xbf16, #tpu.memory_space<vmem>>, vector<32x78xbf16>,
    %c0_6 = arith.constant 0 : index
    %c0_7 = arith.constant 0 : index
    %c119 = arith.constant 119 : index
    %6 = vector.load %arg1[%c0_6, %c0_7, %c119] : memref<1x32x217xbf16, #tpu.memory_space<vmem>>, vector<1x32x78xbf16>
    %7 = vector.shape_cast %6 : vector<1x32x78xbf16> to vector<32x78xbf16>
    %c64 = arith.constant 64 : index
    %c0_8 = arith.constant 0 : index
    %8 = vector.load %arg7[%c64, %c0_8] : memref<576x78xbf16, #tpu.memory_space<vmem>>, vector<32x78xbf16>
    tpu.vector_store %arg7[%c64, %c0_8], %7 {strides = array<i32>} : memref<576x78xbf16, #tpu.memory_space<vmem>>, vector<32x78xbf16>,
    %c0_9 = arith.constant 0 : index
    %c0_10 = arith.constant 0 : index
    %c127 = arith.constant 127 : index
    %9 = vector.load %arg1[%c0_9, %c0_10, %c127] : memref<1x32x217xbf16, #tpu.memory_space<vmem>>, vector<1x32x78xbf16>
    %10 = vector.shape_cast %9 : vector<1x32x78xbf16> to vector<32x78xbf16>
    %c96 = arith.constant 96 : index
    %c0_11 = arith.constant 0 : index
    %11 = vector.load %arg7[%c96, %c0_11] : memref<576x78xbf16, #tpu.memory_space<vmem>>, vector<32x78xbf16>
    tpu.vector_store %arg7[%c96, %c0_11], %10 {strides = array<i32>} : memref<576x78xbf16, #tpu.memory_space<vmem>>, vector<32x78xbf16>,
    %c0_12 = arith.constant 0 : index
    %c0_13 = arith.constant 0 : index
    %c128 = arith.constant 128 : index
    %12 = vector.load %arg1[%c0_12, %c0_13, %c128] : memref<1x32x217xbf16, #tpu.memory_space<vmem>>, vector<1x32x78xbf16>
    %13 = vector.shape_cast %12 : vector<1x32x78xbf16> to vector<32x78xbf16>
    %c128_14 = arith.constant 128 : index
    %c0_15 = arith.constant 0 : index
    %14 = vector.load %arg7[%c128_14, %c0_15] : memref<576x78xbf16, #tpu.memory_space<vmem>>, vector<32x78xbf16>
    tpu.vector_store %arg7[%c128_14, %c0_15], %13 {strides = array<i32>} : memref<576x78xbf16, #tpu.memory_space<vmem>>, vector<32x78xbf16>,
    %c0_16 = arith.constant 0 : index
    %c0_17 = arith.constant 0 : index
    %c129 = arith.constant 129 : index
    %15 = vector.load %arg1[%c0_16, %c0_17, %c129] : memref<1x32x217xbf16, #tpu.memory_space<vmem>>, vector<1x32x78xbf16>
    %16 = vector.shape_cast %15 : vector<1x32x78xbf16> to vector<32x78xbf16>
    %c160 = arith.constant 160 : index
    %c0_18 = arith.constant 0 : index
    %17 = vector.load %arg7[%c160, %c0_18] : memref<576x78xbf16, #tpu.memory_space<vmem>>, vector<32x78xbf16>
    tpu.vector_store %arg7[%c160, %c0_18], %16 {strides = array<i32>} : memref<576x78xbf16, #tpu.memory_space<vmem>>, vector<32x78xbf16>,
    %c0_19 = arith.constant 0 : index
    %c0_20 = arith.constant 0 : index
    %c137 = arith.constant 137 : index
    %18 = vector.load %arg1[%c0_19, %c0_20, %c137] : memref<1x32x217xbf16, #tpu.memory_space<vmem>>, vector<1x32x78xbf16>
    %19 = vector.shape_cast %18 : vector<1x32x78xbf16> to vector<32x78xbf16>
    %c192 = arith.constant 192 : index
    %c0_21 = arith.constant 0 : index
    %20 = vector.load %arg7[%c192, %c0_21] : memref<576x78xbf16, #tpu.memory_space<vmem>>, vector<32x78xbf16>
    tpu.vector_store %arg7[%c192, %c0_21], %19 {strides = array<i32>} : memref<576x78xbf16, #tpu.memory_space<vmem>>, vector<32x78xbf16>,
    %c0_22 = arith.constant 0 : index
    %c0_23 = arith.constant 0 : index
    %c138 = arith.constant 138 : index
    %21 = vector.load %arg1[%c0_22, %c0_23, %c138] : memref<1x32x217xbf16, #tpu.memory_space<vmem>>, vector<1x32x78xbf16>
    %22 = vector.shape_cast %21 : vector<1x32x78xbf16> to vector<32x78xbf16>
    %c224 = arith.constant 224 : index
    %c0_24 = arith.constant 0 : index
    %23 = vector.load %arg7[%c224, %c0_24] : memref<576x78xbf16, #tpu.memory_space<vmem>>, vector<32x78xbf16>
    tpu.vector_store %arg7[%c224, %c0_24], %22 {strides = array<i32>} : memref<576x78xbf16, #tpu.memory_space<vmem>>, vector<32x78xbf16>,
    %c0_25 = arith.constant 0 : index
    %c0_26 = arith.constant 0 : index
    %c139 = arith.constant 139 : index
    %24 = vector.load %arg1[%c0_25, %c0_26, %c139] : memref<1x32x217xbf16, #tpu.memory_space<vmem>>, vector<1x32x78xbf16>
    %25 = vector.shape_cast %24 : vector<1x32x78xbf16> to vector<32x78xbf16>
    %c256 = arith.constant 256 : index
    %c0_27 = arith.constant 0 : index
    %26 = vector.load %arg7[%c256, %c0_27] : memref<576x78xbf16, #tpu.memory_space<vmem>>, vector<32x78xbf16>
    tpu.vector_store %arg7[%c256, %c0_27], %25 {strides = array<i32>} : memref<576x78xbf16, #tpu.memory_space<vmem>>, vector<32x78xbf16>,
    %c0_28 = arith.constant 0 : index
    %c0_29 = arith.constant 0 : index
    %c117_30 = arith.constant 117 : index
    %27 = vector.load %arg2[%c0_28, %c0_29, %c117_30] : memref<1x32x217xbf16, #tpu.memory_space<vmem>>, vector<1x32x78xbf16>
    %28 = vector.shape_cast %27 : vector<1x32x78xbf16> to vector<32x78xbf16>
    %c288 = arith.constant 288 : index
    %c0_31 = arith.constant 0 : index
    %29 = vector.load %arg7[%c288, %c0_31] : memref<576x78xbf16, #tpu.memory_space<vmem>>, vector<32x78xbf16>
    tpu.vector_store %arg7[%c288, %c0_31], %28 {strides = array<i32>} : memref<576x78xbf16, #tpu.memory_space<vmem>>, vector<32x78xbf16>,
    %c0_32 = arith.constant 0 : index
    %c0_33 = arith.constant 0 : index
    %c118_34 = arith.constant 118 : index
    %30 = vector.load %arg2[%c0_32, %c0_33, %c118_34] : memref<1x32x217xbf16, #tpu.memory_space<vmem>>, vector<1x32x78xbf16>
    %31 = vector.shape_cast %30 : vector<1x32x78xbf16> to vector<32x78xbf16>
    %c320 = arith.constant 320 : index
    %c0_35 = arith.constant 0 : index
    %32 = vector.load %arg7[%c320, %c0_35] : memref<576x78xbf16, #tpu.memory_space<vmem>>, vector<32x78xbf16>
    tpu.vector_store %arg7[%c320, %c0_35], %31 {strides = array<i32>} : memref<576x78xbf16, #tpu.memory_space<vmem>>, vector<32x78xbf16>,
    %c0_36 = arith.constant 0 : index
    %c0_37 = arith.constant 0 : index
    %c119_38 = arith.constant 119 : index
    %33 = vector.load %arg2[%c0_36, %c0_37, %c119_38] : memref<1x32x217xbf16, #tpu.memory_space<vmem>>, vector<1x32x78xbf16>
    %34 = vector.shape_cast %33 : vector<1x32x78xbf16> to vector<32x78xbf16>
    %c352 = arith.constant 352 : index
    %c0_39 = arith.constant 0 : index
    %35 = vector.load %arg7[%c352, %c0_39] : memref<576x78xbf16, #tpu.memory_space<vmem>>, vector<32x78xbf16>
    tpu.vector_store %arg7[%c352, %c0_39], %34 {strides = array<i32>} : memref<576x78xbf16, #tpu.memory_space<vmem>>, vector<32x78xbf16>,
    %c0_40 = arith.constant 0 : index
    %c0_41 = arith.constant 0 : index
    %c127_42 = arith.constant 127 : index
    %36 = vector.load %arg2[%c0_40, %c0_41, %c127_42] : memref<1x32x217xbf16, #tpu.memory_space<vmem>>, vector<1x32x78xbf16>
    %37 = vector.shape_cast %36 : vector<1x32x78xbf16> to vector<32x78xbf16>
    %c384 = arith.constant 384 : index
    %c0_43 = arith.constant 0 : index
    %38 = vector.load %arg7[%c384, %c0_43] : memref<576x78xbf16, #tpu.memory_space<vmem>>, vector<32x78xbf16>
    tpu.vector_store %arg7[%c384, %c0_43], %37 {strides = array<i32>} : memref<576x78xbf16, #tpu.memory_space<vmem>>, vector<32x78xbf16>,
    %c0_44 = arith.constant 0 : index
    %c0_45 = arith.constant 0 : index
    %c128_46 = arith.constant 128 : index
    %39 = vector.load %arg2[%c0_44, %c0_45, %c128_46] : memref<1x32x217xbf16, #tpu.memory_space<vmem>>, vector<1x32x78xbf16>
    %40 = vector.shape_cast %39 : vector<1x32x78xbf16> to vector<32x78xbf16>
    %c416 = arith.constant 416 : index
    %c0_47 = arith.constant 0 : index
    %41 = vector.load %arg7[%c416, %c0_47] : memref<576x78xbf16, #tpu.memory_space<vmem>>, vector<32x78xbf16>
    tpu.vector_store %arg7[%c416, %c0_47], %40 {strides = array<i32>} : memref<576x78xbf16, #tpu.memory_space<vmem>>, vector<32x78xbf16>,
    %c0_48 = arith.constant 0 : index
    %c0_49 = arith.constant 0 : index
    %c129_50 = arith.constant 129 : index
    %42 = vector.load %arg2[%c0_48, %c0_49, %c129_50] : memref<1x32x217xbf16, #tpu.memory_space<vmem>>, vector<1x32x78xbf16>
    %43 = vector.shape_cast %42 : vector<1x32x78xbf16> to vector<32x78xbf16>
    %c448 = arith.constant 448 : index
    %c0_51 = arith.constant 0 : index
    %44 = vector.load %arg7[%c448, %c0_51] : memref<576x78xbf16, #tpu.memory_space<vmem>>, vector<32x78xbf16>
    tpu.vector_store %arg7[%c448, %c0_51], %43 {strides = array<i32>} : memref<576x78xbf16, #tpu.memory_space<vmem>>, vector<32x78xbf16>,
    %c0_52 = arith.constant 0 : index
    %c0_53 = arith.constant 0 : index
    %c137_54 = arith.constant 137 : index
    %45 = vector.load %arg2[%c0_52, %c0_53, %c137_54] : memref<1x32x217xbf16, #tpu.memory_space<vmem>>, vector<1x32x78xbf16>
    %46 = vector.shape_cast %45 : vector<1x32x78xbf16> to vector<32x78xbf16>
    %c480 = arith.constant 480 : index
    %c0_55 = arith.constant 0 : index
    %47 = vector.load %arg7[%c480, %c0_55] : memref<576x78xbf16, #tpu.memory_space<vmem>>, vector<32x78xbf16>
    tpu.vector_store %arg7[%c480, %c0_55], %46 {strides = array<i32>} : memref<576x78xbf16, #tpu.memory_space<vmem>>, vector<32x78xbf16>,
    %c0_56 = arith.constant 0 : index
    %c0_57 = arith.constant 0 : index
    %c138_58 = arith.constant 138 : index
    %48 = vector.load %arg2[%c0_56, %c0_57, %c138_58] : memref<1x32x217xbf16, #tpu.memory_space<vmem>>, vector<1x32x78xbf16>
    %49 = vector.shape_cast %48 : vector<1x32x78xbf16> to vector<32x78xbf16>
    %c512 = arith.constant 512 : index
    %c0_59 = arith.constant 0 : index
    %50 = vector.load %arg7[%c512, %c0_59] : memref<576x78xbf16, #tpu.memory_space<vmem>>, vector<32x78xbf16>
    tpu.vector_store %arg7[%c512, %c0_59], %49 {strides = array<i32>} : memref<576x78xbf16, #tpu.memory_space<vmem>>, vector<32x78xbf16>,
    %c0_60 = arith.constant 0 : index
    %c0_61 = arith.constant 0 : index
    %c139_62 = arith.constant 139 : index
    %51 = vector.load %arg2[%c0_60, %c0_61, %c139_62] : memref<1x32x217xbf16, #tpu.memory_space<vmem>>, vector<1x32x78xbf16>
    %52 = vector.shape_cast %51 : vector<1x32x78xbf16> to vector<32x78xbf16>
    %c544 = arith.constant 544 : index
    %c0_63 = arith.constant 0 : index
    %53 = vector.load %arg7[%c544, %c0_63] : memref<576x78xbf16, #tpu.memory_space<vmem>>, vector<32x78xbf16>
    tpu.vector_store %arg7[%c544, %c0_63], %52 {strides = array<i32>} : memref<576x78xbf16, #tpu.memory_space<vmem>>, vector<32x78xbf16>,
    %c0_64 = arith.constant 0 : index
    %c0_65 = arith.constant 0 : index
    %54 = vector.load %arg3[%c0_64, %c0_65] : memref<32x576xbf16, #tpu.memory_space<vmem>>, vector<32x576xbf16>
    %c0_66 = arith.constant 0 : index
    %c0_67 = arith.constant 0 : index
    %55 = vector.load %arg7[%c0_66, %c0_67] : memref<576x78xbf16, #tpu.memory_space<vmem>>, vector<576x78xbf16>
    %cst = arith.constant dense<0.000000e+00> : vector<32x78xf32>
    %56 = tpu.matmul %54, %55, %cst {dimension_numbers = #tpu.dot_dimension_numbers<[1], [0], [0], [1], [0, 0, 1, 1], [], []>} : vector<32x576xbf16>, vector<576x78xbf16>, vector<32x78xf32> -> vector<32x78xf32>
    %c0_68 = arith.constant 0 : index
    %c0_69 = arith.constant 0 : index
    %57 = vector.load %arg4[%c0_68, %c0_69] : memref<32x1xf32, #tpu.memory_space<vmem>>, vector<32x1xf32>
    %58 = vector.broadcast %57 : vector<32x1xf32> to vector<32x78xf32>
    %59 = arith.addf %56, %58 : vector<32x78xf32>
    %cst_70 = arith.constant 0.000000e+00 : f32
    %60 = vector.broadcast %cst_70 : f32 to vector<32x78xf32>
    %61 = arith.cmpf oge, %59, %60 : vector<32x78xf32>
    %cst_71 = arith.constant 2.000000e-01 : f32
    %62 = vector.broadcast %cst_71 : f32 to vector<32x78xf32>
    %63 = arith.mulf %62, %59 : vector<32x78xf32>
    %64 = arith.select %61, %59, %63 : vector<32x78xi1>, vector<32x78xf32>
    %c0_72 = arith.constant 0 : index
    %c0_73 = arith.constant 0 : index
    %65 = vector.load %arg5[%c0_72, %c0_73] : memref<1x78xf32, #tpu.memory_space<vmem>>, vector<1x78xf32>
    %66 = vector.broadcast %65 : vector<1x78xf32> to vector<32x78xf32>
    %67 = arith.mulf %64, %66 : vector<32x78xf32>
    %cst_74 = arith.constant 0.000000e+00 : bf16
    %68 = vector.broadcast %cst_74 : bf16 to vector<32x128xbf16>
    %c0_75 = arith.constant 0 : index
    %c0_76 = arith.constant 0 : index
    %c0_77 = arith.constant 0 : index
    %69 = vector.load %arg6[%c0_75, %c0_76, %c0_77] : memref<1x32x217xbf16, #tpu.memory_space<vmem>>, vector<1x32x128xbf16>
    %70 = vector.shape_cast %69 : vector<1x32x128xbf16> to vector<32x128xbf16>
    %71 = vector.shape_cast %68 : vector<32x128xbf16> to vector<1x32x128xbf16>
    tpu.vector_store %arg6[%c0_75, %c0_76, %c0_77], %71 {strides = array<i32>} : memref<1x32x217xbf16, #tpu.memory_space<vmem>>, vector<1x32x128xbf16>,
    %72 = arith.truncf %67 : vector<32x78xf32> to vector<32x78xbf16>
    %c0_78 = arith.constant 0 : index
    %c0_79 = arith.constant 0 : index
    %c128_80 = arith.constant 128 : index
    %73 = vector.load %arg6[%c0_78, %c0_79, %c128_80] : memref<1x32x217xbf16, #tpu.memory_space<vmem>>, vector<1x32x78xbf16>
    %74 = vector.shape_cast %73 : vector<1x32x78xbf16> to vector<32x78xbf16>
    %75 = vector.shape_cast %72 : vector<32x78xbf16> to vector<1x32x78xbf16>
    tpu.vector_store %arg6[%c0_78, %c0_79, %c128_80], %75 {strides = array<i32>} : memref<1x32x217xbf16, #tpu.memory_space<vmem>>, vector<1x32x78xbf16>,
    %cst_81 = arith.constant 0.000000e+00 : bf16
    %76 = vector.broadcast %cst_81 : bf16 to vector<32x11xbf16>
    %c0_82 = arith.constant 0 : index
    %c0_83 = arith.constant 0 : index
    %c206 = arith.constant 206 : index
    %77 = vector.load %arg6[%c0_82, %c0_83, %c206] : memref<1x32x217xbf16, #tpu.memory_space<vmem>>, vector<1x32x11xbf16>
    %78 = vector.shape_cast %77 : vector<1x32x11xbf16> to vector<32x11xbf16>
    %79 = vector.shape_cast %76 : vector<32x11xbf16> to vector<1x32x11xbf16>
    tpu.vector_store %arg6[%c0_82, %c0_83, %c206], %79 {strides = array<i32>} : memref<1x32x217xbf16, #tpu.memory_space<vmem>>, vector<1x32x11xbf16>,
    return
  }
  func.func @transform_0(%arg0: i32) -> (i32, i32, i32) {
    %c0_i32 = arith.constant 0 : i32
    %c0_i32_0 = arith.constant 0 : i32
    %c0_i32_1 = arith.constant 0 : i32
    return %arg0, %c0_i32, %c0_i32_0 : i32, i32, i32
  }
  func.func @transform_1(%arg0: i32) -> (i32, i32, i32) {
    %c0_i32 = arith.constant 0 : i32
    %c0_i32_0 = arith.constant 0 : i32
    %c0_i32_1 = arith.constant 0 : i32
    return %arg0, %c0_i32, %c0_i32_0 : i32, i32, i32
  }
  func.func @transform_2(%arg0: i32) -> (i32, i32) {
    %c0_i32 = arith.constant 0 : i32
    %c0_i32_0 = arith.constant 0 : i32
    %c0_i32_1 = arith.constant 0 : i32
    return %c0_i32, %c0_i32_0 : i32, i32
  }
  func.func @transform_3(%arg0: i32) -> (i32, i32) {
    %c0_i32 = arith.constant 0 : i32
    %c0_i32_0 = arith.constant 0 : i32
    %c0_i32_1 = arith.constant 0 : i32
    return %c0_i32, %c0_i32_0 : i32, i32
  }
  func.func @transform_4(%arg0: i32) -> (i32, i32) {
    %c0_i32 = arith.constant 0 : i32
    %c0_i32_0 = arith.constant 0 : i32
    %c0_i32_1 = arith.constant 0 : i32
    return %c0_i32, %c0_i32_0 : i32, i32
  }
  func.func @transform_5(%arg0: i32) -> (i32, i32, i32) {
    %c0_i32 = arith.constant 0 : i32
    %c0_i32_0 = arith.constant 0 : i32
    %c0_i32_1 = arith.constant 0 : i32
    return %arg0, %c0_i32, %c0_i32_0 : i32, i32, i32
  }
}

module attributes {stable_mosaic.version = 11 : i64} {
  func.func @_conv3x3_kernel(%arg0: i32, %arg1: memref<1x32x433xbf16, #tpu.memory_space<vmem>>, %arg2: memref<16x288xbf16, #tpu.memory_space<vmem>>, %arg3: memref<16x1xf32, #tpu.memory_space<vmem>>, %arg4: memref<1x286xf32, #tpu.memory_space<vmem>>, %arg5: memref<1x16x433xbf16, #tpu.memory_space<vmem>>, %arg6: memref<288x286xbf16, #tpu.memory_space<vmem>>) attributes {dimension_semantics = [#tpu.dimension_semantics<parallel>], iteration_bounds = array<i64: 2>, scalar_prefetch = 0 : i64, scratch_operands = 1 : i64, tpu.core_type = #tpu.core_type<tc>, window_params = [{transform_indices = @transform_0, window_bounds = array<i64: 1, 32, 433>}, {pipeline_mode = #tpu.pipeline_mode<synchronous>, transform_indices = @transform_1, window_bounds = array<i64: 16, 288>}, {pipeline_mode = #tpu.pipeline_mode<synchronous>, transform_indices = @transform_2, window_bounds = array<i64: 16, 1>}, {pipeline_mode = #tpu.pipeline_mode<synchronous>, transform_indices = @transform_3, window_bounds = array<i64: 1, 286>}, {transform_indices = @transform_4, window_bounds = array<i64: 1, 16, 433>}]} {
    %c0 = arith.constant 0 : index
    %c0_0 = arith.constant 0 : index
    %c109 = arith.constant 109 : index
    %0 = vector.load %arg1[%c0, %c0_0, %c109] : memref<1x32x433xbf16, #tpu.memory_space<vmem>>, vector<1x32x286xbf16>
    %1 = vector.shape_cast %0 : vector<1x32x286xbf16> to vector<32x286xbf16>
    %c0_1 = arith.constant 0 : index
    %c0_2 = arith.constant 0 : index
    %2 = vector.load %arg6[%c0_1, %c0_2] : memref<288x286xbf16, #tpu.memory_space<vmem>>, vector<32x286xbf16>
    tpu.vector_store %arg6[%c0_1, %c0_2], %1 {strides = array<i32>} : memref<288x286xbf16, #tpu.memory_space<vmem>>, vector<32x286xbf16>,
    %c0_3 = arith.constant 0 : index
    %c0_4 = arith.constant 0 : index
    %c110 = arith.constant 110 : index
    %3 = vector.load %arg1[%c0_3, %c0_4, %c110] : memref<1x32x433xbf16, #tpu.memory_space<vmem>>, vector<1x32x286xbf16>
    %4 = vector.shape_cast %3 : vector<1x32x286xbf16> to vector<32x286xbf16>
    %c32 = arith.constant 32 : index
    %c0_5 = arith.constant 0 : index
    %5 = vector.load %arg6[%c32, %c0_5] : memref<288x286xbf16, #tpu.memory_space<vmem>>, vector<32x286xbf16>
    tpu.vector_store %arg6[%c32, %c0_5], %4 {strides = array<i32>} : memref<288x286xbf16, #tpu.memory_space<vmem>>, vector<32x286xbf16>,
    %c0_6 = arith.constant 0 : index
    %c0_7 = arith.constant 0 : index
    %c111 = arith.constant 111 : index
    %6 = vector.load %arg1[%c0_6, %c0_7, %c111] : memref<1x32x433xbf16, #tpu.memory_space<vmem>>, vector<1x32x286xbf16>
    %7 = vector.shape_cast %6 : vector<1x32x286xbf16> to vector<32x286xbf16>
    %c64 = arith.constant 64 : index
    %c0_8 = arith.constant 0 : index
    %8 = vector.load %arg6[%c64, %c0_8] : memref<288x286xbf16, #tpu.memory_space<vmem>>, vector<32x286xbf16>
    tpu.vector_store %arg6[%c64, %c0_8], %7 {strides = array<i32>} : memref<288x286xbf16, #tpu.memory_space<vmem>>, vector<32x286xbf16>,
    %c0_9 = arith.constant 0 : index
    %c0_10 = arith.constant 0 : index
    %c127 = arith.constant 127 : index
    %9 = vector.load %arg1[%c0_9, %c0_10, %c127] : memref<1x32x433xbf16, #tpu.memory_space<vmem>>, vector<1x32x286xbf16>
    %10 = vector.shape_cast %9 : vector<1x32x286xbf16> to vector<32x286xbf16>
    %c96 = arith.constant 96 : index
    %c0_11 = arith.constant 0 : index
    %11 = vector.load %arg6[%c96, %c0_11] : memref<288x286xbf16, #tpu.memory_space<vmem>>, vector<32x286xbf16>
    tpu.vector_store %arg6[%c96, %c0_11], %10 {strides = array<i32>} : memref<288x286xbf16, #tpu.memory_space<vmem>>, vector<32x286xbf16>,
    %c0_12 = arith.constant 0 : index
    %c0_13 = arith.constant 0 : index
    %c128 = arith.constant 128 : index
    %12 = vector.load %arg1[%c0_12, %c0_13, %c128] : memref<1x32x433xbf16, #tpu.memory_space<vmem>>, vector<1x32x286xbf16>
    %13 = vector.shape_cast %12 : vector<1x32x286xbf16> to vector<32x286xbf16>
    %c128_14 = arith.constant 128 : index
    %c0_15 = arith.constant 0 : index
    %14 = vector.load %arg6[%c128_14, %c0_15] : memref<288x286xbf16, #tpu.memory_space<vmem>>, vector<32x286xbf16>
    tpu.vector_store %arg6[%c128_14, %c0_15], %13 {strides = array<i32>} : memref<288x286xbf16, #tpu.memory_space<vmem>>, vector<32x286xbf16>,
    %c0_16 = arith.constant 0 : index
    %c0_17 = arith.constant 0 : index
    %c129 = arith.constant 129 : index
    %15 = vector.load %arg1[%c0_16, %c0_17, %c129] : memref<1x32x433xbf16, #tpu.memory_space<vmem>>, vector<1x32x286xbf16>
    %16 = vector.shape_cast %15 : vector<1x32x286xbf16> to vector<32x286xbf16>
    %c160 = arith.constant 160 : index
    %c0_18 = arith.constant 0 : index
    %17 = vector.load %arg6[%c160, %c0_18] : memref<288x286xbf16, #tpu.memory_space<vmem>>, vector<32x286xbf16>
    tpu.vector_store %arg6[%c160, %c0_18], %16 {strides = array<i32>} : memref<288x286xbf16, #tpu.memory_space<vmem>>, vector<32x286xbf16>,
    %c0_19 = arith.constant 0 : index
    %c0_20 = arith.constant 0 : index
    %c145 = arith.constant 145 : index
    %18 = vector.load %arg1[%c0_19, %c0_20, %c145] : memref<1x32x433xbf16, #tpu.memory_space<vmem>>, vector<1x32x286xbf16>
    %19 = vector.shape_cast %18 : vector<1x32x286xbf16> to vector<32x286xbf16>
    %c192 = arith.constant 192 : index
    %c0_21 = arith.constant 0 : index
    %20 = vector.load %arg6[%c192, %c0_21] : memref<288x286xbf16, #tpu.memory_space<vmem>>, vector<32x286xbf16>
    tpu.vector_store %arg6[%c192, %c0_21], %19 {strides = array<i32>} : memref<288x286xbf16, #tpu.memory_space<vmem>>, vector<32x286xbf16>,
    %c0_22 = arith.constant 0 : index
    %c0_23 = arith.constant 0 : index
    %c146 = arith.constant 146 : index
    %21 = vector.load %arg1[%c0_22, %c0_23, %c146] : memref<1x32x433xbf16, #tpu.memory_space<vmem>>, vector<1x32x286xbf16>
    %22 = vector.shape_cast %21 : vector<1x32x286xbf16> to vector<32x286xbf16>
    %c224 = arith.constant 224 : index
    %c0_24 = arith.constant 0 : index
    %23 = vector.load %arg6[%c224, %c0_24] : memref<288x286xbf16, #tpu.memory_space<vmem>>, vector<32x286xbf16>
    tpu.vector_store %arg6[%c224, %c0_24], %22 {strides = array<i32>} : memref<288x286xbf16, #tpu.memory_space<vmem>>, vector<32x286xbf16>,
    %c0_25 = arith.constant 0 : index
    %c0_26 = arith.constant 0 : index
    %c147 = arith.constant 147 : index
    %24 = vector.load %arg1[%c0_25, %c0_26, %c147] : memref<1x32x433xbf16, #tpu.memory_space<vmem>>, vector<1x32x286xbf16>
    %25 = vector.shape_cast %24 : vector<1x32x286xbf16> to vector<32x286xbf16>
    %c256 = arith.constant 256 : index
    %c0_27 = arith.constant 0 : index
    %26 = vector.load %arg6[%c256, %c0_27] : memref<288x286xbf16, #tpu.memory_space<vmem>>, vector<32x286xbf16>
    tpu.vector_store %arg6[%c256, %c0_27], %25 {strides = array<i32>} : memref<288x286xbf16, #tpu.memory_space<vmem>>, vector<32x286xbf16>,
    %c0_28 = arith.constant 0 : index
    %c0_29 = arith.constant 0 : index
    %27 = vector.load %arg2[%c0_28, %c0_29] : memref<16x288xbf16, #tpu.memory_space<vmem>>, vector<16x288xbf16>
    %c0_30 = arith.constant 0 : index
    %c0_31 = arith.constant 0 : index
    %28 = vector.load %arg6[%c0_30, %c0_31] : memref<288x286xbf16, #tpu.memory_space<vmem>>, vector<288x286xbf16>
    %cst = arith.constant dense<0.000000e+00> : vector<16x286xf32>
    %29 = tpu.matmul %27, %28, %cst {dimension_numbers = #tpu.dot_dimension_numbers<[1], [0], [0], [1], [0, 0, 1, 1], [], []>} : vector<16x288xbf16>, vector<288x286xbf16>, vector<16x286xf32> -> vector<16x286xf32>
    %c0_32 = arith.constant 0 : index
    %c0_33 = arith.constant 0 : index
    %30 = vector.load %arg3[%c0_32, %c0_33] : memref<16x1xf32, #tpu.memory_space<vmem>>, vector<16x1xf32>
    %31 = vector.broadcast %30 : vector<16x1xf32> to vector<16x286xf32>
    %32 = arith.addf %29, %31 : vector<16x286xf32>
    %cst_34 = arith.constant 0.000000e+00 : f32
    %33 = vector.broadcast %cst_34 : f32 to vector<16x286xf32>
    %34 = arith.cmpf oge, %32, %33 : vector<16x286xf32>
    %cst_35 = arith.constant 2.000000e-01 : f32
    %35 = vector.broadcast %cst_35 : f32 to vector<16x286xf32>
    %36 = arith.mulf %35, %32 : vector<16x286xf32>
    %37 = arith.select %34, %32, %36 : vector<16x286xi1>, vector<16x286xf32>
    %c0_36 = arith.constant 0 : index
    %c0_37 = arith.constant 0 : index
    %38 = vector.load %arg4[%c0_36, %c0_37] : memref<1x286xf32, #tpu.memory_space<vmem>>, vector<1x286xf32>
    %39 = vector.broadcast %38 : vector<1x286xf32> to vector<16x286xf32>
    %40 = arith.mulf %37, %39 : vector<16x286xf32>
    %cst_38 = arith.constant 0.000000e+00 : bf16
    %41 = vector.broadcast %cst_38 : bf16 to vector<16x128xbf16>
    %c0_39 = arith.constant 0 : index
    %c0_40 = arith.constant 0 : index
    %c0_41 = arith.constant 0 : index
    %42 = vector.load %arg5[%c0_39, %c0_40, %c0_41] : memref<1x16x433xbf16, #tpu.memory_space<vmem>>, vector<1x16x128xbf16>
    %43 = vector.shape_cast %42 : vector<1x16x128xbf16> to vector<16x128xbf16>
    %44 = vector.shape_cast %41 : vector<16x128xbf16> to vector<1x16x128xbf16>
    tpu.vector_store %arg5[%c0_39, %c0_40, %c0_41], %44 {strides = array<i32>} : memref<1x16x433xbf16, #tpu.memory_space<vmem>>, vector<1x16x128xbf16>,
    %45 = arith.truncf %40 : vector<16x286xf32> to vector<16x286xbf16>
    %c0_42 = arith.constant 0 : index
    %c0_43 = arith.constant 0 : index
    %c128_44 = arith.constant 128 : index
    %46 = vector.load %arg5[%c0_42, %c0_43, %c128_44] : memref<1x16x433xbf16, #tpu.memory_space<vmem>>, vector<1x16x286xbf16>
    %47 = vector.shape_cast %46 : vector<1x16x286xbf16> to vector<16x286xbf16>
    %48 = vector.shape_cast %45 : vector<16x286xbf16> to vector<1x16x286xbf16>
    tpu.vector_store %arg5[%c0_42, %c0_43, %c128_44], %48 {strides = array<i32>} : memref<1x16x433xbf16, #tpu.memory_space<vmem>>, vector<1x16x286xbf16>,
    %cst_45 = arith.constant 0.000000e+00 : bf16
    %49 = vector.broadcast %cst_45 : bf16 to vector<16x19xbf16>
    %c0_46 = arith.constant 0 : index
    %c0_47 = arith.constant 0 : index
    %c414 = arith.constant 414 : index
    %50 = vector.load %arg5[%c0_46, %c0_47, %c414] : memref<1x16x433xbf16, #tpu.memory_space<vmem>>, vector<1x16x19xbf16>
    %51 = vector.shape_cast %50 : vector<1x16x19xbf16> to vector<16x19xbf16>
    %52 = vector.shape_cast %49 : vector<16x19xbf16> to vector<1x16x19xbf16>
    tpu.vector_store %arg5[%c0_46, %c0_47, %c414], %52 {strides = array<i32>} : memref<1x16x433xbf16, #tpu.memory_space<vmem>>, vector<1x16x19xbf16>,
    return
  }
  func.func @transform_0(%arg0: i32) -> (i32, i32, i32) {
    %c0_i32 = arith.constant 0 : i32
    %c0_i32_0 = arith.constant 0 : i32
    %c0_i32_1 = arith.constant 0 : i32
    return %arg0, %c0_i32, %c0_i32_0 : i32, i32, i32
  }
  func.func @transform_1(%arg0: i32) -> (i32, i32) {
    %c0_i32 = arith.constant 0 : i32
    %c0_i32_0 = arith.constant 0 : i32
    %c0_i32_1 = arith.constant 0 : i32
    return %c0_i32, %c0_i32_0 : i32, i32
  }
  func.func @transform_2(%arg0: i32) -> (i32, i32) {
    %c0_i32 = arith.constant 0 : i32
    %c0_i32_0 = arith.constant 0 : i32
    %c0_i32_1 = arith.constant 0 : i32
    return %c0_i32, %c0_i32_0 : i32, i32
  }
  func.func @transform_3(%arg0: i32) -> (i32, i32) {
    %c0_i32 = arith.constant 0 : i32
    %c0_i32_0 = arith.constant 0 : i32
    %c0_i32_1 = arith.constant 0 : i32
    return %c0_i32, %c0_i32_0 : i32, i32
  }
  func.func @transform_4(%arg0: i32) -> (i32, i32, i32) {
    %c0_i32 = arith.constant 0 : i32
    %c0_i32_0 = arith.constant 0 : i32
    %c0_i32_1 = arith.constant 0 : i32
    return %arg0, %c0_i32, %c0_i32_0 : i32, i32, i32
  }
}

module attributes {stable_mosaic.version = 11 : i64} {
  func.func @_conv3x3_kernel(%arg0: i32, %arg1: memref<1x32x433xbf16, #tpu.memory_space<vmem>>, %arg2: memref<1x16x433xbf16, #tpu.memory_space<vmem>>, %arg3: memref<32x432xbf16, #tpu.memory_space<vmem>>, %arg4: memref<32x1xf32, #tpu.memory_space<vmem>>, %arg5: memref<1x286xf32, #tpu.memory_space<vmem>>, %arg6: memref<1x32x433xbf16, #tpu.memory_space<vmem>>, %arg7: memref<432x286xbf16, #tpu.memory_space<vmem>>) attributes {dimension_semantics = [#tpu.dimension_semantics<parallel>], iteration_bounds = array<i64: 2>, scalar_prefetch = 0 : i64, scratch_operands = 1 : i64, tpu.core_type = #tpu.core_type<tc>, window_params = [{transform_indices = @transform_0, window_bounds = array<i64: 1, 32, 433>}, {transform_indices = @transform_1, window_bounds = array<i64: 1, 16, 433>}, {pipeline_mode = #tpu.pipeline_mode<synchronous>, transform_indices = @transform_2, window_bounds = array<i64: 32, 432>}, {pipeline_mode = #tpu.pipeline_mode<synchronous>, transform_indices = @transform_3, window_bounds = array<i64: 32, 1>}, {pipeline_mode = #tpu.pipeline_mode<synchronous>, transform_indices = @transform_4, window_bounds = array<i64: 1, 286>}, {transform_indices = @transform_5, window_bounds = array<i64: 1, 32, 433>}]} {
    %c0 = arith.constant 0 : index
    %c0_0 = arith.constant 0 : index
    %c109 = arith.constant 109 : index
    %0 = vector.load %arg1[%c0, %c0_0, %c109] : memref<1x32x433xbf16, #tpu.memory_space<vmem>>, vector<1x32x286xbf16>
    %1 = vector.shape_cast %0 : vector<1x32x286xbf16> to vector<32x286xbf16>
    %c0_1 = arith.constant 0 : index
    %c0_2 = arith.constant 0 : index
    %2 = vector.load %arg7[%c0_1, %c0_2] : memref<432x286xbf16, #tpu.memory_space<vmem>>, vector<32x286xbf16>
    tpu.vector_store %arg7[%c0_1, %c0_2], %1 {strides = array<i32>} : memref<432x286xbf16, #tpu.memory_space<vmem>>, vector<32x286xbf16>,
    %c0_3 = arith.constant 0 : index
    %c0_4 = arith.constant 0 : index
    %c110 = arith.constant 110 : index
    %3 = vector.load %arg1[%c0_3, %c0_4, %c110] : memref<1x32x433xbf16, #tpu.memory_space<vmem>>, vector<1x32x286xbf16>
    %4 = vector.shape_cast %3 : vector<1x32x286xbf16> to vector<32x286xbf16>
    %c32 = arith.constant 32 : index
    %c0_5 = arith.constant 0 : index
    %5 = vector.load %arg7[%c32, %c0_5] : memref<432x286xbf16, #tpu.memory_space<vmem>>, vector<32x286xbf16>
    tpu.vector_store %arg7[%c32, %c0_5], %4 {strides = array<i32>} : memref<432x286xbf16, #tpu.memory_space<vmem>>, vector<32x286xbf16>,
    %c0_6 = arith.constant 0 : index
    %c0_7 = arith.constant 0 : index
    %c111 = arith.constant 111 : index
    %6 = vector.load %arg1[%c0_6, %c0_7, %c111] : memref<1x32x433xbf16, #tpu.memory_space<vmem>>, vector<1x32x286xbf16>
    %7 = vector.shape_cast %6 : vector<1x32x286xbf16> to vector<32x286xbf16>
    %c64 = arith.constant 64 : index
    %c0_8 = arith.constant 0 : index
    %8 = vector.load %arg7[%c64, %c0_8] : memref<432x286xbf16, #tpu.memory_space<vmem>>, vector<32x286xbf16>
    tpu.vector_store %arg7[%c64, %c0_8], %7 {strides = array<i32>} : memref<432x286xbf16, #tpu.memory_space<vmem>>, vector<32x286xbf16>,
    %c0_9 = arith.constant 0 : index
    %c0_10 = arith.constant 0 : index
    %c127 = arith.constant 127 : index
    %9 = vector.load %arg1[%c0_9, %c0_10, %c127] : memref<1x32x433xbf16, #tpu.memory_space<vmem>>, vector<1x32x286xbf16>
    %10 = vector.shape_cast %9 : vector<1x32x286xbf16> to vector<32x286xbf16>
    %c96 = arith.constant 96 : index
    %c0_11 = arith.constant 0 : index
    %11 = vector.load %arg7[%c96, %c0_11] : memref<432x286xbf16, #tpu.memory_space<vmem>>, vector<32x286xbf16>
    tpu.vector_store %arg7[%c96, %c0_11], %10 {strides = array<i32>} : memref<432x286xbf16, #tpu.memory_space<vmem>>, vector<32x286xbf16>,
    %c0_12 = arith.constant 0 : index
    %c0_13 = arith.constant 0 : index
    %c128 = arith.constant 128 : index
    %12 = vector.load %arg1[%c0_12, %c0_13, %c128] : memref<1x32x433xbf16, #tpu.memory_space<vmem>>, vector<1x32x286xbf16>
    %13 = vector.shape_cast %12 : vector<1x32x286xbf16> to vector<32x286xbf16>
    %c128_14 = arith.constant 128 : index
    %c0_15 = arith.constant 0 : index
    %14 = vector.load %arg7[%c128_14, %c0_15] : memref<432x286xbf16, #tpu.memory_space<vmem>>, vector<32x286xbf16>
    tpu.vector_store %arg7[%c128_14, %c0_15], %13 {strides = array<i32>} : memref<432x286xbf16, #tpu.memory_space<vmem>>, vector<32x286xbf16>,
    %c0_16 = arith.constant 0 : index
    %c0_17 = arith.constant 0 : index
    %c129 = arith.constant 129 : index
    %15 = vector.load %arg1[%c0_16, %c0_17, %c129] : memref<1x32x433xbf16, #tpu.memory_space<vmem>>, vector<1x32x286xbf16>
    %16 = vector.shape_cast %15 : vector<1x32x286xbf16> to vector<32x286xbf16>
    %c160 = arith.constant 160 : index
    %c0_18 = arith.constant 0 : index
    %17 = vector.load %arg7[%c160, %c0_18] : memref<432x286xbf16, #tpu.memory_space<vmem>>, vector<32x286xbf16>
    tpu.vector_store %arg7[%c160, %c0_18], %16 {strides = array<i32>} : memref<432x286xbf16, #tpu.memory_space<vmem>>, vector<32x286xbf16>,
    %c0_19 = arith.constant 0 : index
    %c0_20 = arith.constant 0 : index
    %c145 = arith.constant 145 : index
    %18 = vector.load %arg1[%c0_19, %c0_20, %c145] : memref<1x32x433xbf16, #tpu.memory_space<vmem>>, vector<1x32x286xbf16>
    %19 = vector.shape_cast %18 : vector<1x32x286xbf16> to vector<32x286xbf16>
    %c192 = arith.constant 192 : index
    %c0_21 = arith.constant 0 : index
    %20 = vector.load %arg7[%c192, %c0_21] : memref<432x286xbf16, #tpu.memory_space<vmem>>, vector<32x286xbf16>
    tpu.vector_store %arg7[%c192, %c0_21], %19 {strides = array<i32>} : memref<432x286xbf16, #tpu.memory_space<vmem>>, vector<32x286xbf16>,
    %c0_22 = arith.constant 0 : index
    %c0_23 = arith.constant 0 : index
    %c146 = arith.constant 146 : index
    %21 = vector.load %arg1[%c0_22, %c0_23, %c146] : memref<1x32x433xbf16, #tpu.memory_space<vmem>>, vector<1x32x286xbf16>
    %22 = vector.shape_cast %21 : vector<1x32x286xbf16> to vector<32x286xbf16>
    %c224 = arith.constant 224 : index
    %c0_24 = arith.constant 0 : index
    %23 = vector.load %arg7[%c224, %c0_24] : memref<432x286xbf16, #tpu.memory_space<vmem>>, vector<32x286xbf16>
    tpu.vector_store %arg7[%c224, %c0_24], %22 {strides = array<i32>} : memref<432x286xbf16, #tpu.memory_space<vmem>>, vector<32x286xbf16>,
    %c0_25 = arith.constant 0 : index
    %c0_26 = arith.constant 0 : index
    %c147 = arith.constant 147 : index
    %24 = vector.load %arg1[%c0_25, %c0_26, %c147] : memref<1x32x433xbf16, #tpu.memory_space<vmem>>, vector<1x32x286xbf16>
    %25 = vector.shape_cast %24 : vector<1x32x286xbf16> to vector<32x286xbf16>
    %c256 = arith.constant 256 : index
    %c0_27 = arith.constant 0 : index
    %26 = vector.load %arg7[%c256, %c0_27] : memref<432x286xbf16, #tpu.memory_space<vmem>>, vector<32x286xbf16>
    tpu.vector_store %arg7[%c256, %c0_27], %25 {strides = array<i32>} : memref<432x286xbf16, #tpu.memory_space<vmem>>, vector<32x286xbf16>,
    %c0_28 = arith.constant 0 : index
    %c0_29 = arith.constant 0 : index
    %c109_30 = arith.constant 109 : index
    %27 = vector.load %arg2[%c0_28, %c0_29, %c109_30] : memref<1x16x433xbf16, #tpu.memory_space<vmem>>, vector<1x16x286xbf16>
    %28 = vector.shape_cast %27 : vector<1x16x286xbf16> to vector<16x286xbf16>
    %c288 = arith.constant 288 : index
    %c0_31 = arith.constant 0 : index
    %29 = vector.load %arg7[%c288, %c0_31] : memref<432x286xbf16, #tpu.memory_space<vmem>>, vector<16x286xbf16>
    tpu.vector_store %arg7[%c288, %c0_31], %28 {strides = array<i32>} : memref<432x286xbf16, #tpu.memory_space<vmem>>, vector<16x286xbf16>,
    %c0_32 = arith.constant 0 : index
    %c0_33 = arith.constant 0 : index
    %c110_34 = arith.constant 110 : index
    %30 = vector.load %arg2[%c0_32, %c0_33, %c110_34] : memref<1x16x433xbf16, #tpu.memory_space<vmem>>, vector<1x16x286xbf16>
    %31 = vector.shape_cast %30 : vector<1x16x286xbf16> to vector<16x286xbf16>
    %c304 = arith.constant 304 : index
    %c0_35 = arith.constant 0 : index
    %32 = vector.load %arg7[%c304, %c0_35] : memref<432x286xbf16, #tpu.memory_space<vmem>>, vector<16x286xbf16>
    tpu.vector_store %arg7[%c304, %c0_35], %31 {strides = array<i32>} : memref<432x286xbf16, #tpu.memory_space<vmem>>, vector<16x286xbf16>,
    %c0_36 = arith.constant 0 : index
    %c0_37 = arith.constant 0 : index
    %c111_38 = arith.constant 111 : index
    %33 = vector.load %arg2[%c0_36, %c0_37, %c111_38] : memref<1x16x433xbf16, #tpu.memory_space<vmem>>, vector<1x16x286xbf16>
    %34 = vector.shape_cast %33 : vector<1x16x286xbf16> to vector<16x286xbf16>
    %c320 = arith.constant 320 : index
    %c0_39 = arith.constant 0 : index
    %35 = vector.load %arg7[%c320, %c0_39] : memref<432x286xbf16, #tpu.memory_space<vmem>>, vector<16x286xbf16>
    tpu.vector_store %arg7[%c320, %c0_39], %34 {strides = array<i32>} : memref<432x286xbf16, #tpu.memory_space<vmem>>, vector<16x286xbf16>,
    %c0_40 = arith.constant 0 : index
    %c0_41 = arith.constant 0 : index
    %c127_42 = arith.constant 127 : index
    %36 = vector.load %arg2[%c0_40, %c0_41, %c127_42] : memref<1x16x433xbf16, #tpu.memory_space<vmem>>, vector<1x16x286xbf16>
    %37 = vector.shape_cast %36 : vector<1x16x286xbf16> to vector<16x286xbf16>
    %c336 = arith.constant 336 : index
    %c0_43 = arith.constant 0 : index
    %38 = vector.load %arg7[%c336, %c0_43] : memref<432x286xbf16, #tpu.memory_space<vmem>>, vector<16x286xbf16>
    tpu.vector_store %arg7[%c336, %c0_43], %37 {strides = array<i32>} : memref<432x286xbf16, #tpu.memory_space<vmem>>, vector<16x286xbf16>,
    %c0_44 = arith.constant 0 : index
    %c0_45 = arith.constant 0 : index
    %c128_46 = arith.constant 128 : index
    %39 = vector.load %arg2[%c0_44, %c0_45, %c128_46] : memref<1x16x433xbf16, #tpu.memory_space<vmem>>, vector<1x16x286xbf16>
    %40 = vector.shape_cast %39 : vector<1x16x286xbf16> to vector<16x286xbf16>
    %c352 = arith.constant 352 : index
    %c0_47 = arith.constant 0 : index
    %41 = vector.load %arg7[%c352, %c0_47] : memref<432x286xbf16, #tpu.memory_space<vmem>>, vector<16x286xbf16>
    tpu.vector_store %arg7[%c352, %c0_47], %40 {strides = array<i32>} : memref<432x286xbf16, #tpu.memory_space<vmem>>, vector<16x286xbf16>,
    %c0_48 = arith.constant 0 : index
    %c0_49 = arith.constant 0 : index
    %c129_50 = arith.constant 129 : index
    %42 = vector.load %arg2[%c0_48, %c0_49, %c129_50] : memref<1x16x433xbf16, #tpu.memory_space<vmem>>, vector<1x16x286xbf16>
    %43 = vector.shape_cast %42 : vector<1x16x286xbf16> to vector<16x286xbf16>
    %c368 = arith.constant 368 : index
    %c0_51 = arith.constant 0 : index
    %44 = vector.load %arg7[%c368, %c0_51] : memref<432x286xbf16, #tpu.memory_space<vmem>>, vector<16x286xbf16>
    tpu.vector_store %arg7[%c368, %c0_51], %43 {strides = array<i32>} : memref<432x286xbf16, #tpu.memory_space<vmem>>, vector<16x286xbf16>,
    %c0_52 = arith.constant 0 : index
    %c0_53 = arith.constant 0 : index
    %c145_54 = arith.constant 145 : index
    %45 = vector.load %arg2[%c0_52, %c0_53, %c145_54] : memref<1x16x433xbf16, #tpu.memory_space<vmem>>, vector<1x16x286xbf16>
    %46 = vector.shape_cast %45 : vector<1x16x286xbf16> to vector<16x286xbf16>
    %c384 = arith.constant 384 : index
    %c0_55 = arith.constant 0 : index
    %47 = vector.load %arg7[%c384, %c0_55] : memref<432x286xbf16, #tpu.memory_space<vmem>>, vector<16x286xbf16>
    tpu.vector_store %arg7[%c384, %c0_55], %46 {strides = array<i32>} : memref<432x286xbf16, #tpu.memory_space<vmem>>, vector<16x286xbf16>,
    %c0_56 = arith.constant 0 : index
    %c0_57 = arith.constant 0 : index
    %c146_58 = arith.constant 146 : index
    %48 = vector.load %arg2[%c0_56, %c0_57, %c146_58] : memref<1x16x433xbf16, #tpu.memory_space<vmem>>, vector<1x16x286xbf16>
    %49 = vector.shape_cast %48 : vector<1x16x286xbf16> to vector<16x286xbf16>
    %c400 = arith.constant 400 : index
    %c0_59 = arith.constant 0 : index
    %50 = vector.load %arg7[%c400, %c0_59] : memref<432x286xbf16, #tpu.memory_space<vmem>>, vector<16x286xbf16>
    tpu.vector_store %arg7[%c400, %c0_59], %49 {strides = array<i32>} : memref<432x286xbf16, #tpu.memory_space<vmem>>, vector<16x286xbf16>,
    %c0_60 = arith.constant 0 : index
    %c0_61 = arith.constant 0 : index
    %c147_62 = arith.constant 147 : index
    %51 = vector.load %arg2[%c0_60, %c0_61, %c147_62] : memref<1x16x433xbf16, #tpu.memory_space<vmem>>, vector<1x16x286xbf16>
    %52 = vector.shape_cast %51 : vector<1x16x286xbf16> to vector<16x286xbf16>
    %c416 = arith.constant 416 : index
    %c0_63 = arith.constant 0 : index
    %53 = vector.load %arg7[%c416, %c0_63] : memref<432x286xbf16, #tpu.memory_space<vmem>>, vector<16x286xbf16>
    tpu.vector_store %arg7[%c416, %c0_63], %52 {strides = array<i32>} : memref<432x286xbf16, #tpu.memory_space<vmem>>, vector<16x286xbf16>,
    %c0_64 = arith.constant 0 : index
    %c0_65 = arith.constant 0 : index
    %54 = vector.load %arg3[%c0_64, %c0_65] : memref<32x432xbf16, #tpu.memory_space<vmem>>, vector<32x432xbf16>
    %c0_66 = arith.constant 0 : index
    %c0_67 = arith.constant 0 : index
    %55 = vector.load %arg7[%c0_66, %c0_67] : memref<432x286xbf16, #tpu.memory_space<vmem>>, vector<432x286xbf16>
    %cst = arith.constant dense<0.000000e+00> : vector<32x286xf32>
    %56 = tpu.matmul %54, %55, %cst {dimension_numbers = #tpu.dot_dimension_numbers<[1], [0], [0], [1], [0, 0, 1, 1], [], []>} : vector<32x432xbf16>, vector<432x286xbf16>, vector<32x286xf32> -> vector<32x286xf32>
    %c0_68 = arith.constant 0 : index
    %c0_69 = arith.constant 0 : index
    %57 = vector.load %arg4[%c0_68, %c0_69] : memref<32x1xf32, #tpu.memory_space<vmem>>, vector<32x1xf32>
    %58 = vector.broadcast %57 : vector<32x1xf32> to vector<32x286xf32>
    %59 = arith.addf %56, %58 : vector<32x286xf32>
    %cst_70 = arith.constant 0.000000e+00 : f32
    %60 = vector.broadcast %cst_70 : f32 to vector<32x286xf32>
    %61 = arith.cmpf oge, %59, %60 : vector<32x286xf32>
    %cst_71 = arith.constant 2.000000e-01 : f32
    %62 = vector.broadcast %cst_71 : f32 to vector<32x286xf32>
    %63 = arith.mulf %62, %59 : vector<32x286xf32>
    %64 = arith.select %61, %59, %63 : vector<32x286xi1>, vector<32x286xf32>
    %c0_72 = arith.constant 0 : index
    %c0_73 = arith.constant 0 : index
    %65 = vector.load %arg5[%c0_72, %c0_73] : memref<1x286xf32, #tpu.memory_space<vmem>>, vector<1x286xf32>
    %66 = vector.broadcast %65 : vector<1x286xf32> to vector<32x286xf32>
    %67 = arith.mulf %64, %66 : vector<32x286xf32>
    %cst_74 = arith.constant 0.000000e+00 : bf16
    %68 = vector.broadcast %cst_74 : bf16 to vector<32x128xbf16>
    %c0_75 = arith.constant 0 : index
    %c0_76 = arith.constant 0 : index
    %c0_77 = arith.constant 0 : index
    %69 = vector.load %arg6[%c0_75, %c0_76, %c0_77] : memref<1x32x433xbf16, #tpu.memory_space<vmem>>, vector<1x32x128xbf16>
    %70 = vector.shape_cast %69 : vector<1x32x128xbf16> to vector<32x128xbf16>
    %71 = vector.shape_cast %68 : vector<32x128xbf16> to vector<1x32x128xbf16>
    tpu.vector_store %arg6[%c0_75, %c0_76, %c0_77], %71 {strides = array<i32>} : memref<1x32x433xbf16, #tpu.memory_space<vmem>>, vector<1x32x128xbf16>,
    %72 = arith.truncf %67 : vector<32x286xf32> to vector<32x286xbf16>
    %c0_78 = arith.constant 0 : index
    %c0_79 = arith.constant 0 : index
    %c128_80 = arith.constant 128 : index
    %73 = vector.load %arg6[%c0_78, %c0_79, %c128_80] : memref<1x32x433xbf16, #tpu.memory_space<vmem>>, vector<1x32x286xbf16>
    %74 = vector.shape_cast %73 : vector<1x32x286xbf16> to vector<32x286xbf16>
    %75 = vector.shape_cast %72 : vector<32x286xbf16> to vector<1x32x286xbf16>
    tpu.vector_store %arg6[%c0_78, %c0_79, %c128_80], %75 {strides = array<i32>} : memref<1x32x433xbf16, #tpu.memory_space<vmem>>, vector<1x32x286xbf16>,
    %cst_81 = arith.constant 0.000000e+00 : bf16
    %76 = vector.broadcast %cst_81 : bf16 to vector<32x19xbf16>
    %c0_82 = arith.constant 0 : index
    %c0_83 = arith.constant 0 : index
    %c414 = arith.constant 414 : index
    %77 = vector.load %arg6[%c0_82, %c0_83, %c414] : memref<1x32x433xbf16, #tpu.memory_space<vmem>>, vector<1x32x19xbf16>
    %78 = vector.shape_cast %77 : vector<1x32x19xbf16> to vector<32x19xbf16>
    %79 = vector.shape_cast %76 : vector<32x19xbf16> to vector<1x32x19xbf16>
    tpu.vector_store %arg6[%c0_82, %c0_83, %c414], %79 {strides = array<i32>} : memref<1x32x433xbf16, #tpu.memory_space<vmem>>, vector<1x32x19xbf16>,
    return
  }
  func.func @transform_0(%arg0: i32) -> (i32, i32, i32) {
    %c0_i32 = arith.constant 0 : i32
    %c0_i32_0 = arith.constant 0 : i32
    %c0_i32_1 = arith.constant 0 : i32
    return %arg0, %c0_i32, %c0_i32_0 : i32, i32, i32
  }
  func.func @transform_1(%arg0: i32) -> (i32, i32, i32) {
    %c0_i32 = arith.constant 0 : i32
    %c0_i32_0 = arith.constant 0 : i32
    %c0_i32_1 = arith.constant 0 : i32
    return %arg0, %c0_i32, %c0_i32_0 : i32, i32, i32
  }
  func.func @transform_2(%arg0: i32) -> (i32, i32) {
    %c0_i32 = arith.constant 0 : i32
    %c0_i32_0 = arith.constant 0 : i32
    %c0_i32_1 = arith.constant 0 : i32
    return %c0_i32, %c0_i32_0 : i32, i32
  }
  func.func @transform_3(%arg0: i32) -> (i32, i32) {
    %c0_i32 = arith.constant 0 : i32
    %c0_i32_0 = arith.constant 0 : i32
    %c0_i32_1 = arith.constant 0 : i32
    return %c0_i32, %c0_i32_0 : i32, i32
  }
  func.func @transform_4(%arg0: i32) -> (i32, i32) {
    %c0_i32 = arith.constant 0 : i32
    %c0_i32_0 = arith.constant 0 : i32
    %c0_i32_1 = arith.constant 0 : i32
    return %c0_i32, %c0_i32_0 : i32, i32
  }
  func.func @transform_5(%arg0: i32) -> (i32, i32, i32) {
    %c0_i32 = arith.constant 0 : i32
    %c0_i32_0 = arith.constant 0 : i32
    %c0_i32_1 = arith.constant 0 : i32
    return %arg0, %c0_i32, %c0_i32_0 : i32, i32, i32
  }
}

module attributes {stable_mosaic.version = 11 : i64} {
  func.func @_head_kernel(%arg0: i32, %arg1: memref<1x16x433xbf16, #tpu.memory_space<vmem>>, %arg2: memref<16x144xbf16, #tpu.memory_space<vmem>>, %arg3: memref<16x1xf32, #tpu.memory_space<vmem>>, %arg4: memref<2x144xbf16, #tpu.memory_space<vmem>>, %arg5: memref<2x1xf32, #tpu.memory_space<vmem>>, %arg6: memref<1x286xf32, #tpu.memory_space<vmem>>, %arg7: memref<1x2x433xf32, #tpu.memory_space<vmem>>, %arg8: memref<16x433xbf16, #tpu.memory_space<vmem>>, %arg9: memref<144x286xbf16, #tpu.memory_space<vmem>>) attributes {dimension_semantics = [#tpu.dimension_semantics<parallel>], iteration_bounds = array<i64: 2>, scalar_prefetch = 0 : i64, scratch_operands = 2 : i64, tpu.core_type = #tpu.core_type<tc>, window_params = [{transform_indices = @transform_0, window_bounds = array<i64: 1, 16, 433>}, {pipeline_mode = #tpu.pipeline_mode<synchronous>, transform_indices = @transform_1, window_bounds = array<i64: 16, 144>}, {pipeline_mode = #tpu.pipeline_mode<synchronous>, transform_indices = @transform_2, window_bounds = array<i64: 16, 1>}, {pipeline_mode = #tpu.pipeline_mode<synchronous>, transform_indices = @transform_3, window_bounds = array<i64: 2, 144>}, {pipeline_mode = #tpu.pipeline_mode<synchronous>, transform_indices = @transform_4, window_bounds = array<i64: 2, 1>}, {pipeline_mode = #tpu.pipeline_mode<synchronous>, transform_indices = @transform_5, window_bounds = array<i64: 1, 286>}, {transform_indices = @transform_6, window_bounds = array<i64: 1, 2, 433>}]} {
    %c0 = arith.constant 0 : index
    %c0_0 = arith.constant 0 : index
    %c109 = arith.constant 109 : index
    %0 = vector.load %arg1[%c0, %c0_0, %c109] : memref<1x16x433xbf16, #tpu.memory_space<vmem>>, vector<1x16x286xbf16>
    %1 = vector.shape_cast %0 : vector<1x16x286xbf16> to vector<16x286xbf16>
    %c0_1 = arith.constant 0 : index
    %c0_2 = arith.constant 0 : index
    %2 = vector.load %arg9[%c0_1, %c0_2] : memref<144x286xbf16, #tpu.memory_space<vmem>>, vector<16x286xbf16>
    tpu.vector_store %arg9[%c0_1, %c0_2], %1 {strides = array<i32>} : memref<144x286xbf16, #tpu.memory_space<vmem>>, vector<16x286xbf16>,
    %c0_3 = arith.constant 0 : index
    %c0_4 = arith.constant 0 : index
    %c110 = arith.constant 110 : index
    %3 = vector.load %arg1[%c0_3, %c0_4, %c110] : memref<1x16x433xbf16, #tpu.memory_space<vmem>>, vector<1x16x286xbf16>
    %4 = vector.shape_cast %3 : vector<1x16x286xbf16> to vector<16x286xbf16>
    %c16 = arith.constant 16 : index
    %c0_5 = arith.constant 0 : index
    %5 = vector.load %arg9[%c16, %c0_5] : memref<144x286xbf16, #tpu.memory_space<vmem>>, vector<16x286xbf16>
    tpu.vector_store %arg9[%c16, %c0_5], %4 {strides = array<i32>} : memref<144x286xbf16, #tpu.memory_space<vmem>>, vector<16x286xbf16>,
    %c0_6 = arith.constant 0 : index
    %c0_7 = arith.constant 0 : index
    %c111 = arith.constant 111 : index
    %6 = vector.load %arg1[%c0_6, %c0_7, %c111] : memref<1x16x433xbf16, #tpu.memory_space<vmem>>, vector<1x16x286xbf16>
    %7 = vector.shape_cast %6 : vector<1x16x286xbf16> to vector<16x286xbf16>
    %c32 = arith.constant 32 : index
    %c0_8 = arith.constant 0 : index
    %8 = vector.load %arg9[%c32, %c0_8] : memref<144x286xbf16, #tpu.memory_space<vmem>>, vector<16x286xbf16>
    tpu.vector_store %arg9[%c32, %c0_8], %7 {strides = array<i32>} : memref<144x286xbf16, #tpu.memory_space<vmem>>, vector<16x286xbf16>,
    %c0_9 = arith.constant 0 : index
    %c0_10 = arith.constant 0 : index
    %c127 = arith.constant 127 : index
    %9 = vector.load %arg1[%c0_9, %c0_10, %c127] : memref<1x16x433xbf16, #tpu.memory_space<vmem>>, vector<1x16x286xbf16>
    %10 = vector.shape_cast %9 : vector<1x16x286xbf16> to vector<16x286xbf16>
    %c48 = arith.constant 48 : index
    %c0_11 = arith.constant 0 : index
    %11 = vector.load %arg9[%c48, %c0_11] : memref<144x286xbf16, #tpu.memory_space<vmem>>, vector<16x286xbf16>
    tpu.vector_store %arg9[%c48, %c0_11], %10 {strides = array<i32>} : memref<144x286xbf16, #tpu.memory_space<vmem>>, vector<16x286xbf16>,
    %c0_12 = arith.constant 0 : index
    %c0_13 = arith.constant 0 : index
    %c128 = arith.constant 128 : index
    %12 = vector.load %arg1[%c0_12, %c0_13, %c128] : memref<1x16x433xbf16, #tpu.memory_space<vmem>>, vector<1x16x286xbf16>
    %13 = vector.shape_cast %12 : vector<1x16x286xbf16> to vector<16x286xbf16>
    %c64 = arith.constant 64 : index
    %c0_14 = arith.constant 0 : index
    %14 = vector.load %arg9[%c64, %c0_14] : memref<144x286xbf16, #tpu.memory_space<vmem>>, vector<16x286xbf16>
    tpu.vector_store %arg9[%c64, %c0_14], %13 {strides = array<i32>} : memref<144x286xbf16, #tpu.memory_space<vmem>>, vector<16x286xbf16>,
    %c0_15 = arith.constant 0 : index
    %c0_16 = arith.constant 0 : index
    %c129 = arith.constant 129 : index
    %15 = vector.load %arg1[%c0_15, %c0_16, %c129] : memref<1x16x433xbf16, #tpu.memory_space<vmem>>, vector<1x16x286xbf16>
    %16 = vector.shape_cast %15 : vector<1x16x286xbf16> to vector<16x286xbf16>
    %c80 = arith.constant 80 : index
    %c0_17 = arith.constant 0 : index
    %17 = vector.load %arg9[%c80, %c0_17] : memref<144x286xbf16, #tpu.memory_space<vmem>>, vector<16x286xbf16>
    tpu.vector_store %arg9[%c80, %c0_17], %16 {strides = array<i32>} : memref<144x286xbf16, #tpu.memory_space<vmem>>, vector<16x286xbf16>,
    %c0_18 = arith.constant 0 : index
    %c0_19 = arith.constant 0 : index
    %c145 = arith.constant 145 : index
    %18 = vector.load %arg1[%c0_18, %c0_19, %c145] : memref<1x16x433xbf16, #tpu.memory_space<vmem>>, vector<1x16x286xbf16>
    %19 = vector.shape_cast %18 : vector<1x16x286xbf16> to vector<16x286xbf16>
    %c96 = arith.constant 96 : index
    %c0_20 = arith.constant 0 : index
    %20 = vector.load %arg9[%c96, %c0_20] : memref<144x286xbf16, #tpu.memory_space<vmem>>, vector<16x286xbf16>
    tpu.vector_store %arg9[%c96, %c0_20], %19 {strides = array<i32>} : memref<144x286xbf16, #tpu.memory_space<vmem>>, vector<16x286xbf16>,
    %c0_21 = arith.constant 0 : index
    %c0_22 = arith.constant 0 : index
    %c146 = arith.constant 146 : index
    %21 = vector.load %arg1[%c0_21, %c0_22, %c146] : memref<1x16x433xbf16, #tpu.memory_space<vmem>>, vector<1x16x286xbf16>
    %22 = vector.shape_cast %21 : vector<1x16x286xbf16> to vector<16x286xbf16>
    %c112 = arith.constant 112 : index
    %c0_23 = arith.constant 0 : index
    %23 = vector.load %arg9[%c112, %c0_23] : memref<144x286xbf16, #tpu.memory_space<vmem>>, vector<16x286xbf16>
    tpu.vector_store %arg9[%c112, %c0_23], %22 {strides = array<i32>} : memref<144x286xbf16, #tpu.memory_space<vmem>>, vector<16x286xbf16>,
    %c0_24 = arith.constant 0 : index
    %c0_25 = arith.constant 0 : index
    %c147 = arith.constant 147 : index
    %24 = vector.load %arg1[%c0_24, %c0_25, %c147] : memref<1x16x433xbf16, #tpu.memory_space<vmem>>, vector<1x16x286xbf16>
    %25 = vector.shape_cast %24 : vector<1x16x286xbf16> to vector<16x286xbf16>
    %c128_26 = arith.constant 128 : index
    %c0_27 = arith.constant 0 : index
    %26 = vector.load %arg9[%c128_26, %c0_27] : memref<144x286xbf16, #tpu.memory_space<vmem>>, vector<16x286xbf16>
    tpu.vector_store %arg9[%c128_26, %c0_27], %25 {strides = array<i32>} : memref<144x286xbf16, #tpu.memory_space<vmem>>, vector<16x286xbf16>,
    %c0_28 = arith.constant 0 : index
    %c0_29 = arith.constant 0 : index
    %27 = vector.load %arg2[%c0_28, %c0_29] : memref<16x144xbf16, #tpu.memory_space<vmem>>, vector<16x144xbf16>
    %c0_30 = arith.constant 0 : index
    %c0_31 = arith.constant 0 : index
    %28 = vector.load %arg9[%c0_30, %c0_31] : memref<144x286xbf16, #tpu.memory_space<vmem>>, vector<144x286xbf16>
    %cst = arith.constant dense<0.000000e+00> : vector<16x286xf32>
    %29 = tpu.matmul %27, %28, %cst {dimension_numbers = #tpu.dot_dimension_numbers<[1], [0], [0], [1], [0, 0, 1, 1], [], []>} : vector<16x144xbf16>, vector<144x286xbf16>, vector<16x286xf32> -> vector<16x286xf32>
    %c0_32 = arith.constant 0 : index
    %c0_33 = arith.constant 0 : index
    %30 = vector.load %arg3[%c0_32, %c0_33] : memref<16x1xf32, #tpu.memory_space<vmem>>, vector<16x1xf32>
    %31 = vector.broadcast %30 : vector<16x1xf32> to vector<16x286xf32>
    %32 = arith.addf %29, %31 : vector<16x286xf32>
    %cst_34 = arith.constant 0.000000e+00 : f32
    %33 = vector.broadcast %cst_34 : f32 to vector<16x286xf32>
    %34 = arith.cmpf oge, %32, %33 : vector<16x286xf32>
    %cst_35 = arith.constant 2.000000e-01 : f32
    %35 = vector.broadcast %cst_35 : f32 to vector<16x286xf32>
    %36 = arith.mulf %35, %32 : vector<16x286xf32>
    %37 = arith.select %34, %32, %36 : vector<16x286xi1>, vector<16x286xf32>
    %c0_36 = arith.constant 0 : index
    %c0_37 = arith.constant 0 : index
    %38 = vector.load %arg6[%c0_36, %c0_37] : memref<1x286xf32, #tpu.memory_space<vmem>>, vector<1x286xf32>
    %39 = vector.broadcast %38 : vector<1x286xf32> to vector<16x286xf32>
    %40 = arith.mulf %37, %39 : vector<16x286xf32>
    %cst_38 = arith.constant 0.000000e+00 : bf16
    %41 = vector.broadcast %cst_38 : bf16 to vector<16x128xbf16>
    %c0_39 = arith.constant 0 : index
    %c0_40 = arith.constant 0 : index
    %42 = vector.load %arg8[%c0_39, %c0_40] : memref<16x433xbf16, #tpu.memory_space<vmem>>, vector<16x128xbf16>
    tpu.vector_store %arg8[%c0_39, %c0_40], %41 {strides = array<i32>} : memref<16x433xbf16, #tpu.memory_space<vmem>>, vector<16x128xbf16>,
    %43 = arith.truncf %40 : vector<16x286xf32> to vector<16x286xbf16>
    %c0_41 = arith.constant 0 : index
    %c128_42 = arith.constant 128 : index
    %44 = vector.load %arg8[%c0_41, %c128_42] : memref<16x433xbf16, #tpu.memory_space<vmem>>, vector<16x286xbf16>
    tpu.vector_store %arg8[%c0_41, %c128_42], %43 {strides = array<i32>} : memref<16x433xbf16, #tpu.memory_space<vmem>>, vector<16x286xbf16>,
    %cst_43 = arith.constant 0.000000e+00 : bf16
    %45 = vector.broadcast %cst_43 : bf16 to vector<16x19xbf16>
    %c0_44 = arith.constant 0 : index
    %c414 = arith.constant 414 : index
    %46 = vector.load %arg8[%c0_44, %c414] : memref<16x433xbf16, #tpu.memory_space<vmem>>, vector<16x19xbf16>
    tpu.vector_store %arg8[%c0_44, %c414], %45 {strides = array<i32>} : memref<16x433xbf16, #tpu.memory_space<vmem>>, vector<16x19xbf16>,
    %c0_45 = arith.constant 0 : index
    %c109_46 = arith.constant 109 : index
    %47 = vector.load %arg8[%c0_45, %c109_46] : memref<16x433xbf16, #tpu.memory_space<vmem>>, vector<16x286xbf16>
    %c0_47 = arith.constant 0 : index
    %c0_48 = arith.constant 0 : index
    %48 = vector.load %arg9[%c0_47, %c0_48] : memref<144x286xbf16, #tpu.memory_space<vmem>>, vector<16x286xbf16>
    tpu.vector_store %arg9[%c0_47, %c0_48], %47 {strides = array<i32>} : memref<144x286xbf16, #tpu.memory_space<vmem>>, vector<16x286xbf16>,
    %c0_49 = arith.constant 0 : index
    %c110_50 = arith.constant 110 : index
    %49 = vector.load %arg8[%c0_49, %c110_50] : memref<16x433xbf16, #tpu.memory_space<vmem>>, vector<16x286xbf16>
    %c16_51 = arith.constant 16 : index
    %c0_52 = arith.constant 0 : index
    %50 = vector.load %arg9[%c16_51, %c0_52] : memref<144x286xbf16, #tpu.memory_space<vmem>>, vector<16x286xbf16>
    tpu.vector_store %arg9[%c16_51, %c0_52], %49 {strides = array<i32>} : memref<144x286xbf16, #tpu.memory_space<vmem>>, vector<16x286xbf16>,
    %c0_53 = arith.constant 0 : index
    %c111_54 = arith.constant 111 : index
    %51 = vector.load %arg8[%c0_53, %c111_54] : memref<16x433xbf16, #tpu.memory_space<vmem>>, vector<16x286xbf16>
    %c32_55 = arith.constant 32 : index
    %c0_56 = arith.constant 0 : index
    %52 = vector.load %arg9[%c32_55, %c0_56] : memref<144x286xbf16, #tpu.memory_space<vmem>>, vector<16x286xbf16>
    tpu.vector_store %arg9[%c32_55, %c0_56], %51 {strides = array<i32>} : memref<144x286xbf16, #tpu.memory_space<vmem>>, vector<16x286xbf16>,
    %c0_57 = arith.constant 0 : index
    %c127_58 = arith.constant 127 : index
    %53 = vector.load %arg8[%c0_57, %c127_58] : memref<16x433xbf16, #tpu.memory_space<vmem>>, vector<16x286xbf16>
    %c48_59 = arith.constant 48 : index
    %c0_60 = arith.constant 0 : index
    %54 = vector.load %arg9[%c48_59, %c0_60] : memref<144x286xbf16, #tpu.memory_space<vmem>>, vector<16x286xbf16>
    tpu.vector_store %arg9[%c48_59, %c0_60], %53 {strides = array<i32>} : memref<144x286xbf16, #tpu.memory_space<vmem>>, vector<16x286xbf16>,
    %c0_61 = arith.constant 0 : index
    %c128_62 = arith.constant 128 : index
    %55 = vector.load %arg8[%c0_61, %c128_62] : memref<16x433xbf16, #tpu.memory_space<vmem>>, vector<16x286xbf16>
    %c64_63 = arith.constant 64 : index
    %c0_64 = arith.constant 0 : index
    %56 = vector.load %arg9[%c64_63, %c0_64] : memref<144x286xbf16, #tpu.memory_space<vmem>>, vector<16x286xbf16>
    tpu.vector_store %arg9[%c64_63, %c0_64], %55 {strides = array<i32>} : memref<144x286xbf16, #tpu.memory_space<vmem>>, vector<16x286xbf16>,
    %c0_65 = arith.constant 0 : index
    %c129_66 = arith.constant 129 : index
    %57 = vector.load %arg8[%c0_65, %c129_66] : memref<16x433xbf16, #tpu.memory_space<vmem>>, vector<16x286xbf16>
    %c80_67 = arith.constant 80 : index
    %c0_68 = arith.constant 0 : index
    %58 = vector.load %arg9[%c80_67, %c0_68] : memref<144x286xbf16, #tpu.memory_space<vmem>>, vector<16x286xbf16>
    tpu.vector_store %arg9[%c80_67, %c0_68], %57 {strides = array<i32>} : memref<144x286xbf16, #tpu.memory_space<vmem>>, vector<16x286xbf16>,
    %c0_69 = arith.constant 0 : index
    %c145_70 = arith.constant 145 : index
    %59 = vector.load %arg8[%c0_69, %c145_70] : memref<16x433xbf16, #tpu.memory_space<vmem>>, vector<16x286xbf16>
    %c96_71 = arith.constant 96 : index
    %c0_72 = arith.constant 0 : index
    %60 = vector.load %arg9[%c96_71, %c0_72] : memref<144x286xbf16, #tpu.memory_space<vmem>>, vector<16x286xbf16>
    tpu.vector_store %arg9[%c96_71, %c0_72], %59 {strides = array<i32>} : memref<144x286xbf16, #tpu.memory_space<vmem>>, vector<16x286xbf16>,
    %c0_73 = arith.constant 0 : index
    %c146_74 = arith.constant 146 : index
    %61 = vector.load %arg8[%c0_73, %c146_74] : memref<16x433xbf16, #tpu.memory_space<vmem>>, vector<16x286xbf16>
    %c112_75 = arith.constant 112 : index
    %c0_76 = arith.constant 0 : index
    %62 = vector.load %arg9[%c112_75, %c0_76] : memref<144x286xbf16, #tpu.memory_space<vmem>>, vector<16x286xbf16>
    tpu.vector_store %arg9[%c112_75, %c0_76], %61 {strides = array<i32>} : memref<144x286xbf16, #tpu.memory_space<vmem>>, vector<16x286xbf16>,
    %c0_77 = arith.constant 0 : index
    %c147_78 = arith.constant 147 : index
    %63 = vector.load %arg8[%c0_77, %c147_78] : memref<16x433xbf16, #tpu.memory_space<vmem>>, vector<16x286xbf16>
    %c128_79 = arith.constant 128 : index
    %c0_80 = arith.constant 0 : index
    %64 = vector.load %arg9[%c128_79, %c0_80] : memref<144x286xbf16, #tpu.memory_space<vmem>>, vector<16x286xbf16>
    tpu.vector_store %arg9[%c128_79, %c0_80], %63 {strides = array<i32>} : memref<144x286xbf16, #tpu.memory_space<vmem>>, vector<16x286xbf16>,
    %c0_81 = arith.constant 0 : index
    %c0_82 = arith.constant 0 : index
    %65 = vector.load %arg4[%c0_81, %c0_82] : memref<2x144xbf16, #tpu.memory_space<vmem>>, vector<2x144xbf16>
    %c0_83 = arith.constant 0 : index
    %c0_84 = arith.constant 0 : index
    %66 = vector.load %arg9[%c0_83, %c0_84] : memref<144x286xbf16, #tpu.memory_space<vmem>>, vector<144x286xbf16>
    %cst_85 = arith.constant dense<0.000000e+00> : vector<2x286xf32>
    %67 = tpu.matmul %65, %66, %cst_85 {dimension_numbers = #tpu.dot_dimension_numbers<[1], [0], [0], [1], [0, 0, 1, 1], [], []>} : vector<2x144xbf16>, vector<144x286xbf16>, vector<2x286xf32> -> vector<2x286xf32>
    %c0_86 = arith.constant 0 : index
    %c0_87 = arith.constant 0 : index
    %68 = vector.load %arg5[%c0_86, %c0_87] : memref<2x1xf32, #tpu.memory_space<vmem>>, vector<2x1xf32>
    %69 = vector.broadcast %68 : vector<2x1xf32> to vector<2x286xf32>
    %70 = arith.addf %67, %69 : vector<2x286xf32>
    %c0_88 = arith.constant 0 : index
    %c0_89 = arith.constant 0 : index
    %71 = vector.load %arg6[%c0_88, %c0_89] : memref<1x286xf32, #tpu.memory_space<vmem>>, vector<1x286xf32>
    %72 = vector.broadcast %71 : vector<1x286xf32> to vector<2x286xf32>
    %73 = arith.mulf %70, %72 : vector<2x286xf32>
    %cst_90 = arith.constant 0.000000e+00 : f32
    %74 = vector.broadcast %cst_90 : f32 to vector<2x128xf32>
    %c0_91 = arith.constant 0 : index
    %c0_92 = arith.constant 0 : index
    %c0_93 = arith.constant 0 : index
    %75 = vector.load %arg7[%c0_91, %c0_92, %c0_93] : memref<1x2x433xf32, #tpu.memory_space<vmem>>, vector<1x2x128xf32>
    %76 = vector.shape_cast %75 : vector<1x2x128xf32> to vector<2x128xf32>
    %77 = vector.shape_cast %74 : vector<2x128xf32> to vector<1x2x128xf32>
    tpu.vector_store %arg7[%c0_91, %c0_92, %c0_93], %77 {strides = array<i32>} : memref<1x2x433xf32, #tpu.memory_space<vmem>>, vector<1x2x128xf32>,
    %c0_94 = arith.constant 0 : index
    %c0_95 = arith.constant 0 : index
    %c128_96 = arith.constant 128 : index
    %78 = vector.load %arg7[%c0_94, %c0_95, %c128_96] : memref<1x2x433xf32, #tpu.memory_space<vmem>>, vector<1x2x286xf32>
    %79 = vector.shape_cast %78 : vector<1x2x286xf32> to vector<2x286xf32>
    %80 = vector.shape_cast %73 : vector<2x286xf32> to vector<1x2x286xf32>
    tpu.vector_store %arg7[%c0_94, %c0_95, %c128_96], %80 {strides = array<i32>} : memref<1x2x433xf32, #tpu.memory_space<vmem>>, vector<1x2x286xf32>,
    %cst_97 = arith.constant 0.000000e+00 : f32
    %81 = vector.broadcast %cst_97 : f32 to vector<2x19xf32>
    %c0_98 = arith.constant 0 : index
    %c0_99 = arith.constant 0 : index
    %c414_100 = arith.constant 414 : index
    %82 = vector.load %arg7[%c0_98, %c0_99, %c414_100] : memref<1x2x433xf32, #tpu.memory_space<vmem>>, vector<1x2x19xf32>
    %83 = vector.shape_cast %82 : vector<1x2x19xf32> to vector<2x19xf32>
    %84 = vector.shape_cast %81 : vector<2x19xf32> to vector<1x2x19xf32>
    tpu.vector_store %arg7[%c0_98, %c0_99, %c414_100], %84 {strides = array<i32>} : memref<1x2x433xf32, #tpu.memory_space<vmem>>, vector<1x2x19xf32>,
    return
  }
  func.func @transform_0(%arg0: i32) -> (i32, i32, i32) {
    %c0_i32 = arith.constant 0 : i32
    %c0_i32_0 = arith.constant 0 : i32
    %c0_i32_1 = arith.constant 0 : i32
    return %arg0, %c0_i32, %c0_i32_0 : i32, i32, i32
  }
  func.func @transform_1(%arg0: i32) -> (i32, i32) {
    %c0_i32 = arith.constant 0 : i32
    %c0_i32_0 = arith.constant 0 : i32
    %c0_i32_1 = arith.constant 0 : i32
    return %c0_i32, %c0_i32_0 : i32, i32
  }
  func.func @transform_2(%arg0: i32) -> (i32, i32) {
    %c0_i32 = arith.constant 0 : i32
    %c0_i32_0 = arith.constant 0 : i32
    %c0_i32_1 = arith.constant 0 : i32
    return %c0_i32, %c0_i32_0 : i32, i32
  }
  func.func @transform_3(%arg0: i32) -> (i32, i32) {
    %c0_i32 = arith.constant 0 : i32
    %c0_i32_0 = arith.constant 0 : i32
    %c0_i32_1 = arith.constant 0 : i32
    return %c0_i32, %c0_i32_0 : i32, i32
  }
  func.func @transform_4(%arg0: i32) -> (i32, i32) {
    %c0_i32 = arith.constant 0 : i32
    %c0_i32_0 = arith.constant 0 : i32
    %c0_i32_1 = arith.constant 0 : i32
    return %c0_i32, %c0_i32_0 : i32, i32
  }
  func.func @transform_5(%arg0: i32) -> (i32, i32) {
    %c0_i32 = arith.constant 0 : i32
    %c0_i32_0 = arith.constant 0 : i32
    %c0_i32_1 = arith.constant 0 : i32
    return %c0_i32, %c0_i32_0 : i32, i32
  }
  func.func @transform_6(%arg0: i32) -> (i32, i32, i32) {
    %c0_i32 = arith.constant 0 : i32
    %c0_i32_0 = arith.constant 0 : i32
    %c0_i32_1 = arith.constant 0 : i32
    return %arg0, %c0_i32, %c0_i32_0 : i32, i32, i32
  }
}

</mosaic_0001>

<bundles_post_ra>
// kernel: registration_subnet_forward.11
= control target key start
LH: loop header
LB: loop body
LE: loop exit
PB: predicated region body
PF: predicated region fallthrough
CT: control target
= control target key end

     0   :  { %s808_s15 = smov 0   ;;  %s904_s0 = inlined_call_operand.vmem [shape: bf16[2,8,433], index: 0, kind: input, shape index: {}]   ;;  %s905_s1 = inlined_call_operand.vmem [shape: bf16[16,72], index: 1, kind: input, shape index: {}]   ;;  %s906_s2 = inlined_call_operand.vmem [shape: f32[16,1], index: 2, kind: input, shape index: {}]   ;;  %s907_s3 = inlined_call_operand.vmem [shape: f32[1,286], index: 3, kind: input, shape index: {}]   ;;  %s908_s4 = inlined_call_operand.vmem [shape: bf16[2,16,433], index: 4, kind: output, shape index: {}]  }
   0x1 LB: > { %s677_s16 = sadd.s32 4294967295, %s770_s15   ;;  %p681_p0 = scmp.ge.s32.totalorder %s770_s15, 1  ;;  %s770_s15 = sphi %s808_s15, %s14_s15  }
   0x2   : > { %p162_p1 = scmp.lt.s32.totalorder %s770_s15, 3 }
   0x4   : > { %p163_p2 = pnand %p681_p0, %p162_p1 }
   0x5   : > { %p188_p3 = scmp.lt.s32.totalorder (!%p163_p2), %s677_s16, 1  ;;  %s772_s21 = smov (!%p163_p2), 18   ;;  %vm217_vm0 = vcmask (!%p163_p2), 240640   ;;  %v774_v3 = vmov (!%p163_p2), 0.0   ;;  %v780_v9 = vmov (!%p163_p2), 0   ;;  %vm781_vm1 = vmmov (!%p163_p2), 0  }
   0x6   : > { %166 = sbr.rel (%p163_p2) target bundleno = 398 (0x18e), region = 36  ;;  %s773_s22 = smov (!%p163_p2), 19   ;;  %723 = vmatprep.subr.bf16.mxu1 (!%p163_p2), %v774_v3  ;;  %500 = vmatprep.mubr.bf16.mxu0 (!%p163_p2), %v780_v9  ;;  %v366_v10 = vld [vmem:[%s906_s2 + $0x8] sm:$0xff] (!%p163_p2)  ;;  %v365_v11 = vld [vmem:[%s906_s2] sm:$0xff] (!%p163_p2)  ;;  %vm209_vm2 = vcmask (!%p163_p2), 1043456   ;;  %vm230_vm3 = vcmask (!%p163_p2), 146432  }
   0x7   : > { %s775_s23 = smov (!%p163_p2), 17   ;;  %s776_s24 = smov (!%p163_p2), 1   ;;  %757 = vset.pattern.permute.xlu1 (!%p163_p2), %v780_v9  ;;  %733 = vmatprep.mubr.msk.bf16.mxu1 (!%p163_p2), %vm781_vm1, %v774_v3  ;;  %vm211_vm4 = vcmask (!%p163_p2), 154624   ;;  %vm248_vm5 = vcmask (!%p163_p2), 138240   ;;  %vm266_vm6 = vcmask (!%p163_p2), 7168   ;;  %vm288_vm7 = vcmask (!%p163_p2), 1039360  }
   0x8   : > { %s777_s25 = smov (!%p163_p2), 127   ;;  %s778_s26 = smov (!%p163_p2), 111   ;;  %756 = vset.pattern.permute.xlu0 (!%p163_p2), %v780_v9  ;;  %vm305_vm8 = vcmask (!%p163_p2), 908288   ;;  %vm322_vm9 = vcmask (!%p163_p2), 900096   ;;  %vm339_vm10 = vcmask (!%p163_p2), 891904   ;;  %vm454_vm11 = vcmask (!%p163_p2), 588800  }
   0x9   : > { %s779_s27 = smov (!%p163_p2), 110   ;;  %s782_s28 = smov (!%p163_p2), 109  }
   0xd   : > { %s910_s16 = smov (!%p188_p3, %s677_s16), 1 }
   0xe   : > { %s711_s17 = sshll.u32 %s910_s16, 4  ;;  %s712_s29 = sshll.u32 %s910_s16, 5 }
   0xf   : > { %s822_s20 = scalar_lea.vmem %s904_s0, %s711_s17  ;;  %s848_s6 = scalar_lea.vmem %s908_s4, %s712_s29 }
  0x10   : > { %v219_v0 = vld [vmem:[%s822_s20] sm:$0xff]  ;;  %v220_v2 = vld [vmem:[%s822_s20 + $0x8] sm:$0xff]  ;;  %593 = vst [vmem:[%s848_s6] sm:$0xf] %v780_v9  ;;  %594 = vst [vmem:[%s848_s6 + $0x10] sm:$0xf] %v780_v9 }
  0x11   : > { %223 = vrot.lane.b32.xlu1 %v219_v0, %s772_s21  ;;  %203 = vrot.lane.b32.xlu0 %v219_v0, %s773_s22  ;;  %v826_v1 = vld [vmem:[%s822_s20 + $0x4] sm:$0xff]  ;;  %v274_v4 = vld [vmem:[%s822_s20 + $0xc] sm:$0xf] }
  0x12   : > { %276 = vst.msk [vmem:[#allocation2 + $0x38] sm:$0xf] %vm217_vm0, %v274_v4  ;;  %v278_v5 = vld [vmem:[%s822_s20 + $0xc] sm:$0xf] }
  0x13   : > { %v295_v6 = vld [vmem:[%s822_s20 + $0xc] sm:$0xf] }
  0x14   : > { %v312_v7 = vld [vmem:[%s822_s20 + $0xc] sm:$0xf] }
  0x15   : > { %225 = vrot.lane.b32.xlu1 %v220_v2, %s772_s21  ;;  %205 = vrot.lane.b32.xlu0 %v220_v2, %s773_s22  ;;  %v329_v8 = vld [vmem:[%s822_s20 + $0xc] sm:$0xf] }
  0x19   : > { %243 = vrot.lane.b32.xlu1 %v220_v2, %s775_s23  ;;  %241 = vrot.lane.b32.xlu0 %v219_v0, %s775_s23 }
  0x1d   : > { %261 = vrot.lane.b32.xlu1 %v220_v2, %s776_s24  ;;  %259 = vrot.lane.b32.xlu0 %v219_v0, %s776_s24 }
  0x21   : > { %283 = vrot.lane.b32.xlu1 %v278_v5, %s777_s25  ;;  %281 = vrot.lane.b32.xlu0 %v826_v1, %s777_s25 }
  0x25   : > { %300 = vrot.lane.b32.xlu1 %v295_v6, %s778_s26  ;;  %298 = vrot.lane.b32.xlu0 %v826_v1, %s778_s26 }
  0x29   : > { %317 = vrot.lane.b32.xlu1 %v312_v7, %s779_s27  ;;  %315 = vrot.lane.b32.xlu0 %v826_v1, %s779_s27 }
  0x2d   : > { %334 = vrot.lane.b32.xlu1 %v329_v8, %s782_s28  ;;  %332 = vrot.lane.b32.xlu0 %v826_v1, %s782_s28 }
  0x31   : > { %374 = vperm.xlu1 %757, %v366_v10   ;;  %369 = vperm.xlu0 %756, %v365_v11  }
  0x83   : > { %v224_v12 = vpop.permute.xlu1 %223  ;;  %v204_v13 = vpop.permute.xlu0 %203 }
  0x84   : > { %v207_v14 = vrot.slane %v204_v13, 4  ;;  %v227_v17 = vrot.slane %v224_v12, 4 }
  0x87   : > { %v226_v15 = vpop.permute.xlu1 %225  ;;  %v206_v16 = vpop.permute.xlu0 %205 }
  0x88   : > { %v228_v18 = vrot.slane %v226_v15, 4  ;;  %v208_v19 = vrot.slane %v206_v16, 4 }
  0x8a   : > { %v229_v20 = vsel %vm209_vm2, %v227_v17, %v228_v18  ;;  %v232_v21 = vsel %vm230_vm3, %v226_v15, %v228_v18  ;;  %v210_v22 = vsel %vm209_vm2, %v207_v14, %v208_v19  ;;  %v213_v23 = vsel %vm211_vm4, %v206_v16, %v208_v19  ;;  %v763_v16 = vld [vmem:[%s905_s1] sm:$0xff]  }
  0x8b   : > { %v231_v24 = vsel %vm230_vm3, %v224_v12, %v229_v20  ;;  %236 = vst.msk [vmem:[#allocation2 + $0x14] sm:$0xf] %vm217_vm0, %v232_v21  ;;  %v212_v25 = vsel %vm211_vm4, %v204_v13, %v210_v22  ;;  %218 = vst.msk [vmem:[#allocation2 + $0x8] sm:$0xf] %vm217_vm0, %v213_v23  ;;  %v244_v26 = vpop.permute.xlu1 %243  ;;  %v242_v27 = vpop.permute.xlu0 %241  ;;  %v572_v20 = vlaneseq  ;;  %v570_v23 = vld [vmem:[%s907_s3] sm:$0x7] }
  0x8c   : > { %v246_v28 = vrot.slane %v244_v26, 4  ;;  %v245_v29 = vrot.slane %v242_v27, 4  ;;  %v688_v30 = vcombine.high %v212_v25, %v231_v24  ;;  %v687_v31 = vcombine.low %v212_v25, %v231_v24 }
  0x8d   : > { %v573_v21 = vshrl.u32 %v572_v20, 7  ;;  %vm619_vm3 = vcmask 396528  }
  0x8e   : > { %v250_v32 = vsel %vm248_vm5, %v244_v26, %v246_v28  ;;  %v247_v33 = vsel %vm209_vm2, %v245_v29, %v246_v28  ;;  %468 = vmatprep.subr.bf16.mxu0 %v688_v30 }
  0x8f   : > { %254 = vst.msk [vmem:[#allocation2 + $0x20] sm:$0xf] %vm217_vm0, %v250_v32  ;;  %v249_v34 = vsel %vm248_vm5, %v242_v27, %v247_v33  ;;  %v262_v35 = vpop.permute.xlu1 %261  ;;  %v260_v36 = vpop.permute.xlu0 %259  ;;  %469 = vmatpush1.bf16.msra.mxu0 %v687_v31  ;;  %v578_v24 = vsub.s32 1, %v573_v21  ;;  %v582_v27 = vsub.s32 2, %v573_v21 }
  0x90   : > { %v264_v37 = vrot.slane %v262_v35, 4  ;;  %v263_v38 = vrot.slane %v260_v36, 4 }
  0x92   : > { %v268_v39 = vsel %vm266_vm6, %v262_v35, %v264_v37  ;;  %v265_v40 = vsel %vm209_vm2, %v263_v38, %v264_v37  ;;  %v758_v41 = vld [vmem:[#allocation2 + $0x8] ss:$12 sps:$4 sm:$0xff]   ;;  %v579_v35 = vrot.slane %v570_v23, %v578_v24 }
  0x93   : > { %272 = vst.msk [vmem:[#allocation2 + $0x2c] sm:$0xf] %vm217_vm0, %v268_v39  ;;  %v267_v42 = vsel %vm266_vm6, %v260_v36, %v265_v40  ;;  %v284_v43 = vpop.permute.xlu1 %283  ;;  %v282_v44 = vpop.permute.xlu0 %281  ;;  %724 = vmatpush3.bf16.msra.mxu1 %v758_v41 }
  0x94   : > { %v286_v45 = vrot.slane %v284_v43, 4  ;;  %293 = vst.msk [vmem:[#allocation2 + $0x44] sm:$0xf] %vm217_vm0, %v284_v43  ;;  %v285_v46 = vrot.slane %v282_v44, 4  ;;  %v691_v47 = vcombine.high %v249_v34, %v267_v42  ;;  %v690_v48 = vcombine.low %v249_v34, %v267_v42  ;;  %725 = vmatprep.subr.bf16.mxu1 %v774_v3 }
  0x95   : > { %v583_v43 = vrot.slane %v570_v23, %v582_v27 }
  0x96   : > { %v287_v49 = vsel %vm209_vm2, %v285_v46, %v286_v45  ;;  %470 = vmatprep.subr.bf16.mxu0 %v691_v47 }
  0x97   : > { %v289_v50 = vsel %vm288_vm7, %v282_v44, %v287_v49  ;;  %v301_v51 = vpop.permute.xlu1 %300  ;;  %v299_v52 = vpop.permute.xlu0 %298  ;;  %471 = vmatpush1.bf16.msra.mxu0 %v690_v48 }
  0x98   : > { %v303_v53 = vrot.slane %v301_v51, 4  ;;  %310 = vst.msk [vmem:[#allocation2 + $0x50] sm:$0xf] %vm217_vm0, %v301_v51  ;;  %v302_v54 = vrot.slane %v299_v52, 4  ;;  %v694_v55 = vcombine.high %v826_v1, %v289_v50  ;;  %v693_v56 = vcombine.low %v826_v1, %v289_v50 }
  0x9a   : > { %v304_v57 = vsel %vm209_vm2, %v302_v54, %v303_v53  ;;  %v759_v58 = vld [vmem:[#allocation2 + $0x20] ss:$12 sps:$4 sm:$0xff]   ;;  %472 = vmatprep.subr.bf16.mxu0 %v694_v55 }
  0x9b   : > { %v306_v59 = vsel %vm305_vm8, %v299_v52, %v304_v57  ;;  %v318_v60 = vpop.permute.xlu1 %317  ;;  %v316_v61 = vpop.permute.xlu0 %315  ;;  %473 = vmatpush1.bf16.msra.mxu0 %v693_v56  ;;  %726 = vmatpush3.bf16.msra.mxu1 %v759_v58  ;;  %v760_v2 = vld [vmem:[#allocation2 + $0x38] ss:$12 sps:$4 sm:$0xff]  }
  0x9c   : > { %v320_v62 = vrot.slane %v318_v60, 4  ;;  %327 = vst.msk [vmem:[#allocation2 + $0x5c] sm:$0xf] %vm217_vm0, %v318_v60  ;;  %v319_v63 = vrot.slane %v316_v61, 4  ;;  %727 = vmatprep.subr.bf16.mxu1 %v774_v3 }
  0x9e   : > { %v321_v0 = vsel %vm209_vm2, %v319_v63, %v320_v62 }
  0x9f   : > { %v323_v1 = vsel %vm322_vm9, %v316_v61, %v321_v0  ;;  %v335_v4 = vpop.permute.xlu1 %334  ;;  %v333_v5 = vpop.permute.xlu0 %332  ;;  %728 = vmatpush3.bf16.msra.mxu1 %v760_v2 }
  0xa0   : > { %v337_v6 = vrot.slane %v335_v4, 4  ;;  %344 = vst.msk [vmem:[#allocation2 + $0x68] sm:$0xf] %vm217_vm0, %v335_v4  ;;  %v336_v7 = vrot.slane %v333_v5, 4  ;;  %v697_v8 = vcombine.high %v306_v59, %v323_v1  ;;  %v696_v10 = vcombine.low %v306_v59, %v323_v1  ;;  %729 = vmatprep.subr.bf16.mxu1 %v774_v3 }
  0xa2   : > { %v338_v11 = vsel %vm209_vm2, %v336_v7, %v337_v6  ;;  %474 = vmatprep.subr.bf16.mxu0 %v697_v8 }
  0xa3   : > { %v340_v12 = vsel %vm339_vm10, %v333_v5, %v338_v11  ;;  %v761_v13 = vld [vmem:[#allocation2 + $0x50] ss:$12 sps:$4 sm:$0xff]   ;;  %475 = vmatpush1.bf16.msra.mxu0 %v696_v10 }
  0xa4   : > { %v700_v14 = vcombine.high %v340_v12, %v340_v12  ;;  %v699_v15 = vcombine.low %v340_v12, %v340_v12  ;;  %730 = vmatpush3.bf16.msra.mxu1 %v761_v13 }
  0xa5   : > { %731 = vmatprep.subr.bf16.mxu1 %v774_v3  ;;  %v574_v3 = vsub.s32 0, %v573_v21 }
  0xa6   : > { %702 = vmatprep.subr.msk.bf16.mxu0 %vm209_vm2, %v700_v14  ;;  %v460_v17 = vsel %vm209_vm2, %v699_v15, 0 }
  0xa7   : > { %v762_v18 = vld [vmem:[#allocation2 + $0x68] ss:$0 sps:$4 sm:$0xff]   ;;  %477 = vmatpush1.bf16.msra.mxu0 %v460_v17  ;;  %v575_v30 = vrot.slane %v570_v23, %v574_v3 }
  0xa8   : > { %v466_v19 = vsel %vm209_vm2, %v762_v18, 0 }
  0xa9   : > { %732 = vmatpush3.bf16.msra.mxu1 %v466_v19 }
  0xaa   : > { %703 = vmatmul.mubr.msk.bf16.vlgmr.msra.gmra.mrb[0].mxu0 %vm454_vm11, %v763_v16 }
  0xac   : > { %734 = vmatmul.mubr.msk.bf16.vlgmr.msra.gmra.mrb[0].mxu1 %vm454_vm11, %v763_v16 }
  0xb0   : > { %v370_v22 = vpop.permute.xlu0 %369  ;;  %v375_v25 = vpop.permute.xlu1 %374 }
 0x17d   : > { %v502_v26 = vpop.f32.mrb[0].mxu0 }
 0x17e   : > { %v503_v28 = vadd.f32 %v502_v26, %v370_v22  ;;  %v504_v29 = vpop.f32.mrb[1].mxu0 }
 0x17f   : > { %v505_v31 = vadd.f32 %v504_v29, %v370_v22  ;;  %v506_v32 = vpop.f32.mrb[2].mxu0  ;;  %v545_v33 = vpop.f32.mrb[0].mxu1 }
 0x180   : > { %vm552_vm12 = vcmp.ge.f32.partialorder %v503_v28, 0.0  ;;  %v558_v34 = vmul.f32 0.2, %v503_v28  ;;  %v507_v36 = vadd.f32 %v506_v32, %v375_v25  ;;  %v508_v37 = vpop.f32.mrb[3].mxu0  ;;  %v735_v38 = vpop.f32.mrb[1].mxu1  ;;  %v546_v39 = vadd.f32 %v545_v33, %v370_v22 }
 0x181   : > { %vm553_vm13 = vcmp.ge.f32.partialorder %v505_v31, 0.0  ;;  %v559_v40 = vmul.f32 0.2, %v505_v31  ;;  %v509_v41 = vadd.f32 %v508_v37, %v375_v25  ;;  %v548_v42 = vpop.f32.mrb[2].mxu1 }
 0x182   : > { %v564_v44 = vsel %vm552_vm12, %v503_v28, %v558_v34  ;;  %vm555_vm14 = vcmp.ge.f32.partialorder %v507_v36, 0.0  ;;  %v561_v45 = vmul.f32 0.2, %v507_v36  ;;  %v549_v46 = vadd.f32 %v548_v42, %v375_v25  ;;  %v736_v49 = vpop.f32.mrb[3].mxu1 }
 0x183   : > { %vm554_vm15 = vcmp.ge.f32.partialorder %v546_v39, 0.0  ;;  %v560_v47 = vmul.f32 0.2, %v546_v39  ;;  %v587_v48 = vmul.f32 %v575_v30, %v564_v44  ;;  %v565_v50 = vsel %vm553_vm13, %v505_v31, %v559_v40 }
 0x184   : > { %v567_v51 = vsel %vm555_vm14, %v507_v36, %v561_v45  ;;  %vm556_vm1 = vcmp.ge.f32.partialorder %v509_v41, 0.0  ;;  %v562_v52 = vmul.f32 0.2, %v509_v41  ;;  %vm557_vm2 = vcmp.ge.f32.partialorder %v549_v46, 0.0 }
 0x185   : > { %v563_v53 = vmul.f32 0.2, %v549_v46  ;;  %v566_v54 = vsel %vm554_vm15, %v546_v39, %v560_v47  ;;  %v588_v55 = vmul.f32 %v579_v35, %v565_v50  ;;  %v590_v57 = vmul.f32 %v575_v30, %v567_v51 }
 0x186   : > { %v589_v56 = vmul.f32 %v583_v43, %v566_v54  ;;  %v568_v58 = vsel %vm556_vm1, %v509_v41, %v562_v52 }
 0x187   : > { %v569_v59 = vsel %vm557_vm2, %v549_v46, %v563_v53  ;;  %v713_v60 = vpack.c.bf16 %v588_v55, %v587_v48  ;;  %v591_v61 = vmul.f32 %v579_v35, %v568_v58 }
 0x188   : > { %v592_v62 = vmul.f32 %v583_v43, %v569_v59  ;;  %v714_v63 = vpack.c.bf16 %v589_v56, %v589_v56 }
 0x189   : > { %615 = vst [vmem:[%s848_s6 + $0x4] sm:$0xff] %v713_v60  ;;  %v715_v0 = vpack.c.bf16 %v591_v61, %v590_v57 }
 0x18a   : > { %v716_v2 = vpack.c.bf16 %v592_v62, %v592_v62  ;;  %616 = vst.msk [vmem:[%s848_s6 + $0xc] sm:$0xf] %vm217_vm0, %v714_v63 }
 0x18b   : > { %620 = vst.msk [vmem:[%s848_s6 + $0xc] sm:$0xf] %vm619_vm3, %v780_v9  ;;  %617 = vst [vmem:[%s848_s6 + $0x14] sm:$0xff] %v715_v0 }
 0x18c   : > { %618 = vst.msk [vmem:[%s848_s6 + $0x1c] sm:$0xf] %vm217_vm0, %v716_v2 }
 0x18d   : > { %621 = vst.msk [vmem:[%s848_s6 + $0x1c] sm:$0xf] %vm619_vm3, %v780_v9 }
 0x18e PF: > { %s14_s15 = sadd.s32 1, %s770_s15  }
 0x18f   : > { %p11_p4 = scmp.ge.s32.totalorder %s14_s15, 4  }
 0x191   :  { %13 = sbr.rel (!%p11_p4) target bundleno = 1 (0x1), region = 66 }

// kernel: registration_subnet_forward.12
= control target key start
LH: loop header
LB: loop body
LE: loop exit
PB: predicated region body
PF: predicated region fallthrough
CT: control target
= control target key end

     0   :  { %s678_s15 = smov 0   ;;  %s781_s0 = inlined_call_operand.vmem [shape: bf16[2,16,217], index: 0, kind: input, shape index: {}]   ;;  %s782_s1 = inlined_call_operand.vmem [shape: bf16[32,144], index: 1, kind: input, shape index: {}]   ;;  %s783_s2 = inlined_call_operand.vmem [shape: f32[32,1], index: 2, kind: input, shape index: {}]   ;;  %s784_s3 = inlined_call_operand.vmem [shape: f32[1,78], index: 3, kind: input, shape index: {}]   ;;  %s785_s4 = inlined_call_operand.vmem [shape: bf16[2,32,217], index: 4, kind: output, shape index: {}]  }
   0x1 LB: > { %s544_s16 = sadd.s32 4294967295, %s642_s15   ;;  %p548_p0 = scmp.ge.s32.totalorder %s642_s15, 1  ;;  %s642_s15 = sphi %s678_s15, %s14_s15  }
   0x2   : > { %p162_p1 = scmp.lt.s32.totalorder %s642_s15, 3 }
   0x4   : > { %p163_p2 = pnand %p548_p0, %p162_p1 }
   0x5   : > { %p188_p3 = scmp.lt.s32.totalorder (!%p163_p2), %s544_s16, 1  ;;  %v644_v0 = vmov (!%p163_p2), 0   ;;  %s645_s21 = smov (!%p163_p2), 10   ;;  %vm216_vm0 = vcmask (!%p163_p2), 637952   ;;  %v632_v8 = vld [vmem:[%s782_s1 + $0x4] ss:$8 sps:$4 sm:$0xff] (!%p163_p2)  }
   0x6   : > { %166 = sbr.rel (%p163_p2) target bundleno = 408 (0x198), region = 36  ;;  %387 = vmatprep.subr.bf16.mxu0 (!%p163_p2), %v644_v0  ;;  %585 = vmatprep.subr.bf16.mxu1 (!%p163_p2), %v644_v0  ;;  %s646_s22 = smov (!%p163_p2), 11   ;;  %vm380_vm1 = vcmask (!%p163_p2), 130048   ;;  %v635_v9 = vld [vmem:[%s782_s1 + $0x14] ss:$8 sps:$4 sm:$0xff] (!%p163_p2)   ;;  %v339_v10 = vld [vmem:[%s783_s2 + $0x8] sm:$0xff] (!%p163_p2) }
   0x7   : > { %621 = vset.pattern.permute.xlu1 (!%p163_p2), %v644_v0  ;;  %620 = vset.pattern.permute.xlu0 (!%p163_p2), %v644_v0  ;;  %s647_s23 = smov (!%p163_p2), 9   ;;  %s648_s24 = smov (!%p163_p2), 1   ;;  %v338_v11 = vld [vmem:[%s783_s2] sm:$0xff] (!%p163_p2)  ;;  %v340_v12 = vld [vmem:[%s783_s2 + $0x10] sm:$0xff] (!%p163_p2)  ;;  %v341_v13 = vld [vmem:[%s783_s2 + $0x18] sm:$0xff] (!%p163_p2)  ;;  %vm232_vm2 = vcmask (!%p163_p2), 80896  }
   0x8   : > { %s649_s25 = smov (!%p163_p2), 127   ;;  %s650_s26 = smov (!%p163_p2), 119   ;;  %570 = vmatprep.mubr.msk.bf16.mxu0 (!%p163_p2), %vm380_vm1, %v632_v8  ;;  %571 = vmatprep.mubr.msk.bf16.mxu1 (!%p163_p2), %vm380_vm1, %v635_v9  ;;  %vm213_vm3 = vcmask (!%p163_p2), 89088   ;;  %vm250_vm4 = vcmask (!%p163_p2), 72704   ;;  %vm268_vm5 = vcmask (!%p163_p2), 7168   ;;  %vm479_vm9 = vcmask (!%p163_p2), 633856  }
   0x9   : > { %s651_s27 = smov (!%p163_p2), 118   ;;  %s652_s28 = smov (!%p163_p2), 117   ;;  %v630_v39 = vld [vmem:[%s782_s1] ss:$8 sps:$4 sm:$0xff] (!%p163_p2)   ;;  %v633_v40 = vld [vmem:[%s782_s1 + $0x10] ss:$8 sps:$4 sm:$0xff] (!%p163_p2)  }
   0xa   : > { %v572_v50 = vld [vmem:[%s784_s3] ss:$0 sm:$0xff] (!%p163_p2)  ;;  %vm484_vm11 = vcmask (!%p163_p2), 724592  }
   0xd   : > { %s787_s16 = smov (!%p188_p3, %s544_s16), 1 }
   0xe   : > { %s579_s17 = sshll.u32 %s787_s16, 4 }
   0xf   : > { %s192_s20 = scalar_lea.vmem %s781_s0, %s579_s17  ;;  %s580_s17 = sshll.u32 %s787_s16, 5 }
  0x10   : > { %v622_v1 = vld [vmem:[%s192_s20] ss:$8 sps:$4 sm:$0xff]   ;;  %v624_v2 = vld [vmem:[%s192_s20 + $0x4] ss:$8 sps:$4 sm:$0xff]  }
  0x11   : > { %228 = vrot.lane.b32.xlu1 %v622_v1, %s645_s21  ;;  %209 = vrot.lane.b32.xlu0 %v622_v1, %s646_s22  ;;  %v629_v3 = vld [vmem:[%s192_s20 + $0x4] ss:$8 sps:$4 sm:$0xff]  }
  0x12   : > { %280 = vst.msk [vmem:[#allocation2 + $0x20] sm:$0xff] %vm216_vm0, %v629_v3  ;;  %v625_v4 = vld [vmem:[%s192_s20 + $0x4] ss:$8 sps:$4 sm:$0xff]  }
  0x13   : > { %v626_v5 = vld [vmem:[%s192_s20 + $0x4] ss:$8 sps:$4 sm:$0xff]  }
  0x14   : > { %v627_v6 = vld [vmem:[%s192_s20 + $0x4] ss:$8 sps:$4 sm:$0xff]  }
  0x15   : > { %230 = vrot.lane.b32.xlu1 %v624_v2, %s645_s21  ;;  %211 = vrot.lane.b32.xlu0 %v624_v2, %s646_s22  ;;  %v628_v7 = vld [vmem:[%s192_s20 + $0x4] ss:$8 sps:$4 sm:$0xff]   ;;  %s719_s20 = scalar_lea.vmem %s785_s4, %s580_s17 }
  0x16   : > { %459 = vst [vmem:[%s719_s20] sm:$0xf] %v644_v0  ;;  %460 = vst [vmem:[%s719_s20 + $0x8] sm:$0xf] %v644_v0 }
  0x17   : > { %461 = vst [vmem:[%s719_s20 + $0x10] sm:$0xf] %v644_v0  ;;  %462 = vst [vmem:[%s719_s20 + $0x18] sm:$0xf] %v644_v0 }
  0x19   : > { %248 = vrot.lane.b32.xlu1 %v624_v2, %s647_s23  ;;  %246 = vrot.lane.b32.xlu0 %v622_v1, %s647_s23  ;;  %v333_v34 = vld [vmem:[#allocation2 + $0x20] sm:$0xff] }
  0x1d   : > { %266 = vrot.lane.b32.xlu1 %v624_v2, %s648_s24  ;;  %264 = vrot.lane.b32.xlu0 %v622_v1, %s648_s24 }
  0x21   : > { %288 = vrot.lane.b32.xlu0 %v625_v4, %s649_s25  ;;  %299 = vrot.lane.b32.xlu1 %v626_v5, %s650_s26 }
  0x25   : > { %310 = vrot.lane.b32.xlu0 %v627_v6, %s651_s27  ;;  %321 = vrot.lane.b32.xlu1 %v628_v7, %s652_s28 }
  0x29   : > { %349 = vperm.xlu1 %621, %v339_v10   ;;  %344 = vperm.xlu0 %620, %v338_v11  }
  0x2d   : > { %354 = vperm.xlu1 %621, %v340_v12   ;;  %359 = vperm.xlu0 %620, %v341_v13  }
  0x83   : > { %v229_v14 = vpop.permute.xlu1 %228  ;;  %v210_v15 = vpop.permute.xlu0 %209 }
  0x87   : > { %v231_v16 = vpop.permute.xlu1 %230  ;;  %v212_v17 = vpop.permute.xlu0 %211 }
  0x88   : > { %v233_v18 = vsel %vm232_vm2, %v229_v14, %v231_v16  ;;  %v214_v19 = vsel %vm213_vm3, %v210_v15, %v212_v17 }
  0x89   : > { %235 = vst.msk [vmem:[#allocation2 + $0x8] sm:$0xff] %vm216_vm0, %v233_v18  ;;  %217 = vst.msk [vmem:[#allocation2] sm:$0xff] %vm216_vm0, %v214_v19 }
  0x8b   : > { %v249_v20 = vpop.permute.xlu1 %248  ;;  %v247_v21 = vpop.permute.xlu0 %246 }
  0x8c   : > { %v251_v22 = vsel %vm250_vm4, %v247_v21, %v249_v20 }
  0x8d   : > { %253 = vst.msk [vmem:[#allocation2 + $0x10] sm:$0xff] %vm216_vm0, %v251_v22 }
  0x8f   : > { %v267_v23 = vpop.permute.xlu1 %266  ;;  %v265_v24 = vpop.permute.xlu0 %264 }
  0x90   : > { %v329_v25 = vld [vmem:[#allocation2] sm:$0xff]  ;;  %v269_v26 = vsel %vm268_vm5, %v265_v24, %v267_v23  ;;  %v330_v29 = vld [vmem:[#allocation2 + $0x8] sm:$0xff] }
  0x91   : > { %388 = vmatpush1.bf16.msra.mxu0 %v329_v25  ;;  %594 = vmatpush1.bf16.msra.mxu1 %v329_v25  ;;  %271 = vst.msk [vmem:[#allocation2 + $0x18] sm:$0xff] %vm216_vm0, %v269_v26 }
  0x92   : > { %389 = vmatprep.subr.bf16.mxu0 %v644_v0  ;;  %586 = vmatprep.subr.bf16.mxu1 %v644_v0 }
  0x93   : > { %v289_v27 = vpop.permute.xlu0 %288  ;;  %v300_v28 = vpop.permute.xlu1 %299 }
  0x94   : > { %291 = vst.msk [vmem:[#allocation2 + $0x28] sm:$0xff] %vm216_vm0, %v289_v27  ;;  %302 = vst.msk [vmem:[#allocation2 + $0x30] sm:$0xff] %vm216_vm0, %v300_v28  ;;  %v331_v30 = vld [vmem:[#allocation2 + $0x10] sm:$0xff] }
  0x95   : > { %390 = vmatpush1.bf16.msra.mxu0 %v330_v29  ;;  %595 = vmatpush1.bf16.msra.mxu1 %v330_v29 }
  0x96   : > { %391 = vmatprep.subr.bf16.mxu0 %v644_v0  ;;  %587 = vmatprep.subr.bf16.mxu1 %v644_v0 }
  0x97   : > { %v311_v31 = vpop.permute.xlu0 %310  ;;  %v322_v32 = vpop.permute.xlu1 %321 }
  0x98   : > { %313 = vst.msk [vmem:[#allocation2 + $0x38] sm:$0xff] %vm216_vm0, %v311_v31  ;;  %324 = vst.msk [vmem:[#allocation2 + $0x40] sm:$0xff] %vm216_vm0, %v322_v32  ;;  %v332_v33 = vld [vmem:[#allocation2 + $0x18] sm:$0xff] }
  0x99   : > { %392 = vmatpush1.bf16.msra.mxu0 %v331_v30  ;;  %596 = vmatpush1.bf16.msra.mxu1 %v331_v30 }
  0x9a   : > { %393 = vmatprep.subr.bf16.mxu0 %v644_v0  ;;  %588 = vmatprep.subr.bf16.mxu1 %v644_v0 }
  0x9b   : > { %v334_v35 = vld [vmem:[#allocation2 + $0x28] sm:$0xff]  ;;  %v335_v36 = vld [vmem:[#allocation2 + $0x30] sm:$0xff] }
  0x9d   : > { %394 = vmatpush1.bf16.msra.mxu0 %v332_v33  ;;  %597 = vmatpush1.bf16.msra.mxu1 %v332_v33 }
  0x9e   : > { %395 = vmatprep.subr.bf16.mxu0 %v644_v0  ;;  %589 = vmatprep.subr.bf16.mxu1 %v644_v0 }
  0x9f   : > { %v336_v37 = vld [vmem:[#allocation2 + $0x38] sm:$0xff]  ;;  %v337_v38 = vld [vmem:[#allocation2 + $0x40] sm:$0xff] }
  0xa1   : > { %396 = vmatpush1.bf16.msra.mxu0 %v333_v34  ;;  %598 = vmatpush1.bf16.msra.mxu1 %v333_v34 }
  0xa2   : > { %397 = vmatprep.subr.bf16.mxu0 %v644_v0  ;;  %590 = vmatprep.subr.bf16.mxu1 %v644_v0 }
  0xa5   : > { %398 = vmatpush1.bf16.msra.mxu0 %v334_v35  ;;  %599 = vmatpush1.bf16.msra.mxu1 %v334_v35 }
  0xa6   : > { %399 = vmatprep.subr.bf16.mxu0 %v644_v0  ;;  %591 = vmatprep.subr.bf16.mxu1 %v644_v0 }
  0xa8   : > { %v350_v41 = vpop.permute.xlu1 %349  ;;  %v345_v42 = vpop.permute.xlu0 %344 }
  0xa9   : > { %400 = vmatpush1.bf16.msra.mxu0 %v335_v36  ;;  %600 = vmatpush1.bf16.msra.mxu1 %v335_v36 }
  0xaa   : > { %401 = vmatprep.subr.bf16.mxu0 %v644_v0  ;;  %592 = vmatprep.subr.bf16.mxu1 %v644_v0 }
  0xac   : > { %v355_v43 = vpop.permute.xlu1 %354  ;;  %v360_v53 = vpop.permute.xlu0 %359 }
  0xad   : > { %402 = vmatpush1.bf16.msra.mxu0 %v336_v37  ;;  %601 = vmatpush1.bf16.msra.mxu1 %v336_v37 }
  0xae   : > { %403 = vmatprep.subr.bf16.mxu0 %v644_v0  ;;  %593 = vmatprep.subr.bf16.mxu1 %v644_v0 }
  0xb1   : > { %404 = vmatpush1.bf16.msra.mxu0 %v337_v38  ;;  %602 = vmatpush1.bf16.msra.mxu1 %v337_v38 }
  0xb4   : > { %420 = vmatmul.mubr.bf16.vlgmr.msra.gmra.mrb[0].mxu0 %v630_v39  ;;  %428 = vmatmul.mubr.bf16.vlgmr.msra.gmra.mrb[0].mxu1 %v633_v40 }
 0x187   : > { %v421_v44 = vpop.f32.mrb[0].mxu0  ;;  %v429_v45 = vpop.f32.mrb[0].mxu1 }
 0x188   : > { %v422_v46 = vadd.f32 %v421_v44, %v345_v42  ;;  %v430_v47 = vadd.f32 %v429_v45, %v355_v43  ;;  %v423_v48 = vpop.f32.mrb[1].mxu0  ;;  %v431_v49 = vpop.f32.mrb[1].mxu1 }
 0x189   : > { %v424_v51 = vpop.f32.mrb[2].mxu0  ;;  %v432_v52 = vpop.f32.mrb[2].mxu1 }
 0x18a   : > { %vm436_vm6 = vcmp.ge.f32.partialorder %v422_v46, 0.0  ;;  %v440_v54 = vmul.f32 0.2, %v422_v46  ;;  %vm438_vm7 = vcmp.ge.f32.partialorder %v430_v47, 0.0  ;;  %v442_v55 = vmul.f32 0.2, %v430_v47 }
 0x18b   : > { %v425_v56 = vadd.f32 %v424_v51, %v350_v41  ;;  %v433_v57 = vadd.f32 %v432_v52, %v360_v53  ;;  %v426_v58 = vpop.f32.mrb[3].mxu0  ;;  %v434_v59 = vpop.f32.mrb[3].mxu1 }
 0x18c   : > { %v444_v60 = vsel %vm436_vm6, %v422_v46, %v440_v54  ;;  %v446_v61 = vsel %vm438_vm7, %v430_v47, %v442_v55 }
 0x18d   : > { %v455_v62 = vmul.f32 %v572_v50, %v444_v60  ;;  %v457_v63 = vmul.f32 %v572_v50, %v446_v61  ;;  %vm437_vm8 = vcmp.ge.f32.partialorder %v425_v56, 0.0  ;;  %v441_v1 = vmul.f32 0.2, %v425_v56 }
 0x18e   : > { %vm439_vm10 = vcmp.ge.f32.partialorder %v433_v57, 0.0  ;;  %v443_v2 = vmul.f32 0.2, %v433_v57 }
 0x18f   : > { %v581_v3 = vpack.c.bf16 %v455_v62, %v455_v62  ;;  %v583_v4 = vpack.c.bf16 %v457_v63, %v457_v63  ;;  %v445_v5 = vsel %vm437_vm8, %v425_v56, %v441_v1 }
 0x190   : > { %v456_v6 = vmul.f32 %v572_v50, %v445_v5  ;;  %v447_v7 = vsel %vm439_vm10, %v433_v57, %v443_v2 }
 0x191   : > { %480 = vst.msk [vmem:[%s719_s20 + $0x4] sm:$0xf] %vm479_vm9, %v581_v3  ;;  %482 = vst.msk [vmem:[%s719_s20 + $0x14] sm:$0xf] %vm479_vm9, %v583_v4  ;;  %v458_v8 = vmul.f32 %v572_v50, %v447_v7 }
 0x192   : > { %485 = vst.msk [vmem:[%s719_s20 + $0x4] sm:$0xf] %vm484_vm11, %v644_v0  ;;  %487 = vst.msk [vmem:[%s719_s20 + $0x14] sm:$0xf] %vm484_vm11, %v644_v0  ;;  %v582_v9 = vpack.c.bf16 %v456_v6, %v456_v6 }
 0x193   : > { %v584_v10 = vpack.c.bf16 %v458_v8, %v458_v8 }
 0x194   : > { %481 = vst.msk [vmem:[%s719_s20 + $0xc] sm:$0xf] %vm479_vm9, %v582_v9 }
 0x195   : > { %486 = vst.msk [vmem:[%s719_s20 + $0xc] sm:$0xf] %vm484_vm11, %v644_v0 }
 0x196   : > { %483 = vst.msk [vmem:[%s719_s20 + $0x1c] sm:$0xf] %vm479_vm9, %v584_v10 }
 0x197   : > { %488 = vst.msk [vmem:[%s719_s20 + $0x1c] sm:$0xf] %vm484_vm11, %v644_v0 }
 0x198 PF: > { %s14_s15 = sadd.s32 1, %s642_s15  }
 0x199   : > { %p11_p4 = scmp.ge.s32.totalorder %s14_s15, 4  }
 0x19b   :  { %13 = sbr.rel (!%p11_p4) target bundleno = 1 (0x1), region = 66 }

// kernel: registration_subnet_forward.13
= control target key start
LH: loop header
LB: loop body
LE: loop exit
PB: predicated region body
PF: predicated region fallthrough
CT: control target
= control target key end

     0   :  { %s920_s15 = smov 0   ;;  %s1049_s0 = inlined_call_operand.vmem [shape: bf16[2,32,157], index: 0, kind: input, shape index: {}]   ;;  %s1050_s1 = inlined_call_operand.vmem [shape: bf16[32,288], index: 1, kind: input, shape index: {}]   ;;  %s1051_s2 = inlined_call_operand.vmem [shape: f32[32,1], index: 2, kind: input, shape index: {}]   ;;  %s1052_s3 = inlined_call_operand.vmem [shape: f32[1,22], index: 3, kind: input, shape index: {}]   ;;  %s1053_s4 = inlined_call_operand.vmem [shape: bf16[2,32,157], index: 4, kind: output, shape index: {}]  }
   0x1 LB: > { %s739_s16 = sadd.s32 4294967295, %s884_s15   ;;  %p743_p0 = scmp.ge.s32.totalorder %s884_s15, 1  ;;  %s884_s15 = sphi %s920_s15, %s14_s15  }
   0x2   : > { %p162_p1 = scmp.lt.s32.totalorder %s884_s15, 3 }
   0x4   : > { %p163_p2 = pnand %p743_p0, %p162_p1 }
   0x5   : > { %p188_p3 = scmp.lt.s32.totalorder (!%p163_p2), %s739_s16, 1  ;;  %s886_s21 = smov (!%p163_p2), 7   ;;  %vm232_vm0 = vcmask (!%p163_p2), 179200   ;;  %v872_v13 = vld [vmem:[%s1050_s1 + $0x4] ss:$12 sps:$4 sm:$0xff] (!%p163_p2)   ;;  %vm526_vm1 = vcmask (!%p163_p2), 261120  }
   0x6   : > { %166 = sbr.rel (%p163_p2) target bundleno = 422 (0x1a6), region = 36  ;;  %s887_s22 = smov (!%p163_p2), 6   ;;  %565 = vmatprep.mubr.bf16.mxu0 (!%p163_p2), %v872_v13  ;;  %v875_v16 = vld [vmem:[%s1050_s1 + $0x8] ss:$12 sps:$4 sm:$0xff] (!%p163_p2)   ;;  %v472_v17 = vld [vmem:[%s1051_s2] sm:$0xff] (!%p163_p2)  ;;  %v894_v19 = vmov (!%p163_p2), 0  }
   0x7   : > { %s888_s23 = smov (!%p163_p2), 127   ;;  %s889_s24 = smov (!%p163_p2), 5   ;;  %831 = vmatprep.mubr.msk.bf16.mxu1 (!%p163_p2), %vm526_vm1, %v875_v16  ;;  %v473_v18 = vld [vmem:[%s1051_s2 + $0x8] sm:$0xff] (!%p163_p2)  ;;  %852 = vset.pattern.permute.xlu0 (!%p163_p2), %v894_v19  ;;  %v474_v20 = vld [vmem:[%s1051_s2 + $0x10] sm:$0xff] (!%p163_p2)  ;;  %v475_v21 = vld [vmem:[%s1051_s2 + $0x18] sm:$0xff] (!%p163_p2)  ;;  %vm227_vm2 = vcmask (!%p163_p2), 56320  }
   0x8   : > { %s890_s25 = smov (!%p163_p2), 123   ;;  %s891_s26 = smov (!%p163_p2), 1   ;;  %853 = vset.pattern.permute.xlu1 (!%p163_p2), %v894_v19  ;;  %vm263_vm3 = vcmask (!%p163_p2), 48128   ;;  %vm298_vm4 = vcmask (!%p163_p2), 39936   ;;  %vm333_vm5 = vcmask (!%p163_p2), 7168   ;;  %vm674_vm9 = vcmask (!%p163_p2), 175104  }
   0x9   : > { %s892_s27 = smov (!%p163_p2), 122   ;;  %s893_s30 = smov (!%p163_p2), 121   ;;  %vm679_vm10 = vcmask (!%p163_p2), 232624  }
   0xd   : > { %s1055_s16 = smov (!%p188_p3, %s739_s16), 1 }
   0xe   : > { %s789_s17 = sshll.u32 %s1055_s16, 5 }
   0xf   : > { %s936_s20 = scalar_lea.vmem %s1049_s0, %s789_s17  ;;  %s1013_s28 = scalar_lea.vmem %s1053_s4, %s789_s17 }
  0x10   : > { %v854_v0 = vld [vmem:[%s936_s20 + $0x10] ss:$8 sps:$4 sm:$0xff]   ;;  %v856_v1 = vld [vmem:[%s936_s20 + $0x14] ss:$8 sps:$4 sm:$0xff]   ;;  %v857_v2 = vld [vmem:[%s936_s20] ss:$8 sps:$4 sm:$0xff]  }
  0x11   : > { %223 = vrot.lane.b32.xlu1 %v854_v0, %s886_s21  ;;  %v859_v3 = vld [vmem:[%s936_s20 + $0x4] ss:$8 sps:$4 sm:$0xff]   ;;  %219 = vrot.lane.b32.xlu0 %v857_v2, %s886_s21  ;;  %v869_v6 = vld [vmem:[%s936_s20 + $0x14] ss:$8 sps:$4 sm:$0xff]  }
  0x12   : > { %v868_v4 = vld [vmem:[%s936_s20 + $0x4] ss:$8 sps:$4 sm:$0xff]   ;;  %v861_v7 = vld [vmem:[%s936_s20 + $0x14] ss:$8 sps:$4 sm:$0xff]   ;;  %357 = vst.msk [vmem:[#allocation2 + $0x48] sm:$0xff] %vm232_vm0, %v869_v6  ;;  %654 = vst [vmem:[%s1013_s28] sm:$0xf] %v894_v19 }
  0x13   : > { %v860_v5 = vld [vmem:[%s936_s20 + $0x4] ss:$8 sps:$4 sm:$0xff]   ;;  %356 = vst.msk [vmem:[#allocation2 + $0x40] sm:$0xff] %vm232_vm0, %v868_v4  ;;  %v863_v10 = vld [vmem:[%s936_s20 + $0x14] ss:$8 sps:$4 sm:$0xff]  }
  0x14   : > { %v862_v9 = vld [vmem:[%s936_s20 + $0x4] ss:$8 sps:$4 sm:$0xff]   ;;  %v865_v12 = vld [vmem:[%s936_s20 + $0x14] ss:$8 sps:$4 sm:$0xff]   ;;  %655 = vst [vmem:[%s1013_s28 + $0x8] sm:$0xf] %v894_v19 }
  0x15   : > { %225 = vrot.lane.b32.xlu1 %v856_v1, %s886_s21  ;;  %221 = vrot.lane.b32.xlu0 %v859_v3, %s886_s21  ;;  %v864_v11 = vld [vmem:[%s936_s20 + $0x4] ss:$8 sps:$4 sm:$0xff]   ;;  %v867_v14 = vld [vmem:[%s936_s20 + $0x14] ss:$8 sps:$4 sm:$0xff]  }
  0x16   : > { %v866_v15 = vld [vmem:[%s936_s20 + $0x4] ss:$8 sps:$4 sm:$0xff]   ;;  %v873_v6 = vld [vmem:[%s1050_s1 + $0x1c] ss:$12 sps:$4 sm:$0xff]   ;;  %656 = vst [vmem:[%s1013_s28 + $0x10] sm:$0xf] %v894_v19 }
  0x17   : > { %657 = vst [vmem:[%s1013_s28 + $0x18] sm:$0xf] %v894_v19 }
  0x19   : > { %257 = vrot.lane.b32.xlu1 %v859_v3, %s887_s22  ;;  %255 = vrot.lane.b32.xlu0 %v857_v2, %s887_s22  ;;  %v463_v33 = vld [vmem:[#allocation2 + $0x48] sm:$0xff] }
  0x1a   : > { %v462_v8 = vld [vmem:[#allocation2 + $0x40] sm:$0xff] }
  0x1b   : > { %795 = vmatprep.subr.bf16.mxu0 %v462_v8 }
  0x1d   : > { %259 = vrot.lane.b32.xlu1 %v854_v0, %s887_s22  ;;  %372 = vrot.lane.b32.xlu0 %v860_v5, %s888_s23  ;;  %v870_v5 = vld [vmem:[%s1050_s1] ss:$12 sps:$4 sm:$0xff]  }
  0x21   : > { %374 = vrot.lane.b32.xlu1 %v861_v7, %s888_s23  ;;  %261 = vrot.lane.b32.xlu0 %v856_v1, %s887_s22 }
  0x25   : > { %292 = vrot.lane.b32.xlu1 %v859_v3, %s889_s24  ;;  %290 = vrot.lane.b32.xlu0 %v857_v2, %s889_s24 }
  0x29   : > { %294 = vrot.lane.b32.xlu1 %v854_v0, %s889_s24  ;;  %394 = vrot.lane.b32.xlu0 %v862_v9, %s890_s25  ;;  %v876_v9 = vld [vmem:[%s1050_s1 + $0x18] ss:$12 sps:$4 sm:$0xff]  }
  0x2d   : > { %396 = vrot.lane.b32.xlu1 %v863_v10, %s890_s25  ;;  %296 = vrot.lane.b32.xlu0 %v856_v1, %s889_s24  ;;  %v877_v10 = vld [vmem:[%s1050_s1 + $0x20] ss:$12 sps:$4 sm:$0xff]  }
  0x31   : > { %327 = vrot.lane.b32.xlu1 %v859_v3, %s891_s26  ;;  %325 = vrot.lane.b32.xlu0 %v857_v2, %s891_s26 }
  0x35   : > { %329 = vrot.lane.b32.xlu1 %v854_v0, %s891_s26  ;;  %416 = vrot.lane.b32.xlu0 %v864_v11, %s892_s27 }
  0x39   : > { %418 = vrot.lane.b32.xlu1 %v865_v12, %s892_s27  ;;  %331 = vrot.lane.b32.xlu0 %v856_v1, %s891_s26 }
  0x3d   : > { %440 = vrot.lane.b32.xlu1 %v867_v14, %s893_s30  ;;  %438 = vrot.lane.b32.xlu0 %v866_v15, %s893_s30 }
  0x41   : > { %478 = vperm.xlu0 %852, %v472_v17   ;;  %483 = vperm.xlu1 %853, %v473_v18  }
  0x45   : > { %488 = vperm.xlu1 %853, %v474_v20   ;;  %493 = vperm.xlu0 %852, %v475_v21  }
  0x83   : > { %v224_v22 = vpop.permute.xlu1 %223  ;;  %v220_v23 = vpop.permute.xlu0 %219 }
  0x87   : > { %v226_v24 = vpop.permute.xlu1 %225  ;;  %v222_v26 = vpop.permute.xlu0 %221 }
  0x88   : > { %v229_v25 = vsel %vm227_vm2, %v224_v22, %v226_v24  ;;  %v228_v27 = vsel %vm227_vm2, %v220_v23, %v222_v26 }
  0x89   : > { %234 = vst.msk [vmem:[#allocation2 + $0x8] sm:$0xff] %vm232_vm0, %v229_v25  ;;  %233 = vst.msk [vmem:[#allocation2] sm:$0xff] %vm232_vm0, %v228_v27 }
  0x8b   : > { %v258_v28 = vpop.permute.xlu1 %257  ;;  %v256_v29 = vpop.permute.xlu0 %255 }
  0x8c   : > { %v264_v30 = vsel %vm263_vm3, %v256_v29, %v258_v28 }
  0x8d   : > { %268 = vst.msk [vmem:[#allocation2 + $0x10] sm:$0xff] %vm232_vm0, %v264_v30 }
  0x8f   : > { %v260_v31 = vpop.permute.xlu1 %259  ;;  %v373_v32 = vpop.permute.xlu0 %372 }
  0x90   : > { %378 = vst.msk [vmem:[#allocation2 + $0x50] sm:$0xff] %vm232_vm0, %v373_v32  ;;  %v454_v34 = vld [vmem:[#allocation2] sm:$0xff]  ;;  %v455_v38 = vld [vmem:[#allocation2 + $0x8] sm:$0xff] }
  0x91   : > { %796 = vmatpush3.bf16.msra.mxu0 %v454_v34  ;;  %v782_v34 = vld [vmem:[%s1052_s3] ss:$0 sm:$0xff] }
  0x92   : > { %797 = vmatprep.subr.bf16.mxu0 %v463_v33 }
  0x93   : > { %v375_v35 = vpop.permute.xlu1 %374  ;;  %v262_v36 = vpop.permute.xlu0 %261 }
  0x94   : > { %379 = vst.msk [vmem:[#allocation2 + $0x58] sm:$0xff] %vm232_vm0, %v375_v35  ;;  %v265_v37 = vsel %vm263_vm3, %v260_v31, %v262_v36  ;;  %v456_v43 = vld [vmem:[#allocation2 + $0x10] sm:$0xff] }
  0x95   : > { %269 = vst.msk [vmem:[#allocation2 + $0x18] sm:$0xff] %vm232_vm0, %v265_v37  ;;  %798 = vmatpush3.bf16.msra.mxu0 %v455_v38 }
  0x97   : > { %v293_v39 = vpop.permute.xlu1 %292  ;;  %v291_v40 = vpop.permute.xlu0 %290  ;;  %v464_v41 = vld [vmem:[#allocation2 + $0x50] sm:$0xff] }
  0x98   : > { %v299_v42 = vsel %vm298_vm4, %v291_v40, %v293_v39  ;;  %799 = vmatprep.subr.bf16.mxu0 %v464_v41 }
  0x99   : > { %303 = vst.msk [vmem:[#allocation2 + $0x20] sm:$0xff] %vm232_vm0, %v299_v42  ;;  %800 = vmatpush3.bf16.msra.mxu0 %v456_v43 }
  0x9b   : > { %v295_v44 = vpop.permute.xlu1 %294  ;;  %v465_v45 = vld [vmem:[#allocation2 + $0x58] sm:$0xff]  ;;  %v395_v46 = vpop.permute.xlu0 %394 }
  0x9c   : > { %801 = vmatprep.subr.bf16.mxu0 %v465_v45  ;;  %400 = vst.msk [vmem:[#allocation2 + $0x60] sm:$0xff] %vm232_vm0, %v395_v46  ;;  %v457_v47 = vld [vmem:[#allocation2 + $0x18] sm:$0xff] }
  0x9d   : > { %802 = vmatpush3.bf16.msra.mxu0 %v457_v47 }
  0x9f   : > { %v397_v48 = vpop.permute.xlu1 %396  ;;  %v297_v49 = vpop.permute.xlu0 %296 }
  0xa0   : > { %401 = vst.msk [vmem:[#allocation2 + $0x68] sm:$0xff] %vm232_vm0, %v397_v48  ;;  %v300_v50 = vsel %vm298_vm4, %v295_v44, %v297_v49  ;;  %v458_v55 = vld [vmem:[#allocation2 + $0x20] sm:$0xff] }
  0xa1   : > { %304 = vst.msk [vmem:[#allocation2 + $0x28] sm:$0xff] %vm232_vm0, %v300_v50 }
  0xa3   : > { %v328_v51 = vpop.permute.xlu1 %327  ;;  %v326_v52 = vpop.permute.xlu0 %325  ;;  %v466_v53 = vld [vmem:[#allocation2 + $0x60] sm:$0xff] }
  0xa4   : > { %v334_v54 = vsel %vm333_vm5, %v326_v52, %v328_v51  ;;  %803 = vmatprep.subr.bf16.mxu0 %v466_v53 }
  0xa5   : > { %338 = vst.msk [vmem:[#allocation2 + $0x30] sm:$0xff] %vm232_vm0, %v334_v54  ;;  %804 = vmatpush3.bf16.msra.mxu0 %v458_v55 }
  0xa7   : > { %v330_v56 = vpop.permute.xlu1 %329  ;;  %v467_v57 = vld [vmem:[#allocation2 + $0x68] sm:$0xff]  ;;  %v417_v58 = vpop.permute.xlu0 %416 }
  0xa8   : > { %805 = vmatprep.subr.bf16.mxu0 %v467_v57  ;;  %422 = vst.msk [vmem:[#allocation2 + $0x70] sm:$0xff] %vm232_vm0, %v417_v58  ;;  %v459_v59 = vld [vmem:[#allocation2 + $0x28] sm:$0xff] }
  0xa9   : > { %806 = vmatpush3.bf16.msra.mxu0 %v459_v59 }
  0xab   : > { %v419_v60 = vpop.permute.xlu1 %418  ;;  %v332_v61 = vpop.permute.xlu0 %331 }
  0xac   : > { %423 = vst.msk [vmem:[#allocation2 + $0x78] sm:$0xff] %vm232_vm0, %v419_v60  ;;  %v335_v62 = vsel %vm333_vm5, %v330_v56, %v332_v61  ;;  %v460_v2 = vld [vmem:[#allocation2 + $0x30] sm:$0xff] }
  0xad   : > { %339 = vst.msk [vmem:[#allocation2 + $0x38] sm:$0xff] %vm232_vm0, %v335_v62 }
  0xaf   : > { %v441_v63 = vpop.permute.xlu1 %440  ;;  %v439_v0 = vpop.permute.xlu0 %438  ;;  %v468_v1 = vld [vmem:[#allocation2 + $0x70] sm:$0xff] }
  0xb0   : > { %445 = vst.msk [vmem:[#allocation2 + $0x88] sm:$0xff] %vm232_vm0, %v441_v63  ;;  %444 = vst.msk [vmem:[#allocation2 + $0x80] sm:$0xff] %vm232_vm0, %v439_v0  ;;  %807 = vmatprep.subr.bf16.mxu0 %v468_v1 }
  0xb1   : > { %808 = vmatpush3.bf16.msra.mxu0 %v460_v2 }
  0xb3   : > { %v469_v3 = vld [vmem:[#allocation2 + $0x78] sm:$0xff] }
  0xb4   : > { %809 = vmatprep.subr.bf16.mxu0 %v469_v3  ;;  %v461_v4 = vld [vmem:[#allocation2 + $0x38] sm:$0xff] }
  0xb5   : > { %810 = vmatpush3.bf16.msra.mxu0 %v461_v4 }
  0xb7   : > { %v470_v7 = vld [vmem:[#allocation2 + $0x80] sm:$0xff]  ;;  %v471_v8 = vld [vmem:[#allocation2 + $0x88] sm:$0xff] }
  0xb8   : > { %566 = vmatmul.mubr.bf16.vlgmr.msra.gmra.mrb[0].mxu0 %v870_v5  ;;  %827 = vmatprep.subr.bf16.mxu1 %v470_v7 }
  0xb9   : > { %828 = vmatpush3.bf16.msra.mxu1 %v470_v7  ;;  %573 = vmatprep.mubr.bf16.mxu0 %v873_v6 }
  0xba   : > { %829 = vmatprep.subr.bf16.mxu1 %v471_v8 }
  0xbd   : > { %830 = vmatpush3.bf16.msra.mxu1 %v471_v8 }
  0xc0   : > { %574 = vmatmul.mubr.bf16.gmra.mrb[4].mxu0 %v876_v9  ;;  %832 = vmatmul.mubr.msk.bf16.vlgmr.msra.gmra.mrb[0].mxu1 %vm526_vm1, %v877_v10  ;;  %v484_v13 = vpop.permute.xlu1 %483  ;;  %v479_v18 = vpop.permute.xlu0 %478 }
  0xc4   : > { %v489_v20 = vpop.permute.xlu1 %488  ;;  %v494_v37 = vpop.permute.xlu0 %493 }
 0x18b   : > { %v811_v11 = vpop.f32.mrb[0].mxu0 }
 0x18c   : > { %v812_v12 = vpop.f32.mrb[1].mxu0 }
 0x18d   : > { %v813_v14 = vadd.f32 %v812_v12, %v811_v11  ;;  %v814_v15 = vpop.f32.mrb[2].mxu0 }
 0x18e   : > { %v815_v16 = vpop.f32.mrb[3].mxu0 }
 0x18f   : > { %v816_v17 = vadd.f32 %v815_v16, %v814_v15  ;;  %v568_v21 = vadd.f32 %v813_v14, %v479_v18 }
 0x191   : > { %v571_v30 = vadd.f32 %v816_v17, %v484_v13 }
 0x193   : > { %v817_v22 = vpop.f32.mrb[4].mxu0  ;;  %v833_v23 = vpop.f32.mrb[0].mxu1 }
 0x194   : > { %v818_v24 = vpop.f32.mrb[5].mxu0  ;;  %v616_v25 = vpop.f32.mrb[1].mxu1 }
 0x195   : > { %v819_v26 = vadd.f32 %v818_v24, %v817_v22  ;;  %v617_v27 = vadd.f32 %v616_v25, %v568_v21  ;;  %v820_v28 = vpop.f32.mrb[6].mxu0  ;;  %v834_v29 = vpop.f32.mrb[2].mxu1 }
 0x196   : > { %v821_v31 = vpop.f32.mrb[7].mxu0  ;;  %v619_v32 = vpop.f32.mrb[3].mxu1 }
 0x197   : > { %v576_v33 = vadd.f32 %v819_v26, %v489_v20  ;;  %vm631_vm6 = vcmp.ge.f32.partialorder %v617_v27, 0.0  ;;  %v635_v35 = vmul.f32 0.2, %v617_v27  ;;  %v822_v36 = vadd.f32 %v821_v31, %v820_v28 }
 0x198   : > { %v620_v38 = vadd.f32 %v619_v32, %v571_v30 }
 0x199   : > { %v625_v39 = vadd.f32 %v833_v23, %v576_v33  ;;  %v639_v40 = vsel %vm631_vm6, %v617_v27, %v635_v35  ;;  %v579_v41 = vadd.f32 %v822_v36, %v494_v37 }
 0x19a   : > { %v650_v42 = vmul.f32 %v782_v34, %v639_v40  ;;  %vm632_vm7 = vcmp.ge.f32.partialorder %v620_v38, 0.0  ;;  %v636_v43 = vmul.f32 0.2, %v620_v38 }
 0x19b   : > { %vm633_vm8 = vcmp.ge.f32.partialorder %v625_v39, 0.0  ;;  %v637_v44 = vmul.f32 0.2, %v625_v39  ;;  %v628_v45 = vadd.f32 %v834_v29, %v579_v41 }
 0x19c   : > { %v791_v46 = vpack.c.bf16 %v650_v42, %v650_v42  ;;  %v640_v47 = vsel %vm632_vm7, %v620_v38, %v636_v43 }
 0x19d   : > { %v641_v48 = vsel %vm633_vm8, %v625_v39, %v637_v44  ;;  %vm634_vm11 = vcmp.ge.f32.partialorder %v628_v45, 0.0  ;;  %v638_v49 = vmul.f32 0.2, %v628_v45  ;;  %v651_v50 = vmul.f32 %v782_v34, %v640_v47 }
 0x19e   : > { %v652_v51 = vmul.f32 %v782_v34, %v641_v48  ;;  %675 = vst.msk [vmem:[%s1013_s28 + $0x4] sm:$0xf] %vm674_vm9, %v791_v46 }
 0x19f   : > { %680 = vst.msk [vmem:[%s1013_s28 + $0x4] sm:$0xf] %vm679_vm10, %v894_v19  ;;  %v642_v52 = vsel %vm634_vm11, %v628_v45, %v638_v49  ;;  %v792_v53 = vpack.c.bf16 %v651_v50, %v651_v50 }
 0x1a0   : > { %v793_v54 = vpack.c.bf16 %v652_v51, %v652_v51  ;;  %v653_v55 = vmul.f32 %v782_v34, %v642_v52 }
 0x1a1   : > { %676 = vst.msk [vmem:[%s1013_s28 + $0xc] sm:$0xf] %vm674_vm9, %v792_v53 }
 0x1a2   : > { %677 = vst.msk [vmem:[%s1013_s28 + $0x14] sm:$0xf] %vm674_vm9, %v793_v54  ;;  %v794_v56 = vpack.c.bf16 %v653_v55, %v653_v55 }
 0x1a3   : > { %681 = vst.msk [vmem:[%s1013_s28 + $0xc] sm:$0xf] %vm679_vm10, %v894_v19  ;;  %682 = vst.msk [vmem:[%s1013_s28 + $0x14] sm:$0xf] %vm679_vm10, %v894_v19 }
 0x1a4   : > { %678 = vst.msk [vmem:[%s1013_s28 + $0x1c] sm:$0xf] %vm674_vm9, %v794_v56 }
 0x1a5   : > { %683 = vst.msk [vmem:[%s1013_s28 + $0x1c] sm:$0xf] %vm679_vm10, %v894_v19 }
 0x1a6 PF: > { %s14_s15 = sadd.s32 1, %s884_s15  }
 0x1a7   : > { %p11_p4 = scmp.ge.s32.totalorder %s14_s15, 4  }
 0x1a9   :  { %13 = sbr.rel (!%p11_p4) target bundleno = 1 (0x1), region = 66 }

// kernel: registration_subnet_forward.14
= control target key start
LH: loop header
LB: loop body
LE: loop exit
PB: predicated region body
PF: predicated region fallthrough
CT: control target
= control target key end

     0   :  { %s920_s15 = smov 0   ;;  %s1049_s0 = inlined_call_operand.vmem [shape: bf16[2,32,139], index: 0, kind: input, shape index: {}]   ;;  %s1050_s1 = inlined_call_operand.vmem [shape: bf16[32,288], index: 1, kind: input, shape index: {}]   ;;  %s1051_s2 = inlined_call_operand.vmem [shape: f32[32,1], index: 2, kind: input, shape index: {}]   ;;  %s1052_s3 = inlined_call_operand.vmem [shape: f32[1,6], index: 3, kind: input, shape index: {}]   ;;  %s1053_s4 = inlined_call_operand.vmem [shape: bf16[2,32,139], index: 4, kind: output, shape index: {}]  }
   0x1 LB: > { %s739_s16 = sadd.s32 4294967295, %s884_s15   ;;  %p743_p0 = scmp.ge.s32.totalorder %s884_s15, 1  ;;  %s884_s15 = sphi %s920_s15, %s14_s15  }
   0x2   : > { %p162_p1 = scmp.lt.s32.totalorder %s884_s15, 3 }
   0x4   : > { %p163_p2 = pnand %p743_p0, %p162_p1 }
   0x5   : > { %p188_p3 = scmp.lt.s32.totalorder (!%p163_p2), %s739_s16, 1  ;;  %s886_s21 = smov (!%p163_p2), 5   ;;  %vm232_vm0 = vcmask (!%p163_p2), 48128   ;;  %v872_v13 = vld [vmem:[%s1050_s1 + $0x4] ss:$12 sps:$4 sm:$0xff] (!%p163_p2)   ;;  %vm526_vm1 = vcmask (!%p163_p2), 261120  }
   0x6   : > { %166 = sbr.rel (%p163_p2) target bundleno = 422 (0x1a6), region = 36  ;;  %s887_s22 = smov (!%p163_p2), 4   ;;  %565 = vmatprep.mubr.bf16.mxu0 (!%p163_p2), %v872_v13  ;;  %v875_v16 = vld [vmem:[%s1050_s1 + $0x8] ss:$12 sps:$4 sm:$0xff] (!%p163_p2)   ;;  %v472_v17 = vld [vmem:[%s1051_s2] sm:$0xff] (!%p163_p2)  ;;  %v894_v19 = vmov (!%p163_p2), 0  }
   0x7   : > { %s888_s23 = smov (!%p163_p2), 127   ;;  %s889_s24 = smov (!%p163_p2), 3   ;;  %831 = vmatprep.mubr.msk.bf16.mxu1 (!%p163_p2), %vm526_vm1, %v875_v16  ;;  %v473_v18 = vld [vmem:[%s1051_s2 + $0x8] sm:$0xff] (!%p163_p2)  ;;  %852 = vset.pattern.permute.xlu0 (!%p163_p2), %v894_v19  ;;  %v474_v20 = vld [vmem:[%s1051_s2 + $0x10] sm:$0xff] (!%p163_p2)  ;;  %v475_v21 = vld [vmem:[%s1051_s2 + $0x18] sm:$0xff] (!%p163_p2)  ;;  %vm227_vm2 = vcmask (!%p163_p2), 39936  }
   0x8   : > { %s890_s25 = smov (!%p163_p2), 125   ;;  %s891_s26 = smov (!%p163_p2), 1   ;;  %853 = vset.pattern.permute.xlu1 (!%p163_p2), %v894_v19  ;;  %vm263_vm3 = vcmask (!%p163_p2), 31744   ;;  %vm298_vm4 = vcmask (!%p163_p2), 23552   ;;  %vm333_vm5 = vcmask (!%p163_p2), 7168   ;;  %vm674_vm9 = vcmask (!%p163_p2), 44032  }
   0x9   : > { %s892_s27 = smov (!%p163_p2), 124   ;;  %s893_s30 = smov (!%p163_p2), 123   ;;  %vm679_vm10 = vcmask (!%p163_p2), 85040  }
   0xd   : > { %s1055_s16 = smov (!%p188_p3, %s739_s16), 1 }
   0xe   : > { %s789_s17 = sshll.u32 %s1055_s16, 5 }
   0xf   : > { %s936_s20 = scalar_lea.vmem %s1049_s0, %s789_s17  ;;  %s1013_s28 = scalar_lea.vmem %s1053_s4, %s789_s17 }
  0x10   : > { %v854_v0 = vld [vmem:[%s936_s20 + $0x10] ss:$8 sps:$4 sm:$0xff]   ;;  %v856_v1 = vld [vmem:[%s936_s20 + $0x14] ss:$8 sps:$4 sm:$0xff]   ;;  %v857_v2 = vld [vmem:[%s936_s20] ss:$8 sps:$4 sm:$0xff]  }
  0x11   : > { %223 = vrot.lane.b32.xlu1 %v854_v0, %s886_s21  ;;  %v859_v3 = vld [vmem:[%s936_s20 + $0x4] ss:$8 sps:$4 sm:$0xff]   ;;  %219 = vrot.lane.b32.xlu0 %v857_v2, %s886_s21  ;;  %v869_v6 = vld [vmem:[%s936_s20 + $0x14] ss:$8 sps:$4 sm:$0xff]  }
  0x12   : > { %v868_v4 = vld [vmem:[%s936_s20 + $0x4] ss:$8 sps:$4 sm:$0xff]   ;;  %v861_v7 = vld [vmem:[%s936_s20 + $0x14] ss:$8 sps:$4 sm:$0xff]   ;;  %357 = vst.msk [vmem:[#allocation2 + $0x48] sm:$0xff] %vm232_vm0, %v869_v6  ;;  %654 = vst [vmem:[%s1013_s28] sm:$0xf] %v894_v19 }
  0x13   : > { %v860_v5 = vld [vmem:[%s936_s20 + $0x4] ss:$8 sps:$4 sm:$0xff]   ;;  %356 = vst.msk [vmem:[#allocation2 + $0x40] sm:$0xff] %vm232_vm0, %v868_v4  ;;  %v863_v10 = vld [vmem:[%s936_s20 + $0x14] ss:$8 sps:$4 sm:$0xff]  }
  0x14   : > { %v862_v9 = vld [vmem:[%s936_s20 + $0x4] ss:$8 sps:$4 sm:$0xff]   ;;  %v865_v12 = vld [vmem:[%s936_s20 + $0x14] ss:$8 sps:$4 sm:$0xff]   ;;  %655 = vst [vmem:[%s1013_s28 + $0x8] sm:$0xf] %v894_v19 }
  0x15   : > { %225 = vrot.lane.b32.xlu1 %v856_v1, %s886_s21  ;;  %221 = vrot.lane.b32.xlu0 %v859_v3, %s886_s21  ;;  %v864_v11 = vld [vmem:[%s936_s20 + $0x4] ss:$8 sps:$4 sm:$0xff]   ;;  %v867_v14 = vld [vmem:[%s936_s20 + $0x14] ss:$8 sps:$4 sm:$0xff]  }
  0x16   : > { %v866_v15 = vld [vmem:[%s936_s20 + $0x4] ss:$8 sps:$4 sm:$0xff]   ;;  %v873_v6 = vld [vmem:[%s1050_s1 + $0x1c] ss:$12 sps:$4 sm:$0xff]   ;;  %656 = vst [vmem:[%s1013_s28 + $0x10] sm:$0xf] %v894_v19 }
  0x17   : > { %657 = vst [vmem:[%s1013_s28 + $0x18] sm:$0xf] %v894_v19 }
  0x19   : > { %257 = vrot.lane.b32.xlu1 %v859_v3, %s887_s22  ;;  %255 = vrot.lane.b32.xlu0 %v857_v2, %s887_s22  ;;  %v463_v33 = vld [vmem:[#allocation2 + $0x48] sm:$0xff] }
  0x1a   : > { %v462_v8 = vld [vmem:[#allocation2 + $0x40] sm:$0xff] }
  0x1b   : > { %795 = vmatprep.subr.bf16.mxu0 %v462_v8 }
  0x1d   : > { %259 = vrot.lane.b32.xlu1 %v854_v0, %s887_s22  ;;  %372 = vrot.lane.b32.xlu0 %v860_v5, %s888_s23  ;;  %v870_v5 = vld [vmem:[%s1050_s1] ss:$12 sps:$4 sm:$0xff]  }
  0x21   : > { %374 = vrot.lane.b32.xlu1 %v861_v7, %s888_s23  ;;  %261 = vrot.lane.b32.xlu0 %v856_v1, %s887_s22 }
  0x25   : > { %292 = vrot.lane.b32.xlu1 %v859_v3, %s889_s24  ;;  %290 = vrot.lane.b32.xlu0 %v857_v2, %s889_s24 }
  0x29   : > { %294 = vrot.lane.b32.xlu1 %v854_v0, %s889_s24  ;;  %394 = vrot.lane.b32.xlu0 %v862_v9, %s890_s25  ;;  %v876_v9 = vld [vmem:[%s1050_s1 + $0x18] ss:$12 sps:$4 sm:$0xff]  }
  0x2d   : > { %396 = vrot.lane.b32.xlu1 %v863_v10, %s890_s25  ;;  %296 = vrot.lane.b32.xlu0 %v856_v1, %s889_s24  ;;  %v877_v10 = vld [vmem:[%s1050_s1 + $0x20] ss:$12 sps:$4 sm:$0xff]  }
  0x31   : > { %327 = vrot.lane.b32.xlu1 %v859_v3, %s891_s26  ;;  %325 = vrot.lane.b32.xlu0 %v857_v2, %s891_s26 }
  0x35   : > { %329 = vrot.lane.b32.xlu1 %v854_v0, %s891_s26  ;;  %416 = vrot.lane.b32.xlu0 %v864_v11, %s892_s27 }
  0x39   : > { %418 = vrot.lane.b32.xlu1 %v865_v12, %s892_s27  ;;  %331 = vrot.lane.b32.xlu0 %v856_v1, %s891_s26 }
  0x3d   : > { %440 = vrot.lane.b32.xlu1 %v867_v14, %s893_s30  ;;  %438 = vrot.lane.b32.xlu0 %v866_v15, %s893_s30 }
  0x41   : > { %478 = vperm.xlu0 %852, %v472_v17   ;;  %483 = vperm.xlu1 %853, %v473_v18  }
  0x45   : > { %488 = vperm.xlu1 %853, %v474_v20   ;;  %493 = vperm.xlu0 %852, %v475_v21  }
  0x83   : > { %v224_v22 = vpop.permute.xlu1 %223  ;;  %v220_v23 = vpop.permute.xlu0 %219 }
  0x87   : > { %v226_v24 = vpop.permute.xlu1 %225  ;;  %v222_v26 = vpop.permute.xlu0 %221 }
  0x88   : > { %v229_v25 = vsel %vm227_vm2, %v224_v22, %v226_v24  ;;  %v228_v27 = vsel %vm227_vm2, %v220_v23, %v222_v26 }
  0x89   : > { %234 = vst.msk [vmem:[#allocation2 + $0x8] sm:$0xff] %vm232_vm0, %v229_v25  ;;  %233 = vst.msk [vmem:[#allocation2] sm:$0xff] %vm232_vm0, %v228_v27 }
  0x8b   : > { %v258_v28 = vpop.permute.xlu1 %257  ;;  %v256_v29 = vpop.permute.xlu0 %255 }
  0x8c   : > { %v264_v30 = vsel %vm263_vm3, %v256_v29, %v258_v28 }
  0x8d   : > { %268 = vst.msk [vmem:[#allocation2 + $0x10] sm:$0xff] %vm232_vm0, %v264_v30 }
  0x8f   : > { %v260_v31 = vpop.permute.xlu1 %259  ;;  %v373_v32 = vpop.permute.xlu0 %372 }
  0x90   : > { %378 = vst.msk [vmem:[#allocation2 + $0x50] sm:$0xff] %vm232_vm0, %v373_v32  ;;  %v454_v34 = vld [vmem:[#allocation2] sm:$0xff]  ;;  %v455_v38 = vld [vmem:[#allocation2 + $0x8] sm:$0xff] }
  0x91   : > { %796 = vmatpush3.bf16.msra.mxu0 %v454_v34  ;;  %v782_v34 = vld [vmem:[%s1052_s3] ss:$0 sm:$0xff] }
  0x92   : > { %797 = vmatprep.subr.bf16.mxu0 %v463_v33 }
  0x93   : > { %v375_v35 = vpop.permute.xlu1 %374  ;;  %v262_v36 = vpop.permute.xlu0 %261 }
  0x94   : > { %379 = vst.msk [vmem:[#allocation2 + $0x58] sm:$0xff] %vm232_vm0, %v375_v35  ;;  %v265_v37 = vsel %vm263_vm3, %v260_v31, %v262_v36  ;;  %v456_v43 = vld [vmem:[#allocation2 + $0x10] sm:$0xff] }
  0x95   : > { %269 = vst.msk [vmem:[#allocation2 + $0x18] sm:$0xff] %vm232_vm0, %v265_v37  ;;  %798 = vmatpush3.bf16.msra.mxu0 %v455_v38 }
  0x97   : > { %v293_v39 = vpop.permute.xlu1 %292  ;;  %v291_v40 = vpop.permute.xlu0 %290  ;;  %v464_v41 = vld [vmem:[#allocation2 + $0x50] sm:$0xff] }
  0x98   : > { %v299_v42 = vsel %vm298_vm4, %v291_v40, %v293_v39  ;;  %799 = vmatprep.subr.bf16.mxu0 %v464_v41 }
  0x99   : > { %303 = vst.msk [vmem:[#allocation2 + $0x20] sm:$0xff] %vm232_vm0, %v299_v42  ;;  %800 = vmatpush3.bf16.msra.mxu0 %v456_v43 }
  0x9b   : > { %v295_v44 = vpop.permute.xlu1 %294  ;;  %v465_v45 = vld [vmem:[#allocation2 + $0x58] sm:$0xff]  ;;  %v395_v46 = vpop.permute.xlu0 %394 }
  0x9c   : > { %801 = vmatprep.subr.bf16.mxu0 %v465_v45  ;;  %400 = vst.msk [vmem:[#allocation2 + $0x60] sm:$0xff] %vm232_vm0, %v395_v46  ;;  %v457_v47 = vld [vmem:[#allocation2 + $0x18] sm:$0xff] }
  0x9d   : > { %802 = vmatpush3.bf16.msra.mxu0 %v457_v47 }
  0x9f   : > { %v397_v48 = vpop.permute.xlu1 %396  ;;  %v297_v49 = vpop.permute.xlu0 %296 }
  0xa0   : > { %401 = vst.msk [vmem:[#allocation2 + $0x68] sm:$0xff] %vm232_vm0, %v397_v48  ;;  %v300_v50 = vsel %vm298_vm4, %v295_v44, %v297_v49  ;;  %v458_v55 = vld [vmem:[#allocation2 + $0x20] sm:$0xff] }
  0xa1   : > { %304 = vst.msk [vmem:[#allocation2 + $0x28] sm:$0xff] %vm232_vm0, %v300_v50 }
  0xa3   : > { %v328_v51 = vpop.permute.xlu1 %327  ;;  %v326_v52 = vpop.permute.xlu0 %325  ;;  %v466_v53 = vld [vmem:[#allocation2 + $0x60] sm:$0xff] }
  0xa4   : > { %v334_v54 = vsel %vm333_vm5, %v326_v52, %v328_v51  ;;  %803 = vmatprep.subr.bf16.mxu0 %v466_v53 }
  0xa5   : > { %338 = vst.msk [vmem:[#allocation2 + $0x30] sm:$0xff] %vm232_vm0, %v334_v54  ;;  %804 = vmatpush3.bf16.msra.mxu0 %v458_v55 }
  0xa7   : > { %v330_v56 = vpop.permute.xlu1 %329  ;;  %v467_v57 = vld [vmem:[#allocation2 + $0x68] sm:$0xff]  ;;  %v417_v58 = vpop.permute.xlu0 %416 }
  0xa8   : > { %805 = vmatprep.subr.bf16.mxu0 %v467_v57  ;;  %422 = vst.msk [vmem:[#allocation2 + $0x70] sm:$0xff] %vm232_vm0, %v417_v58  ;;  %v459_v59 = vld [vmem:[#allocation2 + $0x28] sm:$0xff] }
  0xa9   : > { %806 = vmatpush3.bf16.msra.mxu0 %v459_v59 }
  0xab   : > { %v419_v60 = vpop.permute.xlu1 %418  ;;  %v332_v61 = vpop.permute.xlu0 %331 }
  0xac   : > { %423 = vst.msk [vmem:[#allocation2 + $0x78] sm:$0xff] %vm232_vm0, %v419_v60  ;;  %v335_v62 = vsel %vm333_vm5, %v330_v56, %v332_v61  ;;  %v460_v2 = vld [vmem:[#allocation2 + $0x30] sm:$0xff] }
  0xad   : > { %339 = vst.msk [vmem:[#allocation2 + $0x38] sm:$0xff] %vm232_vm0, %v335_v62 }
  0xaf   : > { %v441_v63 = vpop.permute.xlu1 %440  ;;  %v439_v0 = vpop.permute.xlu0 %438  ;;  %v468_v1 = vld [vmem:[#allocation2 + $0x70] sm:$0xff] }
  0xb0   : > { %445 = vst.msk [vmem:[#allocation2 + $0x88] sm:$0xff] %vm232_vm0, %v441_v63  ;;  %444 = vst.msk [vmem:[#allocation2 + $0x80] sm:$0xff] %vm232_vm0, %v439_v0  ;;  %807 = vmatprep.subr.bf16.mxu0 %v468_v1 }
  0xb1   : > { %808 = vmatpush3.bf16.msra.mxu0 %v460_v2 }
  0xb3   : > { %v469_v3 = vld [vmem:[#allocation2 + $0x78] sm:$0xff] }
  0xb4   : > { %809 = vmatprep.subr.bf16.mxu0 %v469_v3  ;;  %v461_v4 = vld [vmem:[#allocation2 + $0x38] sm:$0xff] }
  0xb5   : > { %810 = vmatpush3.bf16.msra.mxu0 %v461_v4 }
  0xb7   : > { %v470_v7 = vld [vmem:[#allocation2 + $0x80] sm:$0xff]  ;;  %v471_v8 = vld [vmem:[#allocation2 + $0x88] sm:$0xff] }
  0xb8   : > { %566 = vmatmul.mubr.bf16.vlgmr.msra.gmra.mrb[0].mxu0 %v870_v5  ;;  %827 = vmatprep.subr.bf16.mxu1 %v470_v7 }
  0xb9   : > { %828 = vmatpush3.bf16.msra.mxu1 %v470_v7  ;;  %573 = vmatprep.mubr.bf16.mxu0 %v873_v6 }
  0xba   : > { %829 = vmatprep.subr.bf16.mxu1 %v471_v8 }
  0xbd   : > { %830 = vmatpush3.bf16.msra.mxu1 %v471_v8 }
  0xc0   : > { %574 = vmatmul.mubr.bf16.gmra.mrb[4].mxu0 %v876_v9  ;;  %832 = vmatmul.mubr.msk.bf16.vlgmr.msra.gmra.mrb[0].mxu1 %vm526_vm1, %v877_v10  ;;  %v484_v13 = vpop.permute.xlu1 %483  ;;  %v479_v18 = vpop.permute.xlu0 %478 }
  0xc4   : > { %v489_v20 = vpop.permute.xlu1 %488  ;;  %v494_v37 = vpop.permute.xlu0 %493 }
 0x18b   : > { %v811_v11 = vpop.f32.mrb[0].mxu0 }
 0x18c   : > { %v812_v12 = vpop.f32.mrb[1].mxu0 }
 0x18d   : > { %v813_v14 = vadd.f32 %v812_v12, %v811_v11  ;;  %v814_v15 = vpop.f32.mrb[2].mxu0 }
 0x18e   : > { %v815_v16 = vpop.f32.mrb[3].mxu0 }
 0x18f   : > { %v816_v17 = vadd.f32 %v815_v16, %v814_v15  ;;  %v568_v21 = vadd.f32 %v813_v14, %v479_v18 }
 0x191   : > { %v571_v30 = vadd.f32 %v816_v17, %v484_v13 }
 0x193   : > { %v817_v22 = vpop.f32.mrb[4].mxu0  ;;  %v833_v23 = vpop.f32.mrb[0].mxu1 }
 0x194   : > { %v818_v24 = vpop.f32.mrb[5].mxu0  ;;  %v616_v25 = vpop.f32.mrb[1].mxu1 }
 0x195   : > { %v819_v26 = vadd.f32 %v818_v24, %v817_v22  ;;  %v617_v27 = vadd.f32 %v616_v25, %v568_v21  ;;  %v820_v28 = vpop.f32.mrb[6].mxu0  ;;  %v834_v29 = vpop.f32.mrb[2].mxu1 }
 0x196   : > { %v821_v31 = vpop.f32.mrb[7].mxu0  ;;  %v619_v32 = vpop.f32.mrb[3].mxu1 }
 0x197   : > { %v576_v33 = vadd.f32 %v819_v26, %v489_v20  ;;  %vm631_vm6 = vcmp.ge.f32.partialorder %v617_v27, 0.0  ;;  %v635_v35 = vmul.f32 0.2, %v617_v27  ;;  %v822_v36 = vadd.f32 %v821_v31, %v820_v28 }
 0x198   : > { %v620_v38 = vadd.f32 %v619_v32, %v571_v30 }
 0x199   : > { %v625_v39 = vadd.f32 %v833_v23, %v576_v33  ;;  %v639_v40 = vsel %vm631_vm6, %v617_v27, %v635_v35  ;;  %v579_v41 = vadd.f32 %v822_v36, %v494_v37 }
 0x19a   : > { %v650_v42 = vmul.f32 %v782_v34, %v639_v40  ;;  %vm632_vm7 = vcmp.ge.f32.partialorder %v620_v38, 0.0  ;;  %v636_v43 = vmul.f32 0.2, %v620_v38 }
 0x19b   : > { %vm633_vm8 = vcmp.ge.f32.partialorder %v625_v39, 0.0  ;;  %v637_v44 = vmul.f32 0.2, %v625_v39  ;;  %v628_v45 = vadd.f32 %v834_v29, %v579_v41 }
 0x19c   : > { %v791_v46 = vpack.c.bf16 %v650_v42, %v650_v42  ;;  %v640_v47 = vsel %vm632_vm7, %v620_v38, %v636_v43 }
 0x19d   : > { %v641_v48 = vsel %vm633_vm8, %v625_v39, %v637_v44  ;;  %vm634_vm11 = vcmp.ge.f32.partialorder %v628_v45, 0.0  ;;  %v638_v49 = vmul.f32 0.2, %v628_v45  ;;  %v651_v50 = vmul.f32 %v782_v34, %v640_v47 }
 0x19e   : > { %v652_v51 = vmul.f32 %v782_v34, %v641_v48  ;;  %675 = vst.msk [vmem:[%s1013_s28 + $0x4] sm:$0xf] %vm674_vm9, %v791_v46 }
 0x19f   : > { %680 = vst.msk [vmem:[%s1013_s28 + $0x4] sm:$0xf] %vm679_vm10, %v894_v19  ;;  %v642_v52 = vsel %vm634_vm11, %v628_v45, %v638_v49  ;;  %v792_v53 = vpack.c.bf16 %v651_v50, %v651_v50 }
 0x1a0   : > { %v793_v54 = vpack.c.bf16 %v652_v51, %v652_v51  ;;  %v653_v55 = vmul.f32 %v782_v34, %v642_v52 }
 0x1a1   : > { %676 = vst.msk [vmem:[%s1013_s28 + $0xc] sm:$0xf] %vm674_vm9, %v792_v53 }
 0x1a2   : > { %677 = vst.msk [vmem:[%s1013_s28 + $0x14] sm:$0xf] %vm674_vm9, %v793_v54  ;;  %v794_v56 = vpack.c.bf16 %v653_v55, %v653_v55 }
 0x1a3   : > { %681 = vst.msk [vmem:[%s1013_s28 + $0xc] sm:$0xf] %vm679_vm10, %v894_v19  ;;  %682 = vst.msk [vmem:[%s1013_s28 + $0x14] sm:$0xf] %vm679_vm10, %v894_v19 }
 0x1a4   : > { %678 = vst.msk [vmem:[%s1013_s28 + $0x1c] sm:$0xf] %vm674_vm9, %v794_v56 }
 0x1a5   : > { %683 = vst.msk [vmem:[%s1013_s28 + $0x1c] sm:$0xf] %vm679_vm10, %v894_v19 }
 0x1a6 PF: > { %s14_s15 = sadd.s32 1, %s884_s15  }
 0x1a7   : > { %p11_p4 = scmp.ge.s32.totalorder %s14_s15, 4  }
 0x1a9   :  { %13 = sbr.rel (!%p11_p4) target bundleno = 1 (0x1), region = 66 }

// kernel: registration_subnet_forward.15
= control target key start
LH: loop header
LB: loop body
LE: loop exit
PB: predicated region body
PF: predicated region fallthrough
CT: control target
= control target key end

     0   :  { %s845_s17 = smov 0   ;;  %s969_s0 = inlined_call_operand.vmem [shape: bf16[2,32,133], index: 0, kind: input, shape index: {}]   ;;  %s970_s1 = inlined_call_operand.vmem [shape: bf16[32,288], index: 1, kind: input, shape index: {}]   ;;  %s971_s2 = inlined_call_operand.vmem [shape: f32[32,1], index: 2, kind: input, shape index: {}]   ;;  %s972_s3 = inlined_call_operand.<no memory space> [shape: f32[1,1], index: 3, kind: input, shape index: {}]   ;;  %s973_s4 = inlined_call_operand.vmem [shape: bf16[2,32,133], index: 4, kind: output, shape index: {}]  }
   0x1   :  { %v9_v0 = vstv %s972_s3 }
   0x2   :  { %10 = vst [vmem:[#allocation3] sm:$0x1] %v9_v0 }
   0x3 LB: > { %s669_s18 = sadd.s32 4294967295, %s806_s17   ;;  %p673_p0 = scmp.ge.s32.totalorder %s806_s17, 1  ;;  %s806_s17 = sphi %s845_s17, %s16_s17  }
   0x4   : > { %p164_p1 = scmp.lt.s32.totalorder %s806_s17, 3 }
   0x6   : > { %p165_p2 = pnand %p673_p0, %p164_p1 }
   0x7   : > { %p190_p3 = scmp.lt.s32.totalorder (!%p165_p2), %s669_s18, 1  ;;  %s808_s22 = smov (!%p165_p2), 4   ;;  %vm221_vm0 = vcmask (!%p165_p2), 7168   ;;  %v794_v17 = vld [vmem:[%s970_s1 + $0x4] ss:$12 sps:$4 sm:$0xff] (!%p165_p2)   ;;  %vm456_vm1 = vcmask (!%p165_p2), 261120  }
   0x8   : > { %168 = sbr.rel (%p165_p2) target bundleno = 411 (0x19b), region = 36  ;;  %s809_s23 = smov (!%p165_p2), 127   ;;  %495 = vmatprep.mubr.bf16.mxu0 (!%p165_p2), %v794_v17  ;;  %v795_v21 = vld [vmem:[%s970_s1 + $0x8] ss:$12 sps:$4 sm:$0xff] (!%p165_p2)   ;;  %v792_v54 = vld [vmem:[%s970_s1] ss:$12 sps:$4 sm:$0xff] (!%p165_p2)  }
   0x9   : > { %s810_s24 = smov (!%p165_p2), 3   ;;  %s811_s25 = smov (!%p165_p2), 126   ;;  %753 = vmatprep.mubr.msk.bf16.mxu1 (!%p165_p2), %vm456_vm1, %v795_v21  ;;  %v797_v56 = vld [vmem:[%s970_s1 + $0x1c] ss:$12 sps:$4 sm:$0xff] (!%p165_p2)   ;;  %v796_v57 = vld [vmem:[%s970_s1 + $0x20] ss:$12 sps:$4 sm:$0xff] (!%p165_p2)  }
   0xa   : > { %s812_s26 = smov (!%p165_p2), 2   ;;  %s813_s27 = smov (!%p165_p2), 125   ;;  %v799_v58 = vld [vmem:[%s970_s1 + $0x18] ss:$12 sps:$4 sm:$0xff] (!%p165_p2)   ;;  %v816_v59 = vmov (!%p165_p2), 0   ;;  %vm604_vm4 = vcmask (!%p165_p2), 3072  }
   0xb   : > { %s814_s28 = smov (!%p165_p2), 1   ;;  %s815_s5 = smov (!%p165_p2), 124   ;;  %v422_v62 = vld [vmem:[%s971_s2] sm:$0xff] (!%p165_p2)  ;;  %v425_v21 = vld [vmem:[%s971_s2 + $0x18] sm:$0xff] (!%p165_p2)  ;;  %vm609_vm5 = vcmask (!%p165_p2), 35848  }
   0xf   : > { %s975_s18 = smov (!%p190_p3, %s669_s18), 1 }
  0x10   : > { %s711_s3 = sshll.u32 %s975_s18, 5 }
  0x11   : > { %s861_s21 = scalar_lea.vmem %s969_s0, %s711_s3  ;;  %s924_s20 = scalar_lea.vmem %s973_s4, %s711_s3 }
  0x12   : > { %v774_v1 = vld [vmem:[%s861_s21] ss:$8 sps:$4 sm:$0xff]   ;;  %v775_v2 = vld [vmem:[%s861_s21 + $0x4] ss:$8 sps:$4 sm:$0xff]   ;;  %v776_v3 = vld [vmem:[%s861_s21 + $0x10] ss:$8 sps:$4 sm:$0xff]  }
  0x13   : > { %215 = vrot.lane.b32.xlu0 %v774_v1, %s808_s22  ;;  %322 = vrot.lane.b32.xlu1 %v775_v2, %s809_s23  ;;  %v777_v4 = vld [vmem:[%s861_s21] ss:$8 sps:$4 sm:$0xff]   ;;  %v778_v5 = vld [vmem:[%s861_s21 + $0x14] ss:$8 sps:$4 sm:$0xff]  }
  0x14   : > { %v779_v6 = vld [vmem:[%s861_s21 + $0x10] ss:$8 sps:$4 sm:$0xff]   ;;  %v780_v7 = vld [vmem:[%s861_s21 + $0x4] ss:$8 sps:$4 sm:$0xff]   ;;  %v781_v8 = vld [vmem:[%s861_s21] ss:$8 sps:$4 sm:$0xff]  }
  0x15   : > { %v782_v9 = vld [vmem:[%s861_s21 + $0x14] ss:$8 sps:$4 sm:$0xff]   ;;  %v783_v10 = vld [vmem:[%s861_s21 + $0x10] ss:$8 sps:$4 sm:$0xff]   ;;  %v790_v11 = vld [vmem:[%s861_s21 + $0x4] ss:$8 sps:$4 sm:$0xff]  }
  0x16   : > { %v784_v12 = vld [vmem:[%s861_s21 + $0x4] ss:$8 sps:$4 sm:$0xff]   ;;  %v791_v13 = vld [vmem:[%s861_s21 + $0x14] ss:$8 sps:$4 sm:$0xff]   ;;  %v785_v14 = vld [vmem:[%s861_s21] ss:$8 sps:$4 sm:$0xff]  }
  0x17   : > { %217 = vrot.lane.b32.xlu0 %v776_v3, %s808_s22  ;;  %238 = vrot.lane.b32.xlu1 %v777_v4, %s810_s24  ;;  %306 = vst.msk [vmem:[#allocation2 + $0x40] sm:$0xff] %vm221_vm0, %v790_v11  ;;  %307 = vst.msk [vmem:[#allocation2 + $0x48] sm:$0xff] %vm221_vm0, %v791_v13  ;;  %v786_v15 = vld [vmem:[%s861_s21 + $0x14] ss:$8 sps:$4 sm:$0xff]   ;;  %v787_v16 = vld [vmem:[%s861_s21 + $0x10] ss:$8 sps:$4 sm:$0xff]  }
  0x18   : > { %v788_v18 = vld [vmem:[%s861_s21 + $0x4] ss:$8 sps:$4 sm:$0xff]   ;;  %v789_v20 = vld [vmem:[%s861_s21 + $0x14] ss:$8 sps:$4 sm:$0xff]   ;;  %584 = vst [vmem:[%s924_s20] sm:$0xf] %v816_v59 }
  0x19   : > { %585 = vst [vmem:[%s924_s20 + $0x8] sm:$0xf] %v816_v59  ;;  %586 = vst [vmem:[%s924_s20 + $0x10] sm:$0xf] %v816_v59  ;;  %v423_v2 = vld [vmem:[%s971_s2 + $0x8] sm:$0xff] }
  0x1a   : > { %587 = vst [vmem:[%s924_s20 + $0x18] sm:$0xf] %v816_v59 }
  0x1b   : > { %324 = vrot.lane.b32.xlu0 %v778_v5, %s809_s23  ;;  %240 = vrot.lane.b32.xlu1 %v779_v6, %s810_s24 }
  0x1e   : > { %v412_v19 = vld [vmem:[#allocation2 + $0x40] sm:$0xff]  ;;  %v413_v26 = vld [vmem:[#allocation2 + $0x48] sm:$0xff] }
  0x1f   : > { %344 = vrot.lane.b32.xlu0 %v780_v7, %s811_s25  ;;  %260 = vrot.lane.b32.xlu1 %v781_v8, %s812_s26 }
  0x20   : > { %717 = vmatprep.subr.bf16.mxu0 %v412_v19 }
  0x23   : > { %346 = vrot.lane.b32.xlu0 %v782_v9, %s811_s25  ;;  %262 = vrot.lane.b32.xlu1 %v783_v10, %s812_s26  ;;  %v704_v10 = vld [vmem:[#allocation3] ss:$0 sm:$0xff] }
  0x27   : > { %366 = vrot.lane.b32.xlu0 %v784_v12, %s813_s27  ;;  %282 = vrot.lane.b32.xlu1 %v785_v14, %s814_s28 }
  0x2b   : > { %368 = vrot.lane.b32.xlu0 %v786_v15, %s813_s27  ;;  %284 = vrot.lane.b32.xlu1 %v787_v16, %s814_s28  ;;  %v424_v15 = vld [vmem:[%s971_s2 + $0x10] sm:$0xff] }
  0x2f   : > { %388 = vrot.lane.b32.xlu0 %v788_v18, %s815_s5  ;;  %390 = vrot.lane.b32.xlu1 %v789_v20, %s815_s5 }
  0x85   : > { %v216_v22 = vpop.permute.xlu0 %215  ;;  %v323_v23 = vpop.permute.xlu1 %322 }
  0x86   : > { %222 = vst.msk [vmem:[#allocation2] sm:$0xff] %vm221_vm0, %v216_v22  ;;  %328 = vst.msk [vmem:[#allocation2 + $0x50] sm:$0xff] %vm221_vm0, %v323_v23 }
  0x89   : > { %v218_v24 = vpop.permute.xlu0 %217  ;;  %v239_v25 = vpop.permute.xlu1 %238 }
  0x8a   : > { %223 = vst.msk [vmem:[#allocation2 + $0x8] sm:$0xff] %vm221_vm0, %v218_v24  ;;  %244 = vst.msk [vmem:[#allocation2 + $0x10] sm:$0xff] %vm221_vm0, %v239_v25 }
  0x8d   : > { %v325_v27 = vpop.permute.xlu0 %324  ;;  %v404_v28 = vld [vmem:[#allocation2] sm:$0xff]  ;;  %v241_v29 = vpop.permute.xlu1 %240  ;;  %v414_v30 = vld [vmem:[#allocation2 + $0x50] sm:$0xff] }
  0x8e   : > { %329 = vst.msk [vmem:[#allocation2 + $0x58] sm:$0xff] %vm221_vm0, %v325_v27  ;;  %718 = vmatpush3.bf16.msra.mxu0 %v404_v28  ;;  %245 = vst.msk [vmem:[#allocation2 + $0x18] sm:$0xff] %vm221_vm0, %v241_v29 }
  0x8f   : > { %719 = vmatprep.subr.bf16.mxu0 %v413_v26 }
  0x91   : > { %v345_v31 = vpop.permute.xlu0 %344  ;;  %v405_v32 = vld [vmem:[#allocation2 + $0x8] sm:$0xff]  ;;  %v261_v33 = vpop.permute.xlu1 %260  ;;  %v406_v34 = vld [vmem:[#allocation2 + $0x10] sm:$0xff] }
  0x92   : > { %350 = vst.msk [vmem:[#allocation2 + $0x60] sm:$0xff] %vm221_vm0, %v345_v31  ;;  %720 = vmatpush3.bf16.msra.mxu0 %v405_v32  ;;  %266 = vst.msk [vmem:[#allocation2 + $0x20] sm:$0xff] %vm221_vm0, %v261_v33 }
  0x93   : > { %721 = vmatprep.subr.bf16.mxu0 %v414_v30 }
  0x95   : > { %v347_v35 = vpop.permute.xlu0 %346  ;;  %v415_v36 = vld [vmem:[#allocation2 + $0x58] sm:$0xff]  ;;  %v263_v37 = vpop.permute.xlu1 %262 }
  0x96   : > { %351 = vst.msk [vmem:[#allocation2 + $0x68] sm:$0xff] %vm221_vm0, %v347_v35  ;;  %722 = vmatpush3.bf16.msra.mxu0 %v406_v34  ;;  %267 = vst.msk [vmem:[#allocation2 + $0x28] sm:$0xff] %vm221_vm0, %v263_v37  ;;  %v407_v38 = vld [vmem:[#allocation2 + $0x18] sm:$0xff] }
  0x97   : > { %723 = vmatprep.subr.bf16.mxu0 %v415_v36 }
  0x99   : > { %v367_v39 = vpop.permute.xlu0 %366  ;;  %v416_v40 = vld [vmem:[#allocation2 + $0x60] sm:$0xff]  ;;  %v283_v41 = vpop.permute.xlu1 %282 }
  0x9a   : > { %372 = vst.msk [vmem:[#allocation2 + $0x70] sm:$0xff] %vm221_vm0, %v367_v39  ;;  %724 = vmatpush3.bf16.msra.mxu0 %v407_v38  ;;  %288 = vst.msk [vmem:[#allocation2 + $0x30] sm:$0xff] %vm221_vm0, %v283_v41  ;;  %v408_v42 = vld [vmem:[#allocation2 + $0x20] sm:$0xff] }
  0x9b   : > { %725 = vmatprep.subr.bf16.mxu0 %v416_v40 }
  0x9d   : > { %v369_v43 = vpop.permute.xlu0 %368  ;;  %v417_v44 = vld [vmem:[#allocation2 + $0x68] sm:$0xff]  ;;  %v285_v45 = vpop.permute.xlu1 %284 }
  0x9e   : > { %373 = vst.msk [vmem:[#allocation2 + $0x78] sm:$0xff] %vm221_vm0, %v369_v43  ;;  %726 = vmatpush3.bf16.msra.mxu0 %v408_v42  ;;  %289 = vst.msk [vmem:[#allocation2 + $0x38] sm:$0xff] %vm221_vm0, %v285_v45  ;;  %v409_v46 = vld [vmem:[#allocation2 + $0x28] sm:$0xff] }
  0x9f   : > { %727 = vmatprep.subr.bf16.mxu0 %v417_v44 }
  0xa1   : > { %v389_v47 = vpop.permute.xlu0 %388  ;;  %v418_v48 = vld [vmem:[#allocation2 + $0x70] sm:$0xff]  ;;  %v391_v49 = vpop.permute.xlu1 %390 }
  0xa2   : > { %394 = vst.msk [vmem:[#allocation2 + $0x80] sm:$0xff] %vm221_vm0, %v389_v47  ;;  %728 = vmatpush3.bf16.msra.mxu0 %v409_v46  ;;  %395 = vst.msk [vmem:[#allocation2 + $0x88] sm:$0xff] %vm221_vm0, %v391_v49  ;;  %v410_v50 = vld [vmem:[#allocation2 + $0x30] sm:$0xff] }
  0xa3   : > { %729 = vmatprep.subr.bf16.mxu0 %v418_v48 }
  0xa5   : > { %v419_v51 = vld [vmem:[#allocation2 + $0x78] sm:$0xff] }
  0xa6   : > { %730 = vmatpush3.bf16.msra.mxu0 %v410_v50  ;;  %v411_v52 = vld [vmem:[#allocation2 + $0x38] sm:$0xff] }
  0xa7   : > { %731 = vmatprep.subr.bf16.mxu0 %v419_v51 }
  0xa9   : > { %v420_v53 = vld [vmem:[#allocation2 + $0x80] sm:$0xff]  ;;  %v421_v55 = vld [vmem:[#allocation2 + $0x88] sm:$0xff] }
  0xaa   : > { %732 = vmatpush3.bf16.msra.mxu0 %v411_v52  ;;  %749 = vmatprep.subr.bf16.mxu1 %v420_v53 }
  0xab   : > { %750 = vmatpush3.bf16.msra.mxu1 %v420_v53 }
  0xac   : > { %751 = vmatprep.subr.bf16.mxu1 %v421_v55 }
  0xad   : > { %496 = vmatmul.mubr.bf16.vlgmr.msra.gmra.mrb[0].mxu0 %v792_v54 }
  0xae   : > { %503 = vmatprep.mubr.bf16.mxu0 %v797_v56 }
  0xaf   : > { %752 = vmatpush3.bf16.msra.mxu1 %v421_v55 }
  0xb2   : > { %754 = vmatmul.mubr.msk.bf16.vlgmr.msra.gmra.mrb[0].mxu1 %vm456_vm1, %v796_v57 }
  0xb5   : > { %504 = vmatmul.mubr.bf16.gmra.mrb[4].mxu0 %v799_v58 }
 0x180   : > { %v733_v60 = vpop.f32.mrb[0].mxu0 }
 0x181   : > { %v734_v61 = vpop.f32.mrb[1].mxu0 }
 0x182   : > { %v735_v63 = vadd.f32 %v734_v61, %v733_v60  ;;  %v736_v0 = vpop.f32.mrb[2].mxu0 }
 0x183   : > { %v737_v1 = vpop.f32.mrb[3].mxu0 }
 0x184   : > { %v738_v3 = vadd.f32 %v737_v1, %v736_v0  ;;  %v498_v4 = vadd.f32 %v735_v63, %v422_v62 }
 0x185   : > { %v755_v5 = vpop.f32.mrb[0].mxu1 }
 0x186   : > { %v546_v6 = vpop.f32.mrb[1].mxu1  ;;  %v501_v7 = vadd.f32 %v738_v3, %v423_v2 }
 0x187   : > { %v547_v8 = vadd.f32 %v546_v6, %v498_v4  ;;  %v756_v9 = vpop.f32.mrb[2].mxu1 }
 0x188   : > { %v739_v11 = vpop.f32.mrb[4].mxu0  ;;  %v549_v12 = vpop.f32.mrb[3].mxu1 }
 0x189   : > { %vm561_vm2 = vcmp.ge.f32.partialorder %v547_v8, 0.0  ;;  %v565_v13 = vmul.f32 0.2, %v547_v8  ;;  %v550_v14 = vadd.f32 %v549_v12, %v501_v7  ;;  %v740_v16 = vpop.f32.mrb[5].mxu0 }
 0x18a   : > { %v741_v17 = vadd.f32 %v740_v16, %v739_v11  ;;  %v742_v18 = vpop.f32.mrb[6].mxu0 }
 0x18b   : > { %v569_v19 = vsel %vm561_vm2, %v547_v8, %v565_v13  ;;  %vm562_vm3 = vcmp.ge.f32.partialorder %v550_v14, 0.0  ;;  %v566_v20 = vmul.f32 0.2, %v550_v14  ;;  %v743_v22 = vpop.f32.mrb[7].mxu0 }
 0x18c   : > { %v580_v23 = vmul.f32 %v704_v10, %v569_v19  ;;  %v506_v24 = vadd.f32 %v741_v17, %v424_v15  ;;  %v744_v25 = vadd.f32 %v743_v22, %v742_v18 }
 0x18d   : > { %v570_v26 = vsel %vm562_vm3, %v550_v14, %v566_v20 }
 0x18e   : > { %v713_v27 = vpack.c.bf16 %v580_v23, %v580_v23  ;;  %v581_v28 = vmul.f32 %v704_v10, %v570_v26  ;;  %v555_v29 = vadd.f32 %v755_v5, %v506_v24  ;;  %v509_v30 = vadd.f32 %v744_v25, %v425_v21 }
 0x190   : > { %605 = vst.msk [vmem:[%s924_s20 + $0x4] sm:$0xf] %vm604_vm4, %v713_v27  ;;  %v714_v31 = vpack.c.bf16 %v581_v28, %v581_v28  ;;  %vm563_vm6 = vcmp.ge.f32.partialorder %v555_v29, 0.0  ;;  %v567_v32 = vmul.f32 0.2, %v555_v29  ;;  %v558_v33 = vadd.f32 %v756_v9, %v509_v30 }
 0x191   : > { %610 = vst.msk [vmem:[%s924_s20 + $0x4] sm:$0xf] %vm609_vm5, %v816_v59 }
 0x192   : > { %606 = vst.msk [vmem:[%s924_s20 + $0xc] sm:$0xf] %vm604_vm4, %v714_v31  ;;  %v571_v34 = vsel %vm563_vm6, %v555_v29, %v567_v32  ;;  %vm564_vm7 = vcmp.ge.f32.partialorder %v558_v33, 0.0  ;;  %v568_v35 = vmul.f32 0.2, %v558_v33 }
 0x193   : > { %611 = vst.msk [vmem:[%s924_s20 + $0xc] sm:$0xf] %vm609_vm5, %v816_v59  ;;  %v582_v36 = vmul.f32 %v704_v10, %v571_v34 }
 0x194   : > { %v572_v37 = vsel %vm564_vm7, %v558_v33, %v568_v35 }
 0x195   : > { %v715_v38 = vpack.c.bf16 %v582_v36, %v582_v36  ;;  %v583_v39 = vmul.f32 %v704_v10, %v572_v37 }
 0x197   : > { %607 = vst.msk [vmem:[%s924_s20 + $0x14] sm:$0xf] %vm604_vm4, %v715_v38  ;;  %v716_v40 = vpack.c.bf16 %v583_v39, %v583_v39 }
 0x198   : > { %612 = vst.msk [vmem:[%s924_s20 + $0x14] sm:$0xf] %vm609_vm5, %v816_v59 }
 0x199   : > { %608 = vst.msk [vmem:[%s924_s20 + $0x1c] sm:$0xf] %vm604_vm4, %v716_v40 }
 0x19a   : > { %613 = vst.msk [vmem:[%s924_s20 + $0x1c] sm:$0xf] %vm609_vm5, %v816_v59 }
 0x19b PF: > { %s16_s17 = sadd.s32 1, %s806_s17  }
 0x19c   : > { %p13_p4 = scmp.ge.s32.totalorder %s16_s17, 4  }
 0x19e   :  { %15 = sbr.rel (!%p13_p4) target bundleno = 3 (0x3), region = 66 }

// kernel: registration_subnet_forward.17
= control target key start
LH: loop header
LB: loop body
LE: loop exit
PB: predicated region body
PF: predicated region fallthrough
CT: control target
= control target key end

     0   :  { %s1406_s18 = smov 0   ;;  %s1664_s0 = inlined_call_operand.vmem [shape: bf16[2,32,157], index: 0, kind: input, shape index: {}]   ;;  %s1665_s1 = inlined_call_operand.vmem [shape: bf16[2,32,157], index: 1, kind: input, shape index: {}]   ;;  %s1666_s2 = inlined_call_operand.vmem [shape: bf16[32,576], index: 2, kind: input, shape index: {}]   ;;  %s1667_s3 = inlined_call_operand.vmem [shape: f32[32,1], index: 3, kind: input, shape index: {}]   ;;  %s1668_s4 = inlined_call_operand.vmem [shape: f32[1,22], index: 4, kind: input, shape index: {}]   ;;  %s1669_s5 = inlined_call_operand.vmem [shape: bf16[2,32,157], index: 5, kind: output, shape index: {}]  }
   0x1 LB: > { %s1131_s19 = sadd.s32 4294967295, %s1365_s18   ;;  %p1135_p0 = scmp.ge.s32.totalorder %s1365_s18, 1  ;;  %s1365_s18 = sphi %s1406_s18, %s15_s18  }
   0x2   : > { %p197_p1 = scmp.lt.s32.totalorder %s1365_s18, 3 }
   0x4   : > { %p198_p2 = pnand %p1135_p0, %p197_p1 }
   0x5   : > { %p230_p3 = scmp.lt.s32.totalorder (!%p198_p2), %s1131_s19, 1  ;;  %s1367_s27 = smov (!%p198_p2), 1   ;;  %vm279_vm0 = vcmask (!%p198_p2), 179200   ;;  %v1347_v24 = vld [vmem:[%s1666_s2 + $0x4] ss:$20 sps:$4 sm:$0xff] (!%p198_p2)   ;;  %v784_v31 = vld [vmem:[%s1667_s3 + $0x8] sm:$0xff] (!%p198_p2) }
   0x6   : > { %201 = sbr.rel (%p198_p2) target bundleno = 472 (0x1d8), region = 40  ;;  %s1368_s28 = smov (!%p198_p2), 7   ;;  %896 = vmatprep.mubr.bf16.mxu0 (!%p198_p2), %v1347_v24  ;;  %v1350_v26 = vld [vmem:[%s1666_s2 + $0xc] ss:$20 sps:$4 sm:$0xff] (!%p198_p2)   ;;  %v1375_v33 = vmov (!%p198_p2), 0   ;;  %v785_v34 = vld [vmem:[%s1667_s3 + $0x10] sm:$0xff] (!%p198_p2) }
   0x7   : > { %s1369_s29 = smov (!%p198_p2), 121   ;;  %s1370_s30 = smov (!%p198_p2), 6   ;;  %945 = vmatprep.mubr.bf16.mxu1 (!%p198_p2), %v1350_v26  ;;  %v783_v32 = vld [vmem:[%s1667_s3] sm:$0xff] (!%p198_p2)  ;;  %1312 = vset.pattern.permute.xlu1 (!%p198_p2), %v1375_v33  ;;  %v786_v35 = vld [vmem:[%s1667_s3 + $0x18] sm:$0xff] (!%p198_p2)  ;;  %vm380_vm1 = vcmask (!%p198_p2), 7168   ;;  %vm274_vm2 = vcmask (!%p198_p2), 56320  }
   0x8   : > { %s1371_s6 = smov (!%p198_p2), 127   ;;  %s1372_s7 = smov (!%p198_p2), 5   ;;  %1311 = vset.pattern.permute.xlu0 (!%p198_p2), %v1375_v33  ;;  %vm310_vm3 = vcmask (!%p198_p2), 48128   ;;  %vm345_vm4 = vcmask (!%p198_p2), 39936   ;;  %vm857_vm5 = vcmask (!%p198_p2), 523264   ;;  %vm1054_vm10 = vcmask (!%p198_p2), 175104  }
   0x9   : > { %s1373_s8 = smov (!%p198_p2), 123   ;;  %s1374_s9 = smov (!%p198_p2), 122   ;;  %vm1059_vm11 = vcmask (!%p198_p2), 232624  }
   0xd   : > { %s1671_s19 = smov (!%p230_p3, %s1131_s19), 1 }
   0xe   : > { %s1414_s20 = sshll.u32 %s1671_s19, 5 }
   0xf   : > { %s1420_s23 = scalar_lea.vmem %s1665_s1, %s1414_s20  ;;  %s1426_s26 = scalar_lea.vmem %s1664_s0, %s1414_s20 }
  0x10   : > { %v1429_v0 = vld [vmem:[%s1420_s23] ss:$8 sps:$4 sm:$0xff]   ;;  %v1432_v1 = vld [vmem:[%s1420_s23 + $0x4] ss:$8 sps:$4 sm:$0xff]   ;;  %v1442_v4 = vld [vmem:[%s1426_s26 + $0x14] ss:$8 sps:$4 sm:$0xff]   ;;  %s1632_s17 = scalar_lea.vmem %s1669_s5, %s1414_s20 }
  0x11   : > { %615 = vrot.lane.b32.xlu1 %v1429_v0, %s1367_s27  ;;  %v1316_v2 = vld [vmem:[%s1426_s26] ss:$8 sps:$4 sm:$0xff]   ;;  %v1318_v3 = vld [vmem:[%s1426_s26 + $0x4] ss:$8 sps:$4 sm:$0xff]   ;;  %v1321_v5 = vld [vmem:[%s1426_s26 + $0x10] ss:$8 sps:$4 sm:$0xff]  }
  0x12   : > { %266 = vrot.lane.b32.xlu0 %v1316_v2, %s1368_s28  ;;  %v1449_v6 = vld [vmem:[%s1420_s23 + $0x10] ss:$8 sps:$4 sm:$0xff]   ;;  %v1324_v7 = vld [vmem:[%s1426_s26 + $0x4] ss:$8 sps:$4 sm:$0xff]   ;;  %v1457_v8 = vld [vmem:[%s1420_s23 + $0x14] ss:$8 sps:$4 sm:$0xff]  }
  0x13   : > { %v1326_v9 = vld [vmem:[%s1426_s26 + $0x4] ss:$8 sps:$4 sm:$0xff]   ;;  %v1342_v11 = vld [vmem:[%s1426_s26 + $0x14] ss:$8 sps:$4 sm:$0xff]   ;;  %1034 = vst [vmem:[%s1632_s17] sm:$0xf] %v1375_v33 }
  0x14   : > { %v1341_v10 = vld [vmem:[%s1426_s26 + $0x4] ss:$8 sps:$4 sm:$0xff]   ;;  %v1327_v12 = vld [vmem:[%s1426_s26 + $0x14] ss:$8 sps:$4 sm:$0xff]   ;;  %404 = vst.msk [vmem:[#allocation2 + $0x48] sm:$0xff] %vm279_vm0, %v1342_v11 }
  0x15   : > { %617 = vrot.lane.b32.xlu1 %v1432_v1, %s1367_s27  ;;  %403 = vst.msk [vmem:[#allocation2 + $0x40] sm:$0xff] %vm279_vm0, %v1341_v10  ;;  %v1343_v13 = vld [vmem:[%s1420_s23 + $0x4] ss:$8 sps:$4 sm:$0xff]   ;;  %v1328_v14 = vld [vmem:[%s1426_s26 + $0x14] ss:$8 sps:$4 sm:$0xff]  }
  0x16   : > { %268 = vrot.lane.b32.xlu0 %v1318_v3, %s1368_s28  ;;  %645 = vst.msk [vmem:[#allocation2 + $0xd0] sm:$0xff] %vm279_vm0, %v1343_v13  ;;  %v1344_v16 = vld [vmem:[%s1420_s23 + $0x14] ss:$8 sps:$4 sm:$0xff]   ;;  %v1329_v17 = vld [vmem:[%s1426_s26 + $0x4] ss:$8 sps:$4 sm:$0xff]  }
  0x17   : > { %646 = vst.msk [vmem:[#allocation2 + $0xd8] sm:$0xff] %vm279_vm0, %v1344_v16  ;;  %v1330_v18 = vld [vmem:[%s1426_s26 + $0x14] ss:$8 sps:$4 sm:$0xff]   ;;  %v1331_v19 = vld [vmem:[%s1420_s23 + $0x4] ss:$8 sps:$4 sm:$0xff]  }
  0x18   : > { %v1332_v20 = vld [vmem:[%s1426_s26 + $0x4] ss:$8 sps:$4 sm:$0xff]   ;;  %v1333_v21 = vld [vmem:[%s1420_s23 + $0x14] ss:$8 sps:$4 sm:$0xff]   ;;  %1035 = vst [vmem:[%s1632_s17 + $0x8] sm:$0xf] %v1375_v33 }
  0x19   : > { %272 = vrot.lane.b32.xlu1 %v1442_v4, %s1368_s28  ;;  %v1334_v22 = vld [vmem:[%s1426_s26 + $0x14] ss:$8 sps:$4 sm:$0xff]   ;;  %v1335_v23 = vld [vmem:[%s1420_s23 + $0x4] ss:$8 sps:$4 sm:$0xff]   ;;  %1036 = vst [vmem:[%s1632_s17 + $0x10] sm:$0xf] %v1375_v33 }
  0x1a   : > { %270 = vrot.lane.b32.xlu0 %v1321_v5, %s1368_s28  ;;  %v1336_v25 = vld [vmem:[%s1420_s23 + $0x14] ss:$8 sps:$4 sm:$0xff]   ;;  %v1337_v28 = vld [vmem:[%s1420_s23 + $0x4] ss:$8 sps:$4 sm:$0xff]   ;;  %1037 = vst [vmem:[%s1632_s17 + $0x18] sm:$0xf] %v1375_v33 }
  0x1b   : > { %v1338_v27 = vld [vmem:[%s1420_s23 + $0x14] ss:$8 sps:$4 sm:$0xff]   ;;  %v1339_v30 = vld [vmem:[%s1420_s23 + $0x4] ss:$8 sps:$4 sm:$0xff]  }
  0x1c   : > { %v755_v15 = vld [vmem:[#allocation2 + $0x40] sm:$0xff]  ;;  %v1340_v29 = vld [vmem:[%s1420_s23 + $0x14] ss:$8 sps:$4 sm:$0xff]   ;;  %v756_v48 = vld [vmem:[#allocation2 + $0x48] sm:$0xff] }
  0x1d   : > { %619 = vrot.lane.b32.xlu1 %v1449_v6, %s1367_s27  ;;  %1220 = vmatprep.subr.bf16.mxu0 %v755_v15 }
  0x1e   : > { %485 = vrot.lane.b32.xlu0 %v1324_v7, %s1369_s29 }
  0x21   : > { %302 = vrot.lane.b32.xlu1 %v1316_v2, %s1370_s30 }
  0x22   : > { %621 = vrot.lane.b32.xlu0 %v1457_v8, %s1367_s27 }
  0x25   : > { %419 = vrot.lane.b32.xlu1 %v1326_v9, %s1371_s6 }
  0x26   : > { %304 = vrot.lane.b32.xlu0 %v1318_v3, %s1370_s30 }
  0x29   : > { %306 = vrot.lane.b32.xlu1 %v1321_v5, %s1370_s30 }
  0x2a   : > { %487 = vrot.lane.b32.xlu0 %v1327_v12, %s1369_s29 }
  0x2d   : > { %421 = vrot.lane.b32.xlu1 %v1328_v14, %s1371_s6  ;;  %v774_v14 = vld [vmem:[#allocation2 + $0xd8] sm:$0xff] }
  0x2e   : > { %308 = vrot.lane.b32.xlu0 %v1442_v4, %s1370_s30 }
  0x31   : > { %515 = vrot.lane.b32.xlu1 %v1432_v1, %s1368_s28 }
  0x32   : > { %513 = vrot.lane.b32.xlu0 %v1429_v0, %s1368_s28 }
  0x35   : > { %339 = vrot.lane.b32.xlu1 %v1318_v3, %s1372_s7 }
  0x36   : > { %337 = vrot.lane.b32.xlu0 %v1316_v2, %s1372_s7 }
  0x39   : > { %517 = vrot.lane.b32.xlu1 %v1449_v6, %s1368_s28 }
  0x3a   : > { %441 = vrot.lane.b32.xlu0 %v1329_v17, %s1373_s8 }
  0x3d   : > { %341 = vrot.lane.b32.xlu1 %v1321_v5, %s1372_s7 }
  0x3e   : > { %519 = vrot.lane.b32.xlu0 %v1457_v8, %s1368_s28 }
  0x41   : > { %443 = vrot.lane.b32.xlu1 %v1330_v18, %s1373_s8 }
  0x42   : > { %343 = vrot.lane.b32.xlu0 %v1442_v4, %s1372_s7 }
  0x45   : > { %549 = vrot.lane.b32.xlu1 %v1432_v1, %s1370_s30 }
  0x46   : > { %547 = vrot.lane.b32.xlu0 %v1429_v0, %s1370_s30 }
  0x49   : > { %372 = vrot.lane.b32.xlu1 %v1316_v2, %s1367_s27 }
  0x4a   : > { %661 = vrot.lane.b32.xlu0 %v1331_v19, %s1371_s6 }
  0x4d   : > { %463 = vrot.lane.b32.xlu1 %v1332_v20, %s1374_s9 }
  0x4e   : > { %374 = vrot.lane.b32.xlu0 %v1318_v3, %s1367_s27  ;;  %v773_v3 = vld [vmem:[#allocation2 + $0xd0] sm:$0xff] }
  0x51   : > { %553 = vrot.lane.b32.xlu1 %v1457_v8, %s1370_s30 }
  0x52   : > { %551 = vrot.lane.b32.xlu0 %v1449_v6, %s1370_s30 }
  0x55   : > { %376 = vrot.lane.b32.xlu1 %v1321_v5, %s1367_s27 }
  0x56   : > { %663 = vrot.lane.b32.xlu0 %v1333_v21, %s1371_s6 }
  0x59   : > { %465 = vrot.lane.b32.xlu1 %v1334_v22, %s1374_s9 }
  0x5a   : > { %378 = vrot.lane.b32.xlu0 %v1442_v4, %s1367_s27 }
  0x5d   : > { %583 = vrot.lane.b32.xlu1 %v1432_v1, %s1372_s7 }
  0x5e   : > { %581 = vrot.lane.b32.xlu0 %v1429_v0, %s1372_s7 }
  0x61   : > { %585 = vrot.lane.b32.xlu1 %v1449_v6, %s1372_s7 }
  0x62   : > { %683 = vrot.lane.b32.xlu0 %v1335_v23, %s1373_s8 }
  0x65   : > { %685 = vrot.lane.b32.xlu1 %v1336_v25, %s1373_s8 }
  0x66   : > { %587 = vrot.lane.b32.xlu0 %v1457_v8, %s1372_s7 }
  0x69   : > { %707 = vrot.lane.b32.xlu1 %v1338_v27, %s1374_s9 }
  0x6a   : > { %705 = vrot.lane.b32.xlu0 %v1337_v28, %s1374_s9 }
  0x6d   : > { %729 = vrot.lane.b32.xlu1 %v1340_v29, %s1369_s29 }
  0x6e   : > { %727 = vrot.lane.b32.xlu0 %v1339_v30, %s1369_s29 }
  0x71   : > { %794 = vperm.xlu1 %1312, %v784_v31  }
  0x72   : > { %789 = vperm.xlu0 %1311, %v783_v32  }
  0x75   : > { %799 = vperm.xlu1 %1312, %v785_v34  }
  0x76   : > { %804 = vperm.xlu0 %1311, %v786_v35  }
  0x83   : > { %v616_v36 = vpop.permute.xlu1 %615 }
  0x84   : > { %v267_v37 = vpop.permute.xlu0 %266 }
  0x87   : > { %v618_v38 = vpop.permute.xlu1 %617 }
  0x88   : > { %v623_v39 = vsel %vm380_vm1, %v616_v36, %v618_v38  ;;  %v269_v40 = vpop.permute.xlu0 %268 }
  0x89   : > { %627 = vst.msk [vmem:[#allocation2 + $0xc0] sm:$0xff] %vm279_vm0, %v623_v39  ;;  %v275_v41 = vsel %vm274_vm2, %v267_v37, %v269_v40 }
  0x8a   : > { %280 = vst.msk [vmem:[#allocation2] sm:$0xff] %vm279_vm0, %v275_v41 }
  0x8b   : > { %v273_v42 = vpop.permute.xlu1 %272 }
  0x8c   : > { %v271_v43 = vpop.permute.xlu0 %270 }
  0x8d   : > { %v276_v44 = vsel %vm274_vm2, %v271_v43, %v273_v42 }
  0x8e   : > { %281 = vst.msk [vmem:[#allocation2 + $0x8] sm:$0xff] %vm279_vm0, %v276_v44 }
  0x8f   : > { %v620_v45 = vpop.permute.xlu1 %619 }
  0x90   : > { %v771_v46 = vld [vmem:[#allocation2 + $0xc0] sm:$0xff]  ;;  %v486_v47 = vpop.permute.xlu0 %485 }
  0x91   : > { %1248 = vmatprep.subr.bf16.mxu1 %v771_v46  ;;  %491 = vst.msk [vmem:[#allocation2 + $0x80] sm:$0xff] %vm279_vm0, %v486_v47  ;;  %v747_v49 = vld [vmem:[#allocation2] sm:$0xff] }
  0x92   : > { %1221 = vmatpush3.bf16.msra.mxu0 %v747_v49 }
  0x93   : > { %v303_v50 = vpop.permute.xlu1 %302  ;;  %1222 = vmatprep.subr.bf16.mxu0 %v756_v48 }
  0x94   : > { %v622_v51 = vpop.permute.xlu0 %621 }
  0x95   : > { %v624_v52 = vsel %vm380_vm1, %v620_v45, %v622_v51  ;;  %v748_v53 = vld [vmem:[#allocation2 + $0x8] sm:$0xff] }
  0x96   : > { %628 = vst.msk [vmem:[#allocation2 + $0xc8] sm:$0xff] %vm279_vm0, %v624_v52  ;;  %1223 = vmatpush3.bf16.msra.mxu0 %v748_v53 }
  0x97   : > { %v420_v54 = vpop.permute.xlu1 %419 }
  0x98   : > { %425 = vst.msk [vmem:[#allocation2 + $0x50] sm:$0xff] %vm279_vm0, %v420_v54  ;;  %v305_v55 = vpop.permute.xlu0 %304  ;;  %v763_v56 = vld [vmem:[#allocation2 + $0x80] sm:$0xff] }
  0x99   : > { %v311_v57 = vsel %vm310_vm3, %v303_v50, %v305_v55  ;;  %1249 = vmatpush3.bf16.msra.mxu1 %v763_v56 }
  0x9a   : > { %315 = vst.msk [vmem:[#allocation2 + $0x10] sm:$0xff] %vm279_vm0, %v311_v57  ;;  %v1345_v57 = vld [vmem:[%s1666_s2] ss:$20 sps:$4 sm:$0xff]  }
  0x9b   : > { %v307_v58 = vpop.permute.xlu1 %306 }
  0x9c   : > { %v488_v59 = vpop.permute.xlu0 %487 }
  0x9d   : > { %492 = vst.msk [vmem:[#allocation2 + $0x88] sm:$0xff] %vm279_vm0, %v488_v59  ;;  %v772_v60 = vld [vmem:[#allocation2 + $0xc8] sm:$0xff] }
  0x9e   : > { %1250 = vmatprep.subr.bf16.mxu1 %v772_v60  ;;  %v1351_v59 = vld [vmem:[%s1666_s2 + $0x2c] ss:$20 sps:$4 sm:$0xff]  }
  0x9f   : > { %v422_v61 = vpop.permute.xlu1 %421  ;;  %v757_v62 = vld [vmem:[#allocation2 + $0x50] sm:$0xff] }
  0xa0   : > { %426 = vst.msk [vmem:[#allocation2 + $0x58] sm:$0xff] %vm279_vm0, %v422_v61  ;;  %1224 = vmatprep.subr.bf16.mxu0 %v757_v62  ;;  %v309_v63 = vpop.permute.xlu0 %308 }
  0xa1   : > { %v312_v0 = vsel %vm310_vm3, %v307_v58, %v309_v63  ;;  %v749_v1 = vld [vmem:[#allocation2 + $0x10] sm:$0xff] }
  0xa2   : > { %316 = vst.msk [vmem:[#allocation2 + $0x18] sm:$0xff] %vm279_vm0, %v312_v0  ;;  %1225 = vmatpush3.bf16.msra.mxu0 %v749_v1 }
  0xa3   : > { %v516_v2 = vpop.permute.xlu1 %515 }
  0xa4   : > { %v514_v4 = vpop.permute.xlu0 %513  ;;  %v764_v5 = vld [vmem:[#allocation2 + $0x88] sm:$0xff] }
  0xa5   : > { %v521_v6 = vsel %vm274_vm2, %v514_v4, %v516_v2  ;;  %1251 = vmatpush3.bf16.msra.mxu1 %v764_v5  ;;  %v1353_v2 = vld [vmem:[%s1666_s2 + $0x28] ss:$20 sps:$4 sm:$0xff]   ;;  %v1357_v5 = vld [vmem:[%s1666_s2 + $0x10] ss:$20 sps:$4 sm:$0xff]  }
  0xa6   : > { %525 = vst.msk [vmem:[#allocation2 + $0x90] sm:$0xff] %vm279_vm0, %v521_v6  ;;  %1252 = vmatprep.subr.bf16.mxu1 %v773_v3 }
  0xa7   : > { %v340_v7 = vpop.permute.xlu1 %339  ;;  %v758_v8 = vld [vmem:[#allocation2 + $0x58] sm:$0xff] }
  0xa8   : > { %1226 = vmatprep.subr.bf16.mxu0 %v758_v8  ;;  %v338_v9 = vpop.permute.xlu0 %337  ;;  %v1348_v8 = vld [vmem:[%s1666_s2 + $0x8] ss:$20 sps:$4 sm:$0xff]  }
  0xa9   : > { %v346_v10 = vsel %vm345_vm4, %v338_v9, %v340_v7  ;;  %v750_v11 = vld [vmem:[#allocation2 + $0x18] sm:$0xff]  ;;  %v1354_v9 = vld [vmem:[%s1666_s2 + $0x34] ss:$20 sps:$4 sm:$0xff]  }
  0xaa   : > { %350 = vst.msk [vmem:[#allocation2 + $0x20] sm:$0xff] %vm279_vm0, %v346_v10  ;;  %1227 = vmatpush3.bf16.msra.mxu0 %v750_v11 }
  0xab   : > { %v518_v12 = vpop.permute.xlu1 %517 }
  0xac   : > { %v442_v13 = vpop.permute.xlu0 %441 }
  0xad   : > { %447 = vst.msk [vmem:[#allocation2 + $0x60] sm:$0xff] %vm279_vm0, %v442_v13  ;;  %v765_v15 = vld [vmem:[#allocation2 + $0x90] sm:$0xff] }
  0xae   : > { %1253 = vmatpush3.bf16.msra.mxu1 %v765_v15  ;;  %v1356_v13 = vld [vmem:[%s1666_s2 + $0x30] ss:$20 sps:$4 sm:$0xff]   ;;  %v1358_v15 = vld [vmem:[%s1666_s2 + $0x38] ss:$20 sps:$4 sm:$0xff]  }
  0xaf   : > { %v342_v16 = vpop.permute.xlu1 %341  ;;  %1254 = vmatprep.subr.bf16.mxu1 %v774_v14 }
  0xb0   : > { %v520_v17 = vpop.permute.xlu0 %519 }
  0xb1   : > { %v522_v18 = vsel %vm274_vm2, %v518_v12, %v520_v17  ;;  %v751_v23 = vld [vmem:[#allocation2 + $0x20] sm:$0xff] }
  0xb2   : > { %526 = vst.msk [vmem:[#allocation2 + $0x98] sm:$0xff] %vm279_vm0, %v522_v18 }
  0xb3   : > { %v444_v19 = vpop.permute.xlu1 %443 }
  0xb4   : > { %448 = vst.msk [vmem:[#allocation2 + $0x68] sm:$0xff] %vm279_vm0, %v444_v19  ;;  %v344_v20 = vpop.permute.xlu0 %343  ;;  %v759_v21 = vld [vmem:[#allocation2 + $0x60] sm:$0xff] }
  0xb5   : > { %v347_v22 = vsel %vm345_vm4, %v342_v16, %v344_v20  ;;  %1228 = vmatprep.subr.bf16.mxu0 %v759_v21 }
  0xb6   : > { %351 = vst.msk [vmem:[#allocation2 + $0x28] sm:$0xff] %vm279_vm0, %v347_v22  ;;  %1229 = vmatpush3.bf16.msra.mxu0 %v751_v23 }
  0xb7   : > { %v550_v24 = vpop.permute.xlu1 %549 }
  0xb8   : > { %v548_v25 = vpop.permute.xlu0 %547 }
  0xb9   : > { %v555_v26 = vsel %vm310_vm3, %v548_v25, %v550_v24  ;;  %v766_v27 = vld [vmem:[#allocation2 + $0x98] sm:$0xff] }
  0xba   : > { %559 = vst.msk [vmem:[#allocation2 + $0xa0] sm:$0xff] %vm279_vm0, %v555_v26  ;;  %1255 = vmatpush3.bf16.msra.mxu1 %v766_v27 }
  0xbb   : > { %v373_v28 = vpop.permute.xlu1 %372  ;;  %v760_v29 = vld [vmem:[#allocation2 + $0x68] sm:$0xff] }
  0xbc   : > { %1230 = vmatprep.subr.bf16.mxu0 %v760_v29  ;;  %v662_v30 = vpop.permute.xlu0 %661 }
  0xbd   : > { %667 = vst.msk [vmem:[#allocation2 + $0xe0] sm:$0xff] %vm279_vm0, %v662_v30  ;;  %v752_v31 = vld [vmem:[#allocation2 + $0x28] sm:$0xff] }
  0xbe   : > { %1231 = vmatpush3.bf16.msra.mxu0 %v752_v31 }
  0xbf   : > { %v464_v32 = vpop.permute.xlu1 %463 }
  0xc0   : > { %469 = vst.msk [vmem:[#allocation2 + $0x70] sm:$0xff] %vm279_vm0, %v464_v32  ;;  %v375_v34 = vpop.permute.xlu0 %374 }
  0xc1   : > { %v381_v35 = vsel %vm380_vm1, %v373_v28, %v375_v34  ;;  %v767_v40 = vld [vmem:[#allocation2 + $0xa0] sm:$0xff] }
  0xc2   : > { %385 = vst.msk [vmem:[#allocation2 + $0x30] sm:$0xff] %vm279_vm0, %v381_v35 }
  0xc3   : > { %v554_v36 = vpop.permute.xlu1 %553 }
  0xc4   : > { %v552_v37 = vpop.permute.xlu0 %551  ;;  %v775_v38 = vld [vmem:[#allocation2 + $0xe0] sm:$0xff] }
  0xc5   : > { %v556_v39 = vsel %vm310_vm3, %v552_v37, %v554_v36  ;;  %1256 = vmatprep.subr.bf16.mxu1 %v775_v38 }
  0xc6   : > { %560 = vst.msk [vmem:[#allocation2 + $0xa8] sm:$0xff] %vm279_vm0, %v556_v39  ;;  %1257 = vmatpush3.bf16.msra.mxu1 %v767_v40 }
  0xc7   : > { %v377_v41 = vpop.permute.xlu1 %376  ;;  %v761_v42 = vld [vmem:[#allocation2 + $0x70] sm:$0xff] }
  0xc8   : > { %1232 = vmatprep.subr.bf16.mxu0 %v761_v42  ;;  %v664_v43 = vpop.permute.xlu0 %663 }
  0xc9   : > { %668 = vst.msk [vmem:[#allocation2 + $0xe8] sm:$0xff] %vm279_vm0, %v664_v43  ;;  %v753_v44 = vld [vmem:[#allocation2 + $0x30] sm:$0xff] }
  0xca   : > { %1233 = vmatpush3.bf16.msra.mxu0 %v753_v44 }
  0xcb   : > { %v466_v45 = vpop.permute.xlu1 %465 }
  0xcc   : > { %470 = vst.msk [vmem:[#allocation2 + $0x78] sm:$0xff] %vm279_vm0, %v466_v45  ;;  %v379_v46 = vpop.permute.xlu0 %378 }
  0xcd   : > { %v382_v47 = vsel %vm380_vm1, %v377_v41, %v379_v46  ;;  %v768_v52 = vld [vmem:[#allocation2 + $0xa8] sm:$0xff] }
  0xce   : > { %386 = vst.msk [vmem:[#allocation2 + $0x38] sm:$0xff] %vm279_vm0, %v382_v47 }
  0xcf   : > { %v584_v48 = vpop.permute.xlu1 %583 }
  0xd0   : > { %v582_v49 = vpop.permute.xlu0 %581  ;;  %v776_v50 = vld [vmem:[#allocation2 + $0xe8] sm:$0xff] }
  0xd1   : > { %v589_v51 = vsel %vm345_vm4, %v582_v49, %v584_v48  ;;  %1258 = vmatprep.subr.bf16.mxu1 %v776_v50 }
  0xd2   : > { %593 = vst.msk [vmem:[#allocation2 + $0xb0] sm:$0xff] %vm279_vm0, %v589_v51  ;;  %1259 = vmatpush3.bf16.msra.mxu1 %v768_v52 }
  0xd3   : > { %v586_v53 = vpop.permute.xlu1 %585  ;;  %v762_v54 = vld [vmem:[#allocation2 + $0x78] sm:$0xff] }
  0xd4   : > { %1234 = vmatprep.subr.bf16.mxu0 %v762_v54  ;;  %v684_v55 = vpop.permute.xlu0 %683 }
  0xd5   : > { %689 = vst.msk [vmem:[#allocation2 + $0xf0] sm:$0xff] %vm279_vm0, %v684_v55  ;;  %v754_v56 = vld [vmem:[#allocation2 + $0x38] sm:$0xff] }
  0xd6   : > { %1235 = vmatpush3.bf16.msra.mxu0 %v754_v56 }
  0xd7   : > { %v686_v58 = vpop.permute.xlu1 %685 }
  0xd8   : > { %690 = vst.msk [vmem:[#allocation2 + $0xf8] sm:$0xff] %vm279_vm0, %v686_v58  ;;  %v588_v60 = vpop.permute.xlu0 %587 }
  0xd9   : > { %v590_v61 = vsel %vm345_vm4, %v586_v53, %v588_v60  ;;  %897 = vmatmul.mubr.bf16.vlgmr.msra.gmra.mrb[0].mxu0 %v1345_v57  ;;  %v769_v1 = vld [vmem:[#allocation2 + $0xb0] sm:$0xff] }
  0xda   : > { %594 = vst.msk [vmem:[#allocation2 + $0xb8] sm:$0xff] %vm279_vm0, %v590_v61  ;;  %904 = vmatprep.mubr.bf16.mxu0 %v1351_v59  ;;  %v1206_v59 = vld [vmem:[%s1668_s4] ss:$0 sm:$0xff] }
  0xdb   : > { %v708_v62 = vpop.permute.xlu1 %707 }
  0xdc   : > { %712 = vst.msk [vmem:[#allocation2 + $0x108] sm:$0xff] %vm279_vm0, %v708_v62  ;;  %v706_v63 = vpop.permute.xlu0 %705  ;;  %v777_v0 = vld [vmem:[#allocation2 + $0xf0] sm:$0xff] }
  0xdd   : > { %711 = vst.msk [vmem:[#allocation2 + $0x100] sm:$0xff] %vm279_vm0, %v706_v63  ;;  %1260 = vmatprep.subr.bf16.mxu1 %v777_v0 }
  0xde   : > { %1261 = vmatpush3.bf16.msra.mxu1 %v769_v1 }
  0xdf   : > { %v778_v3 = vld [vmem:[#allocation2 + $0xf8] sm:$0xff]  ;;  %v730_v4 = vpop.permute.xlu1 %729 }
  0xe0   : > { %1262 = vmatprep.subr.bf16.mxu1 %v778_v3  ;;  %734 = vst.msk [vmem:[#allocation2 + $0x118] sm:$0xff] %vm279_vm0, %v730_v4  ;;  %v728_v6 = vpop.permute.xlu0 %727 }
  0xe1   : > { %v770_v7 = vld [vmem:[#allocation2 + $0xb8] sm:$0xff]  ;;  %733 = vst.msk [vmem:[#allocation2 + $0x110] sm:$0xff] %vm279_vm0, %v728_v6  ;;  %905 = vmatmul.mubr.bf16.gmra.mrb[4].mxu0 %v1353_v2 }
  0xe2   : > { %1263 = vmatpush3.bf16.msra.mxu1 %v770_v7  ;;  %1290 = vmatprep.mubr.msk.bf16.mxu0 %vm857_vm5, %v1357_v5 }
  0xe3   : > { %v780_v11 = vld [vmem:[#allocation2 + $0x108] sm:$0xff] }
  0xe4   : > { %v779_v10 = vld [vmem:[#allocation2 + $0x100] sm:$0xff] }
  0xe5   : > { %946 = vmatmul.mubr.bf16.vlgmr.msra.gmra.mrb[0].mxu1 %v1348_v8  ;;  %1282 = vmatprep.subr.bf16.mxu0 %v779_v10 }
  0xe6   : > { %1283 = vmatpush3.bf16.msra.mxu0 %v779_v10  ;;  %953 = vmatprep.mubr.bf16.mxu1 %v1354_v9 }
  0xe7   : > { %1284 = vmatprep.subr.bf16.mxu0 %v780_v11  ;;  %v782_v14 = vld [vmem:[#allocation2 + $0x118] sm:$0xff] }
  0xe8   : > { %v781_v12 = vld [vmem:[#allocation2 + $0x110] sm:$0xff] }
  0xea   : > { %1285 = vmatpush3.bf16.msra.mxu0 %v780_v11 }
  0xeb   : > { %1286 = vmatprep.subr.bf16.mxu0 %v781_v12 }
  0xed   : > { %954 = vmatmul.mubr.bf16.gmra.mrb[4].mxu1 %v1356_v13 }
  0xee   : > { %1287 = vmatpush3.bf16.msra.mxu0 %v781_v12 }
  0xef   : > { %1288 = vmatprep.subr.bf16.mxu0 %v782_v14 }
  0xf0   : > { %v795_v27 = vpop.permute.xlu1 %794 }
  0xf1   : > { %v790_v23 = vpop.permute.xlu0 %789 }
  0xf2   : > { %1289 = vmatpush3.bf16.msra.mxu0 %v782_v14 }
  0xf4   : > { %v800_v40 = vpop.permute.xlu1 %799 }
  0xf5   : > { %1291 = vmatmul.mubr.msk.bf16.vlgmr.msra.gmra.mrb[8].mxu0 %vm857_vm5, %v1358_v15  ;;  %v805_v42 = vpop.permute.xlu0 %804 }
 0x1ac   : > { %v1236_v16 = vpop.f32.mrb[0].mxu0 }
 0x1ad   : > { %v1237_v17 = vpop.f32.mrb[1].mxu0 }
 0x1ae   : > { %v1238_v18 = vadd.f32 %v1237_v17, %v1236_v16  ;;  %v1239_v19 = vpop.f32.mrb[2].mxu0 }
 0x1af   : > { %v1240_v20 = vpop.f32.mrb[3].mxu0 }
 0x1b0   : > { %v1241_v21 = vadd.f32 %v1240_v20, %v1239_v19  ;;  %v899_v30 = vadd.f32 %v1238_v18, %v790_v23 }
 0x1b2   : > { %v902_v36 = vadd.f32 %v1241_v21, %v795_v27 }
 0x1b4   : > { %v1242_v22 = vpop.f32.mrb[4].mxu0 }
 0x1b5   : > { %v1243_v24 = vpop.f32.mrb[5].mxu0 }
 0x1b6   : > { %v1244_v25 = vadd.f32 %v1243_v24, %v1242_v22  ;;  %v1245_v26 = vpop.f32.mrb[6].mxu0 }
 0x1b7   : > { %v1246_v28 = vpop.f32.mrb[7].mxu0 }
 0x1b8   : > { %v1264_v29 = vpop.f32.mrb[0].mxu1  ;;  %v1247_v31 = vadd.f32 %v1246_v28, %v1245_v26  ;;  %v907_v44 = vadd.f32 %v1244_v25, %v800_v40 }
 0x1b9   : > { %v1265_v32 = vpop.f32.mrb[1].mxu1 }
 0x1ba   : > { %v1266_v34 = vadd.f32 %v1265_v32, %v1264_v29  ;;  %v1267_v35 = vpop.f32.mrb[2].mxu1  ;;  %v910_v48 = vadd.f32 %v1247_v31, %v805_v42 }
 0x1bb   : > { %v1268_v37 = vpop.f32.mrb[3].mxu1 }
 0x1bc   : > { %v1269_v38 = vadd.f32 %v1268_v37, %v1267_v35  ;;  %v948_v39 = vadd.f32 %v1266_v34, %v899_v30 }
 0x1be   : > { %v951_v41 = vadd.f32 %v1269_v38, %v902_v36 }
 0x1c0   : > { %v1270_v43 = vpop.f32.mrb[4].mxu1 }
 0x1c1   : > { %v1271_v45 = vpop.f32.mrb[5].mxu1 }
 0x1c2   : > { %v1272_v46 = vadd.f32 %v1271_v45, %v1270_v43  ;;  %v1273_v47 = vpop.f32.mrb[6].mxu1 }
 0x1c3   : > { %v1274_v49 = vpop.f32.mrb[7].mxu1 }
 0x1c4   : > { %v1275_v50 = vadd.f32 %v1274_v49, %v1273_v47  ;;  %v956_v51 = vadd.f32 %v1272_v46, %v907_v44 }
 0x1c6   : > { %v959_v52 = vadd.f32 %v1275_v50, %v910_v48 }
 0x1c8   : > { %v1292_v53 = vpop.f32.mrb[8].mxu0 }
 0x1c9   : > { %v1005_v54 = vadd.f32 %v1292_v53, %v956_v51  ;;  %v996_v55 = vpop.f32.mrb[9].mxu0 }
 0x1ca   : > { %v997_v56 = vadd.f32 %v996_v55, %v948_v39  ;;  %v1293_v57 = vpop.f32.mrb[10].mxu0 }
 0x1cb   : > { %vm1013_vm6 = vcmp.ge.f32.partialorder %v1005_v54, 0.0  ;;  %v1017_v58 = vmul.f32 0.2, %v1005_v54  ;;  %v1008_v60 = vadd.f32 %v1293_v57, %v959_v52  ;;  %v999_v61 = vpop.f32.mrb[11].mxu0 }
 0x1cc   : > { %vm1011_vm7 = vcmp.ge.f32.partialorder %v997_v56, 0.0  ;;  %v1015_v62 = vmul.f32 0.2, %v997_v56  ;;  %v1000_v63 = vadd.f32 %v999_v61, %v951_v41 }
 0x1cd   : > { %v1021_v0 = vsel %vm1013_vm6, %v1005_v54, %v1017_v58  ;;  %vm1014_vm8 = vcmp.ge.f32.partialorder %v1008_v60, 0.0  ;;  %v1018_v1 = vmul.f32 0.2, %v1008_v60 }
 0x1ce   : > { %v1032_v2 = vmul.f32 %v1206_v59, %v1021_v0  ;;  %v1019_v3 = vsel %vm1011_vm7, %v997_v56, %v1015_v62  ;;  %vm1012_vm9 = vcmp.ge.f32.partialorder %v1000_v63, 0.0  ;;  %v1016_v4 = vmul.f32 0.2, %v1000_v63 }
 0x1cf   : > { %v1030_v5 = vmul.f32 %v1206_v59, %v1019_v3  ;;  %v1022_v6 = vsel %vm1014_vm8, %v1008_v60, %v1018_v1 }
 0x1d0   : > { %v1218_v7 = vpack.c.bf16 %v1032_v2, %v1032_v2  ;;  %v1033_v8 = vmul.f32 %v1206_v59, %v1022_v6  ;;  %v1020_v9 = vsel %vm1012_vm9, %v1000_v63, %v1016_v4 }
 0x1d1   : > { %v1216_v10 = vpack.c.bf16 %v1030_v5, %v1030_v5  ;;  %v1031_v11 = vmul.f32 %v1206_v59, %v1020_v9 }
 0x1d2   : > { %1057 = vst.msk [vmem:[%s1632_s17 + $0x14] sm:$0xf] %vm1054_vm10, %v1218_v7  ;;  %v1219_v12 = vpack.c.bf16 %v1033_v8, %v1033_v8 }
 0x1d3   : > { %1062 = vst.msk [vmem:[%s1632_s17 + $0x14] sm:$0xf] %vm1059_vm11, %v1375_v33  ;;  %v1217_v13 = vpack.c.bf16 %v1031_v11, %v1031_v11 }
 0x1d4   : > { %1055 = vst.msk [vmem:[%s1632_s17 + $0x4] sm:$0xf] %vm1054_vm10, %v1216_v10  ;;  %1058 = vst.msk [vmem:[%s1632_s17 + $0x1c] sm:$0xf] %vm1054_vm10, %v1219_v12 }
 0x1d5   : > { %1060 = vst.msk [vmem:[%s1632_s17 + $0x4] sm:$0xf] %vm1059_vm11, %v1375_v33  ;;  %1063 = vst.msk [vmem:[%s1632_s17 + $0x1c] sm:$0xf] %vm1059_vm11, %v1375_v33 }
 0x1d6   : > { %1056 = vst.msk [vmem:[%s1632_s17 + $0xc] sm:$0xf] %vm1054_vm10, %v1217_v13 }
 0x1d7   : > { %1061 = vst.msk [vmem:[%s1632_s17 + $0xc] sm:$0xf] %vm1059_vm11, %v1375_v33 }
 0x1d8 PF: > { %s15_s18 = sadd.s32 1, %s1365_s18  }
 0x1d9   : > { %p12_p4 = scmp.ge.s32.totalorder %s15_s18, 4  }
 0x1db   :  { %14 = sbr.rel (!%p12_p4) target bundleno = 1 (0x1), region = 73 }

// kernel: registration_subnet_forward.16
= control target key start
LH: loop header
LB: loop body
LE: loop exit
PB: predicated region body
PF: predicated region fallthrough
CT: control target
= control target key end

     0   :  { %s1406_s18 = smov 0   ;;  %s1664_s0 = inlined_call_operand.vmem [shape: bf16[2,32,139], index: 0, kind: input, shape index: {}]   ;;  %s1665_s1 = inlined_call_operand.vmem [shape: bf16[2,32,139], index: 1, kind: input, shape index: {}]   ;;  %s1666_s2 = inlined_call_operand.vmem [shape: bf16[32,576], index: 2, kind: input, shape index: {}]   ;;  %s1667_s3 = inlined_call_operand.vmem [shape: f32[32,1], index: 3, kind: input, shape index: {}]   ;;  %s1668_s4 = inlined_call_operand.vmem [shape: f32[1,6], index: 4, kind: input, shape index: {}]   ;;  %s1669_s5 = inlined_call_operand.vmem [shape: bf16[2,32,139], index: 5, kind: output, shape index: {}]  }
   0x1 LB: > { %s1131_s19 = sadd.s32 4294967295, %s1365_s18   ;;  %p1135_p0 = scmp.ge.s32.totalorder %s1365_s18, 1  ;;  %s1365_s18 = sphi %s1406_s18, %s15_s18  }
   0x2   : > { %p197_p1 = scmp.lt.s32.totalorder %s1365_s18, 3 }
   0x4   : > { %p198_p2 = pnand %p1135_p0, %p197_p1 }
   0x5   : > { %p230_p3 = scmp.lt.s32.totalorder (!%p198_p2), %s1131_s19, 1  ;;  %s1367_s27 = smov (!%p198_p2), 1   ;;  %vm279_vm0 = vcmask (!%p198_p2), 48128   ;;  %v1347_v24 = vld [vmem:[%s1666_s2 + $0x4] ss:$20 sps:$4 sm:$0xff] (!%p198_p2)   ;;  %v784_v31 = vld [vmem:[%s1667_s3 + $0x8] sm:$0xff] (!%p198_p2) }
   0x6   : > { %201 = sbr.rel (%p198_p2) target bundleno = 472 (0x1d8), region = 40  ;;  %s1368_s28 = smov (!%p198_p2), 5   ;;  %896 = vmatprep.mubr.bf16.mxu0 (!%p198_p2), %v1347_v24  ;;  %v1350_v26 = vld [vmem:[%s1666_s2 + $0xc] ss:$20 sps:$4 sm:$0xff] (!%p198_p2)   ;;  %v1375_v33 = vmov (!%p198_p2), 0   ;;  %v785_v34 = vld [vmem:[%s1667_s3 + $0x10] sm:$0xff] (!%p198_p2) }
   0x7   : > { %s1369_s29 = smov (!%p198_p2), 123   ;;  %s1370_s30 = smov (!%p198_p2), 4   ;;  %945 = vmatprep.mubr.bf16.mxu1 (!%p198_p2), %v1350_v26  ;;  %v783_v32 = vld [vmem:[%s1667_s3] sm:$0xff] (!%p198_p2)  ;;  %1312 = vset.pattern.permute.xlu1 (!%p198_p2), %v1375_v33  ;;  %v786_v35 = vld [vmem:[%s1667_s3 + $0x18] sm:$0xff] (!%p198_p2)  ;;  %vm380_vm1 = vcmask (!%p198_p2), 7168   ;;  %vm274_vm2 = vcmask (!%p198_p2), 39936  }
   0x8   : > { %s1371_s6 = smov (!%p198_p2), 127   ;;  %s1372_s7 = smov (!%p198_p2), 3   ;;  %1311 = vset.pattern.permute.xlu0 (!%p198_p2), %v1375_v33  ;;  %vm310_vm3 = vcmask (!%p198_p2), 31744   ;;  %vm345_vm4 = vcmask (!%p198_p2), 23552   ;;  %vm857_vm5 = vcmask (!%p198_p2), 523264   ;;  %vm1054_vm10 = vcmask (!%p198_p2), 44032  }
   0x9   : > { %s1373_s8 = smov (!%p198_p2), 125   ;;  %s1374_s9 = smov (!%p198_p2), 124   ;;  %vm1059_vm11 = vcmask (!%p198_p2), 85040  }
   0xd   : > { %s1671_s19 = smov (!%p230_p3, %s1131_s19), 1 }
   0xe   : > { %s1414_s20 = sshll.u32 %s1671_s19, 5 }
   0xf   : > { %s1420_s23 = scalar_lea.vmem %s1665_s1, %s1414_s20  ;;  %s1426_s26 = scalar_lea.vmem %s1664_s0, %s1414_s20 }
  0x10   : > { %v1429_v0 = vld [vmem:[%s1420_s23] ss:$8 sps:$4 sm:$0xff]   ;;  %v1432_v1 = vld [vmem:[%s1420_s23 + $0x4] ss:$8 sps:$4 sm:$0xff]   ;;  %v1442_v4 = vld [vmem:[%s1426_s26 + $0x14] ss:$8 sps:$4 sm:$0xff]   ;;  %s1632_s17 = scalar_lea.vmem %s1669_s5, %s1414_s20 }
  0x11   : > { %615 = vrot.lane.b32.xlu1 %v1429_v0, %s1367_s27  ;;  %v1316_v2 = vld [vmem:[%s1426_s26] ss:$8 sps:$4 sm:$0xff]   ;;  %v1318_v3 = vld [vmem:[%s1426_s26 + $0x4] ss:$8 sps:$4 sm:$0xff]   ;;  %v1321_v5 = vld [vmem:[%s1426_s26 + $0x10] ss:$8 sps:$4 sm:$0xff]  }
  0x12   : > { %266 = vrot.lane.b32.xlu0 %v1316_v2, %s1368_s28  ;;  %v1449_v6 = vld [vmem:[%s1420_s23 + $0x10] ss:$8 sps:$4 sm:$0xff]   ;;  %v1324_v7 = vld [vmem:[%s1426_s26 + $0x4] ss:$8 sps:$4 sm:$0xff]   ;;  %v1457_v8 = vld [vmem:[%s1420_s23 + $0x14] ss:$8 sps:$4 sm:$0xff]  }
  0x13   : > { %v1326_v9 = vld [vmem:[%s1426_s26 + $0x4] ss:$8 sps:$4 sm:$0xff]   ;;  %v1342_v11 = vld [vmem:[%s1426_s26 + $0x14] ss:$8 sps:$4 sm:$0xff]   ;;  %1034 = vst [vmem:[%s1632_s17] sm:$0xf] %v1375_v33 }
  0x14   : > { %v1341_v10 = vld [vmem:[%s1426_s26 + $0x4] ss:$8 sps:$4 sm:$0xff]   ;;  %v1327_v12 = vld [vmem:[%s1426_s26 + $0x14] ss:$8 sps:$4 sm:$0xff]   ;;  %404 = vst.msk [vmem:[#allocation2 + $0x48] sm:$0xff] %vm279_vm0, %v1342_v11 }
  0x15   : > { %617 = vrot.lane.b32.xlu1 %v1432_v1, %s1367_s27  ;;  %403 = vst.msk [vmem:[#allocation2 + $0x40] sm:$0xff] %vm279_vm0, %v1341_v10  ;;  %v1343_v13 = vld [vmem:[%s1420_s23 + $0x4] ss:$8 sps:$4 sm:$0xff]   ;;  %v1328_v14 = vld [vmem:[%s1426_s26 + $0x14] ss:$8 sps:$4 sm:$0xff]  }
  0x16   : > { %268 = vrot.lane.b32.xlu0 %v1318_v3, %s1368_s28  ;;  %645 = vst.msk [vmem:[#allocation2 + $0xd0] sm:$0xff] %vm279_vm0, %v1343_v13  ;;  %v1344_v16 = vld [vmem:[%s1420_s23 + $0x14] ss:$8 sps:$4 sm:$0xff]   ;;  %v1329_v17 = vld [vmem:[%s1426_s26 + $0x4] ss:$8 sps:$4 sm:$0xff]  }
  0x17   : > { %646 = vst.msk [vmem:[#allocation2 + $0xd8] sm:$0xff] %vm279_vm0, %v1344_v16  ;;  %v1330_v18 = vld [vmem:[%s1426_s26 + $0x14] ss:$8 sps:$4 sm:$0xff]   ;;  %v1331_v19 = vld [vmem:[%s1420_s23 + $0x4] ss:$8 sps:$4 sm:$0xff]  }
  0x18   : > { %v1332_v20 = vld [vmem:[%s1426_s26 + $0x4] ss:$8 sps:$4 sm:$0xff]   ;;  %v1333_v21 = vld [vmem:[%s1420_s23 + $0x14] ss:$8 sps:$4 sm:$0xff]   ;;  %1035 = vst [vmem:[%s1632_s17 + $0x8] sm:$0xf] %v1375_v33 }
  0x19   : > { %272 = vrot.lane.b32.xlu1 %v1442_v4, %s1368_s28  ;;  %v1334_v22 = vld [vmem:[%s1426_s26 + $0x14] ss:$8 sps:$4 sm:$0xff]   ;;  %v1335_v23 = vld [vmem:[%s1420_s23 + $0x4] ss:$8 sps:$4 sm:$0xff]   ;;  %1036 = vst [vmem:[%s1632_s17 + $0x10] sm:$0xf] %v1375_v33 }
  0x1a   : > { %270 = vrot.lane.b32.xlu0 %v1321_v5, %s1368_s28  ;;  %v1336_v25 = vld [vmem:[%s1420_s23 + $0x14] ss:$8 sps:$4 sm:$0xff]   ;;  %v1337_v28 = vld [vmem:[%s1420_s23 + $0x4] ss:$8 sps:$4 sm:$0xff]   ;;  %1037 = vst [vmem:[%s1632_s17 + $0x18] sm:$0xf] %v1375_v33 }
  0x1b   : > { %v1338_v27 = vld [vmem:[%s1420_s23 + $0x14] ss:$8 sps:$4 sm:$0xff]   ;;  %v1339_v30 = vld [vmem:[%s1420_s23 + $0x4] ss:$8 sps:$4 sm:$0xff]  }
  0x1c   : > { %v755_v15 = vld [vmem:[#allocation2 + $0x40] sm:$0xff]  ;;  %v1340_v29 = vld [vmem:[%s1420_s23 + $0x14] ss:$8 sps:$4 sm:$0xff]   ;;  %v756_v48 = vld [vmem:[#allocation2 + $0x48] sm:$0xff] }
  0x1d   : > { %619 = vrot.lane.b32.xlu1 %v1449_v6, %s1367_s27  ;;  %1220 = vmatprep.subr.bf16.mxu0 %v755_v15 }
  0x1e   : > { %485 = vrot.lane.b32.xlu0 %v1324_v7, %s1369_s29 }
  0x21   : > { %302 = vrot.lane.b32.xlu1 %v1316_v2, %s1370_s30 }
  0x22   : > { %621 = vrot.lane.b32.xlu0 %v1457_v8, %s1367_s27 }
  0x25   : > { %419 = vrot.lane.b32.xlu1 %v1326_v9, %s1371_s6 }
  0x26   : > { %304 = vrot.lane.b32.xlu0 %v1318_v3, %s1370_s30 }
  0x29   : > { %306 = vrot.lane.b32.xlu1 %v1321_v5, %s1370_s30 }
  0x2a   : > { %487 = vrot.lane.b32.xlu0 %v1327_v12, %s1369_s29 }
  0x2d   : > { %421 = vrot.lane.b32.xlu1 %v1328_v14, %s1371_s6  ;;  %v774_v14 = vld [vmem:[#allocation2 + $0xd8] sm:$0xff] }
  0x2e   : > { %308 = vrot.lane.b32.xlu0 %v1442_v4, %s1370_s30 }
  0x31   : > { %515 = vrot.lane.b32.xlu1 %v1432_v1, %s1368_s28 }
  0x32   : > { %513 = vrot.lane.b32.xlu0 %v1429_v0, %s1368_s28 }
  0x35   : > { %339 = vrot.lane.b32.xlu1 %v1318_v3, %s1372_s7 }
  0x36   : > { %337 = vrot.lane.b32.xlu0 %v1316_v2, %s1372_s7 }
  0x39   : > { %517 = vrot.lane.b32.xlu1 %v1449_v6, %s1368_s28 }
  0x3a   : > { %441 = vrot.lane.b32.xlu0 %v1329_v17, %s1373_s8 }
  0x3d   : > { %341 = vrot.lane.b32.xlu1 %v1321_v5, %s1372_s7 }
  0x3e   : > { %519 = vrot.lane.b32.xlu0 %v1457_v8, %s1368_s28 }
  0x41   : > { %443 = vrot.lane.b32.xlu1 %v1330_v18, %s1373_s8 }
  0x42   : > { %343 = vrot.lane.b32.xlu0 %v1442_v4, %s1372_s7 }
  0x45   : > { %549 = vrot.lane.b32.xlu1 %v1432_v1, %s1370_s30 }
  0x46   : > { %547 = vrot.lane.b32.xlu0 %v1429_v0, %s1370_s30 }
  0x49   : > { %372 = vrot.lane.b32.xlu1 %v1316_v2, %s1367_s27 }
  0x4a   : > { %661 = vrot.lane.b32.xlu0 %v1331_v19, %s1371_s6 }
  0x4d   : > { %463 = vrot.lane.b32.xlu1 %v1332_v20, %s1374_s9 }
  0x4e   : > { %374 = vrot.lane.b32.xlu0 %v1318_v3, %s1367_s27  ;;  %v773_v3 = vld [vmem:[#allocation2 + $0xd0] sm:$0xff] }
  0x51   : > { %553 = vrot.lane.b32.xlu1 %v1457_v8, %s1370_s30 }
  0x52   : > { %551 = vrot.lane.b32.xlu0 %v1449_v6, %s1370_s30 }
  0x55   : > { %376 = vrot.lane.b32.xlu1 %v1321_v5, %s1367_s27 }
  0x56   : > { %663 = vrot.lane.b32.xlu0 %v1333_v21, %s1371_s6 }
  0x59   : > { %465 = vrot.lane.b32.xlu1 %v1334_v22, %s1374_s9 }
  0x5a   : > { %378 = vrot.lane.b32.xlu0 %v1442_v4, %s1367_s27 }
  0x5d   : > { %583 = vrot.lane.b32.xlu1 %v1432_v1, %s1372_s7 }
  0x5e   : > { %581 = vrot.lane.b32.xlu0 %v1429_v0, %s1372_s7 }
  0x61   : > { %585 = vrot.lane.b32.xlu1 %v1449_v6, %s1372_s7 }
  0x62   : > { %683 = vrot.lane.b32.xlu0 %v1335_v23, %s1373_s8 }
  0x65   : > { %685 = vrot.lane.b32.xlu1 %v1336_v25, %s1373_s8 }
  0x66   : > { %587 = vrot.lane.b32.xlu0 %v1457_v8, %s1372_s7 }
  0x69   : > { %707 = vrot.lane.b32.xlu1 %v1338_v27, %s1374_s9 }
  0x6a   : > { %705 = vrot.lane.b32.xlu0 %v1337_v28, %s1374_s9 }
  0x6d   : > { %729 = vrot.lane.b32.xlu1 %v1340_v29, %s1369_s29 }
  0x6e   : > { %727 = vrot.lane.b32.xlu0 %v1339_v30, %s1369_s29 }
  0x71   : > { %794 = vperm.xlu1 %1312, %v784_v31  }
  0x72   : > { %789 = vperm.xlu0 %1311, %v783_v32  }
  0x75   : > { %799 = vperm.xlu1 %1312, %v785_v34  }
  0x76   : > { %804 = vperm.xlu0 %1311, %v786_v35  }
  0x83   : > { %v616_v36 = vpop.permute.xlu1 %615 }
  0x84   : > { %v267_v37 = vpop.permute.xlu0 %266 }
  0x87   : > { %v618_v38 = vpop.permute.xlu1 %617 }
  0x88   : > { %v623_v39 = vsel %vm380_vm1, %v616_v36, %v618_v38  ;;  %v269_v40 = vpop.permute.xlu0 %268 }
  0x89   : > { %627 = vst.msk [vmem:[#allocation2 + $0xc0] sm:$0xff] %vm279_vm0, %v623_v39  ;;  %v275_v41 = vsel %vm274_vm2, %v267_v37, %v269_v40 }
  0x8a   : > { %280 = vst.msk [vmem:[#allocation2] sm:$0xff] %vm279_vm0, %v275_v41 }
  0x8b   : > { %v273_v42 = vpop.permute.xlu1 %272 }
  0x8c   : > { %v271_v43 = vpop.permute.xlu0 %270 }
  0x8d   : > { %v276_v44 = vsel %vm274_vm2, %v271_v43, %v273_v42 }
  0x8e   : > { %281 = vst.msk [vmem:[#allocation2 + $0x8] sm:$0xff] %vm279_vm0, %v276_v44 }
  0x8f   : > { %v620_v45 = vpop.permute.xlu1 %619 }
  0x90   : > { %v771_v46 = vld [vmem:[#allocation2 + $0xc0] sm:$0xff]  ;;  %v486_v47 = vpop.permute.xlu0 %485 }
  0x91   : > { %1248 = vmatprep.subr.bf16.mxu1 %v771_v46  ;;  %491 = vst.msk [vmem:[#allocation2 + $0x80] sm:$0xff] %vm279_vm0, %v486_v47  ;;  %v747_v49 = vld [vmem:[#allocation2] sm:$0xff] }
  0x92   : > { %1221 = vmatpush3.bf16.msra.mxu0 %v747_v49 }
  0x93   : > { %v303_v50 = vpop.permute.xlu1 %302  ;;  %1222 = vmatprep.subr.bf16.mxu0 %v756_v48 }
  0x94   : > { %v622_v51 = vpop.permute.xlu0 %621 }
  0x95   : > { %v624_v52 = vsel %vm380_vm1, %v620_v45, %v622_v51  ;;  %v748_v53 = vld [vmem:[#allocation2 + $0x8] sm:$0xff] }
  0x96   : > { %628 = vst.msk [vmem:[#allocation2 + $0xc8] sm:$0xff] %vm279_vm0, %v624_v52  ;;  %1223 = vmatpush3.bf16.msra.mxu0 %v748_v53 }
  0x97   : > { %v420_v54 = vpop.permute.xlu1 %419 }
  0x98   : > { %425 = vst.msk [vmem:[#allocation2 + $0x50] sm:$0xff] %vm279_vm0, %v420_v54  ;;  %v305_v55 = vpop.permute.xlu0 %304  ;;  %v763_v56 = vld [vmem:[#allocation2 + $0x80] sm:$0xff] }
  0x99   : > { %v311_v57 = vsel %vm310_vm3, %v303_v50, %v305_v55  ;;  %1249 = vmatpush3.bf16.msra.mxu1 %v763_v56 }
  0x9a   : > { %315 = vst.msk [vmem:[#allocation2 + $0x10] sm:$0xff] %vm279_vm0, %v311_v57  ;;  %v1345_v57 = vld [vmem:[%s1666_s2] ss:$20 sps:$4 sm:$0xff]  }
  0x9b   : > { %v307_v58 = vpop.permute.xlu1 %306 }
  0x9c   : > { %v488_v59 = vpop.permute.xlu0 %487 }
  0x9d   : > { %492 = vst.msk [vmem:[#allocation2 + $0x88] sm:$0xff] %vm279_vm0, %v488_v59  ;;  %v772_v60 = vld [vmem:[#allocation2 + $0xc8] sm:$0xff] }
  0x9e   : > { %1250 = vmatprep.subr.bf16.mxu1 %v772_v60  ;;  %v1351_v59 = vld [vmem:[%s1666_s2 + $0x2c] ss:$20 sps:$4 sm:$0xff]  }
  0x9f   : > { %v422_v61 = vpop.permute.xlu1 %421  ;;  %v757_v62 = vld [vmem:[#allocation2 + $0x50] sm:$0xff] }
  0xa0   : > { %426 = vst.msk [vmem:[#allocation2 + $0x58] sm:$0xff] %vm279_vm0, %v422_v61  ;;  %1224 = vmatprep.subr.bf16.mxu0 %v757_v62  ;;  %v309_v63 = vpop.permute.xlu0 %308 }
  0xa1   : > { %v312_v0 = vsel %vm310_vm3, %v307_v58, %v309_v63  ;;  %v749_v1 = vld [vmem:[#allocation2 + $0x10] sm:$0xff] }
  0xa2   : > { %316 = vst.msk [vmem:[#allocation2 + $0x18] sm:$0xff] %vm279_vm0, %v312_v0  ;;  %1225 = vmatpush3.bf16.msra.mxu0 %v749_v1 }
  0xa3   : > { %v516_v2 = vpop.permute.xlu1 %515 }
  0xa4   : > { %v514_v4 = vpop.permute.xlu0 %513  ;;  %v764_v5 = vld [vmem:[#allocation2 + $0x88] sm:$0xff] }
  0xa5   : > { %v521_v6 = vsel %vm274_vm2, %v514_v4, %v516_v2  ;;  %1251 = vmatpush3.bf16.msra.mxu1 %v764_v5  ;;  %v1353_v2 = vld [vmem:[%s1666_s2 + $0x28] ss:$20 sps:$4 sm:$0xff]   ;;  %v1357_v5 = vld [vmem:[%s1666_s2 + $0x10] ss:$20 sps:$4 sm:$0xff]  }
  0xa6   : > { %525 = vst.msk [vmem:[#allocation2 + $0x90] sm:$0xff] %vm279_vm0, %v521_v6  ;;  %1252 = vmatprep.subr.bf16.mxu1 %v773_v3 }
  0xa7   : > { %v340_v7 = vpop.permute.xlu1 %339  ;;  %v758_v8 = vld [vmem:[#allocation2 + $0x58] sm:$0xff] }
  0xa8   : > { %1226 = vmatprep.subr.bf16.mxu0 %v758_v8  ;;  %v338_v9 = vpop.permute.xlu0 %337  ;;  %v1348_v8 = vld [vmem:[%s1666_s2 + $0x8] ss:$20 sps:$4 sm:$0xff]  }
  0xa9   : > { %v346_v10 = vsel %vm345_vm4, %v338_v9, %v340_v7  ;;  %v750_v11 = vld [vmem:[#allocation2 + $0x18] sm:$0xff]  ;;  %v1354_v9 = vld [vmem:[%s1666_s2 + $0x34] ss:$20 sps:$4 sm:$0xff]  }
  0xaa   : > { %350 = vst.msk [vmem:[#allocation2 + $0x20] sm:$0xff] %vm279_vm0, %v346_v10  ;;  %1227 = vmatpush3.bf16.msra.mxu0 %v750_v11 }
  0xab   : > { %v518_v12 = vpop.permute.xlu1 %517 }
  0xac   : > { %v442_v13 = vpop.permute.xlu0 %441 }
  0xad   : > { %447 = vst.msk [vmem:[#allocation2 + $0x60] sm:$0xff] %vm279_vm0, %v442_v13  ;;  %v765_v15 = vld [vmem:[#allocation2 + $0x90] sm:$0xff] }
  0xae   : > { %1253 = vmatpush3.bf16.msra.mxu1 %v765_v15  ;;  %v1356_v13 = vld [vmem:[%s1666_s2 + $0x30] ss:$20 sps:$4 sm:$0xff]   ;;  %v1358_v15 = vld [vmem:[%s1666_s2 + $0x38] ss:$20 sps:$4 sm:$0xff]  }
  0xaf   : > { %v342_v16 = vpop.permute.xlu1 %341  ;;  %1254 = vmatprep.subr.bf16.mxu1 %v774_v14 }
  0xb0   : > { %v520_v17 = vpop.permute.xlu0 %519 }
  0xb1   : > { %v522_v18 = vsel %vm274_vm2, %v518_v12, %v520_v17  ;;  %v751_v23 = vld [vmem:[#allocation2 + $0x20] sm:$0xff] }
  0xb2   : > { %526 = vst.msk [vmem:[#allocation2 + $0x98] sm:$0xff] %vm279_vm0, %v522_v18 }
  0xb3   : > { %v444_v19 = vpop.permute.xlu1 %443 }
  0xb4   : > { %448 = vst.msk [vmem:[#allocation2 + $0x68] sm:$0xff] %vm279_vm0, %v444_v19  ;;  %v344_v20 = vpop.permute.xlu0 %343  ;;  %v759_v21 = vld [vmem:[#allocation2 + $0x60] sm:$0xff] }
  0xb5   : > { %v347_v22 = vsel %vm345_vm4, %v342_v16, %v344_v20  ;;  %1228 = vmatprep.subr.bf16.mxu0 %v759_v21 }
  0xb6   : > { %351 = vst.msk [vmem:[#allocation2 + $0x28] sm:$0xff] %vm279_vm0, %v347_v22  ;;  %1229 = vmatpush3.bf16.msra.mxu0 %v751_v23 }
  0xb7   : > { %v550_v24 = vpop.permute.xlu1 %549 }
  0xb8   : > { %v548_v25 = vpop.permute.xlu0 %547 }
  0xb9   : > { %v555_v26 = vsel %vm310_vm3, %v548_v25, %v550_v24  ;;  %v766_v27 = vld [vmem:[#allocation2 + $0x98] sm:$0xff] }
  0xba   : > { %559 = vst.msk [vmem:[#allocation2 + $0xa0] sm:$0xff] %vm279_vm0, %v555_v26  ;;  %1255 = vmatpush3.bf16.msra.mxu1 %v766_v27 }
  0xbb   : > { %v373_v28 = vpop.permute.xlu1 %372  ;;  %v760_v29 = vld [vmem:[#allocation2 + $0x68] sm:$0xff] }
  0xbc   : > { %1230 = vmatprep.subr.bf16.mxu0 %v760_v29  ;;  %v662_v30 = vpop.permute.xlu0 %661 }
  0xbd   : > { %667 = vst.msk [vmem:[#allocation2 + $0xe0] sm:$0xff] %vm279_vm0, %v662_v30  ;;  %v752_v31 = vld [vmem:[#allocation2 + $0x28] sm:$0xff] }
  0xbe   : > { %1231 = vmatpush3.bf16.msra.mxu0 %v752_v31 }
  0xbf   : > { %v464_v32 = vpop.permute.xlu1 %463 }
  0xc0   : > { %469 = vst.msk [vmem:[#allocation2 + $0x70] sm:$0xff] %vm279_vm0, %v464_v32  ;;  %v375_v34 = vpop.permute.xlu0 %374 }
  0xc1   : > { %v381_v35 = vsel %vm380_vm1, %v373_v28, %v375_v34  ;;  %v767_v40 = vld [vmem:[#allocation2 + $0xa0] sm:$0xff] }
  0xc2   : > { %385 = vst.msk [vmem:[#allocation2 + $0x30] sm:$0xff] %vm279_vm0, %v381_v35 }
  0xc3   : > { %v554_v36 = vpop.permute.xlu1 %553 }
  0xc4   : > { %v552_v37 = vpop.permute.xlu0 %551  ;;  %v775_v38 = vld [vmem:[#allocation2 + $0xe0] sm:$0xff] }
  0xc5   : > { %v556_v39 = vsel %vm310_vm3, %v552_v37, %v554_v36  ;;  %1256 = vmatprep.subr.bf16.mxu1 %v775_v38 }
  0xc6   : > { %560 = vst.msk [vmem:[#allocation2 + $0xa8] sm:$0xff] %vm279_vm0, %v556_v39  ;;  %1257 = vmatpush3.bf16.msra.mxu1 %v767_v40 }
  0xc7   : > { %v377_v41 = vpop.permute.xlu1 %376  ;;  %v761_v42 = vld [vmem:[#allocation2 + $0x70] sm:$0xff] }
  0xc8   : > { %1232 = vmatprep.subr.bf16.mxu0 %v761_v42  ;;  %v664_v43 = vpop.permute.xlu0 %663 }
  0xc9   : > { %668 = vst.msk [vmem:[#allocation2 + $0xe8] sm:$0xff] %vm279_vm0, %v664_v43  ;;  %v753_v44 = vld [vmem:[#allocation2 + $0x30] sm:$0xff] }
  0xca   : > { %1233 = vmatpush3.bf16.msra.mxu0 %v753_v44 }
  0xcb   : > { %v466_v45 = vpop.permute.xlu1 %465 }
  0xcc   : > { %470 = vst.msk [vmem:[#allocation2 + $0x78] sm:$0xff] %vm279_vm0, %v466_v45  ;;  %v379_v46 = vpop.permute.xlu0 %378 }
  0xcd   : > { %v382_v47 = vsel %vm380_vm1, %v377_v41, %v379_v46  ;;  %v768_v52 = vld [vmem:[#allocation2 + $0xa8] sm:$0xff] }
  0xce   : > { %386 = vst.msk [vmem:[#allocation2 + $0x38] sm:$0xff] %vm279_vm0, %v382_v47 }
  0xcf   : > { %v584_v48 = vpop.permute.xlu1 %583 }
  0xd0   : > { %v582_v49 = vpop.permute.xlu0 %581  ;;  %v776_v50 = vld [vmem:[#allocation2 + $0xe8] sm:$0xff] }
  0xd1   : > { %v589_v51 = vsel %vm345_vm4, %v582_v49, %v584_v48  ;;  %1258 = vmatprep.subr.bf16.mxu1 %v776_v50 }
  0xd2   : > { %593 = vst.msk [vmem:[#allocation2 + $0xb0] sm:$0xff] %vm279_vm0, %v589_v51  ;;  %1259 = vmatpush3.bf16.msra.mxu1 %v768_v52 }
  0xd3   : > { %v586_v53 = vpop.permute.xlu1 %585  ;;  %v762_v54 = vld [vmem:[#allocation2 + $0x78] sm:$0xff] }
  0xd4   : > { %1234 = vmatprep.subr.bf16.mxu0 %v762_v54  ;;  %v684_v55 = vpop.permute.xlu0 %683 }
  0xd5   : > { %689 = vst.msk [vmem:[#allocation2 + $0xf0] sm:$0xff] %vm279_vm0, %v684_v55  ;;  %v754_v56 = vld [vmem:[#allocation2 + $0x38] sm:$0xff] }
  0xd6   : > { %1235 = vmatpush3.bf16.msra.mxu0 %v754_v56 }
  0xd7   : > { %v686_v58 = vpop.permute.xlu1 %685 }
  0xd8   : > { %690 = vst.msk [vmem:[#allocation2 + $0xf8] sm:$0xff] %vm279_vm0, %v686_v58  ;;  %v588_v60 = vpop.permute.xlu0 %587 }
  0xd9   : > { %v590_v61 = vsel %vm345_vm4, %v586_v53, %v588_v60  ;;  %897 = vmatmul.mubr.bf16.vlgmr.msra.gmra.mrb[0].mxu0 %v1345_v57  ;;  %v769_v1 = vld [vmem:[#allocation2 + $0xb0] sm:$0xff] }
  0xda   : > { %594 = vst.msk [vmem:[#allocation2 + $0xb8] sm:$0xff] %vm279_vm0, %v590_v61  ;;  %904 = vmatprep.mubr.bf16.mxu0 %v1351_v59  ;;  %v1206_v59 = vld [vmem:[%s1668_s4] ss:$0 sm:$0xff] }
  0xdb   : > { %v708_v62 = vpop.permute.xlu1 %707 }
  0xdc   : > { %712 = vst.msk [vmem:[#allocation2 + $0x108] sm:$0xff] %vm279_vm0, %v708_v62  ;;  %v706_v63 = vpop.permute.xlu0 %705  ;;  %v777_v0 = vld [vmem:[#allocation2 + $0xf0] sm:$0xff] }
  0xdd   : > { %711 = vst.msk [vmem:[#allocation2 + $0x100] sm:$0xff] %vm279_vm0, %v706_v63  ;;  %1260 = vmatprep.subr.bf16.mxu1 %v777_v0 }
  0xde   : > { %1261 = vmatpush3.bf16.msra.mxu1 %v769_v1 }
  0xdf   : > { %v778_v3 = vld [vmem:[#allocation2 + $0xf8] sm:$0xff]  ;;  %v730_v4 = vpop.permute.xlu1 %729 }
  0xe0   : > { %1262 = vmatprep.subr.bf16.mxu1 %v778_v3  ;;  %734 = vst.msk [vmem:[#allocation2 + $0x118] sm:$0xff] %vm279_vm0, %v730_v4  ;;  %v728_v6 = vpop.permute.xlu0 %727 }
  0xe1   : > { %v770_v7 = vld [vmem:[#allocation2 + $0xb8] sm:$0xff]  ;;  %733 = vst.msk [vmem:[#allocation2 + $0x110] sm:$0xff] %vm279_vm0, %v728_v6  ;;  %905 = vmatmul.mubr.bf16.gmra.mrb[4].mxu0 %v1353_v2 }
  0xe2   : > { %1263 = vmatpush3.bf16.msra.mxu1 %v770_v7  ;;  %1290 = vmatprep.mubr.msk.bf16.mxu0 %vm857_vm5, %v1357_v5 }
  0xe3   : > { %v780_v11 = vld [vmem:[#allocation2 + $0x108] sm:$0xff] }
  0xe4   : > { %v779_v10 = vld [vmem:[#allocation2 + $0x100] sm:$0xff] }
  0xe5   : > { %946 = vmatmul.mubr.bf16.vlgmr.msra.gmra.mrb[0].mxu1 %v1348_v8  ;;  %1282 = vmatprep.subr.bf16.mxu0 %v779_v10 }
  0xe6   : > { %1283 = vmatpush3.bf16.msra.mxu0 %v779_v10  ;;  %953 = vmatprep.mubr.bf16.mxu1 %v1354_v9 }
  0xe7   : > { %1284 = vmatprep.subr.bf16.mxu0 %v780_v11  ;;  %v782_v14 = vld [vmem:[#allocation2 + $0x118] sm:$0xff] }
  0xe8   : > { %v781_v12 = vld [vmem:[#allocation2 + $0x110] sm:$0xff] }
  0xea   : > { %1285 = vmatpush3.bf16.msra.mxu0 %v780_v11 }
  0xeb   : > { %1286 = vmatprep.subr.bf16.mxu0 %v781_v12 }
  0xed   : > { %954 = vmatmul.mubr.bf16.gmra.mrb[4].mxu1 %v1356_v13 }
  0xee   : > { %1287 = vmatpush3.bf16.msra.mxu0 %v781_v12 }
  0xef   : > { %1288 = vmatprep.subr.bf16.mxu0 %v782_v14 }
  0xf0   : > { %v795_v27 = vpop.permute.xlu1 %794 }
  0xf1   : > { %v790_v23 = vpop.permute.xlu0 %789 }
  0xf2   : > { %1289 = vmatpush3.bf16.msra.mxu0 %v782_v14 }
  0xf4   : > { %v800_v40 = vpop.permute.xlu1 %799 }
  0xf5   : > { %1291 = vmatmul.mubr.msk.bf16.vlgmr.msra.gmra.mrb[8].mxu0 %vm857_vm5, %v1358_v15  ;;  %v805_v42 = vpop.permute.xlu0 %804 }
 0x1ac   : > { %v1236_v16 = vpop.f32.mrb[0].mxu0 }
 0x1ad   : > { %v1237_v17 = vpop.f32.mrb[1].mxu0 }
 0x1ae   : > { %v1238_v18 = vadd.f32 %v1237_v17, %v1236_v16  ;;  %v1239_v19 = vpop.f32.mrb[2].mxu0 }
 0x1af   : > { %v1240_v20 = vpop.f32.mrb[3].mxu0 }
 0x1b0   : > { %v1241_v21 = vadd.f32 %v1240_v20, %v1239_v19  ;;  %v899_v30 = vadd.f32 %v1238_v18, %v790_v23 }
 0x1b2   : > { %v902_v36 = vadd.f32 %v1241_v21, %v795_v27 }
 0x1b4   : > { %v1242_v22 = vpop.f32.mrb[4].mxu0 }
 0x1b5   : > { %v1243_v24 = vpop.f32.mrb[5].mxu0 }
 0x1b6   : > { %v1244_v25 = vadd.f32 %v1243_v24, %v1242_v22  ;;  %v1245_v26 = vpop.f32.mrb[6].mxu0 }
 0x1b7   : > { %v1246_v28 = vpop.f32.mrb[7].mxu0 }
 0x1b8   : > { %v1264_v29 = vpop.f32.mrb[0].mxu1  ;;  %v1247_v31 = vadd.f32 %v1246_v28, %v1245_v26  ;;  %v907_v44 = vadd.f32 %v1244_v25, %v800_v40 }
 0x1b9   : > { %v1265_v32 = vpop.f32.mrb[1].mxu1 }
 0x1ba   : > { %v1266_v34 = vadd.f32 %v1265_v32, %v1264_v29  ;;  %v1267_v35 = vpop.f32.mrb[2].mxu1  ;;  %v910_v48 = vadd.f32 %v1247_v31, %v805_v42 }
 0x1bb   : > { %v1268_v37 = vpop.f32.mrb[3].mxu1 }
 0x1bc   : > { %v1269_v38 = vadd.f32 %v1268_v37, %v1267_v35  ;;  %v948_v39 = vadd.f32 %v1266_v34, %v899_v30 }
 0x1be   : > { %v951_v41 = vadd.f32 %v1269_v38, %v902_v36 }
 0x1c0   : > { %v1270_v43 = vpop.f32.mrb[4].mxu1 }
 0x1c1   : > { %v1271_v45 = vpop.f32.mrb[5].mxu1 }
 0x1c2   : > { %v1272_v46 = vadd.f32 %v1271_v45, %v1270_v43  ;;  %v1273_v47 = vpop.f32.mrb[6].mxu1 }
 0x1c3   : > { %v1274_v49 = vpop.f32.mrb[7].mxu1 }
 0x1c4   : > { %v1275_v50 = vadd.f32 %v1274_v49, %v1273_v47  ;;  %v956_v51 = vadd.f32 %v1272_v46, %v907_v44 }
 0x1c6   : > { %v959_v52 = vadd.f32 %v1275_v50, %v910_v48 }
 0x1c8   : > { %v1292_v53 = vpop.f32.mrb[8].mxu0 }
 0x1c9   : > { %v1005_v54 = vadd.f32 %v1292_v53, %v956_v51  ;;  %v996_v55 = vpop.f32.mrb[9].mxu0 }
 0x1ca   : > { %v997_v56 = vadd.f32 %v996_v55, %v948_v39  ;;  %v1293_v57 = vpop.f32.mrb[10].mxu0 }
 0x1cb   : > { %vm1013_vm6 = vcmp.ge.f32.partialorder %v1005_v54, 0.0  ;;  %v1017_v58 = vmul.f32 0.2, %v1005_v54  ;;  %v1008_v60 = vadd.f32 %v1293_v57, %v959_v52  ;;  %v999_v61 = vpop.f32.mrb[11].mxu0 }
 0x1cc   : > { %vm1011_vm7 = vcmp.ge.f32.partialorder %v997_v56, 0.0  ;;  %v1015_v62 = vmul.f32 0.2, %v997_v56  ;;  %v1000_v63 = vadd.f32 %v999_v61, %v951_v41 }
 0x1cd   : > { %v1021_v0 = vsel %vm1013_vm6, %v1005_v54, %v1017_v58  ;;  %vm1014_vm8 = vcmp.ge.f32.partialorder %v1008_v60, 0.0  ;;  %v1018_v1 = vmul.f32 0.2, %v1008_v60 }
 0x1ce   : > { %v1032_v2 = vmul.f32 %v1206_v59, %v1021_v0  ;;  %v1019_v3 = vsel %vm1011_vm7, %v997_v56, %v1015_v62  ;;  %vm1012_vm9 = vcmp.ge.f32.partialorder %v1000_v63, 0.0  ;;  %v1016_v4 = vmul.f32 0.2, %v1000_v63 }
 0x1cf   : > { %v1030_v5 = vmul.f32 %v1206_v59, %v1019_v3  ;;  %v1022_v6 = vsel %vm1014_vm8, %v1008_v60, %v1018_v1 }
 0x1d0   : > { %v1218_v7 = vpack.c.bf16 %v1032_v2, %v1032_v2  ;;  %v1033_v8 = vmul.f32 %v1206_v59, %v1022_v6  ;;  %v1020_v9 = vsel %vm1012_vm9, %v1000_v63, %v1016_v4 }
 0x1d1   : > { %v1216_v10 = vpack.c.bf16 %v1030_v5, %v1030_v5  ;;  %v1031_v11 = vmul.f32 %v1206_v59, %v1020_v9 }
 0x1d2   : > { %1057 = vst.msk [vmem:[%s1632_s17 + $0x14] sm:$0xf] %vm1054_vm10, %v1218_v7  ;;  %v1219_v12 = vpack.c.bf16 %v1033_v8, %v1033_v8 }
 0x1d3   : > { %1062 = vst.msk [vmem:[%s1632_s17 + $0x14] sm:$0xf] %vm1059_vm11, %v1375_v33  ;;  %v1217_v13 = vpack.c.bf16 %v1031_v11, %v1031_v11 }
 0x1d4   : > { %1055 = vst.msk [vmem:[%s1632_s17 + $0x4] sm:$0xf] %vm1054_vm10, %v1216_v10  ;;  %1058 = vst.msk [vmem:[%s1632_s17 + $0x1c] sm:$0xf] %vm1054_vm10, %v1219_v12 }
 0x1d5   : > { %1060 = vst.msk [vmem:[%s1632_s17 + $0x4] sm:$0xf] %vm1059_vm11, %v1375_v33  ;;  %1063 = vst.msk [vmem:[%s1632_s17 + $0x1c] sm:$0xf] %vm1059_vm11, %v1375_v33 }
 0x1d6   : > { %1056 = vst.msk [vmem:[%s1632_s17 + $0xc] sm:$0xf] %vm1054_vm10, %v1217_v13 }
 0x1d7   : > { %1061 = vst.msk [vmem:[%s1632_s17 + $0xc] sm:$0xf] %vm1059_vm11, %v1375_v33 }
 0x1d8 PF: > { %s15_s18 = sadd.s32 1, %s1365_s18  }
 0x1d9   : > { %p12_p4 = scmp.ge.s32.totalorder %s15_s18, 4  }
 0x1db   :  { %14 = sbr.rel (!%p12_p4) target bundleno = 1 (0x1), region = 73 }

// kernel: registration_subnet_forward.18
= control target key start
LH: loop header
LB: loop body
LE: loop exit
PB: predicated region body
PF: predicated region fallthrough
CT: control target
= control target key end

     0   :  { %s1406_s18 = smov 0   ;;  %s1664_s0 = inlined_call_operand.vmem [shape: bf16[2,32,217], index: 0, kind: input, shape index: {}]   ;;  %s1665_s1 = inlined_call_operand.vmem [shape: bf16[2,32,217], index: 1, kind: input, shape index: {}]   ;;  %s1666_s2 = inlined_call_operand.vmem [shape: bf16[32,576], index: 2, kind: input, shape index: {}]   ;;  %s1667_s3 = inlined_call_operand.vmem [shape: f32[32,1], index: 3, kind: input, shape index: {}]   ;;  %s1668_s4 = inlined_call_operand.vmem [shape: f32[1,78], index: 4, kind: input, shape index: {}]   ;;  %s1669_s5 = inlined_call_operand.vmem [shape: bf16[2,32,217], index: 5, kind: output, shape index: {}]  }
   0x1 LB: > { %s1131_s19 = sadd.s32 4294967295, %s1365_s18   ;;  %p1135_p0 = scmp.ge.s32.totalorder %s1365_s18, 1  ;;  %s1365_s18 = sphi %s1406_s18, %s15_s18  }
   0x2   : > { %p197_p1 = scmp.lt.s32.totalorder %s1365_s18, 3 }
   0x4   : > { %p198_p2 = pnand %p1135_p0, %p197_p1 }
   0x5   : > { %p230_p3 = scmp.lt.s32.totalorder (!%p198_p2), %s1131_s19, 1  ;;  %s1367_s27 = smov (!%p198_p2), 1   ;;  %vm279_vm0 = vcmask (!%p198_p2), 637952   ;;  %v1347_v24 = vld [vmem:[%s1666_s2 + $0x4] ss:$20 sps:$4 sm:$0xff] (!%p198_p2)   ;;  %v784_v31 = vld [vmem:[%s1667_s3 + $0x8] sm:$0xff] (!%p198_p2) }
   0x6   : > { %201 = sbr.rel (%p198_p2) target bundleno = 472 (0x1d8), region = 40  ;;  %s1368_s28 = smov (!%p198_p2), 11   ;;  %896 = vmatprep.mubr.bf16.mxu0 (!%p198_p2), %v1347_v24  ;;  %v1350_v26 = vld [vmem:[%s1666_s2 + $0xc] ss:$20 sps:$4 sm:$0xff] (!%p198_p2)   ;;  %v1375_v33 = vmov (!%p198_p2), 0   ;;  %v785_v34 = vld [vmem:[%s1667_s3 + $0x10] sm:$0xff] (!%p198_p2) }
   0x7   : > { %s1369_s29 = smov (!%p198_p2), 117   ;;  %s1370_s30 = smov (!%p198_p2), 10   ;;  %945 = vmatprep.mubr.bf16.mxu1 (!%p198_p2), %v1350_v26  ;;  %v783_v32 = vld [vmem:[%s1667_s3] sm:$0xff] (!%p198_p2)  ;;  %1312 = vset.pattern.permute.xlu1 (!%p198_p2), %v1375_v33  ;;  %v786_v35 = vld [vmem:[%s1667_s3 + $0x18] sm:$0xff] (!%p198_p2)  ;;  %vm380_vm1 = vcmask (!%p198_p2), 7168   ;;  %vm274_vm2 = vcmask (!%p198_p2), 89088  }
   0x8   : > { %s1371_s6 = smov (!%p198_p2), 127   ;;  %s1372_s7 = smov (!%p198_p2), 9   ;;  %1311 = vset.pattern.permute.xlu0 (!%p198_p2), %v1375_v33  ;;  %vm310_vm3 = vcmask (!%p198_p2), 80896   ;;  %vm345_vm4 = vcmask (!%p198_p2), 72704   ;;  %vm857_vm5 = vcmask (!%p198_p2), 523264   ;;  %vm1054_vm10 = vcmask (!%p198_p2), 633856  }
   0x9   : > { %s1373_s8 = smov (!%p198_p2), 119   ;;  %s1374_s9 = smov (!%p198_p2), 118   ;;  %vm1059_vm11 = vcmask (!%p198_p2), 724592  }
   0xd   : > { %s1671_s19 = smov (!%p230_p3, %s1131_s19), 1 }
   0xe   : > { %s1414_s20 = sshll.u32 %s1671_s19, 5 }
   0xf   : > { %s1420_s23 = scalar_lea.vmem %s1665_s1, %s1414_s20  ;;  %s1426_s26 = scalar_lea.vmem %s1664_s0, %s1414_s20 }
  0x10   : > { %v1429_v0 = vld [vmem:[%s1420_s23] ss:$8 sps:$4 sm:$0xff]   ;;  %v1432_v1 = vld [vmem:[%s1420_s23 + $0x4] ss:$8 sps:$4 sm:$0xff]   ;;  %v1442_v4 = vld [vmem:[%s1426_s26 + $0x14] ss:$8 sps:$4 sm:$0xff]   ;;  %s1632_s17 = scalar_lea.vmem %s1669_s5, %s1414_s20 }
  0x11   : > { %615 = vrot.lane.b32.xlu1 %v1429_v0, %s1367_s27  ;;  %v1316_v2 = vld [vmem:[%s1426_s26] ss:$8 sps:$4 sm:$0xff]   ;;  %v1318_v3 = vld [vmem:[%s1426_s26 + $0x4] ss:$8 sps:$4 sm:$0xff]   ;;  %v1321_v5 = vld [vmem:[%s1426_s26 + $0x10] ss:$8 sps:$4 sm:$0xff]  }
  0x12   : > { %266 = vrot.lane.b32.xlu0 %v1316_v2, %s1368_s28  ;;  %v1449_v6 = vld [vmem:[%s1420_s23 + $0x10] ss:$8 sps:$4 sm:$0xff]   ;;  %v1324_v7 = vld [vmem:[%s1426_s26 + $0x4] ss:$8 sps:$4 sm:$0xff]   ;;  %v1457_v8 = vld [vmem:[%s1420_s23 + $0x14] ss:$8 sps:$4 sm:$0xff]  }
  0x13   : > { %v1326_v9 = vld [vmem:[%s1426_s26 + $0x4] ss:$8 sps:$4 sm:$0xff]   ;;  %v1342_v11 = vld [vmem:[%s1426_s26 + $0x14] ss:$8 sps:$4 sm:$0xff]   ;;  %1034 = vst [vmem:[%s1632_s17] sm:$0xf] %v1375_v33 }
  0x14   : > { %v1341_v10 = vld [vmem:[%s1426_s26 + $0x4] ss:$8 sps:$4 sm:$0xff]   ;;  %v1327_v12 = vld [vmem:[%s1426_s26 + $0x14] ss:$8 sps:$4 sm:$0xff]   ;;  %404 = vst.msk [vmem:[#allocation2 + $0x48] sm:$0xff] %vm279_vm0, %v1342_v11 }
  0x15   : > { %617 = vrot.lane.b32.xlu1 %v1432_v1, %s1367_s27  ;;  %403 = vst.msk [vmem:[#allocation2 + $0x40] sm:$0xff] %vm279_vm0, %v1341_v10  ;;  %v1343_v13 = vld [vmem:[%s1420_s23 + $0x4] ss:$8 sps:$4 sm:$0xff]   ;;  %v1328_v14 = vld [vmem:[%s1426_s26 + $0x14] ss:$8 sps:$4 sm:$0xff]  }
  0x16   : > { %268 = vrot.lane.b32.xlu0 %v1318_v3, %s1368_s28  ;;  %645 = vst.msk [vmem:[#allocation2 + $0xd0] sm:$0xff] %vm279_vm0, %v1343_v13  ;;  %v1344_v16 = vld [vmem:[%s1420_s23 + $0x14] ss:$8 sps:$4 sm:$0xff]   ;;  %v1329_v17 = vld [vmem:[%s1426_s26 + $0x4] ss:$8 sps:$4 sm:$0xff]  }
  0x17   : > { %646 = vst.msk [vmem:[#allocation2 + $0xd8] sm:$0xff] %vm279_vm0, %v1344_v16  ;;  %v1330_v18 = vld [vmem:[%s1426_s26 + $0x14] ss:$8 sps:$4 sm:$0xff]   ;;  %v1331_v19 = vld [vmem:[%s1420_s23 + $0x4] ss:$8 sps:$4 sm:$0xff]  }
  0x18   : > { %v1332_v20 = vld [vmem:[%s1426_s26 + $0x4] ss:$8 sps:$4 sm:$0xff]   ;;  %v1333_v21 = vld [vmem:[%s1420_s23 + $0x14] ss:$8 sps:$4 sm:$0xff]   ;;  %1035 = vst [vmem:[%s1632_s17 + $0x8] sm:$0xf] %v1375_v33 }
  0x19   : > { %272 = vrot.lane.b32.xlu1 %v1442_v4, %s1368_s28  ;;  %v1334_v22 = vld [vmem:[%s1426_s26 + $0x14] ss:$8 sps:$4 sm:$0xff]   ;;  %v1335_v23 = vld [vmem:[%s1420_s23 + $0x4] ss:$8 sps:$4 sm:$0xff]   ;;  %1036 = vst [vmem:[%s1632_s17 + $0x10] sm:$0xf] %v1375_v33 }
  0x1a   : > { %270 = vrot.lane.b32.xlu0 %v1321_v5, %s1368_s28  ;;  %v1336_v25 = vld [vmem:[%s1420_s23 + $0x14] ss:$8 sps:$4 sm:$0xff]   ;;  %v1337_v28 = vld [vmem:[%s1420_s23 + $0x4] ss:$8 sps:$4 sm:$0xff]   ;;  %1037 = vst [vmem:[%s1632_s17 + $0x18] sm:$0xf] %v1375_v33 }
  0x1b   : > { %v1338_v27 = vld [vmem:[%s1420_s23 + $0x14] ss:$8 sps:$4 sm:$0xff]   ;;  %v1339_v30 = vld [vmem:[%s1420_s23 + $0x4] ss:$8 sps:$4 sm:$0xff]  }
  0x1c   : > { %v755_v15 = vld [vmem:[#allocation2 + $0x40] sm:$0xff]  ;;  %v1340_v29 = vld [vmem:[%s1420_s23 + $0x14] ss:$8 sps:$4 sm:$0xff]   ;;  %v756_v48 = vld [vmem:[#allocation2 + $0x48] sm:$0xff] }
  0x1d   : > { %619 = vrot.lane.b32.xlu1 %v1449_v6, %s1367_s27  ;;  %1220 = vmatprep.subr.bf16.mxu0 %v755_v15 }
  0x1e   : > { %485 = vrot.lane.b32.xlu0 %v1324_v7, %s1369_s29 }
  0x21   : > { %302 = vrot.lane.b32.xlu1 %v1316_v2, %s1370_s30 }
  0x22   : > { %621 = vrot.lane.b32.xlu0 %v1457_v8, %s1367_s27 }
  0x25   : > { %419 = vrot.lane.b32.xlu1 %v1326_v9, %s1371_s6 }
  0x26   : > { %304 = vrot.lane.b32.xlu0 %v1318_v3, %s1370_s30 }
  0x29   : > { %306 = vrot.lane.b32.xlu1 %v1321_v5, %s1370_s30 }
  0x2a   : > { %487 = vrot.lane.b32.xlu0 %v1327_v12, %s1369_s29 }
  0x2d   : > { %421 = vrot.lane.b32.xlu1 %v1328_v14, %s1371_s6  ;;  %v774_v14 = vld [vmem:[#allocation2 + $0xd8] sm:$0xff] }
  0x2e   : > { %308 = vrot.lane.b32.xlu0 %v1442_v4, %s1370_s30 }
  0x31   : > { %515 = vrot.lane.b32.xlu1 %v1432_v1, %s1368_s28 }
  0x32   : > { %513 = vrot.lane.b32.xlu0 %v1429_v0, %s1368_s28 }
  0x35   : > { %339 = vrot.lane.b32.xlu1 %v1318_v3, %s1372_s7 }
  0x36   : > { %337 = vrot.lane.b32.xlu0 %v1316_v2, %s1372_s7 }
  0x39   : > { %517 = vrot.lane.b32.xlu1 %v1449_v6, %s1368_s28 }
  0x3a   : > { %441 = vrot.lane.b32.xlu0 %v1329_v17, %s1373_s8 }
  0x3d   : > { %341 = vrot.lane.b32.xlu1 %v1321_v5, %s1372_s7 }
  0x3e   : > { %519 = vrot.lane.b32.xlu0 %v1457_v8, %s1368_s28 }
  0x41   : > { %443 = vrot.lane.b32.xlu1 %v1330_v18, %s1373_s8 }
  0x42   : > { %343 = vrot.lane.b32.xlu0 %v1442_v4, %s1372_s7 }
  0x45   : > { %549 = vrot.lane.b32.xlu1 %v1432_v1, %s1370_s30 }
  0x46   : > { %547 = vrot.lane.b32.xlu0 %v1429_v0, %s1370_s30 }
  0x49   : > { %372 = vrot.lane.b32.xlu1 %v1316_v2, %s1367_s27 }
  0x4a   : > { %661 = vrot.lane.b32.xlu0 %v1331_v19, %s1371_s6 }
  0x4d   : > { %463 = vrot.lane.b32.xlu1 %v1332_v20, %s1374_s9 }
  0x4e   : > { %374 = vrot.lane.b32.xlu0 %v1318_v3, %s1367_s27  ;;  %v773_v3 = vld [vmem:[#allocation2 + $0xd0] sm:$0xff] }
  0x51   : > { %553 = vrot.lane.b32.xlu1 %v1457_v8, %s1370_s30 }
  0x52   : > { %551 = vrot.lane.b32.xlu0 %v1449_v6, %s1370_s30 }
  0x55   : > { %376 = vrot.lane.b32.xlu1 %v1321_v5, %s1367_s27 }
  0x56   : > { %663 = vrot.lane.b32.xlu0 %v1333_v21, %s1371_s6 }
  0x59   : > { %465 = vrot.lane.b32.xlu1 %v1334_v22, %s1374_s9 }
  0x5a   : > { %378 = vrot.lane.b32.xlu0 %v1442_v4, %s1367_s27 }
  0x5d   : > { %583 = vrot.lane.b32.xlu1 %v1432_v1, %s1372_s7 }
  0x5e   : > { %581 = vrot.lane.b32.xlu0 %v1429_v0, %s1372_s7 }
  0x61   : > { %585 = vrot.lane.b32.xlu1 %v1449_v6, %s1372_s7 }
  0x62   : > { %683 = vrot.lane.b32.xlu0 %v1335_v23, %s1373_s8 }
  0x65   : > { %685 = vrot.lane.b32.xlu1 %v1336_v25, %s1373_s8 }
  0x66   : > { %587 = vrot.lane.b32.xlu0 %v1457_v8, %s1372_s7 }
  0x69   : > { %707 = vrot.lane.b32.xlu1 %v1338_v27, %s1374_s9 }
  0x6a   : > { %705 = vrot.lane.b32.xlu0 %v1337_v28, %s1374_s9 }
  0x6d   : > { %729 = vrot.lane.b32.xlu1 %v1340_v29, %s1369_s29 }
  0x6e   : > { %727 = vrot.lane.b32.xlu0 %v1339_v30, %s1369_s29 }
  0x71   : > { %794 = vperm.xlu1 %1312, %v784_v31  }
  0x72   : > { %789 = vperm.xlu0 %1311, %v783_v32  }
  0x75   : > { %799 = vperm.xlu1 %1312, %v785_v34  }
  0x76   : > { %804 = vperm.xlu0 %1311, %v786_v35  }
  0x83   : > { %v616_v36 = vpop.permute.xlu1 %615 }
  0x84   : > { %v267_v37 = vpop.permute.xlu0 %266 }
  0x87   : > { %v618_v38 = vpop.permute.xlu1 %617 }
  0x88   : > { %v623_v39 = vsel %vm380_vm1, %v616_v36, %v618_v38  ;;  %v269_v40 = vpop.permute.xlu0 %268 }
  0x89   : > { %627 = vst.msk [vmem:[#allocation2 + $0xc0] sm:$0xff] %vm279_vm0, %v623_v39  ;;  %v275_v41 = vsel %vm274_vm2, %v267_v37, %v269_v40 }
  0x8a   : > { %280 = vst.msk [vmem:[#allocation2] sm:$0xff] %vm279_vm0, %v275_v41 }
  0x8b   : > { %v273_v42 = vpop.permute.xlu1 %272 }
  0x8c   : > { %v271_v43 = vpop.permute.xlu0 %270 }
  0x8d   : > { %v276_v44 = vsel %vm274_vm2, %v271_v43, %v273_v42 }
  0x8e   : > { %281 = vst.msk [vmem:[#allocation2 + $0x8] sm:$0xff] %vm279_vm0, %v276_v44 }
  0x8f   : > { %v620_v45 = vpop.permute.xlu1 %619 }
  0x90   : > { %v771_v46 = vld [vmem:[#allocation2 + $0xc0] sm:$0xff]  ;;  %v486_v47 = vpop.permute.xlu0 %485 }
  0x91   : > { %1248 = vmatprep.subr.bf16.mxu1 %v771_v46  ;;  %491 = vst.msk [vmem:[#allocation2 + $0x80] sm:$0xff] %vm279_vm0, %v486_v47  ;;  %v747_v49 = vld [vmem:[#allocation2] sm:$0xff] }
  0x92   : > { %1221 = vmatpush3.bf16.msra.mxu0 %v747_v49 }
  0x93   : > { %v303_v50 = vpop.permute.xlu1 %302  ;;  %1222 = vmatprep.subr.bf16.mxu0 %v756_v48 }
  0x94   : > { %v622_v51 = vpop.permute.xlu0 %621 }
  0x95   : > { %v624_v52 = vsel %vm380_vm1, %v620_v45, %v622_v51  ;;  %v748_v53 = vld [vmem:[#allocation2 + $0x8] sm:$0xff] }
  0x96   : > { %628 = vst.msk [vmem:[#allocation2 + $0xc8] sm:$0xff] %vm279_vm0, %v624_v52  ;;  %1223 = vmatpush3.bf16.msra.mxu0 %v748_v53 }
  0x97   : > { %v420_v54 = vpop.permute.xlu1 %419 }
  0x98   : > { %425 = vst.msk [vmem:[#allocation2 + $0x50] sm:$0xff] %vm279_vm0, %v420_v54  ;;  %v305_v55 = vpop.permute.xlu0 %304  ;;  %v763_v56 = vld [vmem:[#allocation2 + $0x80] sm:$0xff] }
  0x99   : > { %v311_v57 = vsel %vm310_vm3, %v303_v50, %v305_v55  ;;  %1249 = vmatpush3.bf16.msra.mxu1 %v763_v56 }
  0x9a   : > { %315 = vst.msk [vmem:[#allocation2 + $0x10] sm:$0xff] %vm279_vm0, %v311_v57  ;;  %v1345_v57 = vld [vmem:[%s1666_s2] ss:$20 sps:$4 sm:$0xff]  }
  0x9b   : > { %v307_v58 = vpop.permute.xlu1 %306 }
  0x9c   : > { %v488_v59 = vpop.permute.xlu0 %487 }
  0x9d   : > { %492 = vst.msk [vmem:[#allocation2 + $0x88] sm:$0xff] %vm279_vm0, %v488_v59  ;;  %v772_v60 = vld [vmem:[#allocation2 + $0xc8] sm:$0xff] }
  0x9e   : > { %1250 = vmatprep.subr.bf16.mxu1 %v772_v60  ;;  %v1351_v59 = vld [vmem:[%s1666_s2 + $0x2c] ss:$20 sps:$4 sm:$0xff]  }
  0x9f   : > { %v422_v61 = vpop.permute.xlu1 %421  ;;  %v757_v62 = vld [vmem:[#allocation2 + $0x50] sm:$0xff] }
  0xa0   : > { %426 = vst.msk [vmem:[#allocation2 + $0x58] sm:$0xff] %vm279_vm0, %v422_v61  ;;  %1224 = vmatprep.subr.bf16.mxu0 %v757_v62  ;;  %v309_v63 = vpop.permute.xlu0 %308 }
  0xa1   : > { %v312_v0 = vsel %vm310_vm3, %v307_v58, %v309_v63  ;;  %v749_v1 = vld [vmem:[#allocation2 + $0x10] sm:$0xff] }
  0xa2   : > { %316 = vst.msk [vmem:[#allocation2 + $0x18] sm:$0xff] %vm279_vm0, %v312_v0  ;;  %1225 = vmatpush3.bf16.msra.mxu0 %v749_v1 }
  0xa3   : > { %v516_v2 = vpop.permute.xlu1 %515 }
  0xa4   : > { %v514_v4 = vpop.permute.xlu0 %513  ;;  %v764_v5 = vld [vmem:[#allocation2 + $0x88] sm:$0xff] }
  0xa5   : > { %v521_v6 = vsel %vm274_vm2, %v514_v4, %v516_v2  ;;  %1251 = vmatpush3.bf16.msra.mxu1 %v764_v5  ;;  %v1353_v2 = vld [vmem:[%s1666_s2 + $0x28] ss:$20 sps:$4 sm:$0xff]   ;;  %v1357_v5 = vld [vmem:[%s1666_s2 + $0x10] ss:$20 sps:$4 sm:$0xff]  }
  0xa6   : > { %525 = vst.msk [vmem:[#allocation2 + $0x90] sm:$0xff] %vm279_vm0, %v521_v6  ;;  %1252 = vmatprep.subr.bf16.mxu1 %v773_v3 }
  0xa7   : > { %v340_v7 = vpop.permute.xlu1 %339  ;;  %v758_v8 = vld [vmem:[#allocation2 + $0x58] sm:$0xff] }
  0xa8   : > { %1226 = vmatprep.subr.bf16.mxu0 %v758_v8  ;;  %v338_v9 = vpop.permute.xlu0 %337  ;;  %v1348_v8 = vld [vmem:[%s1666_s2 + $0x8] ss:$20 sps:$4 sm:$0xff]  }
  0xa9   : > { %v346_v10 = vsel %vm345_vm4, %v338_v9, %v340_v7  ;;  %v750_v11 = vld [vmem:[#allocation2 + $0x18] sm:$0xff]  ;;  %v1354_v9 = vld [vmem:[%s1666_s2 + $0x34] ss:$20 sps:$4 sm:$0xff]  }
  0xaa   : > { %350 = vst.msk [vmem:[#allocation2 + $0x20] sm:$0xff] %vm279_vm0, %v346_v10  ;;  %1227 = vmatpush3.bf16.msra.mxu0 %v750_v11 }
  0xab   : > { %v518_v12 = vpop.permute.xlu1 %517 }
  0xac   : > { %v442_v13 = vpop.permute.xlu0 %441 }
  0xad   : > { %447 = vst.msk [vmem:[#allocation2 + $0x60] sm:$0xff] %vm279_vm0, %v442_v13  ;;  %v765_v15 = vld [vmem:[#allocation2 + $0x90] sm:$0xff] }
  0xae   : > { %1253 = vmatpush3.bf16.msra.mxu1 %v765_v15  ;;  %v1356_v13 = vld [vmem:[%s1666_s2 + $0x30] ss:$20 sps:$4 sm:$0xff]   ;;  %v1358_v15 = vld [vmem:[%s1666_s2 + $0x38] ss:$20 sps:$4 sm:$0xff]  }
  0xaf   : > { %v342_v16 = vpop.permute.xlu1 %341  ;;  %1254 = vmatprep.subr.bf16.mxu1 %v774_v14 }
  0xb0   : > { %v520_v17 = vpop.permute.xlu0 %519 }
  0xb1   : > { %v522_v18 = vsel %vm274_vm2, %v518_v12, %v520_v17  ;;  %v751_v23 = vld [vmem:[#allocation2 + $0x20] sm:$0xff] }
  0xb2   : > { %526 = vst.msk [vmem:[#allocation2 + $0x98] sm:$0xff] %vm279_vm0, %v522_v18 }
  0xb3   : > { %v444_v19 = vpop.permute.xlu1 %443 }
  0xb4   : > { %448 = vst.msk [vmem:[#allocation2 + $0x68] sm:$0xff] %vm279_vm0, %v444_v19  ;;  %v344_v20 = vpop.permute.xlu0 %343  ;;  %v759_v21 = vld [vmem:[#allocation2 + $0x60] sm:$0xff] }
  0xb5   : > { %v347_v22 = vsel %vm345_vm4, %v342_v16, %v344_v20  ;;  %1228 = vmatprep.subr.bf16.mxu0 %v759_v21 }
  0xb6   : > { %351 = vst.msk [vmem:[#allocation2 + $0x28] sm:$0xff] %vm279_vm0, %v347_v22  ;;  %1229 = vmatpush3.bf16.msra.mxu0 %v751_v23 }
  0xb7   : > { %v550_v24 = vpop.permute.xlu1 %549 }
  0xb8   : > { %v548_v25 = vpop.permute.xlu0 %547 }
  0xb9   : > { %v555_v26 = vsel %vm310_vm3, %v548_v25, %v550_v24  ;;  %v766_v27 = vld [vmem:[#allocation2 + $0x98] sm:$0xff] }
  0xba   : > { %559 = vst.msk [vmem:[#allocation2 + $0xa0] sm:$0xff] %vm279_vm0, %v555_v26  ;;  %1255 = vmatpush3.bf16.msra.mxu1 %v766_v27 }
  0xbb   : > { %v373_v28 = vpop.permute.xlu1 %372  ;;  %v760_v29 = vld [vmem:[#allocation2 + $0x68] sm:$0xff] }
  0xbc   : > { %1230 = vmatprep.subr.bf16.mxu0 %v760_v29  ;;  %v662_v30 = vpop.permute.xlu0 %661 }
  0xbd   : > { %667 = vst.msk [vmem:[#allocation2 + $0xe0] sm:$0xff] %vm279_vm0, %v662_v30  ;;  %v752_v31 = vld [vmem:[#allocation2 + $0x28] sm:$0xff] }
  0xbe   : > { %1231 = vmatpush3.bf16.msra.mxu0 %v752_v31 }
  0xbf   : > { %v464_v32 = vpop.permute.xlu1 %463 }
  0xc0   : > { %469 = vst.msk [vmem:[#allocation2 + $0x70] sm:$0xff] %vm279_vm0, %v464_v32  ;;  %v375_v34 = vpop.permute.xlu0 %374 }
  0xc1   : > { %v381_v35 = vsel %vm380_vm1, %v373_v28, %v375_v34  ;;  %v767_v40 = vld [vmem:[#allocation2 + $0xa0] sm:$0xff] }
  0xc2   : > { %385 = vst.msk [vmem:[#allocation2 + $0x30] sm:$0xff] %vm279_vm0, %v381_v35 }
  0xc3   : > { %v554_v36 = vpop.permute.xlu1 %553 }
  0xc4   : > { %v552_v37 = vpop.permute.xlu0 %551  ;;  %v775_v38 = vld [vmem:[#allocation2 + $0xe0] sm:$0xff] }
  0xc5   : > { %v556_v39 = vsel %vm310_vm3, %v552_v37, %v554_v36  ;;  %1256 = vmatprep.subr.bf16.mxu1 %v775_v38 }
  0xc6   : > { %560 = vst.msk [vmem:[#allocation2 + $0xa8] sm:$0xff] %vm279_vm0, %v556_v39  ;;  %1257 = vmatpush3.bf16.msra.mxu1 %v767_v40 }
  0xc7   : > { %v377_v41 = vpop.permute.xlu1 %376  ;;  %v761_v42 = vld [vmem:[#allocation2 + $0x70] sm:$0xff] }
  0xc8   : > { %1232 = vmatprep.subr.bf16.mxu0 %v761_v42  ;;  %v664_v43 = vpop.permute.xlu0 %663 }
  0xc9   : > { %668 = vst.msk [vmem:[#allocation2 + $0xe8] sm:$0xff] %vm279_vm0, %v664_v43  ;;  %v753_v44 = vld [vmem:[#allocation2 + $0x30] sm:$0xff] }
  0xca   : > { %1233 = vmatpush3.bf16.msra.mxu0 %v753_v44 }
  0xcb   : > { %v466_v45 = vpop.permute.xlu1 %465 }
  0xcc   : > { %470 = vst.msk [vmem:[#allocation2 + $0x78] sm:$0xff] %vm279_vm0, %v466_v45  ;;  %v379_v46 = vpop.permute.xlu0 %378 }
  0xcd   : > { %v382_v47 = vsel %vm380_vm1, %v377_v41, %v379_v46  ;;  %v768_v52 = vld [vmem:[#allocation2 + $0xa8] sm:$0xff] }
  0xce   : > { %386 = vst.msk [vmem:[#allocation2 + $0x38] sm:$0xff] %vm279_vm0, %v382_v47 }
  0xcf   : > { %v584_v48 = vpop.permute.xlu1 %583 }
  0xd0   : > { %v582_v49 = vpop.permute.xlu0 %581  ;;  %v776_v50 = vld [vmem:[#allocation2 + $0xe8] sm:$0xff] }
  0xd1   : > { %v589_v51 = vsel %vm345_vm4, %v582_v49, %v584_v48  ;;  %1258 = vmatprep.subr.bf16.mxu1 %v776_v50 }
  0xd2   : > { %593 = vst.msk [vmem:[#allocation2 + $0xb0] sm:$0xff] %vm279_vm0, %v589_v51  ;;  %1259 = vmatpush3.bf16.msra.mxu1 %v768_v52 }
  0xd3   : > { %v586_v53 = vpop.permute.xlu1 %585  ;;  %v762_v54 = vld [vmem:[#allocation2 + $0x78] sm:$0xff] }
  0xd4   : > { %1234 = vmatprep.subr.bf16.mxu0 %v762_v54  ;;  %v684_v55 = vpop.permute.xlu0 %683 }
  0xd5   : > { %689 = vst.msk [vmem:[#allocation2 + $0xf0] sm:$0xff] %vm279_vm0, %v684_v55  ;;  %v754_v56 = vld [vmem:[#allocation2 + $0x38] sm:$0xff] }
  0xd6   : > { %1235 = vmatpush3.bf16.msra.mxu0 %v754_v56 }
  0xd7   : > { %v686_v58 = vpop.permute.xlu1 %685 }
  0xd8   : > { %690 = vst.msk [vmem:[#allocation2 + $0xf8] sm:$0xff] %vm279_vm0, %v686_v58  ;;  %v588_v60 = vpop.permute.xlu0 %587 }
  0xd9   : > { %v590_v61 = vsel %vm345_vm4, %v586_v53, %v588_v60  ;;  %897 = vmatmul.mubr.bf16.vlgmr.msra.gmra.mrb[0].mxu0 %v1345_v57  ;;  %v769_v1 = vld [vmem:[#allocation2 + $0xb0] sm:$0xff] }
  0xda   : > { %594 = vst.msk [vmem:[#allocation2 + $0xb8] sm:$0xff] %vm279_vm0, %v590_v61  ;;  %904 = vmatprep.mubr.bf16.mxu0 %v1351_v59  ;;  %v1206_v59 = vld [vmem:[%s1668_s4] ss:$0 sm:$0xff] }
  0xdb   : > { %v708_v62 = vpop.permute.xlu1 %707 }
  0xdc   : > { %712 = vst.msk [vmem:[#allocation2 + $0x108] sm:$0xff] %vm279_vm0, %v708_v62  ;;  %v706_v63 = vpop.permute.xlu0 %705  ;;  %v777_v0 = vld [vmem:[#allocation2 + $0xf0] sm:$0xff] }
  0xdd   : > { %711 = vst.msk [vmem:[#allocation2 + $0x100] sm:$0xff] %vm279_vm0, %v706_v63  ;;  %1260 = vmatprep.subr.bf16.mxu1 %v777_v0 }
  0xde   : > { %1261 = vmatpush3.bf16.msra.mxu1 %v769_v1 }
  0xdf   : > { %v778_v3 = vld [vmem:[#allocation2 + $0xf8] sm:$0xff]  ;;  %v730_v4 = vpop.permute.xlu1 %729 }
  0xe0   : > { %1262 = vmatprep.subr.bf16.mxu1 %v778_v3  ;;  %734 = vst.msk [vmem:[#allocation2 + $0x118] sm:$0xff] %vm279_vm0, %v730_v4  ;;  %v728_v6 = vpop.permute.xlu0 %727 }
  0xe1   : > { %v770_v7 = vld [vmem:[#allocation2 + $0xb8] sm:$0xff]  ;;  %733 = vst.msk [vmem:[#allocation2 + $0x110] sm:$0xff] %vm279_vm0, %v728_v6  ;;  %905 = vmatmul.mubr.bf16.gmra.mrb[4].mxu0 %v1353_v2 }
  0xe2   : > { %1263 = vmatpush3.bf16.msra.mxu1 %v770_v7  ;;  %1290 = vmatprep.mubr.msk.bf16.mxu0 %vm857_vm5, %v1357_v5 }
  0xe3   : > { %v780_v11 = vld [vmem:[#allocation2 + $0x108] sm:$0xff] }
  0xe4   : > { %v779_v10 = vld [vmem:[#allocation2 + $0x100] sm:$0xff] }
  0xe5   : > { %946 = vmatmul.mubr.bf16.vlgmr.msra.gmra.mrb[0].mxu1 %v1348_v8  ;;  %1282 = vmatprep.subr.bf16.mxu0 %v779_v10 }
  0xe6   : > { %1283 = vmatpush3.bf16.msra.mxu0 %v779_v10  ;;  %953 = vmatprep.mubr.bf16.mxu1 %v1354_v9 }
  0xe7   : > { %1284 = vmatprep.subr.bf16.mxu0 %v780_v11  ;;  %v782_v14 = vld [vmem:[#allocation2 + $0x118] sm:$0xff] }
  0xe8   : > { %v781_v12 = vld [vmem:[#allocation2 + $0x110] sm:$0xff] }
  0xea   : > { %1285 = vmatpush3.bf16.msra.mxu0 %v780_v11 }
  0xeb   : > { %1286 = vmatprep.subr.bf16.mxu0 %v781_v12 }
  0xed   : > { %954 = vmatmul.mubr.bf16.gmra.mrb[4].mxu1 %v1356_v13 }
  0xee   : > { %1287 = vmatpush3.bf16.msra.mxu0 %v781_v12 }
  0xef   : > { %1288 = vmatprep.subr.bf16.mxu0 %v782_v14 }
  0xf0   : > { %v795_v27 = vpop.permute.xlu1 %794 }
  0xf1   : > { %v790_v23 = vpop.permute.xlu0 %789 }
  0xf2   : > { %1289 = vmatpush3.bf16.msra.mxu0 %v782_v14 }
  0xf4   : > { %v800_v40 = vpop.permute.xlu1 %799 }
  0xf5   : > { %1291 = vmatmul.mubr.msk.bf16.vlgmr.msra.gmra.mrb[8].mxu0 %vm857_vm5, %v1358_v15  ;;  %v805_v42 = vpop.permute.xlu0 %804 }
 0x1ac   : > { %v1236_v16 = vpop.f32.mrb[0].mxu0 }
 0x1ad   : > { %v1237_v17 = vpop.f32.mrb[1].mxu0 }
 0x1ae   : > { %v1238_v18 = vadd.f32 %v1237_v17, %v1236_v16  ;;  %v1239_v19 = vpop.f32.mrb[2].mxu0 }
 0x1af   : > { %v1240_v20 = vpop.f32.mrb[3].mxu0 }
 0x1b0   : > { %v1241_v21 = vadd.f32 %v1240_v20, %v1239_v19  ;;  %v899_v30 = vadd.f32 %v1238_v18, %v790_v23 }
 0x1b2   : > { %v902_v36 = vadd.f32 %v1241_v21, %v795_v27 }
 0x1b4   : > { %v1242_v22 = vpop.f32.mrb[4].mxu0 }
 0x1b5   : > { %v1243_v24 = vpop.f32.mrb[5].mxu0 }
 0x1b6   : > { %v1244_v25 = vadd.f32 %v1243_v24, %v1242_v22  ;;  %v1245_v26 = vpop.f32.mrb[6].mxu0 }
 0x1b7   : > { %v1246_v28 = vpop.f32.mrb[7].mxu0 }
 0x1b8   : > { %v1264_v29 = vpop.f32.mrb[0].mxu1  ;;  %v1247_v31 = vadd.f32 %v1246_v28, %v1245_v26  ;;  %v907_v44 = vadd.f32 %v1244_v25, %v800_v40 }
 0x1b9   : > { %v1265_v32 = vpop.f32.mrb[1].mxu1 }
 0x1ba   : > { %v1266_v34 = vadd.f32 %v1265_v32, %v1264_v29  ;;  %v1267_v35 = vpop.f32.mrb[2].mxu1  ;;  %v910_v48 = vadd.f32 %v1247_v31, %v805_v42 }
 0x1bb   : > { %v1268_v37 = vpop.f32.mrb[3].mxu1 }
 0x1bc   : > { %v1269_v38 = vadd.f32 %v1268_v37, %v1267_v35  ;;  %v948_v39 = vadd.f32 %v1266_v34, %v899_v30 }
 0x1be   : > { %v951_v41 = vadd.f32 %v1269_v38, %v902_v36 }
 0x1c0   : > { %v1270_v43 = vpop.f32.mrb[4].mxu1 }
 0x1c1   : > { %v1271_v45 = vpop.f32.mrb[5].mxu1 }
 0x1c2   : > { %v1272_v46 = vadd.f32 %v1271_v45, %v1270_v43  ;;  %v1273_v47 = vpop.f32.mrb[6].mxu1 }
 0x1c3   : > { %v1274_v49 = vpop.f32.mrb[7].mxu1 }
 0x1c4   : > { %v1275_v50 = vadd.f32 %v1274_v49, %v1273_v47  ;;  %v956_v51 = vadd.f32 %v1272_v46, %v907_v44 }
 0x1c6   : > { %v959_v52 = vadd.f32 %v1275_v50, %v910_v48 }
 0x1c8   : > { %v1292_v53 = vpop.f32.mrb[8].mxu0 }
 0x1c9   : > { %v1005_v54 = vadd.f32 %v1292_v53, %v956_v51  ;;  %v996_v55 = vpop.f32.mrb[9].mxu0 }
 0x1ca   : > { %v997_v56 = vadd.f32 %v996_v55, %v948_v39  ;;  %v1293_v57 = vpop.f32.mrb[10].mxu0 }
 0x1cb   : > { %vm1013_vm6 = vcmp.ge.f32.partialorder %v1005_v54, 0.0  ;;  %v1017_v58 = vmul.f32 0.2, %v1005_v54  ;;  %v1008_v60 = vadd.f32 %v1293_v57, %v959_v52  ;;  %v999_v61 = vpop.f32.mrb[11].mxu0 }
 0x1cc   : > { %vm1011_vm7 = vcmp.ge.f32.partialorder %v997_v56, 0.0  ;;  %v1015_v62 = vmul.f32 0.2, %v997_v56  ;;  %v1000_v63 = vadd.f32 %v999_v61, %v951_v41 }
 0x1cd   : > { %v1021_v0 = vsel %vm1013_vm6, %v1005_v54, %v1017_v58  ;;  %vm1014_vm8 = vcmp.ge.f32.partialorder %v1008_v60, 0.0  ;;  %v1018_v1 = vmul.f32 0.2, %v1008_v60 }
 0x1ce   : > { %v1032_v2 = vmul.f32 %v1206_v59, %v1021_v0  ;;  %v1019_v3 = vsel %vm1011_vm7, %v997_v56, %v1015_v62  ;;  %vm1012_vm9 = vcmp.ge.f32.partialorder %v1000_v63, 0.0  ;;  %v1016_v4 = vmul.f32 0.2, %v1000_v63 }
 0x1cf   : > { %v1030_v5 = vmul.f32 %v1206_v59, %v1019_v3  ;;  %v1022_v6 = vsel %vm1014_vm8, %v1008_v60, %v1018_v1 }
 0x1d0   : > { %v1218_v7 = vpack.c.bf16 %v1032_v2, %v1032_v2  ;;  %v1033_v8 = vmul.f32 %v1206_v59, %v1022_v6  ;;  %v1020_v9 = vsel %vm1012_vm9, %v1000_v63, %v1016_v4 }
 0x1d1   : > { %v1216_v10 = vpack.c.bf16 %v1030_v5, %v1030_v5  ;;  %v1031_v11 = vmul.f32 %v1206_v59, %v1020_v9 }
 0x1d2   : > { %1057 = vst.msk [vmem:[%s1632_s17 + $0x14] sm:$0xf] %vm1054_vm10, %v1218_v7  ;;  %v1219_v12 = vpack.c.bf16 %v1033_v8, %v1033_v8 }
 0x1d3   : > { %1062 = vst.msk [vmem:[%s1632_s17 + $0x14] sm:$0xf] %vm1059_vm11, %v1375_v33  ;;  %v1217_v13 = vpack.c.bf16 %v1031_v11, %v1031_v11 }
 0x1d4   : > { %1055 = vst.msk [vmem:[%s1632_s17 + $0x4] sm:$0xf] %vm1054_vm10, %v1216_v10  ;;  %1058 = vst.msk [vmem:[%s1632_s17 + $0x1c] sm:$0xf] %vm1054_vm10, %v1219_v12 }
 0x1d5   : > { %1060 = vst.msk [vmem:[%s1632_s17 + $0x4] sm:$0xf] %vm1059_vm11, %v1375_v33  ;;  %1063 = vst.msk [vmem:[%s1632_s17 + $0x1c] sm:$0xf] %vm1059_vm11, %v1375_v33 }
 0x1d6   : > { %1056 = vst.msk [vmem:[%s1632_s17 + $0xc] sm:$0xf] %vm1054_vm10, %v1217_v13 }
 0x1d7   : > { %1061 = vst.msk [vmem:[%s1632_s17 + $0xc] sm:$0xf] %vm1059_vm11, %v1375_v33 }
 0x1d8 PF: > { %s15_s18 = sadd.s32 1, %s1365_s18  }
 0x1d9   : > { %p12_p4 = scmp.ge.s32.totalorder %s15_s18, 4  }
 0x1db   :  { %14 = sbr.rel (!%p12_p4) target bundleno = 1 (0x1), region = 73 }

// kernel: registration_subnet_forward.20
= control target key start
LH: loop header
LB: loop body
LE: loop exit
PB: predicated region body
PF: predicated region fallthrough
CT: control target
= control target key end

     0   :  { %s1407_s15 = smov 0   ;;  %s1643_s0 = inlined_call_operand.vmem [shape: bf16[2,32,433], index: 0, kind: input, shape index: {}]   ;;  %s1644_s1 = inlined_call_operand.vmem [shape: bf16[16,288], index: 1, kind: input, shape index: {}]   ;;  %s1645_s2 = inlined_call_operand.vmem [shape: f32[16,1], index: 2, kind: input, shape index: {}]   ;;  %s1646_s3 = inlined_call_operand.vmem [shape: f32[1,286], index: 3, kind: input, shape index: {}]   ;;  %s1647_s4 = inlined_call_operand.vmem [shape: bf16[2,16,433], index: 4, kind: output, shape index: {}]  }
   0x1 LB: > { %s1181_s16 = sadd.s32 4294967295, %s1369_s15   ;;  %p1185_p0 = scmp.ge.s32.totalorder %s1369_s15, 1  ;;  %s1369_s15 = sphi %s1407_s15, %s14_s15  }
   0x2   : > { %p162_p1 = scmp.lt.s32.totalorder %s1369_s15, 3 }
   0x4   : > { %p163_p2 = pnand %p1185_p0, %p162_p1 }
   0x5   : > { %p188_p3 = scmp.lt.s32.totalorder (!%p163_p2), %s1181_s16, 1  ;;  %s1371_s21 = smov (!%p163_p2), 19   ;;  %vm270_vm0 = vcmask (!%p163_p2), 244736   ;;  %v1376_v14 = vmov (!%p163_p2), 0   ;;  %v1514_v23 = vld [vmem:[%s1644_s1 + $0x4] ss:$12 sps:$4 sm:$0xff] (!%p163_p2)  }
   0x6   : > { %166 = sbr.rel (%p163_p2) target bundleno = 478 (0x1de), region = 36  ;;  %s1372_s22 = smov (!%p163_p2), 18   ;;  %962 = vmatprep.mubr.bf16.mxu1 (!%p163_p2), %v1376_v14  ;;  %1329 = vset.pattern.permute.xlu0 (!%p163_p2), %v1376_v14  ;;  %v856_v24 = vld [vmem:[%s1645_s2] sm:$0xff] (!%p163_p2)  ;;  %v857_v25 = vld [vmem:[%s1645_s2 + $0x8] sm:$0xff] (!%p163_p2)  ;;  %vm255_vm1 = vcmask (!%p163_p2), 154624   ;;  %vm331_vm2 = vcmask (!%p163_p2), 146432  }
   0x7   : > { %s1373_s23 = smov (!%p163_p2), 17   ;;  %s1374_s24 = smov (!%p163_p2), 109   ;;  %1330 = vset.pattern.permute.xlu1 (!%p163_p2), %v1376_v14  ;;  %919 = vmatprep.mubr.bf16.mxu0 (!%p163_p2), %v1514_v23  ;;  %vm406_vm3 = vcmask (!%p163_p2), 138240   ;;  %vm781_vm4 = vcmask (!%p163_p2), 891904   ;;  %vm481_vm5 = vcmask (!%p163_p2), 7168   ;;  %vm883_vm6 = vcmask (!%p163_p2), 261120  }
   0x8   : > { %s1375_s25 = smov (!%p163_p2), 1   ;;  %s1377_s30 = smov (!%p163_p2), 127   ;;  %vm592_vm7 = vcmask (!%p163_p2), 1039360   ;;  %vm655_vm8 = vcmask (!%p163_p2), 908288   ;;  %vm718_vm9 = vcmask (!%p163_p2), 900096   ;;  %vm1381_vm10 = vmmov (!%p163_p2), 0  }
   0x9   : > { %s1378_s5 = smov (!%p163_p2), 111   ;;  %s1379_s6 = smov (!%p163_p2), 110  }
   0xd   : > { %s1649_s16 = smov (!%p188_p3, %s1181_s16), 1 }
   0xe   : > { %s1263_s17 = sshll.u32 %s1649_s16, 6  ;;  %s1264_s26 = sshll.u32 %s1649_s16, 5 }
   0xf   : > { %s1421_s20 = scalar_lea.vmem %s1643_s0, %s1263_s17  ;;  %s1478_s29 = scalar_lea.vmem %s1647_s4, %s1264_s26 }
  0x10   : > { %v1331_v0 = vld [vmem:[%s1421_s20 + $0x4] ss:$16 sps:$4 sm:$0xff]   ;;  %v1333_v1 = vld [vmem:[%s1421_s20] ss:$16 sps:$4 sm:$0xff]   ;;  %v1334_v2 = vld [vmem:[%s1421_s20 + $0x8] ss:$16 sps:$4 sm:$0xff]  }
  0x11   : > { %241 = vrot.lane.b32.xlu0 %v1331_v0, %s1371_s21  ;;  %239 = vrot.lane.b32.xlu1 %v1333_v1, %s1371_s21  ;;  %v1336_v3 = vld [vmem:[%s1421_s20 + $0x24] ss:$16 sps:$4 sm:$0xff]   ;;  %v1338_v4 = vld [vmem:[%s1421_s20 + $0x28] ss:$16 sps:$4 sm:$0xff]  }
  0x12   : > { %v1431_v5 = vld [vmem:[%s1421_s20 + $0x8] ss:$16 sps:$4 sm:$0xff]   ;;  %v1340_v6 = vld [vmem:[%s1421_s20 + $0x20] ss:$16 sps:$4 sm:$0xff]   ;;  %v1436_v7 = vld [vmem:[%s1421_s20 + $0x4] ss:$16 sps:$4 sm:$0xff]  }
  0x13   : > { %v1440_v8 = vld [vmem:[%s1421_s20 + $0x28] ss:$16 sps:$4 sm:$0xff]   ;;  %v1443_v9 = vld [vmem:[%s1421_s20 + $0x24] ss:$16 sps:$4 sm:$0xff]   ;;  %v1343_v10 = vld [vmem:[%s1421_s20 + $0xc] ss:$16 sps:$4 sm:$0xff]  }
  0x14   : > { %v1357_v11 = vld [vmem:[%s1421_s20 + $0xc] ss:$16 sps:$4 sm:$0xff]   ;;  %1096 = vst [vmem:[%s1478_s29] sm:$0xf] %v1376_v14  ;;  %1097 = vst [vmem:[%s1478_s29 + $0x10] sm:$0xf] %v1376_v14 }
  0x15   : > { %243 = vrot.lane.b32.xlu0 %v1334_v2, %s1371_s21  ;;  %249 = vrot.lane.b32.xlu1 %v1336_v3, %s1371_s21  ;;  %v1347_v12 = vld [vmem:[%s1421_s20 + $0x2c] ss:$16 sps:$4 sm:$0xff]   ;;  %542 = vst.msk [vmem:[#allocation2 + $0xd0] sm:$0xff] %vm270_vm0, %v1357_v11 }
  0x16   : > { %v1359_v13 = vld [vmem:[%s1421_s20 + $0x2c] ss:$16 sps:$4 sm:$0xff]  }
  0x17   : > { %545 = vst.msk [vmem:[#allocation2 + $0xe8] sm:$0xff] %vm270_vm0, %v1359_v13  ;;  %v1349_v15 = vld [vmem:[%s1421_s20 + $0xc] ss:$16 sps:$4 sm:$0xff]  }
  0x18   : > { %v1350_v16 = vld [vmem:[%s1421_s20 + $0x2c] ss:$16 sps:$4 sm:$0xff]  }
  0x19   : > { %251 = vrot.lane.b32.xlu0 %v1338_v4, %s1371_s21  ;;  %247 = vrot.lane.b32.xlu1 %v1340_v6, %s1371_s21  ;;  %v1351_v17 = vld [vmem:[%s1421_s20 + $0xc] ss:$16 sps:$4 sm:$0xff]  }
  0x1a   : > { %v1352_v18 = vld [vmem:[%s1421_s20 + $0x2c] ss:$16 sps:$4 sm:$0xff]  }
  0x1b   : > { %v1353_v19 = vld [vmem:[%s1421_s20 + $0xc] ss:$16 sps:$4 sm:$0xff]  }
  0x1c   : > { %v1354_v20 = vld [vmem:[%s1421_s20 + $0x2c] ss:$16 sps:$4 sm:$0xff]  }
  0x1d   : > { %317 = vrot.lane.b32.xlu0 %v1331_v0, %s1372_s22  ;;  %319 = vrot.lane.b32.xlu1 %v1334_v2, %s1372_s22  ;;  %v1355_v21 = vld [vmem:[%s1421_s20 + $0xc] ss:$16 sps:$4 sm:$0xff]  }
  0x1e   : > { %v1356_v22 = vld [vmem:[%s1421_s20 + $0x2c] ss:$16 sps:$4 sm:$0xff]  }
  0x21   : > { %315 = vrot.lane.b32.xlu0 %v1333_v1, %s1372_s22  ;;  %325 = vrot.lane.b32.xlu1 %v1336_v3, %s1372_s22 }
  0x25   : > { %327 = vrot.lane.b32.xlu0 %v1338_v4, %s1372_s22  ;;  %323 = vrot.lane.b32.xlu1 %v1340_v6, %s1372_s22 }
  0x29   : > { %392 = vrot.lane.b32.xlu0 %v1331_v0, %s1373_s23  ;;  %394 = vrot.lane.b32.xlu1 %v1334_v2, %s1373_s23 }
  0x2d   : > { %390 = vrot.lane.b32.xlu0 %v1333_v1, %s1373_s23  ;;  %771 = vrot.lane.b32.xlu1 %v1431_v5, %s1374_s24 }
  0x31   : > { %773 = vrot.lane.b32.xlu0 %v1343_v10, %s1374_s24  ;;  %769 = vrot.lane.b32.xlu1 %v1436_v7, %s1374_s24 }
  0x35   : > { %400 = vrot.lane.b32.xlu0 %v1336_v3, %s1373_s23  ;;  %402 = vrot.lane.b32.xlu1 %v1338_v4, %s1373_s23 }
  0x39   : > { %398 = vrot.lane.b32.xlu0 %v1340_v6, %s1373_s23  ;;  %777 = vrot.lane.b32.xlu1 %v1440_v8, %s1374_s24 }
  0x3d   : > { %779 = vrot.lane.b32.xlu0 %v1347_v12, %s1374_s24  ;;  %775 = vrot.lane.b32.xlu1 %v1443_v9, %s1374_s24 }
  0x41   : > { %467 = vrot.lane.b32.xlu0 %v1331_v0, %s1375_s25  ;;  %469 = vrot.lane.b32.xlu1 %v1334_v2, %s1375_s25 }
  0x45   : > { %465 = vrot.lane.b32.xlu0 %v1333_v1, %s1375_s25  ;;  %245 = vrot.lane.b32.xlu1 %v1349_v15, %s1371_s21  ;;  %v828_v1 = vld [vmem:[#allocation2 + $0xd0] sm:$0xff] }
  0x49   : > { %475 = vrot.lane.b32.xlu0 %v1336_v3, %s1375_s25  ;;  %477 = vrot.lane.b32.xlu1 %v1338_v4, %s1375_s25  ;;  %v1567_v3 = vld [vmem:[%s1644_s1 + $0x8] ss:$12 sps:$4 sm:$0xff]  }
  0x4d   : > { %473 = vrot.lane.b32.xlu0 %v1340_v6, %s1375_s25  ;;  %253 = vrot.lane.b32.xlu1 %v1350_v16, %s1371_s21 }
  0x51   : > { %321 = vrot.lane.b32.xlu0 %v1349_v15, %s1372_s22  ;;  %584 = vrot.lane.b32.xlu1 %v1351_v17, %s1377_s30 }
  0x55   : > { %329 = vrot.lane.b32.xlu0 %v1350_v16, %s1372_s22  ;;  %590 = vrot.lane.b32.xlu1 %v1352_v18, %s1377_s30 }
  0x59   : > { %582 = vrot.lane.b32.xlu0 %v1431_v5, %s1377_s30  ;;  %580 = vrot.lane.b32.xlu1 %v1436_v7, %s1377_s30 }
  0x5d   : > { %396 = vrot.lane.b32.xlu0 %v1349_v15, %s1373_s23  ;;  %647 = vrot.lane.b32.xlu1 %v1353_v19, %s1378_s5 }
  0x61   : > { %588 = vrot.lane.b32.xlu0 %v1440_v8, %s1377_s30  ;;  %586 = vrot.lane.b32.xlu1 %v1443_v9, %s1377_s30 }
  0x65   : > { %404 = vrot.lane.b32.xlu0 %v1350_v16, %s1373_s23  ;;  %653 = vrot.lane.b32.xlu1 %v1354_v20, %s1378_s5 }
  0x69   : > { %645 = vrot.lane.b32.xlu0 %v1431_v5, %s1378_s5  ;;  %643 = vrot.lane.b32.xlu1 %v1436_v7, %s1378_s5 }
  0x6d   : > { %471 = vrot.lane.b32.xlu0 %v1349_v15, %s1375_s25  ;;  %710 = vrot.lane.b32.xlu1 %v1355_v21, %s1379_s6 }
  0x71   : > { %651 = vrot.lane.b32.xlu0 %v1440_v8, %s1378_s5  ;;  %649 = vrot.lane.b32.xlu1 %v1443_v9, %s1378_s5 }
  0x75   : > { %479 = vrot.lane.b32.xlu0 %v1350_v16, %s1375_s25  ;;  %716 = vrot.lane.b32.xlu1 %v1356_v22, %s1379_s6  ;;  %v831_v22 = vld [vmem:[#allocation2 + $0xe8] sm:$0xff] }
  0x79   : > { %708 = vrot.lane.b32.xlu0 %v1431_v5, %s1379_s6  ;;  %706 = vrot.lane.b32.xlu1 %v1436_v7, %s1379_s6 }
  0x7d   : > { %714 = vrot.lane.b32.xlu0 %v1440_v8, %s1379_s6  ;;  %712 = vrot.lane.b32.xlu1 %v1443_v9, %s1379_s6 }
  0x81   : > { %860 = vperm.xlu0 %1329, %v856_v24   ;;  %865 = vperm.xlu1 %1330, %v857_v25  }
  0x83   : > { %v242_v26 = vpop.permute.xlu0 %241  ;;  %v240_v27 = vpop.permute.xlu1 %239 }
  0x84   : > { %v256_v28 = vsel %vm255_vm1, %v240_v27, %v242_v26 }
  0x87   : > { %v1529_v29 = vpop.permute.xlu0 %243  ;;  %v250_v31 = vpop.permute.xlu1 %249 }
  0x88   : > { %v257_v30 = vsel %vm255_vm1, %v242_v26, %v1529_v29 }
  0x89   : > { %887 = vmatprep.subr.bf16.mxu0 %v257_v30 }
  0x8a   : > { %888 = vmatpush1.bf16.msra.mxu0 %v256_v28 }
  0x8b   : > { %v1533_v32 = vpop.permute.xlu0 %251  ;;  %v248_v34 = vpop.permute.xlu1 %247 }
  0x8c   : > { %v260_v33 = vsel %vm255_vm1, %v250_v31, %v1533_v32  ;;  %v259_v35 = vsel %vm255_vm1, %v248_v34, %v250_v31 }
  0x8d   : > { %889 = vmatprep.subr.bf16.mxu0 %v260_v33 }
  0x8e   : > { %890 = vmatpush1.bf16.msra.mxu0 %v259_v35 }
  0x8f   : > { %v318_v36 = vpop.permute.xlu0 %317  ;;  %v1538_v37 = vpop.permute.xlu1 %319 }
  0x90   : > { %v333_v38 = vsel %vm331_vm2, %v318_v36, %v1538_v37 }
  0x91   : > { %891 = vmatprep.subr.bf16.mxu0 %v333_v38 }
  0x93   : > { %v316_v39 = vpop.permute.xlu0 %315  ;;  %v326_v41 = vpop.permute.xlu1 %325 }
  0x94   : > { %v332_v40 = vsel %vm331_vm2, %v316_v39, %v318_v36 }
  0x95   : > { %892 = vmatpush1.bf16.msra.mxu0 %v332_v40 }
  0x97   : > { %v1543_v42 = vpop.permute.xlu0 %327  ;;  %v324_v44 = vpop.permute.xlu1 %323 }
  0x98   : > { %v336_v43 = vsel %vm331_vm2, %v326_v41, %v1543_v42  ;;  %v335_v45 = vsel %vm331_vm2, %v324_v44, %v326_v41 }
  0x99   : > { %893 = vmatprep.subr.bf16.mxu0 %v336_v43 }
  0x9a   : > { %894 = vmatpush1.bf16.msra.mxu0 %v335_v45 }
  0x9b   : > { %v393_v46 = vpop.permute.xlu0 %392  ;;  %v1548_v47 = vpop.permute.xlu1 %394 }
  0x9c   : > { %v408_v48 = vsel %vm406_vm3, %v393_v46, %v1548_v47 }
  0x9d   : > { %895 = vmatprep.subr.bf16.mxu0 %v408_v48 }
  0x9f   : > { %v391_v49 = vpop.permute.xlu0 %390  ;;  %v772_v51 = vpop.permute.xlu1 %771 }
  0xa0   : > { %v407_v50 = vsel %vm406_vm3, %v391_v49, %v393_v46 }
  0xa1   : > { %896 = vmatpush1.bf16.msra.mxu0 %v407_v50 }
  0xa3   : > { %v774_v52 = vpop.permute.xlu0 %773  ;;  %v770_v54 = vpop.permute.xlu1 %769 }
  0xa4   : > { %v783_v53 = vsel %vm781_vm4, %v772_v51, %v774_v52  ;;  %794 = vst.msk [vmem:[#allocation2 + $0x190] sm:$0xff] %vm270_vm0, %v774_v52  ;;  %v782_v55 = vsel %vm781_vm4, %v770_v54, %v772_v51 }
  0xa5   : > { %930 = vmatprep.subr.bf16.mxu1 %v783_v53 }
  0xa6   : > { %931 = vmatpush1.bf16.msra.mxu1 %v782_v55 }
  0xa7   : > { %v401_v56 = vpop.permute.xlu0 %400  ;;  %v1556_v57 = vpop.permute.xlu1 %402 }
  0xa8   : > { %v411_v58 = vsel %vm406_vm3, %v401_v56, %v1556_v57 }
  0xa9   : > { %897 = vmatprep.subr.bf16.mxu0 %v411_v58 }
  0xab   : > { %v399_v59 = vpop.permute.xlu0 %398  ;;  %v778_v61 = vpop.permute.xlu1 %777 }
  0xac   : > { %v410_v60 = vsel %vm406_vm3, %v399_v59, %v401_v56 }
  0xad   : > { %898 = vmatpush1.bf16.msra.mxu0 %v410_v60 }
  0xaf   : > { %v780_v62 = vpop.permute.xlu0 %779  ;;  %v776_v0 = vpop.permute.xlu1 %775 }
  0xb0   : > { %v785_v63 = vsel %vm781_vm4, %v778_v61, %v780_v62  ;;  %797 = vst.msk [vmem:[#allocation2 + $0x1a8] sm:$0xff] %vm270_vm0, %v780_v62  ;;  %v784_v2 = vsel %vm781_vm4, %v776_v0, %v778_v61 }
  0xb1   : > { %932 = vmatprep.subr.bf16.mxu1 %v785_v63 }
  0xb2   : > { %933 = vmatpush1.bf16.msra.mxu1 %v784_v2 }
  0xb3   : > { %v468_v4 = vpop.permute.xlu0 %467  ;;  %1269 = vmatprep.subr.bf16.mxu1 %v828_v1  ;;  %v1569_v6 = vpop.permute.xlu1 %469 }
  0xb4   : > { %v483_v10 = vsel %vm481_vm5, %v468_v4, %v1569_v6 }
  0xb5   : > { %1255 = vmatmul.mubr.msk.bf16.vlgmr.msra.gmra.mrb[0].mxu1 %vm883_vm6, %v1567_v3  ;;  %899 = vmatprep.subr.bf16.mxu0 %v483_v10 }
  0xb6   : > { %1005 = vmatprep.mubr.bf16.mxu1 %v1514_v23 }
  0xb7   : > { %v466_v11 = vpop.permute.xlu0 %465  ;;  %v246_v13 = vpop.permute.xlu1 %245 }
  0xb8   : > { %v482_v12 = vsel %vm481_vm5, %v466_v11, %v468_v4  ;;  %v258_v15 = vsel %vm255_vm1, %v1529_v29, %v246_v13 }
  0xb9   : > { %900 = vmatpush1.bf16.msra.mxu0 %v482_v12  ;;  %271 = vst.msk [vmem:[#allocation2 + $0x10] sm:$0xff] %vm270_vm0, %v258_v15 }
  0xbb   : > { %v476_v16 = vpop.permute.xlu0 %475  ;;  %v1580_v17 = vpop.permute.xlu1 %477 }
  0xbc   : > { %v486_v18 = vsel %vm481_vm5, %v476_v16, %v1580_v17 }
  0xbd   : > { %901 = vmatprep.subr.bf16.mxu0 %v486_v18  ;;  %v1360_v18 = vld [vmem:[%s1644_s1] ss:$12 sps:$4 sm:$0xff]  }
  0xbf   : > { %v474_v19 = vpop.permute.xlu0 %473  ;;  %v254_v21 = vpop.permute.xlu1 %253 }
  0xc0   : > { %v485_v20 = vsel %vm481_vm5, %v474_v19, %v476_v16  ;;  %v261_v23 = vsel %vm255_vm1, %v1533_v32, %v254_v21  ;;  %v804_v24 = vld [vmem:[#allocation2 + $0x10] sm:$0xff]  ;;  %v1380_v19 = vmov 0.0   ;;  %v855_v21 = vld [vmem:[#allocation2 + $0x1a8] sm:$0xff]  ;;  %vm1119_vm1 = vcmask 240640  }
  0xc1   : > { %902 = vmatpush1.bf16.msra.mxu0 %v485_v20  ;;  %274 = vst.msk [vmem:[#allocation2 + $0x28] sm:$0xff] %vm270_vm0, %v261_v23  ;;  %1270 = vmatpush3.bf16.msra.mxu1 %v804_v24  ;;  %v852_v20 = vld [vmem:[#allocation2 + $0x190] sm:$0xff] }
  0xc2   : > { %903 = vmatprep.subr.bf16.mxu0 %v1431_v5  ;;  %1271 = vmatprep.subr.bf16.mxu1 %v831_v22 }
  0xc3   : > { %v322_v25 = vpop.permute.xlu0 %321  ;;  %v585_v27 = vpop.permute.xlu1 %584 }
  0xc4   : > { %v334_v26 = vsel %vm331_vm2, %v1538_v37, %v322_v25  ;;  %605 = vst.msk [vmem:[#allocation2 + $0x100] sm:$0xff] %vm270_vm0, %v585_v27 }
  0xc5   : > { %346 = vst.msk [vmem:[#allocation2 + $0x40] sm:$0xff] %vm270_vm0, %v334_v26  ;;  %904 = vmatpush1.bf16.msra.mxu0 %v1436_v7  ;;  %v1075_v26 = vlaneseq }
  0xc6   : > { %905 = vmatprep.subr.bf16.mxu0 %v1440_v8 }
  0xc7   : > { %v330_v28 = vpop.permute.xlu0 %329  ;;  %v591_v30 = vpop.permute.xlu1 %590 }
  0xc8   : > { %v337_v29 = vsel %vm331_vm2, %v1543_v42, %v330_v28  ;;  %608 = vst.msk [vmem:[#allocation2 + $0x118] sm:$0xff] %vm270_vm0, %v591_v30  ;;  %v807_v5 = vld [vmem:[#allocation2 + $0x28] sm:$0xff]  ;;  %vm1123_vm2 = vcmask 396528  }
  0xc9   : > { %349 = vst.msk [vmem:[#allocation2 + $0x58] sm:$0xff] %vm270_vm0, %v337_v29  ;;  %906 = vmatpush1.bf16.msra.mxu0 %v1443_v9  ;;  %1272 = vmatpush3.bf16.msra.mxu1 %v807_v5 }
  0xcb   : > { %v583_v31 = vpop.permute.xlu0 %582  ;;  %v581_v7 = vpop.permute.xlu1 %580  ;;  %v834_v33 = vld [vmem:[#allocation2 + $0x100] sm:$0xff] }
  0xcc   : > { %v594_v32 = vsel %vm592_vm7, %v583_v31, %v585_v27  ;;  %v810_v8 = vld [vmem:[#allocation2 + $0x40] sm:$0xff]  ;;  %v593_v34 = vsel %vm592_vm7, %v581_v7, %v583_v31  ;;  %1273 = vmatprep.subr.bf16.mxu1 %v834_v33  ;;  %v1076_v27 = vshrl.u32 %v1075_v26, 7 }
  0xcd   : > { %907 = vmatprep.subr.bf16.mxu0 %v594_v32  ;;  %1274 = vmatpush3.bf16.msra.mxu1 %v810_v8  ;;  %v1073_v7 = vld [vmem:[%s1646_s3] sm:$0x7] }
  0xce   : > { %908 = vmatpush1.bf16.msra.mxu0 %v593_v34  ;;  %v1077_v31 = vsub.s32 0, %v1076_v27  ;;  %v1081_v34 = vsub.s32 1, %v1076_v27 }
  0xcf   : > { %v397_v35 = vpop.permute.xlu0 %396  ;;  %v648_v37 = vpop.permute.xlu1 %647  ;;  %v837_v38 = vld [vmem:[#allocation2 + $0x118] sm:$0xff] }
  0xd0   : > { %v409_v36 = vsel %vm406_vm3, %v1548_v47, %v397_v35  ;;  %v813_v9 = vld [vmem:[#allocation2 + $0x58] sm:$0xff]  ;;  %668 = vst.msk [vmem:[#allocation2 + $0x130] sm:$0xff] %vm270_vm0, %v648_v37  ;;  %1275 = vmatprep.subr.bf16.mxu1 %v837_v38 }
  0xd1   : > { %421 = vst.msk [vmem:[#allocation2 + $0x70] sm:$0xff] %vm270_vm0, %v409_v36  ;;  %1276 = vmatpush3.bf16.msra.mxu1 %v813_v9 }
  0xd3   : > { %v589_v39 = vpop.permute.xlu0 %588  ;;  %v587_v41 = vpop.permute.xlu1 %586 }
  0xd4   : > { %v596_v40 = vsel %vm592_vm7, %v589_v39, %v591_v30  ;;  %v595_v42 = vsel %vm592_vm7, %v587_v41, %v589_v39 }
  0xd5   : > { %909 = vmatprep.subr.bf16.mxu0 %v596_v40 }
  0xd6   : > { %910 = vmatpush1.bf16.msra.mxu0 %v595_v42  ;;  %v1078_v42 = vrot.slane %v1073_v7, %v1077_v31 }
  0xd7   : > { %v405_v43 = vpop.permute.xlu0 %404  ;;  %v654_v45 = vpop.permute.xlu1 %653  ;;  %v840_v46 = vld [vmem:[#allocation2 + $0x130] sm:$0xff] }
  0xd8   : > { %v412_v44 = vsel %vm406_vm3, %v1556_v57, %v405_v43  ;;  %v816_v47 = vld [vmem:[#allocation2 + $0x70] sm:$0xff]  ;;  %671 = vst.msk [vmem:[#allocation2 + $0x148] sm:$0xff] %vm270_vm0, %v654_v45  ;;  %1277 = vmatprep.subr.bf16.mxu1 %v840_v46  ;;  %v1082_v46 = vrot.slane %v1073_v7, %v1081_v34 }
  0xd9   : > { %424 = vst.msk [vmem:[#allocation2 + $0x88] sm:$0xff] %vm270_vm0, %v412_v44  ;;  %1278 = vmatpush3.bf16.msra.mxu1 %v816_v47 }
  0xdb   : > { %v646_v48 = vpop.permute.xlu0 %645  ;;  %v644_v50 = vpop.permute.xlu1 %643 }
  0xdc   : > { %v657_v49 = vsel %vm655_vm8, %v646_v48, %v648_v37  ;;  %v656_v51 = vsel %vm655_vm8, %v644_v50, %v646_v48  ;;  %v1085_v48 = vsub.s32 2, %v1076_v27 }
  0xdd   : > { %911 = vmatprep.subr.bf16.mxu0 %v657_v49 }
  0xde   : > { %912 = vmatpush1.bf16.msra.mxu0 %v656_v51 }
  0xdf   : > { %v472_v52 = vpop.permute.xlu0 %471  ;;  %v711_v54 = vpop.permute.xlu1 %710  ;;  %v843_v55 = vld [vmem:[#allocation2 + $0x148] sm:$0xff] }
  0xe0   : > { %v484_v53 = vsel %vm481_vm5, %v1569_v6, %v472_v52  ;;  %v819_v56 = vld [vmem:[#allocation2 + $0x88] sm:$0xff]  ;;  %731 = vst.msk [vmem:[#allocation2 + $0x160] sm:$0xff] %vm270_vm0, %v711_v54  ;;  %1279 = vmatprep.subr.bf16.mxu1 %v843_v55 }
  0xe1   : > { %496 = vst.msk [vmem:[#allocation2 + $0xa0] sm:$0xff] %vm270_vm0, %v484_v53  ;;  %1280 = vmatpush3.bf16.msra.mxu1 %v819_v56 }
  0xe3   : > { %v652_v57 = vpop.permute.xlu0 %651  ;;  %v650_v59 = vpop.permute.xlu1 %649 }
  0xe4   : > { %v659_v58 = vsel %vm655_vm8, %v652_v57, %v654_v45  ;;  %v658_v60 = vsel %vm655_vm8, %v650_v59, %v652_v57 }
  0xe5   : > { %913 = vmatprep.subr.bf16.mxu0 %v659_v58 }
  0xe6   : > { %914 = vmatpush1.bf16.msra.mxu0 %v658_v60 }
  0xe7   : > { %v480_v61 = vpop.permute.xlu0 %479  ;;  %v717_v63 = vpop.permute.xlu1 %716  ;;  %v846_v0 = vld [vmem:[#allocation2 + $0x160] sm:$0xff] }
  0xe8   : > { %v487_v62 = vsel %vm481_vm5, %v1580_v17, %v480_v61  ;;  %v822_v1 = vld [vmem:[#allocation2 + $0xa0] sm:$0xff]  ;;  %734 = vst.msk [vmem:[#allocation2 + $0x178] sm:$0xff] %vm270_vm0, %v717_v63  ;;  %1281 = vmatprep.subr.bf16.mxu1 %v846_v0 }
  0xe9   : > { %499 = vst.msk [vmem:[#allocation2 + $0xb8] sm:$0xff] %vm270_vm0, %v487_v62  ;;  %1282 = vmatpush3.bf16.msra.mxu1 %v822_v1 }
  0xeb   : > { %v709_v2 = vpop.permute.xlu0 %708  ;;  %v707_v6 = vpop.permute.xlu1 %706 }
  0xec   : > { %v720_v4 = vsel %vm718_vm9, %v709_v2, %v711_v54  ;;  %v719_v10 = vsel %vm718_vm9, %v707_v6, %v709_v2 }
  0xed   : > { %915 = vmatprep.subr.bf16.mxu0 %v720_v4 }
  0xee   : > { %916 = vmatpush1.bf16.msra.mxu0 %v719_v10 }
  0xef   : > { %v715_v11 = vpop.permute.xlu0 %714  ;;  %v713_v13 = vpop.permute.xlu1 %712  ;;  %v849_v15 = vld [vmem:[#allocation2 + $0x178] sm:$0xff] }
  0xf0   : > { %v722_v12 = vsel %vm718_vm9, %v715_v11, %v717_v63  ;;  %v825_v16 = vld [vmem:[#allocation2 + $0xb8] sm:$0xff]  ;;  %v721_v17 = vsel %vm718_vm9, %v713_v13, %v715_v11  ;;  %1283 = vmatprep.subr.bf16.mxu1 %v849_v15  ;;  %v1086_v63 = vrot.slane %v1073_v7, %v1085_v48 }
  0xf1   : > { %917 = vmatprep.subr.bf16.mxu0 %v722_v12  ;;  %1284 = vmatpush3.bf16.msra.mxu1 %v825_v16 }
  0xf2   : > { %918 = vmatpush1.bf16.msra.mxu0 %v721_v17  ;;  %1294 = vmatprep.subr.bf16.mxu1 %v1380_v19 }
  0xf4   : > { %1006 = vmatmul.mubr.bf16.vlgmr.msra.gmra.mrb[4].mxu1 %v1360_v18 }
  0xf5   : > { %920 = vmatmul.mubr.bf16.vlgmr.msra.gmra.mrb[0].mxu0 %v1360_v18  ;;  %1295 = vmatpush3.bf16.msra.mxu1 %v852_v20 }
  0xf6   : > { %1298 = vmatprep.mubr.msk.bf16.mxu1 %vm1381_vm10, %v1380_v19  ;;  %1296 = vmatprep.subr.bf16.mxu1 %v1380_v19 }
  0xf9   : > { %1297 = vmatpush3.bf16.msra.mxu1 %v855_v21 }
  0xfc   : > { %1299 = vmatmul.mubr.msk.bf16.vlgmr.msra.gmra.mrb[8].mxu1 %vm883_vm6, %v1567_v3 }
 0x100   : > { %v861_v28 = vpop.permute.xlu0 %860  ;;  %v866_v29 = vpop.permute.xlu1 %865 }
 0x188   : > { %v964_v22 = vpop.f32.mrb[0].mxu1 }
 0x189   : > { %v966_v23 = vpop.f32.mrb[1].mxu1 }
 0x18a   : > { %v968_v24 = vpop.f32.mrb[2].mxu1 }
 0x18b   : > { %v970_v25 = vpop.f32.mrb[3].mxu1 }
 0x1c7   : > { %v1285_v30 = vpop.f32.mrb[4].mxu1 }
 0x1c8   : > { %v921_v5 = vpop.f32.mrb[0].mxu0  ;;  %v1286_v32 = vpop.f32.mrb[5].mxu1 }
 0x1c9   : > { %v922_v33 = vadd.f32 %v921_v5, %v861_v28  ;;  %v923_v8 = vpop.f32.mrb[1].mxu0  ;;  %v1287_v3 = vadd.f32 %v1286_v32, %v1285_v30  ;;  %v1288_v35 = vpop.f32.mrb[6].mxu1 }
 0x1ca   : > { %v924_v36 = vadd.f32 %v923_v8, %v861_v28  ;;  %v925_v37 = vpop.f32.mrb[2].mxu0  ;;  %v1289_v38 = vpop.f32.mrb[7].mxu1 }
 0x1cb   : > { %v965_v9 = vadd.f32 %v964_v22, %v922_v33  ;;  %v926_v39 = vadd.f32 %v925_v37, %v866_v29  ;;  %v927_v40 = vpop.f32.mrb[3].mxu0  ;;  %v1290_v41 = vadd.f32 %v1289_v38, %v1288_v35  ;;  %v1008_v51 = vadd.f32 %v1287_v3, %v861_v28 }
 0x1cc   : > { %v967_v43 = vadd.f32 %v966_v23, %v924_v36  ;;  %v928_v44 = vadd.f32 %v927_v40, %v866_v29 }
 0x1cd   : > { %vm1055_vm11 = vcmp.ge.f32.partialorder %v965_v9, 0.0  ;;  %v1061_v45 = vmul.f32 0.2, %v965_v9  ;;  %v969_v47 = vadd.f32 %v968_v24, %v926_v39  ;;  %v1011_v58 = vadd.f32 %v1290_v41, %v866_v29 }
 0x1ce   : > { %vm1056_vm12 = vcmp.ge.f32.partialorder %v967_v43, 0.0  ;;  %v1062_v49 = vmul.f32 0.2, %v967_v43  ;;  %v971_v50 = vadd.f32 %v970_v25, %v928_v44 }
 0x1cf   : > { %v1067_v52 = vsel %vm1055_vm11, %v965_v9, %v1061_v45  ;;  %vm1058_vm13 = vcmp.ge.f32.partialorder %v969_v47, 0.0  ;;  %v1064_v53 = vmul.f32 0.2, %v969_v47  ;;  %v1048_v54 = vpop.f32.mrb[8].mxu1 }
 0x1d0   : > { %v1090_v55 = vmul.f32 %v1078_v42, %v1067_v52  ;;  %v1068_v56 = vsel %vm1056_vm12, %v967_v43, %v1062_v49  ;;  %vm1059_vm14 = vcmp.ge.f32.partialorder %v971_v50, 0.0  ;;  %v1065_v57 = vmul.f32 0.2, %v971_v50  ;;  %v1300_v60 = vpop.f32.mrb[9].mxu1 }
 0x1d1   : > { %v1049_v59 = vadd.f32 %v1048_v54, %v1008_v51  ;;  %v1091_v61 = vmul.f32 %v1082_v46, %v1068_v56  ;;  %v1070_v62 = vsel %vm1058_vm13, %v969_v47, %v1064_v53  ;;  %v1051_v0 = vpop.f32.mrb[10].mxu1 }
 0x1d2   : > { %v1093_v1 = vmul.f32 %v1078_v42, %v1070_v62  ;;  %v1071_v2 = vsel %vm1059_vm14, %v971_v50, %v1065_v57  ;;  %v1052_v10 = vadd.f32 %v1051_v0, %v1011_v58  ;;  %v1301_v11 = vpop.f32.mrb[11].mxu1 }
 0x1d3   : > { %vm1057_vm15 = vcmp.ge.f32.partialorder %v1049_v59, 0.0  ;;  %v1063_v4 = vmul.f32 0.2, %v1049_v59  ;;  %v1265_v6 = vpack.c.bf16 %v1091_v61, %v1090_v55  ;;  %v1094_v12 = vmul.f32 %v1082_v46, %v1071_v2 }
 0x1d4   : > { %vm1060_vm0 = vcmp.ge.f32.partialorder %v1052_v10, 0.0  ;;  %v1066_v15 = vmul.f32 0.2, %v1052_v10 }
 0x1d5   : > { %v1069_v13 = vsel %vm1057_vm15, %v1049_v59, %v1063_v4  ;;  %1118 = vst [vmem:[%s1478_s29 + $0x4] sm:$0xff] %v1265_v6  ;;  %v1267_v17 = vpack.c.bf16 %v1094_v12, %v1093_v1 }
 0x1d6   : > { %v1092_v16 = vmul.f32 %v1086_v63, %v1069_v13  ;;  %v1072_v18 = vsel %vm1060_vm0, %v1052_v10, %v1066_v15 }
 0x1d7   : > { %v1095_v20 = vmul.f32 %v1086_v63, %v1072_v18  ;;  %1121 = vst [vmem:[%s1478_s29 + $0x14] sm:$0xff] %v1267_v17 }
 0x1d8   : > { %v1266_v19 = vpack.c.bf16 %v1092_v16, %v1092_v16 }
 0x1d9   : > { %v1268_v21 = vpack.c.bf16 %v1095_v20, %v1095_v20 }
 0x1da   : > { %1120 = vst.msk [vmem:[%s1478_s29 + $0xc] sm:$0xf] %vm1119_vm1, %v1266_v19 }
 0x1db   : > { %1124 = vst.msk [vmem:[%s1478_s29 + $0xc] sm:$0xf] %vm1123_vm2, %v1376_v14 }
 0x1dc   : > { %1122 = vst.msk [vmem:[%s1478_s29 + $0x1c] sm:$0xf] %vm1119_vm1, %v1268_v21 }
 0x1dd   : > { %1125 = vst.msk [vmem:[%s1478_s29 + $0x1c] sm:$0xf] %vm1123_vm2, %v1376_v14 }
 0x1de PF: > { %s14_s15 = sadd.s32 1, %s1369_s15  }
 0x1df   : > { %p11_p4 = scmp.ge.s32.totalorder %s14_s15, 4  }
 0x1e1   :  { %13 = sbr.rel (!%p11_p4) target bundleno = 1 (0x1), region = 66 }

// kernel: registration_subnet_forward.19
= control target key start
LH: loop header
LB: loop body
LE: loop exit
PB: predicated region body
PF: predicated region fallthrough
CT: control target
= control target key end

     0   :  { %s1993_s18 = smov 0   ;;  %s2412_s0 = inlined_call_operand.vmem [shape: bf16[2,32,433], index: 0, kind: input, shape index: {}]   ;;  %s2413_s1 = inlined_call_operand.vmem [shape: bf16[2,16,433], index: 1, kind: input, shape index: {}]   ;;  %s2414_s2 = inlined_call_operand.vmem [shape: bf16[32,432], index: 2, kind: input, shape index: {}]   ;;  %s2415_s3 = inlined_call_operand.vmem [shape: f32[32,1], index: 3, kind: input, shape index: {}]   ;;  %s2416_s4 = inlined_call_operand.vmem [shape: f32[1,286], index: 4, kind: input, shape index: {}]   ;;  %s2417_s5 = inlined_call_operand.vmem [shape: bf16[2,32,433], index: 5, kind: output, shape index: {}]  }
   0x1 LB: > { %s1692_s19 = sadd.s32 4294967295, %s1952_s18   ;;  %p1696_p0 = scmp.ge.s32.totalorder %s1952_s18, 1  ;;  %s1952_s18 = sphi %s1993_s18, %s15_s18  }
   0x2   : > { %p197_p1 = scmp.lt.s32.totalorder %s1952_s18, 3 }
   0x4   : > { %p198_p2 = pnand %p1696_p0, %p197_p1 }
   0x5   : > { %p230_p3 = scmp.lt.s32.totalorder (!%p198_p2), %s1692_s19, 1  ;;  %s1954_s24 = smov (!%p198_p2), 19   ;;  %vm317_vm0 = vcmask (!%p198_p2), 244736   ;;  %v1935_v23 = vld [vmem:[%s2414_s2 + $0x4] ss:$16 sps:$4 sm:$0xff] (!%p198_p2)   ;;  %v1961_v25 = vmov (!%p198_p2), 0  }
   0x6   : > { %201 = sbr.rel (%p198_p2) target bundleno = 540 (0x21c), region = 40  ;;  %s1955_s26 = smov (!%p198_p2), 18   ;;  %1436 = vmatprep.mubr.bf16.mxu1 (!%p198_p2), %v1935_v23  ;;  %1330 = vmatprep.mubr.bf16.mxu0 (!%p198_p2), %v1935_v23  ;;  %vm302_vm1 = vcmask (!%p198_p2), 154624   ;;  %vm378_vm2 = vcmask (!%p198_p2), 146432   ;;  %vm453_vm3 = vcmask (!%p198_p2), 138240   ;;  %vm528_vm4 = vcmask (!%p198_p2), 7168  }
   0x7   : > { %s1956_s30 = smov (!%p198_p2), 17   ;;  %s1957_s6 = smov (!%p198_p2), 1   ;;  %1891 = vset.pattern.permute.xlu1 (!%p198_p2), %v1961_v25  ;;  %1890 = vset.pattern.permute.xlu0 (!%p198_p2), %v1961_v25  ;;  %vm639_vm5 = vcmask (!%p198_p2), 1039360   ;;  %vm702_vm6 = vcmask (!%p198_p2), 908288   ;;  %vm765_vm7 = vcmask (!%p198_p2), 900096   ;;  %vm828_vm8 = vcmask (!%p198_p2), 891904  }
   0x8   : > { %s1958_s7 = smov (!%p198_p2), 127   ;;  %s1959_s8 = smov (!%p198_p2), 111   ;;  %vm1291_vm9 = vcmask (!%p198_p2), 392192   ;;  %vm1612_vm12 = vcmask (!%p198_p2), 240640   ;;  %vm1620_vm15 = vcmask (!%p198_p2), 396528  }
   0x9   : > { %s1960_s9 = smov (!%p198_p2), 110   ;;  %s1962_s12 = smov (!%p198_p2), 109  }
   0xd   : > { %s2419_s19 = smov (!%p230_p3, %s1692_s19), 1 }
   0xe   : > { %s1818_s20 = sshll.u32 %s2419_s19, 6  ;;  %s1819_s25 = sshll.u32 %s2419_s19, 5 }
   0xf   : > { %s2009_s23 = scalar_lea.vmem %s2412_s0, %s1818_s20  ;;  %s2041_s29 = scalar_lea.vmem %s2413_s1, %s1819_s25 }
  0x10   : > { %v1892_v0 = vld [vmem:[%s2009_s23 + $0x4] ss:$16 sps:$4 sm:$0xff]   ;;  %v1894_v1 = vld [vmem:[%s2009_s23] ss:$16 sps:$4 sm:$0xff]   ;;  %v1895_v2 = vld [vmem:[%s2009_s23 + $0x8] ss:$16 sps:$4 sm:$0xff]   ;;  %s2353_s15 = scalar_lea.vmem %s2417_s5, %s1818_s20 }
  0x11   : > { %288 = vrot.lane.b32.xlu0 %v1892_v0, %s1954_s24  ;;  %286 = vrot.lane.b32.xlu1 %v1894_v1, %s1954_s24  ;;  %v1897_v3 = vld [vmem:[%s2009_s23 + $0x24] ss:$16 sps:$4 sm:$0xff]   ;;  %v1899_v4 = vld [vmem:[%s2009_s23 + $0x28] ss:$16 sps:$4 sm:$0xff]  }
  0x12   : > { %v2020_v5 = vld [vmem:[%s2009_s23 + $0x8] ss:$16 sps:$4 sm:$0xff]   ;;  %v1901_v6 = vld [vmem:[%s2009_s23 + $0x20] ss:$16 sps:$4 sm:$0xff]   ;;  %v2025_v7 = vld [vmem:[%s2009_s23 + $0x4] ss:$16 sps:$4 sm:$0xff]  }
  0x13   : > { %v2028_v8 = vld [vmem:[%s2009_s23 + $0x28] ss:$16 sps:$4 sm:$0xff]   ;;  %v2031_v9 = vld [vmem:[%s2009_s23 + $0x24] ss:$16 sps:$4 sm:$0xff]   ;;  %v1931_v12 = vld [vmem:[%s2009_s23 + $0xc] ss:$16 sps:$4 sm:$0xff]  }
  0x14   : > { %v2046_v10 = vld [vmem:[%s2041_s29 + $0x8] ss:$16 sps:$4 sm:$0xff]   ;;  %v2049_v11 = vld [vmem:[%s2041_s29 + $0x4] ss:$16 sps:$4 sm:$0xff]   ;;  %589 = vst.msk [vmem:[#allocation2 + $0xd0] sm:$0xff] %vm317_vm0, %v1931_v12  ;;  %1567 = vst [vmem:[%s2353_s15] sm:$0xf] %v1961_v25 }
  0x15   : > { %290 = vrot.lane.b32.xlu0 %v1895_v2, %s1954_s24  ;;  %296 = vrot.lane.b32.xlu1 %v1897_v3, %s1954_s24  ;;  %v1932_v13 = vld [vmem:[%s2009_s23 + $0x2c] ss:$16 sps:$4 sm:$0xff]   ;;  %v1918_v27 = vld [vmem:[%s2041_s29 + $0x4] ss:$16 sps:$4 sm:$0xff]  }
  0x16   : > { %592 = vst.msk [vmem:[#allocation2 + $0xe8] sm:$0xff] %vm317_vm0, %v1932_v13  ;;  %v1902_v15 = vld [vmem:[%s2009_s23 + $0xc] ss:$16 sps:$4 sm:$0xff]   ;;  %v1920_v28 = vld [vmem:[%s2041_s29 + $0x8] ss:$16 sps:$4 sm:$0xff]  }
  0x17   : > { %v1903_v16 = vld [vmem:[%s2009_s23 + $0x2c] ss:$16 sps:$4 sm:$0xff]   ;;  %v1922_v29 = vld [vmem:[%s2041_s29] ss:$16 sps:$4 sm:$0xff]   ;;  %1568 = vst [vmem:[%s2353_s15 + $0x10] sm:$0xf] %v1961_v25 }
  0x18   : > { %v1906_v17 = vld [vmem:[%s2009_s23 + $0xc] ss:$16 sps:$4 sm:$0xff]   ;;  %1569 = vst [vmem:[%s2353_s15 + $0x20] sm:$0xf] %v1961_v25  ;;  %1570 = vst [vmem:[%s2353_s15 + $0x30] sm:$0xf] %v1961_v25 }
  0x19   : > { %298 = vrot.lane.b32.xlu0 %v1899_v4, %s1954_s24  ;;  %294 = vrot.lane.b32.xlu1 %v1901_v6, %s1954_s24  ;;  %v1910_v18 = vld [vmem:[%s2009_s23 + $0x2c] ss:$16 sps:$4 sm:$0xff]  }
  0x1a   : > { %v1912_v19 = vld [vmem:[%s2009_s23 + $0xc] ss:$16 sps:$4 sm:$0xff]  }
  0x1b   : > { %v1174_v14 = vld [vmem:[#allocation2 + $0xd0] sm:$0xff]  ;;  %v1913_v20 = vld [vmem:[%s2009_s23 + $0x2c] ss:$16 sps:$4 sm:$0xff]  }
  0x1c   : > { %1829 = vmatprep.subr.bf16.mxu1 %v1174_v14  ;;  %v1914_v21 = vld [vmem:[%s2009_s23 + $0xc] ss:$16 sps:$4 sm:$0xff]  }
  0x1d   : > { %364 = vrot.lane.b32.xlu0 %v1892_v0, %s1955_s26  ;;  %366 = vrot.lane.b32.xlu1 %v1895_v2, %s1955_s26  ;;  %v1915_v22 = vld [vmem:[%s2009_s23 + $0x2c] ss:$16 sps:$4 sm:$0xff]  }
  0x1e   : > { %v1916_v24 = vld [vmem:[%s2009_s23 + $0xc] ss:$16 sps:$4 sm:$0xff]  }
  0x1f   : > { %v1917_v26 = vld [vmem:[%s2009_s23 + $0x2c] ss:$16 sps:$4 sm:$0xff]  }
  0x20   : > { %v1923_v30 = vld [vmem:[%s2041_s29 + $0xc] ss:$16 sps:$4 sm:$0xff]  }
  0x21   : > { %362 = vrot.lane.b32.xlu0 %v1894_v1, %s1955_s26  ;;  %372 = vrot.lane.b32.xlu1 %v1897_v3, %s1955_s26  ;;  %v1936_v47 = vld [vmem:[%s2041_s29 + $0xc] ss:$16 sps:$4 sm:$0xff]  }
  0x22   : > { %1015 = vst.msk [vmem:[#allocation2 + $0x220] sm:$0xff] %vm317_vm0, %v1936_v47  ;;  %v1926_v55 = vld [vmem:[%s2041_s29 + $0xc] ss:$16 sps:$4 sm:$0xff]  }
  0x23   : > { %v1928_v63 = vld [vmem:[%s2041_s29 + $0xc] ss:$16 sps:$4 sm:$0xff]  }
  0x25   : > { %374 = vrot.lane.b32.xlu0 %v1899_v4, %s1955_s26  ;;  %370 = vrot.lane.b32.xlu1 %v1901_v6, %s1955_s26 }
  0x29   : > { %439 = vrot.lane.b32.xlu0 %v1892_v0, %s1956_s30  ;;  %441 = vrot.lane.b32.xlu1 %v1895_v2, %s1956_s30 }
  0x2d   : > { %437 = vrot.lane.b32.xlu0 %v1894_v1, %s1956_s30  ;;  %447 = vrot.lane.b32.xlu1 %v1897_v3, %s1956_s30 }
  0x31   : > { %449 = vrot.lane.b32.xlu0 %v1899_v4, %s1956_s30  ;;  %445 = vrot.lane.b32.xlu1 %v1901_v6, %s1956_s30 }
  0x35   : > { %514 = vrot.lane.b32.xlu0 %v1892_v0, %s1957_s6  ;;  %516 = vrot.lane.b32.xlu1 %v1895_v2, %s1957_s6 }
  0x39   : > { %512 = vrot.lane.b32.xlu0 %v1894_v1, %s1957_s6  ;;  %522 = vrot.lane.b32.xlu1 %v1897_v3, %s1957_s6  ;;  %v1929_v3 = vld [vmem:[%s2041_s29 + $0xc] ss:$16 sps:$4 sm:$0xff]  }
  0x3d   : > { %524 = vrot.lane.b32.xlu0 %v1899_v4, %s1957_s6  ;;  %520 = vrot.lane.b32.xlu1 %v1901_v6, %s1957_s6 }
  0x41   : > { %292 = vrot.lane.b32.xlu0 %v1902_v15, %s1954_s24  ;;  %300 = vrot.lane.b32.xlu1 %v1903_v16, %s1954_s24 }
  0x45   : > { %629 = vrot.lane.b32.xlu0 %v2020_v5, %s1958_s7  ;;  %631 = vrot.lane.b32.xlu1 %v1906_v17, %s1958_s7  ;;  %v1930_v17 = vld [vmem:[%s2041_s29 + $0xc] ss:$16 sps:$4 sm:$0xff]  }
  0x49   : > { %368 = vrot.lane.b32.xlu0 %v1902_v15, %s1955_s26  ;;  %627 = vrot.lane.b32.xlu1 %v2025_v7, %s1958_s7 }
  0x4d   : > { %635 = vrot.lane.b32.xlu0 %v2028_v8, %s1958_s7  ;;  %637 = vrot.lane.b32.xlu1 %v1910_v18, %s1958_s7 }
  0x51   : > { %376 = vrot.lane.b32.xlu0 %v1903_v16, %s1955_s26  ;;  %633 = vrot.lane.b32.xlu1 %v2031_v9, %s1958_s7 }
  0x55   : > { %692 = vrot.lane.b32.xlu0 %v2020_v5, %s1959_s8  ;;  %694 = vrot.lane.b32.xlu1 %v1912_v19, %s1959_s8 }
  0x59   : > { %443 = vrot.lane.b32.xlu0 %v1902_v15, %s1956_s30  ;;  %690 = vrot.lane.b32.xlu1 %v2025_v7, %s1959_s8 }
  0x5d   : > { %698 = vrot.lane.b32.xlu0 %v2028_v8, %s1959_s8  ;;  %700 = vrot.lane.b32.xlu1 %v1913_v20, %s1959_s8 }
  0x61   : > { %451 = vrot.lane.b32.xlu0 %v1903_v16, %s1956_s30  ;;  %696 = vrot.lane.b32.xlu1 %v2031_v9, %s1959_s8 }
  0x65   : > { %755 = vrot.lane.b32.xlu0 %v2020_v5, %s1960_s9  ;;  %757 = vrot.lane.b32.xlu1 %v1914_v21, %s1960_s9 }
  0x69   : > { %518 = vrot.lane.b32.xlu0 %v1902_v15, %s1957_s6  ;;  %753 = vrot.lane.b32.xlu1 %v2025_v7, %s1960_s9 }
  0x6d   : > { %761 = vrot.lane.b32.xlu0 %v2028_v8, %s1960_s9  ;;  %763 = vrot.lane.b32.xlu1 %v1915_v22, %s1960_s9 }
  0x71   : > { %526 = vrot.lane.b32.xlu0 %v1903_v16, %s1957_s6  ;;  %759 = vrot.lane.b32.xlu1 %v2031_v9, %s1960_s9 }
  0x75   : > { %818 = vrot.lane.b32.xlu0 %v2020_v5, %s1962_s12  ;;  %820 = vrot.lane.b32.xlu1 %v1916_v24, %s1962_s12 }
  0x79   : > { %816 = vrot.lane.b32.xlu0 %v2025_v7, %s1962_s12  ;;  %824 = vrot.lane.b32.xlu1 %v2028_v8, %s1962_s12 }
  0x7d   : > { %826 = vrot.lane.b32.xlu0 %v1917_v26, %s1962_s12  ;;  %822 = vrot.lane.b32.xlu1 %v2031_v9, %s1962_s12  ;;  %v1177_v26 = vld [vmem:[#allocation2 + $0xe8] sm:$0xff] }
  0x81   : > { %867 = vrot.lane.b32.xlu0 %v1918_v27, %s1954_s24  ;;  %869 = vrot.lane.b32.xlu1 %v1920_v28, %s1954_s24 }
  0x83   : > { %v289_v31 = vpop.permute.xlu0 %288  ;;  %v287_v32 = vpop.permute.xlu1 %286 }
  0x84   : > { %v303_v33 = vsel %vm302_vm1, %v287_v32, %v289_v31 }
  0x85   : > { %865 = vrot.lane.b32.xlu0 %v1922_v29, %s1954_s24  ;;  %871 = vrot.lane.b32.xlu1 %v1923_v30, %s1954_s24 }
  0x87   : > { %v2141_v34 = vpop.permute.xlu0 %290  ;;  %v297_v36 = vpop.permute.xlu1 %296 }
  0x88   : > { %v304_v35 = vsel %vm302_vm1, %v289_v31, %v2141_v34  ;;  %v1231_v31 = vld [vmem:[%s2415_s3 + $0x10] sm:$0xff] }
  0x89   : > { %904 = vrot.lane.b32.xlu0 %v1918_v27, %s1955_s26  ;;  %1298 = vmatprep.subr.bf16.mxu0 %v304_v35 }
  0x8a   : > { %906 = vrot.lane.b32.xlu1 %v1920_v28, %s1955_s26  ;;  %1299 = vmatpush1.bf16.msra.mxu0 %v303_v33 }
  0x8b   : > { %v2147_v37 = vpop.permute.xlu0 %298  ;;  %v295_v39 = vpop.permute.xlu1 %294 }
  0x8c   : > { %v307_v38 = vsel %vm302_vm1, %v297_v36, %v2147_v37  ;;  %v306_v40 = vsel %vm302_vm1, %v295_v39, %v297_v36 }
  0x8d   : > { %902 = vrot.lane.b32.xlu0 %v1922_v29, %s1955_s26  ;;  %1300 = vmatprep.subr.bf16.mxu0 %v307_v38 }
  0x8e   : > { %908 = vrot.lane.b32.xlu1 %v1923_v30, %s1955_s26  ;;  %1301 = vmatpush1.bf16.msra.mxu0 %v306_v40 }
  0x8f   : > { %v365_v41 = vpop.permute.xlu0 %364  ;;  %v2154_v42 = vpop.permute.xlu1 %366 }
  0x90   : > { %v380_v43 = vsel %vm378_vm2, %v365_v41, %v2154_v42 }
  0x91   : > { %941 = vrot.lane.b32.xlu0 %v1918_v27, %s1956_s30  ;;  %1302 = vmatprep.subr.bf16.mxu0 %v380_v43 }
  0x92   : > { %943 = vrot.lane.b32.xlu1 %v1920_v28, %s1956_s30 }
  0x93   : > { %v363_v44 = vpop.permute.xlu0 %362  ;;  %v373_v46 = vpop.permute.xlu1 %372 }
  0x94   : > { %v379_v45 = vsel %vm378_vm2, %v363_v44, %v365_v41 }
  0x95   : > { %939 = vrot.lane.b32.xlu0 %v1922_v29, %s1956_s30  ;;  %1303 = vmatpush1.bf16.msra.mxu0 %v379_v45 }
  0x96   : > { %945 = vrot.lane.b32.xlu1 %v1923_v30, %s1956_s30 }
  0x97   : > { %v2165_v48 = vpop.permute.xlu0 %374  ;;  %v371_v50 = vpop.permute.xlu1 %370 }
  0x98   : > { %v383_v49 = vsel %vm378_vm2, %v373_v46, %v2165_v48  ;;  %v382_v51 = vsel %vm378_vm2, %v371_v50, %v373_v46 }
  0x99   : > { %978 = vrot.lane.b32.xlu0 %v1918_v27, %s1957_s6  ;;  %1304 = vmatprep.subr.bf16.mxu0 %v383_v49  ;;  %v1229_v27 = vld [vmem:[%s2415_s3] sm:$0xff] }
  0x9a   : > { %980 = vrot.lane.b32.xlu1 %v1920_v28, %s1957_s6  ;;  %1305 = vmatpush1.bf16.msra.mxu0 %v382_v51 }
  0x9b   : > { %v440_v52 = vpop.permute.xlu0 %439  ;;  %v2172_v53 = vpop.permute.xlu1 %441 }
  0x9c   : > { %v455_v54 = vsel %vm453_vm3, %v440_v52, %v2172_v53 }
  0x9d   : > { %976 = vrot.lane.b32.xlu0 %v1922_v29, %s1957_s6  ;;  %1306 = vmatprep.subr.bf16.mxu0 %v455_v54 }
  0x9e   : > { %982 = vrot.lane.b32.xlu1 %v1923_v30, %s1957_s6  ;;  %v1232_v30 = vld [vmem:[%s2415_s3 + $0x18] sm:$0xff] }
  0x9f   : > { %v438_v56 = vpop.permute.xlu0 %437  ;;  %v448_v58 = vpop.permute.xlu1 %447 }
  0xa0   : > { %v454_v57 = vsel %vm453_vm3, %v438_v56, %v440_v52 }
  0xa1   : > { %1035 = vrot.lane.b32.xlu0 %v2046_v10, %s1958_s7  ;;  %1307 = vmatpush1.bf16.msra.mxu0 %v454_v57 }
  0xa2   : > { %1037 = vrot.lane.b32.xlu1 %v1926_v55, %s1958_s7 }
  0xa3   : > { %v2183_v59 = vpop.permute.xlu0 %449  ;;  %v446_v61 = vpop.permute.xlu1 %445 }
  0xa4   : > { %v458_v60 = vsel %vm453_vm3, %v448_v58, %v2183_v59  ;;  %v457_v62 = vsel %vm453_vm3, %v446_v61, %v448_v58 }
  0xa5   : > { %1033 = vrot.lane.b32.xlu0 %v2049_v11, %s1958_s7  ;;  %1308 = vmatprep.subr.bf16.mxu0 %v458_v60 }
  0xa6   : > { %1066 = vrot.lane.b32.xlu1 %v2046_v10, %s1959_s8  ;;  %1309 = vmatpush1.bf16.msra.mxu0 %v457_v62 }
  0xa7   : > { %v515_v0 = vpop.permute.xlu0 %514  ;;  %v2193_v1 = vpop.permute.xlu1 %516 }
  0xa8   : > { %v530_v2 = vsel %vm528_vm4, %v515_v0, %v2193_v1 }
  0xa9   : > { %1068 = vrot.lane.b32.xlu0 %v1928_v63, %s1959_s8  ;;  %1310 = vmatprep.subr.bf16.mxu0 %v530_v2 }
  0xaa   : > { %1064 = vrot.lane.b32.xlu1 %v2049_v11, %s1959_s8 }
  0xab   : > { %v513_v4 = vpop.permute.xlu0 %512  ;;  %v523_v12 = vpop.permute.xlu1 %522 }
  0xac   : > { %v529_v6 = vsel %vm528_vm4, %v513_v4, %v515_v0 }
  0xad   : > { %1097 = vrot.lane.b32.xlu0 %v2046_v10, %s1960_s9  ;;  %1311 = vmatpush1.bf16.msra.mxu0 %v529_v6 }
  0xae   : > { %1099 = vrot.lane.b32.xlu1 %v1929_v3, %s1960_s9 }
  0xaf   : > { %v2205_v13 = vpop.permute.xlu0 %524  ;;  %v521_v15 = vpop.permute.xlu1 %520 }
  0xb0   : > { %v533_v14 = vsel %vm528_vm4, %v523_v12, %v2205_v13  ;;  %v532_v16 = vsel %vm528_vm4, %v521_v15, %v523_v12 }
  0xb1   : > { %1095 = vrot.lane.b32.xlu0 %v2049_v11, %s1960_s9  ;;  %1312 = vmatprep.subr.bf16.mxu0 %v533_v14 }
  0xb2   : > { %1128 = vrot.lane.b32.xlu1 %v2046_v10, %s1962_s12  ;;  %1313 = vmatpush1.bf16.msra.mxu0 %v532_v16 }
  0xb3   : > { %v293_v18 = vpop.permute.xlu0 %292  ;;  %1314 = vmatprep.subr.bf16.mxu0 %v2020_v5  ;;  %v301_v20 = vpop.permute.xlu1 %300 }
  0xb4   : > { %v305_v19 = vsel %vm302_vm1, %v2141_v34, %v293_v18  ;;  %v308_v21 = vsel %vm302_vm1, %v2147_v37, %v301_v20 }
  0xb5   : > { %318 = vst.msk [vmem:[#allocation2 + $0x10] sm:$0xff] %vm317_vm0, %v305_v19  ;;  %1130 = vrot.lane.b32.xlu0 %v1930_v17, %s1962_s12  ;;  %321 = vst.msk [vmem:[#allocation2 + $0x28] sm:$0xff] %vm317_vm0, %v308_v21  ;;  %v1933_v21 = vld [vmem:[%s2414_s2] ss:$16 sps:$4 sm:$0xff]  }
  0xb6   : > { %1126 = vrot.lane.b32.xlu1 %v2049_v11, %s1962_s12  ;;  %1315 = vmatpush1.bf16.msra.mxu0 %v2025_v7  ;;  %v1230_v7 = vld [vmem:[%s2415_s3 + $0x8] sm:$0xff] }
  0xb7   : > { %v630_v5 = vpop.permute.xlu0 %629  ;;  %1316 = vmatprep.subr.bf16.mxu0 %v2028_v8  ;;  %v632_v22 = vpop.permute.xlu1 %631 }
  0xb8   : > { %v641_v23 = vsel %vm639_vm5, %v630_v5, %v632_v22  ;;  %652 = vst.msk [vmem:[#allocation2 + $0x100] sm:$0xff] %vm317_vm0, %v632_v22 }
  0xb9   : > { %1235 = vperm.xlu0 %1890, %v1229_v27  }
  0xba   : > { %1317 = vmatpush1.bf16.msra.mxu0 %v2031_v9  ;;  %1240 = vperm.xlu1 %1891, %v1230_v7  }
  0xbb   : > { %v369_v24 = vpop.permute.xlu0 %368  ;;  %1318 = vmatprep.subr.bf16.mxu0 %v641_v23  ;;  %v628_v28 = vpop.permute.xlu1 %627 }
  0xbc   : > { %v381_v8 = vsel %vm378_vm2, %v2154_v42, %v369_v24  ;;  %v1150_v29 = vld [vmem:[#allocation2 + $0x10] sm:$0xff]  ;;  %v640_v9 = vsel %vm639_vm5, %v628_v28, %v630_v5  ;;  %v1153_v34 = vld [vmem:[#allocation2 + $0x28] sm:$0xff] }
  0xbd   : > { %393 = vst.msk [vmem:[#allocation2 + $0x40] sm:$0xff] %vm317_vm0, %v381_v8  ;;  %1830 = vmatpush3.bf16.msra.mxu1 %v1150_v29  ;;  %1250 = vperm.xlu0 %1890, %v1232_v30   ;;  %v1937_v5 = vld [vmem:[%s2414_s2 + $0x24] ss:$16 sps:$4 sm:$0xff]   ;;  %v1939_v29 = vld [vmem:[%s2414_s2 + $0x20] ss:$16 sps:$4 sm:$0xff]  }
  0xbe   : > { %1831 = vmatprep.subr.bf16.mxu1 %v1177_v26  ;;  %1319 = vmatpush1.bf16.msra.mxu0 %v640_v9 }
  0xbf   : > { %v636_v32 = vpop.permute.xlu0 %635  ;;  %v638_v33 = vpop.permute.xlu1 %637  ;;  %v1180_v35 = vld [vmem:[#allocation2 + $0x100] sm:$0xff]  ;;  %1245 = vperm.xlu1 %1891, %v1231_v31  }
  0xc0   : > { %v643_v36 = vsel %vm639_vm5, %v636_v32, %v638_v33  ;;  %655 = vst.msk [vmem:[#allocation2 + $0x118] sm:$0xff] %vm317_vm0, %v638_v33 }
  0xc1   : > { %1832 = vmatpush3.bf16.msra.mxu1 %v1153_v34  ;;  %1320 = vmatprep.subr.bf16.mxu0 %v643_v36 }
  0xc2   : > { %1833 = vmatprep.subr.bf16.mxu1 %v1180_v35 }
  0xc3   : > { %v377_v37 = vpop.permute.xlu0 %376  ;;  %v634_v39 = vpop.permute.xlu1 %633 }
  0xc4   : > { %v384_v38 = vsel %vm378_vm2, %v2165_v48, %v377_v37  ;;  %v1156_v40 = vld [vmem:[#allocation2 + $0x40] sm:$0xff]  ;;  %v642_v41 = vsel %vm639_vm5, %v634_v39, %v636_v32  ;;  %v1942_v32 = vld [vmem:[%s2414_s2 + $0xc] ss:$16 sps:$4 sm:$0xff]  }
  0xc5   : > { %396 = vst.msk [vmem:[#allocation2 + $0x58] sm:$0xff] %vm317_vm0, %v384_v38  ;;  %1834 = vmatpush3.bf16.msra.mxu1 %v1156_v40  ;;  %1321 = vmatpush1.bf16.msra.mxu0 %v642_v41 }
  0xc7   : > { %v693_v42 = vpop.permute.xlu0 %692  ;;  %v695_v43 = vpop.permute.xlu1 %694  ;;  %v1183_v44 = vld [vmem:[#allocation2 + $0x118] sm:$0xff] }
  0xc8   : > { %v704_v45 = vsel %vm702_vm6, %v693_v42, %v695_v43  ;;  %715 = vst.msk [vmem:[#allocation2 + $0x130] sm:$0xff] %vm317_vm0, %v695_v43  ;;  %1835 = vmatprep.subr.bf16.mxu1 %v1183_v44 }
  0xc9   : > { %1322 = vmatprep.subr.bf16.mxu0 %v704_v45 }
  0xcb   : > { %v444_v46 = vpop.permute.xlu0 %443  ;;  %v691_v48 = vpop.permute.xlu1 %690 }
  0xcc   : > { %v456_v47 = vsel %vm453_vm3, %v2172_v53, %v444_v46  ;;  %v1159_v49 = vld [vmem:[#allocation2 + $0x58] sm:$0xff]  ;;  %v703_v50 = vsel %vm702_vm6, %v691_v48, %v693_v42 }
  0xcd   : > { %468 = vst.msk [vmem:[#allocation2 + $0x70] sm:$0xff] %vm317_vm0, %v456_v47  ;;  %1836 = vmatpush3.bf16.msra.mxu1 %v1159_v49  ;;  %1323 = vmatpush1.bf16.msra.mxu0 %v703_v50 }
  0xcf   : > { %v699_v51 = vpop.permute.xlu0 %698  ;;  %v701_v52 = vpop.permute.xlu1 %700  ;;  %v1186_v54 = vld [vmem:[#allocation2 + $0x130] sm:$0xff] }
  0xd0   : > { %v706_v55 = vsel %vm702_vm6, %v699_v51, %v701_v52  ;;  %718 = vst.msk [vmem:[#allocation2 + $0x148] sm:$0xff] %vm317_vm0, %v701_v52  ;;  %1837 = vmatprep.subr.bf16.mxu1 %v1186_v54 }
  0xd1   : > { %1324 = vmatprep.subr.bf16.mxu0 %v706_v55 }
  0xd3   : > { %v452_v56 = vpop.permute.xlu0 %451  ;;  %v697_v57 = vpop.permute.xlu1 %696 }
  0xd4   : > { %v459_v53 = vsel %vm453_vm3, %v2183_v59, %v452_v56  ;;  %v1162_v58 = vld [vmem:[#allocation2 + $0x70] sm:$0xff]  ;;  %v705_v60 = vsel %vm702_vm6, %v697_v57, %v699_v51 }
  0xd5   : > { %471 = vst.msk [vmem:[#allocation2 + $0x88] sm:$0xff] %vm317_vm0, %v459_v53  ;;  %1838 = vmatpush3.bf16.msra.mxu1 %v1162_v58  ;;  %1325 = vmatpush1.bf16.msra.mxu0 %v705_v60 }
  0xd7   : > { %v756_v61 = vpop.permute.xlu0 %755  ;;  %v758_v62 = vpop.permute.xlu1 %757  ;;  %v1189_v63 = vld [vmem:[#allocation2 + $0x148] sm:$0xff] }
  0xd8   : > { %v767_v0 = vsel %vm765_vm7, %v756_v61, %v758_v62  ;;  %778 = vst.msk [vmem:[#allocation2 + $0x160] sm:$0xff] %vm317_vm0, %v758_v62  ;;  %1839 = vmatprep.subr.bf16.mxu1 %v1189_v63 }
  0xd9   : > { %1326 = vmatprep.subr.bf16.mxu0 %v767_v0 }
  0xdb   : > { %v519_v2 = vpop.permute.xlu0 %518  ;;  %v754_v3 = vpop.permute.xlu1 %753 }
  0xdc   : > { %v531_v59 = vsel %vm528_vm4, %v2193_v1, %v519_v2  ;;  %v1165_v4 = vld [vmem:[#allocation2 + $0x88] sm:$0xff]  ;;  %v766_v6 = vsel %vm765_vm7, %v754_v3, %v756_v61 }
  0xdd   : > { %543 = vst.msk [vmem:[#allocation2 + $0xa0] sm:$0xff] %vm317_vm0, %v531_v59  ;;  %1840 = vmatpush3.bf16.msra.mxu1 %v1165_v4  ;;  %1327 = vmatpush1.bf16.msra.mxu0 %v766_v6 }
  0xdf   : > { %v762_v12 = vpop.permute.xlu0 %761  ;;  %v764_v14 = vpop.permute.xlu1 %763  ;;  %v1192_v15 = vld [vmem:[#allocation2 + $0x160] sm:$0xff] }
  0xe0   : > { %v769_v16 = vsel %vm765_vm7, %v762_v12, %v764_v14  ;;  %781 = vst.msk [vmem:[#allocation2 + $0x178] sm:$0xff] %vm317_vm0, %v764_v14  ;;  %1841 = vmatprep.subr.bf16.mxu1 %v1192_v15 }
  0xe1   : > { %1328 = vmatprep.subr.bf16.mxu0 %v769_v16 }
  0xe3   : > { %v527_v17 = vpop.permute.xlu0 %526  ;;  %v760_v18 = vpop.permute.xlu1 %759 }
  0xe4   : > { %v534_v1 = vsel %vm528_vm4, %v2205_v13, %v527_v17  ;;  %v1168_v19 = vld [vmem:[#allocation2 + $0xa0] sm:$0xff]  ;;  %v768_v20 = vsel %vm765_vm7, %v760_v18, %v762_v12 }
  0xe5   : > { %546 = vst.msk [vmem:[#allocation2 + $0xb8] sm:$0xff] %vm317_vm0, %v534_v1  ;;  %1842 = vmatpush3.bf16.msra.mxu1 %v1168_v19  ;;  %1329 = vmatpush1.bf16.msra.mxu0 %v768_v20 }
  0xe7   : > { %v819_v22 = vpop.permute.xlu0 %818  ;;  %v821_v23 = vpop.permute.xlu1 %820  ;;  %v1195_v13 = vld [vmem:[#allocation2 + $0x178] sm:$0xff] }
  0xe8   : > { %v830_v24 = vsel %vm828_vm8, %v819_v22, %v821_v23  ;;  %841 = vst.msk [vmem:[#allocation2 + $0x190] sm:$0xff] %vm317_vm0, %v821_v23  ;;  %1843 = vmatprep.subr.bf16.mxu1 %v1195_v13  ;;  %1331 = vmatmul.mubr.bf16.vlgmr.msra.gmra.mrb[0].mxu0 %v1933_v21 }
  0xe9   : > { %1351 = vmatprep.subr.bf16.mxu0 %v830_v24  ;;  %1340 = vmatprep.mubr.bf16.mxu0 %v1937_v5 }
  0xeb   : > { %v817_v26 = vpop.permute.xlu0 %816  ;;  %v825_v7 = vpop.permute.xlu1 %824 }
  0xec   : > { %v829_v27 = vsel %vm828_vm8, %v817_v26, %v819_v22  ;;  %v1171_v8 = vld [vmem:[#allocation2 + $0xb8] sm:$0xff] }
  0xed   : > { %1844 = vmatpush3.bf16.msra.mxu1 %v1171_v8  ;;  %1352 = vmatpush1.bf16.msra.mxu0 %v829_v27 }
  0xee   : > { %1453 = vmatprep.subr.bf16.mxu1 %v1961_v25 }
  0xef   : > { %v827_v28 = vpop.permute.xlu0 %826  ;;  %v823_v30 = vpop.permute.xlu1 %822  ;;  %v1198_v31 = vld [vmem:[#allocation2 + $0x190] sm:$0xff] }
  0xf0   : > { %v832_v9 = vsel %vm828_vm8, %v825_v7, %v827_v28  ;;  %844 = vst.msk [vmem:[#allocation2 + $0x1a8] sm:$0xff] %vm317_vm0, %v827_v28  ;;  %1437 = vmatmul.mubr.bf16.vlgmr.msra.gmra.mrb[0].mxu1 %v1933_v21  ;;  %v831_v33 = vsel %vm828_vm8, %v823_v30, %v825_v7  ;;  %1341 = vmatmul.mubr.bf16.gmra.mrb[4].mxu0 %v1939_v29 }
  0xf1   : > { %1454 = vmatpush1.bf16.msra.mxu1 %v1198_v31  ;;  %1353 = vmatprep.subr.bf16.mxu0 %v832_v9  ;;  %v1943_v9 = vld [vmem:[%s2414_s2 + $0x2c] ss:$16 sps:$4 sm:$0xff]   ;;  %v1945_v31 = vld [vmem:[%s2414_s2 + $0x28] ss:$16 sps:$4 sm:$0xff]  }
  0xf2   : > { %1455 = vmatprep.subr.bf16.mxu1 %v1961_v25  ;;  %1354 = vmatpush1.bf16.msra.mxu0 %v831_v33 }
  0xf3   : > { %v868_v34 = vpop.permute.xlu0 %867  ;;  %1444 = vmatprep.mubr.bf16.mxu1 %v1937_v5  ;;  %v870_v35 = vpop.permute.xlu1 %869  ;;  %1804 = vmatprep.mubr.msk.bf16.mxu0 %vm1291_vm9, %v1942_v32 }
  0xf4   : > { %v874_v36 = vsel %vm302_vm1, %v868_v34, %v870_v35 }
  0xf5   : > { %1355 = vmatprep.subr.bf16.mxu0 %v874_v36 }
  0xf7   : > { %v866_v37 = vpop.permute.xlu0 %865  ;;  %v1201_v38 = vld [vmem:[#allocation2 + $0x1a8] sm:$0xff]  ;;  %v872_v40 = vpop.permute.xlu1 %871 }
  0xf8   : > { %v873_v39 = vsel %vm302_vm1, %v866_v37, %v868_v34  ;;  %1456 = vmatpush1.bf16.msra.mxu1 %v1201_v38  ;;  %v875_v41 = vsel %vm302_vm1, %v870_v35, %v872_v40 }
  0xf9   : > { %1457 = vmatprep.subr.bf16.mxu1 %v1961_v25  ;;  %1356 = vmatpush1.bf16.msra.mxu0 %v873_v39  ;;  %881 = vst.msk [vmem:[#allocation2 + $0x1c0] sm:$0xff] %vm317_vm0, %v875_v41 }
  0xfa   : > { %1445 = vmatmul.mubr.bf16.gmra.mrb[4].mxu1 %v1939_v29  ;;  %v1940_v29 = vld [vmem:[%s2414_s2 + $0x8] ss:$16 sps:$4 sm:$0xff]  }
  0xfb   : > { %v905_v42 = vpop.permute.xlu0 %904  ;;  %1806 = vmatprep.mubr.msk.bf16.mxu1 %vm1291_vm9, %v1942_v32 }
  0xfc   : > { %v907_v43 = vpop.permute.xlu1 %906 }
  0xfd   : > { %v911_v44 = vsel %vm378_vm2, %v905_v42, %v907_v43 }
  0xfe   : > { %1357 = vmatprep.subr.bf16.mxu0 %v911_v44  ;;  %v1540_v44 = vlaneseq }
  0xff   : > { %v903_v45 = vpop.permute.xlu0 %902 }
 0x100   : > { %v910_v46 = vsel %vm378_vm2, %v903_v45, %v905_v42  ;;  %v909_v47 = vpop.permute.xlu1 %908  ;;  %v1204_v49 = vld [vmem:[#allocation2 + $0x1c0] sm:$0xff]  ;;  %v1541_v45 = vshrl.u32 %v1540_v44, 7 }
 0x101   : > { %v912_v48 = vsel %vm378_vm2, %v907_v43, %v909_v47  ;;  %1358 = vmatpush1.bf16.msra.mxu0 %v910_v46  ;;  %1458 = vmatpush1.bf16.msra.mxu1 %v1204_v49  ;;  %v1538_v47 = vld [vmem:[%s2416_s4] sm:$0x7] }
 0x102   : > { %918 = vst.msk [vmem:[#allocation2 + $0x1d8] sm:$0xff] %vm317_vm0, %v912_v48  ;;  %1459 = vmatprep.subr.bf16.mxu1 %v1961_v25  ;;  %v1542_v46 = vsub.s32 0, %v1541_v45  ;;  %v1546_v48 = vsub.s32 1, %v1541_v45 }
 0x103   : > { %v942_v50 = vpop.permute.xlu0 %941 }
 0x104   : > { %v944_v51 = vpop.permute.xlu1 %943 }
 0x105   : > { %v948_v52 = vsel %vm453_vm3, %v942_v50, %v944_v51 }
 0x106   : > { %1359 = vmatprep.subr.bf16.mxu0 %v948_v52 }
 0x107   : > { %v940_v54 = vpop.permute.xlu0 %939 }
 0x108   : > { %v947_v55 = vsel %vm453_vm3, %v940_v54, %v942_v50  ;;  %v946_v56 = vpop.permute.xlu1 %945  ;;  %v1550_v50 = vsub.s32 2, %v1541_v45 }
 0x109   : > { %v949_v53 = vsel %vm453_vm3, %v944_v51, %v946_v56  ;;  %v1207_v57 = vld [vmem:[#allocation2 + $0x1d8] sm:$0xff]  ;;  %1360 = vmatpush1.bf16.msra.mxu0 %v947_v55  ;;  %v2366_v56 = vrot.slane %v1538_v47, %v1542_v46 }
 0x10a   : > { %955 = vst.msk [vmem:[#allocation2 + $0x1f0] sm:$0xff] %vm317_vm0, %v949_v53  ;;  %1460 = vmatpush1.bf16.msra.mxu1 %v1207_v57 }
 0x10b   : > { %v979_v58 = vpop.permute.xlu0 %978  ;;  %1461 = vmatprep.subr.bf16.mxu1 %v1961_v25 }
 0x10c   : > { %v981_v60 = vpop.permute.xlu1 %980 }
 0x10d   : > { %v985_v61 = vsel %vm528_vm4, %v979_v58, %v981_v60 }
 0x10e   : > { %1361 = vmatprep.subr.bf16.mxu0 %v985_v61 }
 0x10f   : > { %v977_v62 = vpop.permute.xlu0 %976 }
 0x110   : > { %v984_v63 = vsel %vm528_vm4, %v977_v62, %v979_v58  ;;  %v983_v0 = vpop.permute.xlu1 %982 }
 0x111   : > { %v986_v2 = vsel %vm528_vm4, %v981_v60, %v983_v0  ;;  %v1210_v59 = vld [vmem:[#allocation2 + $0x1f0] sm:$0xff]  ;;  %1362 = vmatpush1.bf16.msra.mxu0 %v984_v63  ;;  %v2368_v60 = vrot.slane %v1538_v47, %v1546_v48  ;;  %v2370_v63 = vrot.slane %v1538_v47, %v1550_v50 }
 0x112   : > { %992 = vst.msk [vmem:[#allocation2 + $0x208] sm:$0xff] %vm317_vm0, %v986_v2  ;;  %1462 = vmatpush1.bf16.msra.mxu1 %v1210_v59  ;;  %1363 = vmatprep.subr.bf16.mxu0 %v2046_v10  ;;  %v1216_v10 = vld [vmem:[#allocation2 + $0x220] sm:$0xff] }
 0x113   : > { %v1036_v3 = vpop.permute.xlu0 %1035  ;;  %1463 = vmatprep.subr.bf16.mxu1 %v1961_v25 }
 0x114   : > { %v1038_v4 = vpop.permute.xlu1 %1037 }
 0x115   : > { %v1040_v6 = vsel %vm639_vm5, %v1036_v3, %v1038_v4  ;;  %1046 = vst.msk [vmem:[#allocation2 + $0x238] sm:$0xff] %vm317_vm0, %v1038_v4  ;;  %1364 = vmatpush1.bf16.msra.mxu0 %v2049_v11 }
 0x116   : > { %1365 = vmatprep.subr.bf16.mxu0 %v1040_v6 }
 0x117   : > { %v1034_v12 = vpop.permute.xlu0 %1033 }
 0x118   : > { %v1039_v14 = vsel %vm639_vm5, %v1034_v12, %v1036_v3  ;;  %v1067_v15 = vpop.permute.xlu1 %1066 }
 0x119   : > { %v1213_v16 = vld [vmem:[#allocation2 + $0x208] sm:$0xff]  ;;  %1366 = vmatpush1.bf16.msra.mxu0 %v1039_v14 }
 0x11a   : > { %1464 = vmatpush1.bf16.msra.mxu1 %v1213_v16 }
 0x11b   : > { %v1069_v17 = vpop.permute.xlu0 %1068  ;;  %1465 = vmatprep.subr.bf16.mxu1 %v1961_v25 }
 0x11c   : > { %v1071_v1 = vsel %vm702_vm6, %v1067_v15, %v1069_v17  ;;  %1077 = vst.msk [vmem:[#allocation2 + $0x250] sm:$0xff] %vm317_vm0, %v1069_v17  ;;  %v1065_v18 = vpop.permute.xlu1 %1064  ;;  %v1219_v20 = vld [vmem:[#allocation2 + $0x238] sm:$0xff] }
 0x11d   : > { %v1070_v19 = vsel %vm702_vm6, %v1065_v18, %v1067_v15  ;;  %1367 = vmatprep.subr.bf16.mxu0 %v1071_v1 }
 0x11e   : > { %1466 = vmatpush1.bf16.msra.mxu1 %v1216_v10  ;;  %1368 = vmatpush1.bf16.msra.mxu0 %v1070_v19 }
 0x11f   : > { %v1098_v11 = vpop.permute.xlu0 %1097  ;;  %1467 = vmatprep.subr.bf16.mxu1 %v1961_v25 }
 0x120   : > { %v1100_v21 = vpop.permute.xlu1 %1099 }
 0x121   : > { %v1102_v5 = vsel %vm765_vm7, %v1098_v11, %v1100_v21  ;;  %1108 = vst.msk [vmem:[#allocation2 + $0x268] sm:$0xff] %vm317_vm0, %v1100_v21 }
 0x122   : > { %1468 = vmatpush1.bf16.msra.mxu1 %v1219_v20  ;;  %1369 = vmatprep.subr.bf16.mxu0 %v1102_v5 }
 0x123   : > { %v1096_v22 = vpop.permute.xlu0 %1095  ;;  %1469 = vmatprep.subr.bf16.mxu1 %v1961_v25  ;;  %v1222_v23 = vld [vmem:[#allocation2 + $0x250] sm:$0xff] }
 0x124   : > { %v1101_v13 = vsel %vm765_vm7, %v1096_v22, %v1098_v11  ;;  %v1129_v24 = vpop.permute.xlu1 %1128 }
 0x125   : > { %1370 = vmatpush1.bf16.msra.mxu0 %v1101_v13 }
 0x126   : > { %1470 = vmatpush1.bf16.msra.mxu1 %v1222_v23 }
 0x127   : > { %v1131_v26 = vpop.permute.xlu0 %1130  ;;  %1471 = vmatprep.subr.bf16.mxu1 %v1961_v25 }
 0x128   : > { %v1133_v27 = vsel %vm828_vm8, %v1129_v24, %v1131_v26  ;;  %1139 = vst.msk [vmem:[#allocation2 + $0x280] sm:$0xff] %vm317_vm0, %v1131_v26  ;;  %v1127_v7 = vpop.permute.xlu1 %1126  ;;  %v1225_v8 = vld [vmem:[#allocation2 + $0x268] sm:$0xff] }
 0x129   : > { %v1132_v28 = vsel %vm828_vm8, %v1127_v7, %v1129_v24  ;;  %1371 = vmatprep.subr.bf16.mxu0 %v1133_v27 }
 0x12a   : > { %1472 = vmatpush1.bf16.msra.mxu1 %v1225_v8  ;;  %1372 = vmatpush1.bf16.msra.mxu0 %v1132_v28 }
 0x12b   : > { %1473 = vmatprep.subr.bf16.mxu1 %v1961_v25 }
 0x12d   : > { %1384 = vmatmul.mubr.bf16.vlgmr.msra.gmra.mrb[0].mxu0 %v1940_v29 }
 0x12e   : > { %1805 = vmatprep.mubr.msk.bf16.mxu0 %vm1291_vm9, %v1943_v9 }
 0x12f   : > { %v1228_v30 = vld [vmem:[#allocation2 + $0x280] sm:$0xff] }
 0x130   : > { %1474 = vmatpush1.bf16.msra.mxu1 %v1228_v30 }
 0x133   : > { %1486 = vmatmul.mubr.bf16.vlgmr.msra.gmra.mrb[8].mxu1 %v1940_v29 }
 0x134   : > { %1807 = vmatprep.mubr.msk.bf16.mxu1 %vm1291_vm9, %v1943_v9 }
 0x135   : > { %1394 = vmatmul.mubr.bf16.gmra.mrb[4].mxu0 %v1945_v31 }
 0x138   : > { %v1236_v49 = vpop.permute.xlu0 %1235 }
 0x139   : > { %v1241_v52 = vpop.permute.xlu1 %1240 }
 0x13b   : > { %1494 = vmatmul.mubr.bf16.gmra.mrb[12].mxu1 %v1945_v31 }
 0x13c   : > { %v1251_v17 = vpop.permute.xlu0 %1250 }
 0x13e   : > { %v1246_v59 = vpop.permute.xlu1 %1245 }
 0x1c3   : > { %v1845_v32 = vpop.f32.mrb[0].mxu1 }
 0x1c4   : > { %v1846_v33 = vpop.f32.mrb[1].mxu1 }
 0x1c5   : > { %v1847_v34 = vadd.f32 %v1846_v33, %v1845_v32  ;;  %v1848_v35 = vpop.f32.mrb[2].mxu1 }
 0x1c6   : > { %v1849_v36 = vpop.f32.mrb[3].mxu1 }
 0x1c7   : > { %v1850_v37 = vadd.f32 %v1849_v36, %v1848_v35  ;;  %v1439_v3 = vadd.f32 %v1847_v34, %v1236_v49 }
 0x1c9   : > { %v1442_v18 = vadd.f32 %v1850_v37, %v1241_v52 }
 0x1cd   : > { %v1851_v38 = vpop.f32.mrb[4].mxu1 }
 0x1ce   : > { %v1852_v39 = vpop.f32.mrb[5].mxu1 }
 0x1cf   : > { %v1853_v40 = vadd.f32 %v1852_v39, %v1851_v38  ;;  %v1854_v41 = vpop.f32.mrb[6].mxu1 }
 0x1d0   : > { %v1855_v42 = vpop.f32.mrb[7].mxu1 }
 0x1d1   : > { %v1856_v43 = vadd.f32 %v1855_v42, %v1854_v41  ;;  %v1447_v20 = vadd.f32 %v1853_v40, %v1246_v59 }
 0x1d3   : > { %v1450_v8 = vadd.f32 %v1856_v43, %v1251_v17 }
 0x200   : > { %v1385_v51 = vpop.f32.mrb[0].mxu0 }
 0x201   : > { %v1857_v54 = vadd.f32 %v1385_v51, %v1236_v49  ;;  %v1387_v55 = vpop.f32.mrb[1].mxu0 }
 0x202   : > { %v1858_v53 = vadd.f32 %v1387_v55, %v1236_v49  ;;  %v1389_v57 = vpop.f32.mrb[2].mxu0 }
 0x203   : > { %vm1502_vm10 = vcmp.ge.f32.partialorder %v1857_v54, 0.0  ;;  %v1514_v58 = vmul.f32 0.2, %v1857_v54  ;;  %v1859_v61 = vadd.f32 %v1389_v57, %v1241_v52  ;;  %v1391_v62 = vpop.f32.mrb[3].mxu0 }
 0x204   : > { %vm1503_vm11 = vcmp.ge.f32.partialorder %v1858_v53, 0.0  ;;  %v1515_v0 = vmul.f32 0.2, %v1858_v53  ;;  %v1860_v2 = vadd.f32 %v1391_v62, %v1241_v52 }
 0x205   : > { %v1526_v4 = vsel %vm1502_vm10, %v1857_v54, %v1514_v58  ;;  %vm1505_vm13 = vcmp.ge.f32.partialorder %v1859_v61, 0.0  ;;  %v1517_v6 = vmul.f32 0.2, %v1859_v61 }
 0x206   : > { %v1487_v12 = vpop.f32.mrb[8].mxu1  ;;  %v1555_v14 = vmul.f32 %v2366_v56, %v1526_v4  ;;  %v1527_v15 = vsel %vm1503_vm11, %v1858_v53, %v1515_v0  ;;  %vm1506_vm14 = vcmp.ge.f32.partialorder %v1860_v2, 0.0  ;;  %v1518_v16 = vmul.f32 0.2, %v1860_v2 }
 0x207   : > { %v1488_v10 = vadd.f32 %v1487_v12, %v1439_v3  ;;  %v1489_v1 = vpop.f32.mrb[9].mxu1  ;;  %v1556_v19 = vmul.f32 %v2368_v60, %v1527_v15  ;;  %v1529_v11 = vsel %vm1505_vm13, %v1859_v61, %v1517_v6 }
 0x208   : > { %v1490_v21 = vpop.f32.mrb[10].mxu1  ;;  %v1558_v5 = vmul.f32 %v2366_v56, %v1529_v11  ;;  %v1530_v22 = vsel %vm1506_vm14, %v1860_v2, %v1518_v16  ;;  %v1395_v23 = vpop.f32.mrb[4].mxu0 }
 0x209   : > { %vm1504_vm0 = vcmp.ge.f32.partialorder %v1488_v10, 0.0  ;;  %v1516_v13 = vmul.f32 0.2, %v1488_v10  ;;  %v1491_v24 = vadd.f32 %v1490_v21, %v1442_v18  ;;  %v1821_v26 = vpack.c.bf16 %v1556_v19, %v1555_v14  ;;  %v1492_v27 = vpop.f32.mrb[11].mxu1  ;;  %v1397_v7 = vpop.f32.mrb[5].mxu0 }
 0x20a   : > { %v1559_v28 = vmul.f32 %v2368_v60, %v1530_v22  ;;  %v1861_v29 = vadd.f32 %v1395_v23, %v1246_v59  ;;  %v1862_v9 = vadd.f32 %v1397_v7, %v1246_v59  ;;  %v1399_v30 = vpop.f32.mrb[6].mxu0 }
 0x20b   : > { %v1528_v31 = vsel %vm1504_vm0, %v1488_v10, %v1516_v13  ;;  %vm1507_vm1 = vcmp.ge.f32.partialorder %v1491_v24, 0.0  ;;  %v1519_v32 = vmul.f32 0.2, %v1491_v24  ;;  %1611 = vst [vmem:[%s2353_s15 + $0x4] sm:$0xff] %v1821_v26  ;;  %v1863_v33 = vadd.f32 %v1399_v30, %v1251_v17  ;;  %v1401_v34 = vpop.f32.mrb[7].mxu0 }
 0x20c   : > { %v1557_v35 = vmul.f32 %v2370_v63, %v1528_v31  ;;  %v1823_v36 = vpack.c.bf16 %v1559_v28, %v1558_v5  ;;  %vm1508_vm2 = vcmp.ge.f32.partialorder %v1861_v29, 0.0  ;;  %v1520_v37 = vmul.f32 0.2, %v1861_v29 }
 0x20d   : > { %v1531_v38 = vsel %vm1507_vm1, %v1491_v24, %v1519_v32  ;;  %vm1509_vm3 = vcmp.ge.f32.partialorder %v1862_v9, 0.0  ;;  %v1521_v39 = vmul.f32 0.2, %v1862_v9  ;;  %vm1511_vm4 = vcmp.ge.f32.partialorder %v1863_v33, 0.0 }
 0x20e   : > { %v1822_v40 = vpack.c.bf16 %v1557_v35, %v1557_v35  ;;  %v1560_v41 = vmul.f32 %v2370_v63, %v1531_v38  ;;  %1614 = vst [vmem:[%s2353_s15 + $0x14] sm:$0xff] %v1823_v36  ;;  %v1495_v42 = vpop.f32.mrb[12].mxu1  ;;  %v1532_v43 = vsel %vm1508_vm2, %v1861_v29, %v1520_v37  ;;  %v1523_v44 = vmul.f32 0.2, %v1863_v33 }
 0x20f   : > { %v1496_v45 = vadd.f32 %v1495_v42, %v1447_v20  ;;  %v1497_v46 = vpop.f32.mrb[13].mxu1  ;;  %v1561_v47 = vmul.f32 %v2366_v56, %v1532_v43  ;;  %v1533_v48 = vsel %vm1509_vm3, %v1862_v9, %v1521_v39  ;;  %v1864_v49 = vadd.f32 %v1401_v34, %v1251_v17 }
 0x210   : > { %1613 = vst.msk [vmem:[%s2353_s15 + $0xc] sm:$0xf] %vm1612_vm12, %v1822_v40  ;;  %v1824_v50 = vpack.c.bf16 %v1560_v41, %v1560_v41  ;;  %v1498_v51 = vpop.f32.mrb[14].mxu1  ;;  %v1562_v52 = vmul.f32 %v2368_v60, %v1533_v48  ;;  %v1535_v54 = vsel %vm1511_vm4, %v1863_v33, %v1523_v44 }
 0x211   : > { %1621 = vst.msk [vmem:[%s2353_s15 + $0xc] sm:$0xf] %vm1620_vm15, %v1961_v25  ;;  %vm1510_vm5 = vcmp.ge.f32.partialorder %v1496_v45, 0.0  ;;  %v1522_v55 = vmul.f32 0.2, %v1496_v45  ;;  %v1499_v53 = vadd.f32 %v1498_v51, %v1450_v8  ;;  %v1500_v57 = vpop.f32.mrb[15].mxu1  ;;  %v1564_v2 = vmul.f32 %v2366_v56, %v1535_v54 }
 0x212   : > { %1615 = vst.msk [vmem:[%s2353_s15 + $0x1c] sm:$0xf] %vm1612_vm12, %v1824_v50  ;;  %v1825_v58 = vpack.c.bf16 %v1562_v52, %v1561_v47  ;;  %vm1512_vm6 = vcmp.ge.f32.partialorder %v1864_v49, 0.0  ;;  %v1524_v61 = vmul.f32 0.2, %v1864_v49 }
 0x213   : > { %1622 = vst.msk [vmem:[%s2353_s15 + $0x1c] sm:$0xf] %vm1620_vm15, %v1961_v25  ;;  %v1534_v62 = vsel %vm1510_vm5, %v1496_v45, %v1522_v55  ;;  %vm1513_vm7 = vcmp.ge.f32.partialorder %v1499_v53, 0.0  ;;  %v1525_v0 = vmul.f32 0.2, %v1499_v53 }
 0x214   : > { %v1563_v59 = vmul.f32 %v2370_v63, %v1534_v62  ;;  %1616 = vst [vmem:[%s2353_s15 + $0x24] sm:$0xff] %v1825_v58  ;;  %v1536_v3 = vsel %vm1512_vm6, %v1864_v49, %v1524_v61 }
 0x215   : > { %v1537_v4 = vsel %vm1513_vm7, %v1499_v53, %v1525_v0  ;;  %v1565_v6 = vmul.f32 %v2368_v60, %v1536_v3 }
 0x216   : > { %v1826_v12 = vpack.c.bf16 %v1563_v59, %v1563_v59  ;;  %v1566_v14 = vmul.f32 %v2370_v63, %v1537_v4 }
 0x217   : > { %v1827_v15 = vpack.c.bf16 %v1565_v6, %v1564_v2 }
 0x218   : > { %1617 = vst.msk [vmem:[%s2353_s15 + $0x2c] sm:$0xf] %vm1612_vm12, %v1826_v12  ;;  %v1828_v16 = vpack.c.bf16 %v1566_v14, %v1566_v14 }
 0x219   : > { %1623 = vst.msk [vmem:[%s2353_s15 + $0x2c] sm:$0xf] %vm1620_vm15, %v1961_v25  ;;  %1618 = vst [vmem:[%s2353_s15 + $0x34] sm:$0xff] %v1827_v15 }
 0x21a   : > { %1619 = vst.msk [vmem:[%s2353_s15 + $0x3c] sm:$0xf] %vm1612_vm12, %v1828_v16 }
 0x21b   : > { %1624 = vst.msk [vmem:[%s2353_s15 + $0x3c] sm:$0xf] %vm1620_vm15, %v1961_v25 }
 0x21c PF: > { %s15_s18 = sadd.s32 1, %s1952_s18  }
 0x21d   : > { %p12_p4 = scmp.ge.s32.totalorder %s15_s18, 4  }
 0x21f   :  { %14 = sbr.rel (!%p12_p4) target bundleno = 1 (0x1), region = 73 }

// kernel: registration_subnet_forward.21
= control target key start
LH: loop header
LB: loop body
LE: loop exit
PB: predicated region body
PF: predicated region fallthrough
CT: control target
= control target key end

     0   :  { %s1322_s21 = smov 0   ;;  %s1588_s0 = inlined_call_operand.vmem [shape: bf16[2,16,433], index: 0, kind: input, shape index: {}]   ;;  %s1589_s1 = inlined_call_operand.vmem [shape: bf16[16,144], index: 1, kind: input, shape index: {}]   ;;  %s1590_s2 = inlined_call_operand.vmem [shape: f32[16,1], index: 2, kind: input, shape index: {}]   ;;  %s1591_s3 = inlined_call_operand.vmem [shape: bf16[2,144], index: 3, kind: input, shape index: {}]   ;;  %s1592_s4 = inlined_call_operand.vmem [shape: f32[2,1], index: 4, kind: input, shape index: {}]   ;;  %s1593_s5 = inlined_call_operand.vmem [shape: f32[1,286], index: 5, kind: input, shape index: {}]   ;;  %s1594_s6 = inlined_call_operand.vmem [shape: f32[2,2,433], index: 6, kind: output, shape index: {}]  }
   0x1 LB: > { %s1177_s22 = sadd.s32 4294967295, %s1273_s21   ;;  %p1181_p0 = scmp.ge.s32.totalorder %s1273_s21, 1  ;;  %s1273_s21 = sphi %s1322_s21, %s16_s21  }
   0x2   : > { %p212_p1 = scmp.lt.s32.totalorder %s1273_s21, 3 }
   0x4   : > { %p213_p2 = pnand %p1181_p0, %p212_p1 }
   0x5   : > { %p242_p3 = scmp.lt.s32.totalorder (!%p213_p2), %s1177_s22, 1  ;;  %s1275_s27 = smov (!%p213_p2), 19   ;;  %v1277_v4 = vmov (!%p213_p2), 0   ;;  %vm290_vm0 = vcmask (!%p213_p2), 244736   ;;  %v1266_v11 = vld [vmem:[%s1589_s1 + $0x4] ss:$8 sps:$4 sm:$0xff] (!%p213_p2)  }
   0x6   : > { %216 = sbr.rel (%p213_p2) target bundleno = 824 (0x338), region = 44  ;;  %s1276_s28 = smov (!%p213_p2), 18   ;;  %654 = vmatprep.subr.bf16.mxu1 (!%p213_p2), %v1277_v4  ;;  %1248 = vset.pattern.permute.xlu0 (!%p213_p2), %v1277_v4  ;;  %vm607_vm1 = vcmask (!%p213_p2), 130048   ;;  %v586_v13 = vld [vmem:[%s1590_s2] sm:$0xff] (!%p213_p2)  ;;  %v587_v14 = vld [vmem:[%s1590_s2 + $0x8] sm:$0xff] (!%p213_p2)  ;;  %vm281_vm2 = vcmask (!%p213_p2), 154624  }
   0x7   : > { %1249 = vset.pattern.permute.xlu1 (!%p213_p2), %v1277_v4  ;;  %s1278_s29 = smov (!%p213_p2), 17   ;;  %s1279_s30 = smov (!%p213_p2), 1   ;;  %1220 = vmatprep.mubr.msk.bf16.mxu1 (!%p213_p2), %vm607_vm1, %v1266_v11  ;;  %vm320_vm3 = vcmask (!%p213_p2), 146432   ;;  %vm358_vm4 = vcmask (!%p213_p2), 138240   ;;  %vm396_vm5 = vcmask (!%p213_p2), 7168   ;;  %vm452_vm6 = vcmask (!%p213_p2), 1039360  }
   0x8   : > { %s1280_s7 = smov (!%p213_p2), 127   ;;  %s1281_s8 = smov (!%p213_p2), 111   ;;  %1219 = vmatprep.mubr.msk.bf16.mxu0 (!%p213_p2), %vm607_vm1, %v1266_v11  ;;  %vm484_vm7 = vcmask (!%p213_p2), 908288   ;;  %vm516_vm8 = vcmask (!%p213_p2), 900096   ;;  %vm548_vm9 = vcmask (!%p213_p2), 891904  }
   0x9   : > { %s1282_s11 = smov (!%p213_p2), 110   ;;  %s1283_s12 = smov (!%p213_p2), 109  }
   0xd   : > { %s1596_s22 = smov (!%p242_p3, %s1177_s22), 1 }
   0xe   : > { %s1226_s23 = sshll.u32 %s1596_s22, 5 }
   0xf   : > { %s1336_s26 = scalar_lea.vmem %s1588_s0, %s1226_s23 }
  0x10   : > { %v1250_v0 = vld [vmem:[%s1336_s26 + $0x4] ss:$16 sps:$4 sm:$0xff]   ;;  %v1252_v1 = vld [vmem:[%s1336_s26] ss:$16 sps:$4 sm:$0xff]   ;;  %v1253_v2 = vld [vmem:[%s1336_s26 + $0x8] ss:$16 sps:$4 sm:$0xff]  }
  0x11   : > { %275 = vrot.lane.b32.xlu0 %v1250_v0, %s1275_s27  ;;  %273 = vrot.lane.b32.xlu1 %v1252_v1, %s1275_s27  ;;  %v1255_v3 = vld [vmem:[%s1336_s26 + $0xc] ss:$16 sps:$4 sm:$0xff]   ;;  %v1363_v6 = vld [vmem:[%s1336_s26 + $0x8] ss:$16 sps:$4 sm:$0xff]  }
  0x12   : > { %v1263_v5 = vld [vmem:[%s1336_s26 + $0xc] ss:$16 sps:$4 sm:$0xff]   ;;  %v1370_v8 = vld [vmem:[%s1336_s26 + $0x4] ss:$16 sps:$4 sm:$0xff]  }
  0x13   : > { %428 = vst.msk [vmem:[#allocation3 + $0x70] sm:$0xff] %vm290_vm0, %v1263_v5  ;;  %v1258_v7 = vld [vmem:[%s1336_s26 + $0xc] ss:$16 sps:$4 sm:$0xff]  }
  0x14   : > { %v1260_v9 = vld [vmem:[%s1336_s26 + $0xc] ss:$16 sps:$4 sm:$0xff]  }
  0x15   : > { %277 = vrot.lane.b32.xlu0 %v1253_v2, %s1275_s27  ;;  %314 = vrot.lane.b32.xlu1 %v1250_v0, %s1276_s28  ;;  %v1261_v10 = vld [vmem:[%s1336_s26 + $0xc] ss:$16 sps:$4 sm:$0xff]  }
  0x16   : > { %v1262_v12 = vld [vmem:[%s1336_s26 + $0xc] ss:$16 sps:$4 sm:$0xff]  }
  0x19   : > { %316 = vrot.lane.b32.xlu0 %v1253_v2, %s1276_s28  ;;  %279 = vrot.lane.b32.xlu1 %v1255_v3, %s1275_s27 }
  0x1a   : > { %v573_v54 = vld [vmem:[#allocation3 + $0x70] sm:$0xff] }
  0x1d   : > { %312 = vrot.lane.b32.xlu0 %v1252_v1, %s1276_s28  ;;  %352 = vrot.lane.b32.xlu1 %v1250_v0, %s1278_s29 }
  0x21   : > { %354 = vrot.lane.b32.xlu0 %v1253_v2, %s1278_s29  ;;  %318 = vrot.lane.b32.xlu1 %v1255_v3, %s1276_s28 }
  0x25   : > { %350 = vrot.lane.b32.xlu0 %v1252_v1, %s1278_s29  ;;  %390 = vrot.lane.b32.xlu1 %v1250_v0, %s1279_s30 }
  0x29   : > { %392 = vrot.lane.b32.xlu0 %v1253_v2, %s1279_s30  ;;  %356 = vrot.lane.b32.xlu1 %v1255_v3, %s1278_s29 }
  0x2d   : > { %388 = vrot.lane.b32.xlu0 %v1252_v1, %s1279_s30  ;;  %394 = vrot.lane.b32.xlu1 %v1255_v3, %s1279_s30 }
  0x31   : > { %448 = vrot.lane.b32.xlu0 %v1363_v6, %s1280_s7  ;;  %450 = vrot.lane.b32.xlu1 %v1258_v7, %s1280_s7 }
  0x35   : > { %446 = vrot.lane.b32.xlu0 %v1370_v8, %s1280_s7  ;;  %480 = vrot.lane.b32.xlu1 %v1363_v6, %s1281_s8 }
  0x39   : > { %482 = vrot.lane.b32.xlu0 %v1260_v9, %s1281_s8  ;;  %478 = vrot.lane.b32.xlu1 %v1370_v8, %s1281_s8 }
  0x3d   : > { %512 = vrot.lane.b32.xlu0 %v1363_v6, %s1282_s11  ;;  %514 = vrot.lane.b32.xlu1 %v1261_v10, %s1282_s11  ;;  %v715_v10 = vlaneseq }
  0x3f   : > { %v1454_v11 = vshrl.u32 %v715_v10, 7 }
  0x41   : > { %510 = vrot.lane.b32.xlu0 %v1370_v8, %s1282_s11  ;;  %544 = vrot.lane.b32.xlu1 %v1363_v6, %s1283_s12 }
  0x45   : > { %546 = vrot.lane.b32.xlu0 %v1262_v12, %s1283_s12  ;;  %542 = vrot.lane.b32.xlu1 %v1370_v8, %s1283_s12 }
  0x49   : > { %590 = vperm.xlu0 %1248, %v586_v13   ;;  %595 = vperm.xlu1 %1249, %v587_v14   ;;  %v717_v13 = vsub.s32 0, %v1454_v11  ;;  %v713_v14 = vld [vmem:[%s1593_s5] sm:$0x7] }
  0x4d   : > { %753 = vrot.lane.b32.xlu1 %v1277_v4, %s1275_s27 }
  0x51   : > { %778 = vrot.lane.b32.xlu1 %v1277_v4, %s1276_s28 }
  0x55   : > { %803 = vrot.lane.b32.xlu1 %v1277_v4, %s1278_s29 }
  0x59   : > { %828 = vrot.lane.b32.xlu1 %v1277_v4, %s1279_s30 }
  0x83   : > { %v276_v15 = vpop.permute.xlu0 %275  ;;  %v274_v16 = vpop.permute.xlu1 %273 }
  0x84   : > { %v282_v20 = vsel %vm281_vm2, %v274_v16, %v276_v15 }
  0x87   : > { %v278_v17 = vpop.permute.xlu0 %277  ;;  %v315_v19 = vpop.permute.xlu1 %314 }
  0x88   : > { %v283_v18 = vsel %vm281_vm2, %v276_v15, %v278_v17  ;;  %v721_v15 = vsub.s32 1, %v1454_v11 }
  0x89   : > { %611 = vmatprep.subr.bf16.mxu0 %v283_v18 }
  0x8a   : > { %612 = vmatpush1.bf16.msra.mxu0 %v282_v20  ;;  %v718_v20 = vrot.slane %v713_v14, %v717_v13 }
  0x8b   : > { %v317_v21 = vpop.permute.xlu0 %316  ;;  %v280_v23 = vpop.permute.xlu1 %279 }
  0x8c   : > { %v322_v22 = vsel %vm320_vm3, %v315_v19, %v317_v21  ;;  %v284_v24 = vsel %vm281_vm2, %v278_v17, %v280_v23 }
  0x8d   : > { %613 = vmatprep.subr.bf16.mxu0 %v322_v22  ;;  %291 = vst.msk [vmem:[#allocation3 + $0x10] sm:$0xff] %vm290_vm0, %v284_v24  ;;  %v722_v24 = vrot.slane %v713_v14, %v721_v15 }
  0x8f   : > { %v313_v25 = vpop.permute.xlu0 %312  ;;  %v353_v27 = vpop.permute.xlu1 %352 }
  0x90   : > { %v321_v26 = vsel %vm320_vm3, %v313_v25, %v315_v19 }
  0x91   : > { %614 = vmatpush1.bf16.msra.mxu0 %v321_v26 }
  0x93   : > { %v355_v28 = vpop.permute.xlu0 %354  ;;  %v319_v30 = vpop.permute.xlu1 %318 }
  0x94   : > { %v360_v29 = vsel %vm358_vm4, %v353_v27, %v355_v28  ;;  %v323_v31 = vsel %vm320_vm3, %v317_v21, %v319_v30  ;;  %v561_v32 = vld [vmem:[#allocation3 + $0x10] sm:$0xff] }
  0x95   : > { %615 = vmatprep.subr.bf16.mxu0 %v360_v29  ;;  %329 = vst.msk [vmem:[#allocation3 + $0x28] sm:$0xff] %vm290_vm0, %v323_v31  ;;  %655 = vmatpush1.bf16.msra.mxu1 %v561_v32  ;;  %v725_v29 = vsub.s32 2, %v1454_v11 }
  0x96   : > { %656 = vmatprep.subr.bf16.mxu1 %v1277_v4 }
  0x97   : > { %v351_v33 = vpop.permute.xlu0 %350  ;;  %v391_v35 = vpop.permute.xlu1 %390 }
  0x98   : > { %v359_v34 = vsel %vm358_vm4, %v351_v33, %v353_v27 }
  0x99   : > { %616 = vmatpush1.bf16.msra.mxu0 %v359_v34 }
  0x9b   : > { %v393_v36 = vpop.permute.xlu0 %392  ;;  %v357_v38 = vpop.permute.xlu1 %356 }
  0x9c   : > { %v398_v37 = vsel %vm396_vm5, %v391_v35, %v393_v36  ;;  %v361_v39 = vsel %vm358_vm4, %v355_v28, %v357_v38  ;;  %v564_v40 = vld [vmem:[#allocation3 + $0x28] sm:$0xff] }
  0x9d   : > { %617 = vmatprep.subr.bf16.mxu0 %v398_v37  ;;  %367 = vst.msk [vmem:[#allocation3 + $0x40] sm:$0xff] %vm290_vm0, %v361_v39  ;;  %657 = vmatpush1.bf16.msra.mxu1 %v564_v40 }
  0x9e   : > { %658 = vmatprep.subr.bf16.mxu1 %v1277_v4 }
  0x9f   : > { %v389_v41 = vpop.permute.xlu0 %388  ;;  %v395_v43 = vpop.permute.xlu1 %394 }
  0xa0   : > { %v397_v42 = vsel %vm396_vm5, %v389_v41, %v391_v35  ;;  %v399_v44 = vsel %vm396_vm5, %v393_v36, %v395_v43 }
  0xa1   : > { %618 = vmatpush1.bf16.msra.mxu0 %v397_v42  ;;  %405 = vst.msk [vmem:[#allocation3 + $0x58] sm:$0xff] %vm290_vm0, %v399_v44 }
  0xa2   : > { %619 = vmatprep.subr.bf16.mxu0 %v1363_v6 }
  0xa3   : > { %v449_v45 = vpop.permute.xlu0 %448  ;;  %v451_v46 = vpop.permute.xlu1 %450 }
  0xa4   : > { %v454_v47 = vsel %vm452_vm6, %v449_v45, %v451_v46  ;;  %460 = vst.msk [vmem:[#allocation3 + $0x88] sm:$0xff] %vm290_vm0, %v451_v46  ;;  %v567_v48 = vld [vmem:[#allocation3 + $0x40] sm:$0xff] }
  0xa5   : > { %620 = vmatpush1.bf16.msra.mxu0 %v1370_v8  ;;  %659 = vmatpush1.bf16.msra.mxu1 %v567_v48  ;;  %v1264_v8 = vld [vmem:[%s1589_s1] ss:$8 sps:$4 sm:$0xff]  }
  0xa6   : > { %621 = vmatprep.subr.bf16.mxu0 %v454_v47  ;;  %660 = vmatprep.subr.bf16.mxu1 %v1277_v4  ;;  %v726_v47 = vrot.slane %v713_v14, %v725_v29 }
  0xa7   : > { %v447_v49 = vpop.permute.xlu0 %446  ;;  %v481_v51 = vpop.permute.xlu1 %480 }
  0xa8   : > { %v453_v50 = vsel %vm452_vm6, %v447_v49, %v449_v45  ;;  %v570_v52 = vld [vmem:[#allocation3 + $0x58] sm:$0xff] }
  0xa9   : > { %622 = vmatpush1.bf16.msra.mxu0 %v453_v50  ;;  %661 = vmatpush1.bf16.msra.mxu1 %v570_v52 }
  0xaa   : > { %662 = vmatprep.subr.bf16.mxu1 %v1277_v4 }
  0xab   : > { %v483_v53 = vpop.permute.xlu0 %482  ;;  %v479_v56 = vpop.permute.xlu1 %478  ;;  %v576_v59 = vld [vmem:[#allocation3 + $0x88] sm:$0xff] }
  0xac   : > { %v486_v55 = vsel %vm484_vm7, %v481_v51, %v483_v53  ;;  %492 = vst.msk [vmem:[#allocation3 + $0xa0] sm:$0xff] %vm290_vm0, %v483_v53  ;;  %v485_v57 = vsel %vm484_vm7, %v479_v56, %v481_v51 }
  0xad   : > { %623 = vmatprep.subr.bf16.mxu0 %v486_v55  ;;  %663 = vmatpush1.bf16.msra.mxu1 %v573_v54 }
  0xae   : > { %624 = vmatpush1.bf16.msra.mxu0 %v485_v57  ;;  %664 = vmatprep.subr.bf16.mxu1 %v1277_v4  ;;  %v959_v57 = vld [vmem:[%s1592_s4] sm:$0x3] }
  0xaf   : > { %v513_v58 = vpop.permute.xlu0 %512  ;;  %v515_v60 = vpop.permute.xlu1 %514 }
  0xb0   : > { %v518_v61 = vsel %vm516_vm8, %v513_v58, %v515_v60  ;;  %524 = vst.msk [vmem:[#allocation3 + $0xb8] sm:$0xff] %vm290_vm0, %v515_v60 }
  0xb1   : > { %665 = vmatpush1.bf16.msra.mxu1 %v576_v59  ;;  %625 = vmatprep.subr.bf16.mxu0 %v518_v61  ;;  %v1221_v61 = vld.sshfl [vmem:[%s1591_s3] sm:$0x11 pattern:$0x75316420] }
  0xb2   : > { %666 = vmatprep.subr.bf16.mxu1 %v1277_v4 }
  0xb3   : > { %v511_v62 = vpop.permute.xlu0 %510  ;;  %v579_v63 = vld [vmem:[#allocation3 + $0xa0] sm:$0xff]  ;;  %v545_v1 = vpop.permute.xlu1 %544 }
  0xb4   : > { %v517_v0 = vsel %vm516_vm8, %v511_v62, %v513_v58  ;;  %v1284_v58 = vmov 1966171168   ;;  %v973_v62 = vcombine.high %v1221_v61, %v1221_v61 }
  0xb5   : > { %626 = vmatpush1.bf16.msra.mxu0 %v517_v0  ;;  %667 = vmatpush1.bf16.msra.mxu1 %v579_v63  ;;  %v975_v59 = vunpack.c.l.s4 %v1284_v58 }
  0xb6   : > { %668 = vmatprep.subr.bf16.mxu1 %v1277_v4 }
  0xb7   : > { %v547_v2 = vpop.permute.xlu0 %546  ;;  %v543_v5 = vpop.permute.xlu1 %542  ;;  %v582_v6 = vld [vmem:[#allocation3 + $0xb8] sm:$0xff]  ;;  %v976_v60 = vunpack.c.0.s8 %v975_v59 }
  0xb8   : > { %v550_v3 = vsel %vm548_vm9, %v545_v1, %v547_v2  ;;  %556 = vst.msk [vmem:[#allocation3 + $0xd0] sm:$0xff] %vm290_vm0, %v547_v2  ;;  %v549_v7 = vsel %vm548_vm9, %v543_v5, %v545_v1 }
  0xb9   : > { %627 = vmatprep.subr.bf16.mxu0 %v550_v3  ;;  %669 = vmatpush1.bf16.msra.mxu1 %v582_v6  ;;  %v979_v63 = vsub.s32 %v976_v60, %v1454_v11 }
  0xba   : > { %628 = vmatpush1.bf16.msra.mxu0 %v549_v7  ;;  %670 = vmatprep.subr.bf16.mxu1 %v1277_v4 }
  0xbb   : > { %v987_v0 = vrot.slane %v973_v62, %v979_v63  ;;  %v1517_v1 = vrot.slane %v1221_v61, %v979_v63 }
  0xbd   : > { %644 = vmatmul.mubr.bf16.vlgmr.msra.gmra.mrb[0].mxu0 %v1264_v8 }
  0xbe   : > { %1222 = vmatprep.mubr.msk.bf16.mxu0 %vm607_vm1, %v987_v0 }
  0xbf   : > { %v585_v9 = vld [vmem:[#allocation3 + $0xd0] sm:$0xff] }
  0xc0   : > { %671 = vmatpush1.bf16.msra.mxu1 %v585_v9 }
  0xc1   : > { %1033 = vmatprep.subr.bf16.mxu1 %v1277_v4 }
  0xc3   : > { %687 = vmatmul.mubr.bf16.vlgmr.msra.gmra.mrb[0].mxu1 %v1264_v8 }
  0xc4   : > { %1223 = vmatprep.mubr.msk.bf16.mxu1 %vm607_vm1, %v987_v0  ;;  %v1285_v0 = vmov 0.0   ;;  %vm1115_vm1 = vcmask 1043458  }
  0xc8   : > { %v591_v12 = vpop.permute.xlu0 %590  ;;  %v596_v17 = vpop.permute.xlu1 %595 }
  0xcc   : > { %v754_v2 = vpop.permute.xlu1 %753 }
  0xd0   : > { %v779_v3 = vpop.permute.xlu1 %778 }
  0xd4   : > { %v804_v5 = vpop.permute.xlu1 %803 }
  0xd8   : > { %v829_v6 = vpop.permute.xlu1 %828 }
 0x190   : > { %v645_v16 = vpop.f32.mrb[0].mxu0 }
 0x191   : > { %v646_v18 = vadd.f32 %v645_v16, %v591_v12  ;;  %v647_v19 = vpop.f32.mrb[1].mxu0 }
 0x192   : > { %v648_v21 = vadd.f32 %v647_v19, %v591_v12  ;;  %v649_v22 = vpop.f32.mrb[2].mxu0 }
 0x193   : > { %vm695_vm10 = vcmp.ge.f32.partialorder %v646_v18, 0.0  ;;  %v701_v23 = vmul.f32 0.2, %v646_v18  ;;  %v650_v25 = vadd.f32 %v649_v22, %v596_v17  ;;  %v651_v26 = vpop.f32.mrb[3].mxu0 }
 0x194   : > { %vm696_vm11 = vcmp.ge.f32.partialorder %v648_v21, 0.0  ;;  %v702_v27 = vmul.f32 0.2, %v648_v21  ;;  %v652_v28 = vadd.f32 %v651_v26, %v596_v17 }
 0x195   : > { %v707_v30 = vsel %vm695_vm10, %v646_v18, %v701_v23  ;;  %vm698_vm12 = vcmp.ge.f32.partialorder %v650_v25, 0.0  ;;  %v704_v31 = vmul.f32 0.2, %v650_v25  ;;  %vm743_vm10 = vcmask 400624  }
 0x196   : > { %v688_v32 = vpop.f32.mrb[0].mxu1  ;;  %v730_v33 = vmul.f32 %v718_v20, %v707_v30  ;;  %v708_v34 = vsel %vm696_vm11, %v648_v21, %v702_v27  ;;  %vm699_vm13 = vcmp.ge.f32.partialorder %v652_v28, 0.0  ;;  %v705_v35 = vmul.f32 0.2, %v652_v28 }
 0x197   : > { %v689_v36 = vadd.f32 %v688_v32, %v591_v12  ;;  %v690_v37 = vpop.f32.mrb[1].mxu1  ;;  %v731_v38 = vmul.f32 %v722_v24, %v708_v34  ;;  %v710_v39 = vsel %vm698_vm12, %v650_v25, %v704_v31 }
 0x198   : > { %v691_v40 = vpop.f32.mrb[2].mxu1  ;;  %v733_v41 = vmul.f32 %v718_v20, %v710_v39  ;;  %v711_v42 = vsel %vm699_vm13, %v652_v28, %v705_v35 }
 0x199   : > { %vm697_vm14 = vcmp.ge.f32.partialorder %v689_v36, 0.0  ;;  %v703_v43 = vmul.f32 0.2, %v689_v36  ;;  %v692_v44 = vadd.f32 %v691_v40, %v596_v17  ;;  %v693_v45 = vpop.f32.mrb[3].mxu1  ;;  %v734_v46 = vmul.f32 %v722_v24, %v711_v42 }
 0x19a   : > { %v1468_v48 = vpack.c.bf16 %v733_v41, %v730_v33 }
 0x19b   : > { %v709_v49 = vsel %vm697_vm14, %v689_v36, %v703_v43  ;;  %vm700_vm15 = vcmp.ge.f32.partialorder %v692_v44, 0.0  ;;  %v706_v50 = vmul.f32 0.2, %v692_v44  ;;  %v1470_v51 = vpack.c.bf16 %v734_v46, %v731_v38 }
 0x19c   : > { %755 = vrot.lane.b32.xlu1 %v1468_v48, %s1275_s27  ;;  %v732_v53 = vmul.f32 %v726_v47, %v709_v49 }
 0x19d   : > { %v712_v52 = vsel %vm700_vm15, %v692_v44, %v706_v50 }
 0x19e   : > { %v735_v54 = vmul.f32 %v726_v47, %v712_v52 }
 0x1a0   : > { %v739_v55 = vpack.c.bf16 %v735_v54, %v732_v53  ;;  %780 = vrot.lane.b32.xlu1 %v1468_v48, %s1276_s28 }
 0x1a2   : > { %742 = vst.msk [vmem:[#allocation2 + $0x18] sm:$0xff] %vm290_vm0, %v739_v55 }
 0x1a3   : > { %744 = vst.msk [vmem:[#allocation2 + $0x18] sm:$0xff] %vm743_vm10, %v1277_v4 }
 0x1a4   : > { %805 = vrot.lane.b32.xlu1 %v1468_v48, %s1278_s29 }
 0x1a8   : > { %830 = vrot.lane.b32.xlu1 %v1468_v48, %s1279_s30 }
 0x1aa   : > { %v748_v56 = vld [vmem:[#allocation2 + $0x18] sm:$0xff] }
 0x1ab   : > { %759 = vrot.lane.b32.xlu0 %v748_v56, %s1275_s27  ;;  %850 = vst.msk [vmem:[#allocation3 + $0x70] sm:$0xff] %vm290_vm0, %v748_v56 }
 0x1ac   : > { %857 = vrot.lane.b32.xlu1 %v1468_v48, %s1280_s7 }
 0x1af   : > { %784 = vrot.lane.b32.xlu0 %v748_v56, %s1276_s28 }
 0x1b0   : > { %881 = vrot.lane.b32.xlu1 %v748_v56, %s1281_s8 }
 0x1b2   : > { %v946_v52 = vld [vmem:[#allocation3 + $0x70] sm:$0xff] }
 0x1b3   : > { %809 = vrot.lane.b32.xlu0 %v748_v56, %s1278_s29 }
 0x1b4   : > { %859 = vrot.lane.b32.xlu1 %v1470_v51, %s1280_s7 }
 0x1b7   : > { %834 = vrot.lane.b32.xlu0 %v748_v56, %s1279_s30 }
 0x1b8   : > { %897 = vrot.lane.b32.xlu1 %v1468_v48, %s1282_s11 }
 0x1bb   : > { %757 = vrot.lane.b32.xlu0 %v1470_v51, %s1275_s27  ;;  %s1227_s27 = sshll.u32 %s1596_s22, 3 }
 0x1bc   : > { %899 = vrot.lane.b32.xlu1 %v1470_v51, %s1282_s11 }
 0x1bf   : > { %782 = vrot.lane.b32.xlu0 %v1470_v51, %s1276_s28 }
 0x1c0   : > { %921 = vrot.lane.b32.xlu1 %v748_v56, %s1283_s12 }
 0x1c3   : > { %807 = vrot.lane.b32.xlu0 %v1470_v51, %s1278_s29 }
 0x1c4   : > { %962 = vperm.xlu1 %1249, %v959_v57  }
 0x1c7   : > { %832 = vrot.lane.b32.xlu0 %v1470_v51, %s1279_s30  ;;  %s1570_s30 = scalar_lea.vmem %s1594_s6, %s1227_s27 }
 0x1c8   : > { %1093 = vst [vmem:[%s1570_s30] sm:$0x3] %v1285_v0 }
 0x1cb   : > { %861 = vrot.lane.b32.xlu0 %v748_v56, %s1280_s7 }
 0x1cf   : > { %877 = vrot.lane.b32.xlu0 %v1468_v48, %s1281_s8 }
 0x1d3   : > { %879 = vrot.lane.b32.xlu0 %v1470_v51, %s1281_s8 }
 0x1d7   : > { %901 = vrot.lane.b32.xlu0 %v748_v56, %s1282_s11 }
 0x1db   : > { %919 = vrot.lane.b32.xlu0 %v1470_v51, %s1283_s12 }
 0x1df   : > { %917 = vrot.lane.b32.xlu0 %v1468_v48, %s1283_s12 }
 0x20e   : > { %v756_v7 = vpop.permute.xlu1 %755 }
 0x20f   : > { %v761_v8 = vsel %vm281_vm2, %v754_v2, %v756_v7  ;;  %v1073_v2 = vld [vmem:[%s1593_s5] sm:$0x7] }
 0x212   : > { %v781_v9 = vpop.permute.xlu1 %780 }
 0x213   : > { %v786_v10 = vsel %vm320_vm3, %v779_v3, %v781_v9 }
 0x216   : > { %v806_v12 = vpop.permute.xlu1 %805 }
 0x217   : > { %v811_v14 = vsel %vm358_vm4, %v804_v5, %v806_v12  ;;  %v1078_v5 = vrot.slane %v1073_v2, %v717_v13 }
 0x21a   : > { %v831_v16 = vpop.permute.xlu1 %830 }
 0x21b   : > { %v836_v17 = vsel %vm396_vm5, %v829_v6, %v831_v16 }
 0x21d   : > { %v760_v18 = vpop.permute.xlu0 %759 }
 0x21e   : > { %v858_v19 = vpop.permute.xlu1 %857 }
 0x221   : > { %v785_v20 = vpop.permute.xlu0 %784 }
 0x222   : > { %v882_v21 = vpop.permute.xlu1 %881 }
 0x223   : > { %890 = vst.msk [vmem:[#allocation3 + $0xa0] sm:$0xff] %vm290_vm0, %v882_v21 }
 0x225   : > { %v810_v22 = vpop.permute.xlu0 %809 }
 0x226   : > { %v860_v23 = vpop.permute.xlu1 %859 }
 0x227   : > { %v863_v24 = vsel %vm452_vm6, %v858_v19, %v860_v23 }
 0x229   : > { %v835_v25 = vpop.permute.xlu0 %834 }
 0x22a   : > { %v898_v26 = vpop.permute.xlu1 %897  ;;  %v952_v59 = vld [vmem:[#allocation3 + $0xa0] sm:$0xff] }
 0x22d   : > { %v758_v27 = vpop.permute.xlu0 %757 }
 0x22e   : > { %v762_v28 = vsel %vm281_vm2, %v756_v7, %v758_v27  ;;  %v763_v30 = vsel %vm281_vm2, %v758_v27, %v760_v18  ;;  %v900_v31 = vpop.permute.xlu1 %899 }
 0x22f   : > { %769 = vst.msk [vmem:[#allocation3 + $0x10] sm:$0xff] %vm290_vm0, %v763_v30  ;;  %992 = vmatprep.subr.bf16.mxu0 %v762_v28  ;;  %v903_v32 = vsel %vm516_vm8, %v898_v26, %v900_v31 }
 0x230   : > { %993 = vmatpush1.bf16.msra.mxu0 %v761_v8  ;;  %v1082_v8 = vrot.slane %v1073_v2, %v721_v15 }
 0x231   : > { %v783_v33 = vpop.permute.xlu0 %782 }
 0x232   : > { %v787_v34 = vsel %vm320_vm3, %v781_v9, %v783_v33  ;;  %v788_v35 = vsel %vm320_vm3, %v783_v33, %v785_v20  ;;  %v922_v36 = vpop.permute.xlu1 %921  ;;  %vm1117_vm3 = vcmask 242692  }
 0x233   : > { %794 = vst.msk [vmem:[#allocation3 + $0x28] sm:$0xff] %vm290_vm0, %v788_v35  ;;  %994 = vmatprep.subr.bf16.mxu0 %v787_v34  ;;  %930 = vst.msk [vmem:[#allocation3 + $0xd0] sm:$0xff] %vm290_vm0, %v922_v36 }
 0x234   : > { %995 = vmatpush1.bf16.msra.mxu0 %v786_v10 }
 0x235   : > { %v808_v37 = vpop.permute.xlu0 %807 }
 0x236   : > { %v812_v38 = vsel %vm358_vm4, %v806_v12, %v808_v37  ;;  %v813_v39 = vsel %vm358_vm4, %v808_v37, %v810_v22  ;;  %v934_v40 = vld [vmem:[#allocation3 + $0x10] sm:$0xff] }
 0x237   : > { %819 = vst.msk [vmem:[#allocation3 + $0x40] sm:$0xff] %vm290_vm0, %v813_v39  ;;  %1034 = vmatpush1.bf16.msra.mxu1 %v934_v40  ;;  %996 = vmatprep.subr.bf16.mxu0 %v812_v38 }
 0x238   : > { %1035 = vmatprep.subr.bf16.mxu1 %v1277_v4  ;;  %997 = vmatpush1.bf16.msra.mxu0 %v811_v14 }
 0x239   : > { %v833_v41 = vpop.permute.xlu0 %832 }
 0x23a   : > { %v837_v42 = vsel %vm396_vm5, %v831_v16, %v833_v41  ;;  %v838_v43 = vsel %vm396_vm5, %v833_v41, %v835_v25  ;;  %v937_v44 = vld [vmem:[#allocation3 + $0x28] sm:$0xff]  ;;  %v958_v63 = vld [vmem:[#allocation3 + $0xd0] sm:$0xff]  ;;  %v1086_v16 = vrot.slane %v1073_v2, %v725_v29  ;;  %vm1120_vm5 = vcmask 394480  }
 0x23b   : > { %844 = vst.msk [vmem:[#allocation3 + $0x58] sm:$0xff] %vm290_vm0, %v838_v43  ;;  %1036 = vmatpush1.bf16.msra.mxu1 %v937_v44  ;;  %998 = vmatprep.subr.bf16.mxu0 %v837_v42 }
 0x23c   : > { %1037 = vmatprep.subr.bf16.mxu1 %v1277_v4  ;;  %999 = vmatpush1.bf16.msra.mxu0 %v836_v17 }
 0x23d   : > { %v862_v45 = vpop.permute.xlu0 %861  ;;  %1000 = vmatprep.subr.bf16.mxu0 %v1470_v51 }
 0x23e   : > { %v864_v46 = vsel %vm452_vm6, %v860_v23, %v862_v45  ;;  %870 = vst.msk [vmem:[#allocation3 + $0x88] sm:$0xff] %vm290_vm0, %v862_v45  ;;  %v940_v47 = vld [vmem:[#allocation3 + $0x40] sm:$0xff] }
 0x23f   : > { %1038 = vmatpush1.bf16.msra.mxu1 %v940_v47 }
 0x240   : > { %1039 = vmatprep.subr.bf16.mxu1 %v1277_v4  ;;  %1001 = vmatpush1.bf16.msra.mxu0 %v1468_v48 }
 0x241   : > { %v878_v49 = vpop.permute.xlu0 %877  ;;  %1002 = vmatprep.subr.bf16.mxu0 %v864_v46 }
 0x242   : > { %v943_v50 = vld [vmem:[#allocation3 + $0x58] sm:$0xff] }
 0x243   : > { %1040 = vmatpush1.bf16.msra.mxu1 %v943_v50  ;;  %v963_v6 = vpop.permute.xlu1 %962 }
 0x244   : > { %1041 = vmatprep.subr.bf16.mxu1 %v1277_v4  ;;  %1003 = vmatpush1.bf16.msra.mxu0 %v863_v24 }
 0x245   : > { %v880_v53 = vpop.permute.xlu0 %879  ;;  %v949_v56 = vld [vmem:[#allocation3 + $0x88] sm:$0xff] }
 0x246   : > { %v883_v51 = vsel %vm484_vm7, %v878_v49, %v880_v53  ;;  %v884_v54 = vsel %vm484_vm7, %v880_v53, %v882_v21 }
 0x247   : > { %1042 = vmatpush1.bf16.msra.mxu1 %v946_v52  ;;  %1004 = vmatprep.subr.bf16.mxu0 %v884_v54 }
 0x248   : > { %1043 = vmatprep.subr.bf16.mxu1 %v1277_v4  ;;  %1005 = vmatpush1.bf16.msra.mxu0 %v883_v51 }
 0x249   : > { %v902_v55 = vpop.permute.xlu0 %901 }
 0x24a   : > { %v904_v48 = vsel %vm516_vm8, %v900_v31, %v902_v55  ;;  %910 = vst.msk [vmem:[#allocation3 + $0xb8] sm:$0xff] %vm290_vm0, %v902_v55  ;;  %vm1114_vm0 = vcmask 1041408  }
 0x24b   : > { %1044 = vmatpush1.bf16.msra.mxu1 %v949_v56  ;;  %1006 = vmatprep.subr.bf16.mxu0 %v904_v48  ;;  %vm1116_vm2 = vmor %vm1115_vm1, %vm1114_vm0 }
 0x24c   : > { %1045 = vmatprep.subr.bf16.mxu1 %v1277_v4  ;;  %1007 = vmatpush1.bf16.msra.mxu0 %v903_v32  ;;  %vm1118_vm4 = vmor %vm1117_vm3, %vm1116_vm2 }
 0x24d   : > { %v920_v57 = vpop.permute.xlu0 %919 }
 0x24e   : > { %v924_v58 = vsel %vm548_vm9, %v920_v57, %v922_v36 }
 0x24f   : > { %1046 = vmatpush1.bf16.msra.mxu1 %v952_v59  ;;  %1008 = vmatprep.subr.bf16.mxu0 %v924_v58 }
 0x250   : > { %1047 = vmatprep.subr.bf16.mxu1 %v1277_v4 }
 0x251   : > { %v918_v60 = vpop.permute.xlu0 %917  ;;  %v955_v61 = vld [vmem:[#allocation3 + $0xb8] sm:$0xff] }
 0x252   : > { %v923_v62 = vsel %vm548_vm9, %v918_v60, %v920_v57 }
 0x253   : > { %1048 = vmatpush1.bf16.msra.mxu1 %v955_v61  ;;  %1009 = vmatpush1.bf16.msra.mxu0 %v923_v62 }
 0x254   : > { %1049 = vmatprep.subr.bf16.mxu1 %v1277_v4  ;;  %v1286_v4 = vmov 1983009808  }
 0x255   : > { %v1099_v3 = vunpack.c.l.s4 %v1286_v4 }
 0x256   : > { %1025 = vmatmul.mubr.bf16.vlgmr.msra.gmra.mrb[4].mxu0 %v1517_v1 }
 0x257   : > { %1050 = vmatpush1.bf16.msra.mxu1 %v958_v63 }
 0x25a   : > { %1066 = vmatmul.mubr.bf16.vlgmr.msra.gmra.mrb[4].mxu1 %v1517_v1  ;;  %v1100_v1 = vunpack.c.0.s8 %v1099_v3 }
 0x25c   : > { %v1103_v20 = vsub.s32 %v1100_v1, %v1454_v11 }
 0x329   : > { %v1026_v7 = vpop.f32.mrb[4].mxu0 }
 0x32a   : > { %v1027_v9 = vadd.f32 %v1026_v7, %v963_v6  ;;  %v1028_v10 = vpop.f32.mrb[5].mxu0 }
 0x32b   : > { %v1029_v12 = vadd.f32 %v1028_v10, %v963_v6  ;;  %v1030_v14 = vpop.f32.mrb[6].mxu0 }
 0x32c   : > { %v1090_v17 = vmul.f32 %v1078_v5, %v1027_v9  ;;  %v1031_v18 = vpop.f32.mrb[7].mxu0 }
 0x32d   : > { %v1067_v19 = vpop.f32.mrb[4].mxu1  ;;  %v1091_v21 = vmul.f32 %v1082_v8, %v1029_v12 }
 0x32e   : > { %v1068_v13 = vadd.f32 %v1067_v19, %v963_v6  ;;  %v1069_v22 = vpop.f32.mrb[5].mxu1 }
 0x32f   : > { %v1097_v15 = vcombine.low %v1090_v17, %v1091_v21  ;;  %v1070_v23 = vpop.f32.mrb[6].mxu1 }
 0x330   : > { %v1092_v24 = vmul.f32 %v1086_v16, %v1068_v13  ;;  %v1071_v25 = vpop.f32.mrb[7].mxu1 }
 0x331   : > { %v1104_v26 = vrot.slane %v1097_v15, %v1103_v20 }
 0x332   : > { %v1111_v29 = vrot.slane %v1092_v24, %v1103_v20 }
 0x334   : > { %v1112_v27 = vcombine.low %v1104_v26, %v1111_v29 }
 0x336   : > { %1119 = vst.msk [vmem:[%s1570_s30 + $0x2] sm:$0x3f] %vm1118_vm4, %v1112_v27 }
 0x337   : > { %1121 = vst.msk [vmem:[%s1570_s30 + $0x6] sm:$0x3] %vm1120_vm5, %v1285_v0 }
 0x338 PF: > { %s16_s21 = sadd.s32 1, %s1273_s21  }
 0x339   : > { %p13_p4 = scmp.ge.s32.totalorder %s16_s21, 4  }
 0x33b   :  { %15 = sbr.rel (!%p13_p4) target bundleno = 1 (0x1), region = 74 }

</bundles_post_ra>
